<compile_context>
chip_gen: v7x
topology: tpu7x:2x2x1
jax: 0.10.0
libtpu: 0.0.40
codegen_flags: <defaults>
</compile_context>

<pallas_src>
import functools

import numpy as np

import jax
import jax.numpy as jnp
from jax.experimental import pallas as pl
from jax.experimental.pallas import tpu as pltpu


PAD = 128  # halo pad on each side of the flat interior (interior lane-aligned)


# -----------------------------------------------------------------------------
# Host-side constant builders
# -----------------------------------------------------------------------------
def _edge_masks_np(H, W):
    """(2, H*W) {0,1} masks for output columns whose dx==0 / dx==2 taps are valid."""
    col = np.arange(H * W, dtype=np.int64) % W
    return np.stack([(col >= 1), (col <= W - 2)]).astype(np.float32)


def _unshuffle_mats_np(H, W, c_in, c_mid, out_c):
    """Constant matrices for ConvPixelUnshuffle(2) + channel-averaging shortcut.

    P  (4, HW, HW/4): per-phase spatial sampling (flat old -> flat new), exact 0/1.
    Pi (4, out_c, c_mid): scatters conv channel c to torch unshuffled channel c*4+s.
    A  (4, out_c, c_in): averaging-shortcut weights over torch unshuffled channels.
    """
    H2, W2 = H // 2, W // 2
    HW, HW4 = H * W, H2 * W2
    P = np.zeros((4, HW, HW4), np.float32)
    Pi = np.zeros((4, out_c, c_mid), np.float32)
    A = np.zeros((4, out_c, c_in), np.float32)
    r = (4 * c_in) // out_c
    for ry in range(2):
        for rx in range(2):
            s = ry * 2 + rx
            for y2 in range(H2):
                for x2 in range(W2):
                    P[s, (2 * y2 + ry) * W + (2 * x2 + rx), y2 * W2 + x2] = 1.0
            for c in range(c_mid):
                Pi[s, c * 4 + s, c] = 1.0
            for i in range(c_in):
                A[s, (i * 4 + s) // r, i] = 1.0 / r
    return P, Pi, A


def _tap_weights(w_oihw):
    """(Cout, Cin, 3, 3) -> (9, Cout, Cin), tap index t = dy*3 + dx."""
    co, ci = w_oihw.shape[0], w_oihw.shape[1]
    return jnp.transpose(w_oihw, (2, 3, 0, 1)).reshape(9, co, ci)


# -----------------------------------------------------------------------------
# Fused encoder kernel
# -----------------------------------------------------------------------------
def _build_kernel(plan, n_params):
    def kernel(*refs):
        x_ref = refs[0]
        prefs = refs[1:1 + n_params]
        o_ref = refs[1 + n_params]
        xe_ref = refs[2 + n_params]   # (C_max, PAD + HW_max + PAD) f32 halo scratch

        def conv3x3(x, e):
            """3x3 stride-1 'same' conv of a flat (Cin, H*W) activation (9 per-tap dots)."""
            C, HW = x.shape
            W = e["W"]
            if e["zero"]:
                # Zero the halo pads only when (Cin, H, W) changed; later convs at
                # the same signature reuse the still-zero halos.
                xe_ref[0:C, 0:PAD] = jnp.zeros((C, PAD), jnp.float32)
                xe_ref[0:C, PAD + HW:PAD + HW + PAD] = jnp.zeros((C, PAD), jnp.float32)
            xe_ref[0:C, PAD:PAD + HW] = x          # aligned interior store

            w_ref = prefs[e["w"]]                  # (9, Cout, Cin)
            m_ref = prefs[e["m"]]                  # (2, HW)
            acc = None
            for dx in range(3):
                part = None
                for dy in range(3):
                    s = (dy - 1) * W + (dx - 1)
                    blk = xe_ref[0:C, PAD + s:PAD + s + HW]
                    d = jnp.dot(w_ref[dy * 3 + dx], blk,
                                preferred_element_type=jnp.float32)
                    part = d if part is None else part + d
                # one mask multiply per dx group (kills horizontal wrap-around)
                if dx == 0:
                    part = part * m_ref[0:1, :]
                elif dx == 2:
                    part = part * m_ref[1:2, :]
                acc = part if acc is None else acc + part
            if e["b"] is not None:
                acc = acc + prefs[e["b"]][...]
            if e["act"] == "silu":
                acc = acc * jax.nn.sigmoid(acc)
            return acc

        x = x_ref[0].astype(jnp.float32)           # (Cin, HW0)
        for e in plan:
            kind = e["kind"]
            if kind == "conv":
                # project_in / project_out (averaging shortcut folded into weights)
                x = conv3x3(x, e["c"])
            elif kind == "res":
                # ResidualBlock(ResBlock, Identity): conv1+SiLU -> conv2 -> RMS -> +x
                h = conv3x3(x, e["c1"])
                y = conv3x3(h, e["c2"])
                ms = jnp.mean(y * y, axis=0, keepdims=True)      # RMS over channels
                y = y * jax.lax.rsqrt(ms + e["eps"])
                y = y * prefs[e["g"]][...] + prefs[e["bt"]][...]
                x = y + x
            else:  # "down": ConvPixelUnshuffle(2) + channel-averaging shortcut
                z = conv3x3(x, e["c"])                           # (out_c/4, HW)
                P_ref, Pi_ref, A_ref = prefs[e["P"]], prefs[e["Pi"]], prefs[e["A"]]
                acc = None
                for s in range(4):
                    Ps = P_ref[s]                                # (HW, HW/4)
                    zp = jnp.dot(z, Ps, preferred_element_type=jnp.float32)
                    xp = jnp.dot(x, Ps, preferred_element_type=jnp.float32)
                    t = (jnp.dot(Pi_ref[s], zp, preferred_element_type=jnp.float32) +
                         jnp.dot(A_ref[s], xp, preferred_element_type=jnp.float32))
                    acc = t if acc is None else acc + t
                x = acc                                          # (out_c, HW/4)
        o_ref[0] = x.astype(o_ref.dtype)
    return kernel


# -----------------------------------------------------------------------------
# Convert torch-layout params into the fused kernel's flat input list + plan
# -----------------------------------------------------------------------------
def to_pallas_model(params, H0, W0, eps=1e-5):
    inputs, plan, cins = [], [], []

    def add(a):
        inputs.append(jnp.asarray(a, dtype=jnp.float32))
        return len(inputs) - 1

    mask_cache = {}

    def mask_for(H, W):
        if (H, W) not in mask_cache:
            mask_cache[(H, W)] = add(_edge_masks_np(H, W))
        return mask_cache[(H, W)]

    state = {"sig": None}

    def conv_entry(w_oihw, b, H, W, act=None):
        cin = int(w_oihw.shape[1])
        cins.append(cin)
        sig = (cin, H, W)
        zero = sig != state["sig"]
        state["sig"] = sig
        return {"w": add(_tap_weights(w_oihw)),
                "b": None if b is None else add(jnp.reshape(b, (-1, 1))),
                "m": mask_for(H, W), "H": H, "W": W, "act": act, "zero": zero}

    H, W = H0, W0
    # project_in (factor-1 ConvLayer: bias, no norm/act)
    plan.append({"kind": "conv",
                 "c": conv_entry(params["proj_in"]["w"], params["proj_in"]["b"], H, W)})

    for st in params["stages"]:
        for blk in st["blocks"]:
            c1 = conv_entry(blk["w1"], blk["b1"], H, W, act="silu")
            c2 = conv_entry(blk["w2"], None, H, W)
            plan.append({"kind": "res", "c1": c1, "c2": c2,
                         "g": add(jnp.reshape(blk["gamma"], (-1, 1))),
                         "bt": add(jnp.reshape(blk["beta"], (-1, 1))),
                         "eps": eps})
        if st["down"] is not None:
            width = int(st["blocks"][0]["w1"].shape[0])
            out_c = int(st["down_out_c"])
            c_mid = out_c // 4
            ce = conv_entry(st["down"]["w"], st["down"]["b"], H, W)
            P, Pi, A = _unshuffle_mats_np(H, W, width, c_mid, out_c)
            plan.append({"kind": "down", "c": ce,
                         "P": add(P), "Pi": add(Pi), "A": add(A)})
            H //= 2
            W //= 2

    # project_out: fold the factor-1 channel-averaging shortcut into the center tap
    # (center im2col tap is exactly the unshifted, unmasked input -> exact).
    w = jnp.asarray(params["proj_out"]["w"])
    c_lat = int(params["latent_channels"])
    c_last = int(w.shape[1])
    assert c_last % c_lat == 0
    g = c_last // c_lat
    avg = np.zeros((c_lat, c_last), np.float32)
    for o in range(c_lat):
        avg[o, o * g:(o + 1) * g] = 1.0 / g
    w = w.at[:, :, 1, 1].add(jnp.asarray(avg))
    plan.append({"kind": "conv",
                 "c": conv_entry(w, params["proj_out"]["b"], H, W)})

    meta = {"latent_channels": c_lat, "Hf": H, "Wf": W,
            "c_max": max(cins), "hw_max": H0 * W0}
    return inputs, plan, meta


def encoder_forward_fused(inputs, plan, meta, x_nchw):
    """Whole-encoder forward in a single pallas_call. Input/output are NCHW."""
    N, Cin, H0, W0 = x_nchw.shape
    HW0 = H0 * W0
    x = x_nchw.reshape(N, Cin, HW0)
    n_params = len(inputs)
    kernel = _build_kernel(plan, n_params)
    c_lat, Hf, Wf = meta["latent_channels"], meta["Hf"], meta["Wf"]
    HWf = Hf * Wf

    in_specs = [pl.BlockSpec((1, Cin, HW0), lambda n: (n, 0, 0))]
    for a in inputs:
        in_specs.append(pl.BlockSpec(a.shape, lambda n, nd=a.ndim: (0,) * nd))

    out = pl.pallas_call(
        kernel,
        out_shape=jax.ShapeDtypeStruct((N, c_lat, HWf), x_nchw.dtype),
        grid=(N,),
        in_specs=in_specs,
        out_specs=pl.BlockSpec((1, c_lat, HWf), lambda n: (n, 0, 0)),
        scratch_shapes=[pltpu.VMEM((meta["c_max"], PAD + meta["hw_max"] + PAD),
                                   jnp.float32)],
        compiler_params=pltpu.CompilerParams(
            dimension_semantics=("parallel",),
            vmem_limit_bytes=32 * 1024 * 1024),
    )(x, *inputs)
    return out.reshape(N, c_lat, Hf, Wf)


# -----------------------------------------------------------------------------
# Parameters (torch-layout OIHW)
# -----------------------------------------------------------------------------
def init_params(key, in_channels, latent_channels, width_list, depth_list):
    keys = iter(jax.random.split(key, 256))

    def conv_w(cin, cout):
        scale = 1.0 / (9.0 * cin) ** 0.5
        return scale * jax.random.normal(next(keys), (cout, cin, 3, 3), jnp.float32)

    def conv_b(cout):
        return 0.01 * jax.random.normal(next(keys), (cout,), jnp.float32)

    params = {"proj_in": {"w": conv_w(in_channels, width_list[0]),
                          "b": conv_b(width_list[0])}}
    num_stages = len(width_list)
    stages = []
    for sid, (width, depth) in enumerate(zip(width_list, depth_list)):
        blocks = []
        for _ in range(depth):
            blocks.append({
                "w1": conv_w(width, width), "b1": conv_b(width),
                "w2": conv_w(width, width),
                "gamma": 1.0 + 0.1 * jax.random.normal(next(keys), (width,), jnp.float32),
                "beta": 0.01 * jax.random.normal(next(keys), (width,), jnp.float32),
            })
        stage = {"blocks": blocks, "down": None, "down_out_c": None}
        if sid < num_stages - 1 and depth > 0:
            out_c = width_list[sid + 1]          # downsample_match_channel=True
            assert out_c % 4 == 0
            stage["down"] = {"w": conv_w(width, out_c // 4), "b": conv_b(out_c // 4)}
            stage["down_out_c"] = out_c
        stages.append(stage)
    params["stages"] = stages
    params["proj_out"] = {"w": conv_w(width_list[-1], latent_channels),
                          "b": conv_b(latent_channels)}
    params["latent_channels"] = latent_channels
    return params


# -----------------------------------------------------------------------------
# Pure-JAX reference (NCHW, lax.conv) for correctness checking
# -----------------------------------------------------------------------------
def _conv_ref(x, w, b=None, act=None):
    y = jax.lax.conv_general_dilated(
        x, w, window_strides=(1, 1), padding=((1, 1), (1, 1)),
        dimension_numbers=("NCHW", "OIHW", "NCHW"),
        precision=jax.lax.Precision.HIGHEST)
    if b is not None:
        y = y + b[None, :, None, None]
    if act == "silu":
        y = y * jax.nn.sigmoid(y)
    return y


def _rms_ref(x, g, bt, eps=1e-5):
    ms = jnp.mean(x * x, axis=1, keepdims=True)
    y = x * jax.lax.rsqrt(ms + eps)
    return y * g[None, :, None, None] + bt[None, :, None, None]


def _pixel_unshuffle_ref(x, r):
    N, C, H, W = x.shape
    x = x.reshape(N, C, H // r, r, W // r, r).transpose(0, 1, 3, 5, 2, 4)
    return x.reshape(N, C * r * r, H // r, W // r)


def _channel_avg_ref(x, out_c, factor):
    if factor > 1:
        x = _pixel_unshuffle_ref(x, factor)
    N, C, H, W = x.shape
    return x.reshape(N, out_c, C // out_c, H, W).mean(axis=2)


def encoder_reference(p, x):
    x = _conv_ref(x, p["proj_in"]["w"], p["proj_in"]["b"])
    for st in p["stages"]:
        for blk in st["blocks"]:
            y = _conv_ref(x, blk["w1"], blk["b1"], act="silu")
            y = _conv_ref(y, blk["w2"], None)
            y = _rms_ref(y, blk["gamma"], blk["beta"])
            x = y + x
        if st["down"] is not None:
            out_c = st["down_out_c"]
            y = _pixel_unshuffle_ref(_conv_ref(x, st["down"]["w"], st["down"]["b"]), 2)
            x = y + _channel_avg_ref(x, out_c, 2)
    y = _conv_ref(x, p["proj_out"]["w"], p["proj_out"]["b"])
    return y + _channel_avg_ref(x, p["latent_channels"], 1)


# -----------------------------------------------------------------------------
if __name__ == "__main__":
    key = jax.random.PRNGKey(0)
    k_params, k_x = jax.random.split(key)

    # Scaled-down EncoderConfig: in_channels=4, latent_channels=8,
    # width_list=(8,16,32), depth_list=(1,1,1), block_type='ResBlock',
    # norm='trms2d', act='silu', ConvPixelUnshuffle downsample with
    # 'averaging' shortcut, out_shortcut='averaging'.
    in_channels, latent_channels = 4, 8
    width_list, depth_list = (8, 16, 32), (1, 1, 1)
    N, H, W = 2, 16, 16

    params = init_params(k_params, in_channels, latent_channels,
                         width_list, depth_list)
    inputs, plan, meta = to_pallas_model(params, H, W)

    x = jax.random.normal(k_x, (N, in_channels, H, W), jnp.float32)   # NCHW

    fwd = jax.jit(functools.partial(encoder_forward_fused, inputs, plan, meta))
    y = fwd(x)
    jax.block_until_ready(y)

    # two ConvPixelUnshuffle downsamples -> spatial / 4
    assert y.shape == (N, latent_channels, H // 4, W // 4), y.shape
    assert bool(jnp.all(jnp.isfinite(y)))

    # correctness vs. a plain-JAX NCHW reference of the same module
    y_ref = encoder_reference(params, x)
    err = float(jnp.max(jnp.abs(y - y_ref)))
    assert err < 5e-2, f"max abs error vs reference: {err}"

    print("KERNEL_OK")
</pallas_src>

<mosaic_0001>
module attributes {stable_mosaic.version = 11 : i64} {
  func.func @kernel(%arg0: i32, %arg1: memref<1x4x256xf32, #tpu.memory_space<vmem>>, %arg2: memref<9x8x4xf32, #tpu.memory_space<vmem>>, %arg3: memref<8x1xf32, #tpu.memory_space<vmem>>, %arg4: memref<2x256xf32, #tpu.memory_space<vmem>>, %arg5: memref<9x8x8xf32, #tpu.memory_space<vmem>>, %arg6: memref<8x1xf32, #tpu.memory_space<vmem>>, %arg7: memref<9x8x8xf32, #tpu.memory_space<vmem>>, %arg8: memref<8x1xf32, #tpu.memory_space<vmem>>, %arg9: memref<8x1xf32, #tpu.memory_space<vmem>>, %arg10: memref<9x4x8xf32, #tpu.memory_space<vmem>>, %arg11: memref<4x1xf32, #tpu.memory_space<vmem>>, %arg12: memref<4x256x64xf32, #tpu.memory_space<vmem>>, %arg13: memref<4x16x4xf32, #tpu.memory_space<vmem>>, %arg14: memref<4x16x8xf32, #tpu.memory_space<vmem>>, %arg15: memref<9x16x16xf32, #tpu.memory_space<vmem>>, %arg16: memref<16x1xf32, #tpu.memory_space<vmem>>, %arg17: memref<2x64xf32, #tpu.memory_space<vmem>>, %arg18: memref<9x16x16xf32, #tpu.memory_space<vmem>>, %arg19: memref<16x1xf32, #tpu.memory_space<vmem>>, %arg20: memref<16x1xf32, #tpu.memory_space<vmem>>, %arg21: memref<9x8x16xf32, #tpu.memory_space<vmem>>, %arg22: memref<8x1xf32, #tpu.memory_space<vmem>>, %arg23: memref<4x64x16xf32, #tpu.memory_space<vmem>>, %arg24: memref<4x32x8xf32, #tpu.memory_space<vmem>>, %arg25: memref<4x32x16xf32, #tpu.memory_space<vmem>>, %arg26: memref<9x32x32xf32, #tpu.memory_space<vmem>>, %arg27: memref<32x1xf32, #tpu.memory_space<vmem>>, %arg28: memref<2x16xf32, #tpu.memory_space<vmem>>, %arg29: memref<9x32x32xf32, #tpu.memory_space<vmem>>, %arg30: memref<32x1xf32, #tpu.memory_space<vmem>>, %arg31: memref<32x1xf32, #tpu.memory_space<vmem>>, %arg32: memref<9x8x32xf32, #tpu.memory_space<vmem>>, %arg33: memref<8x1xf32, #tpu.memory_space<vmem>>, %arg34: memref<1x8x16xf32, #tpu.memory_space<vmem>>, %arg35: memref<32x512xf32, #tpu.memory_space<vmem>>) attributes {dimension_semantics = [#tpu.dimension_semantics<parallel>], iteration_bounds = array<i64: 2>, scalar_prefetch = 0 : i64, scratch_operands = 1 : i64, tpu.core_type = #tpu.core_type<tc>, window_params = [{transform_indices = @transform_0, window_bounds = array<i64: 1, 4, 256>}, {pipeline_mode = #tpu.pipeline_mode<synchronous>, transform_indices = @transform_1, window_bounds = array<i64: 9, 8, 4>}, {pipeline_mode = #tpu.pipeline_mode<synchronous>, transform_indices = @transform_2, window_bounds = array<i64: 8, 1>}, {pipeline_mode = #tpu.pipeline_mode<synchronous>, transform_indices = @transform_3, window_bounds = array<i64: 2, 256>}, {pipeline_mode = #tpu.pipeline_mode<synchronous>, transform_indices = @transform_4, window_bounds = array<i64: 9, 8, 8>}, {pipeline_mode = #tpu.pipeline_mode<synchronous>, transform_indices = @transform_5, window_bounds = array<i64: 8, 1>}, {pipeline_mode = #tpu.pipeline_mode<synchronous>, transform_indices = @transform_6, window_bounds = array<i64: 9, 8, 8>}, {pipeline_mode = #tpu.pipeline_mode<synchronous>, transform_indices = @transform_7, window_bounds = array<i64: 8, 1>}, {pipeline_mode = #tpu.pipeline_mode<synchronous>, transform_indices = @transform_8, window_bounds = array<i64: 8, 1>}, {pipeline_mode = #tpu.pipeline_mode<synchronous>, transform_indices = @transform_9, window_bounds = array<i64: 9, 4, 8>}, {pipeline_mode = #tpu.pipeline_mode<synchronous>, transform_indices = @transform_10, window_bounds = array<i64: 4, 1>}, {pipeline_mode = #tpu.pipeline_mode<synchronous>, transform_indices = @transform_11, window_bounds = array<i64: 4, 256, 64>}, {pipeline_mode = #tpu.pipeline_mode<synchronous>, transform_indices = @transform_12, window_bounds = array<i64: 4, 16, 4>}, {pipeline_mode = #tpu.pipeline_mode<synchronous>, transform_indices = @transform_13, window_bounds = array<i64: 4, 16, 8>}, {pipeline_mode = #tpu.pipeline_mode<synchronous>, transform_indices = @transform_14, window_bounds = array<i64: 9, 16, 16>}, {pipeline_mode = #tpu.pipeline_mode<synchronous>, transform_indices = @transform_15, window_bounds = array<i64: 16, 1>}, {pipeline_mode = #tpu.pipeline_mode<synchronous>, transform_indices = @transform_16, window_bounds = array<i64: 2, 64>}, {pipeline_mode = #tpu.pipeline_mode<synchronous>, transform_indices = @transform_17, window_bounds = array<i64: 9, 16, 16>}, {pipeline_mode = #tpu.pipeline_mode<synchronous>, transform_indices = @transform_18, window_bounds = array<i64: 16, 1>}, {pipeline_mode = #tpu.pipeline_mode<synchronous>, transform_indices = @transform_19, window_bounds = array<i64: 16, 1>}, {pipeline_mode = #tpu.pipeline_mode<synchronous>, transform_indices = @transform_20, window_bounds = array<i64: 9, 8, 16>}, {pipeline_mode = #tpu.pipeline_mode<synchronous>, transform_indices = @transform_21, window_bounds = array<i64: 8, 1>}, {pipeline_mode = #tpu.pipeline_mode<synchronous>, transform_indices = @transform_22, window_bounds = array<i64: 4, 64, 16>}, {pipeline_mode = #tpu.pipeline_mode<synchronous>, transform_indices = @transform_23, window_bounds = array<i64: 4, 32, 8>}, {pipeline_mode = #tpu.pipeline_mode<synchronous>, transform_indices = @transform_24, window_bounds = array<i64: 4, 32, 16>}, {pipeline_mode = #tpu.pipeline_mode<synchronous>, transform_indices = @transform_25, window_bounds = array<i64: 9, 32, 32>}, {pipeline_mode = #tpu.pipeline_mode<synchronous>, transform_indices = @transform_26, window_bounds = array<i64: 32, 1>}, {pipeline_mode = #tpu.pipeline_mode<synchronous>, transform_indices = @transform_27, window_bounds = array<i64: 2, 16>}, {pipeline_mode = #tpu.pipeline_mode<synchronous>, transform_indices = @transform_28, window_bounds = array<i64: 9, 32, 32>}, {pipeline_mode = #tpu.pipeline_mode<synchronous>, transform_indices = @transform_29, window_bounds = array<i64: 32, 1>}, {pipeline_mode = #tpu.pipeline_mode<synchronous>, transform_indices = @transform_30, window_bounds = array<i64: 32, 1>}, {pipeline_mode = #tpu.pipeline_mode<synchronous>, transform_indices = @transform_31, window_bounds = array<i64: 9, 8, 32>}, {pipeline_mode = #tpu.pipeline_mode<synchronous>, transform_indices = @transform_32, window_bounds = array<i64: 8, 1>}, {transform_indices = @transform_33, window_bounds = array<i64: 1, 8, 16>}]} {
    %c0 = arith.constant 0 : index
    %c0_0 = arith.constant 0 : index
    %c0_1 = arith.constant 0 : index
    %0 = vector.load %arg1[%c0, %c0_0, %c0_1] : memref<1x4x256xf32, #tpu.memory_space<vmem>>, vector<1x4x256xf32>
    %1 = vector.shape_cast %0 : vector<1x4x256xf32> to vector<4x256xf32>
    %cst = arith.constant 0.000000e+00 : f32
    %2 = vector.broadcast %cst : f32 to vector<4x128xf32>
    %c0_2 = arith.constant 0 : index
    %c0_3 = arith.constant 0 : index
    %3 = vector.load %arg35[%c0_2, %c0_3] : memref<32x512xf32, #tpu.memory_space<vmem>>, vector<4x128xf32>
    tpu.vector_store %arg35[%c0_2, %c0_3], %2 {strides = array<i32>} : memref<32x512xf32, #tpu.memory_space<vmem>>, vector<4x128xf32>,
    %cst_4 = arith.constant 0.000000e+00 : f32
    %4 = vector.broadcast %cst_4 : f32 to vector<4x128xf32>
    %c0_5 = arith.constant 0 : index
    %c384 = arith.constant 384 : index
    %5 = vector.load %arg35[%c0_5, %c384] : memref<32x512xf32, #tpu.memory_space<vmem>>, vector<4x128xf32>
    tpu.vector_store %arg35[%c0_5, %c384], %4 {strides = array<i32>} : memref<32x512xf32, #tpu.memory_space<vmem>>, vector<4x128xf32>,
    %c0_6 = arith.constant 0 : index
    %c128 = arith.constant 128 : index
    %6 = vector.load %arg35[%c0_6, %c128] : memref<32x512xf32, #tpu.memory_space<vmem>>, vector<4x256xf32>
    tpu.vector_store %arg35[%c0_6, %c128], %1 {strides = array<i32>} : memref<32x512xf32, #tpu.memory_space<vmem>>, vector<4x256xf32>,
    %c0_7 = arith.constant 0 : index
    %c111 = arith.constant 111 : index
    %7 = vector.load %arg35[%c0_7, %c111] : memref<32x512xf32, #tpu.memory_space<vmem>>, vector<4x256xf32>
    %c0_8 = arith.constant 0 : index
    %c0_9 = arith.constant 0 : index
    %c0_10 = arith.constant 0 : index
    %8 = vector.load %arg2[%c0_8, %c0_9, %c0_10] : memref<9x8x4xf32, #tpu.memory_space<vmem>>, vector<1x8x4xf32>
    %9 = vector.shape_cast %8 : vector<1x8x4xf32> to vector<8x4xf32>
    %cst_11 = arith.constant dense<0.000000e+00> : vector<8x256xf32>
    %10 = tpu.matmul %9, %7, %cst_11 {dimension_numbers = #tpu.dot_dimension_numbers<[1], [0], [0], [1], [0, 0, 1, 1], [], []>} : vector<8x4xf32>, vector<4x256xf32>, vector<8x256xf32> -> vector<8x256xf32>
    %c0_12 = arith.constant 0 : index
    %c127 = arith.constant 127 : index
    %11 = vector.load %arg35[%c0_12, %c127] : memref<32x512xf32, #tpu.memory_space<vmem>>, vector<4x256xf32>
    %c3 = arith.constant 3 : index
    %c0_13 = arith.constant 0 : index
    %c0_14 = arith.constant 0 : index
    %12 = vector.load %arg2[%c3, %c0_13, %c0_14] : memref<9x8x4xf32, #tpu.memory_space<vmem>>, vector<1x8x4xf32>
    %13 = vector.shape_cast %12 : vector<1x8x4xf32> to vector<8x4xf32>
    %cst_15 = arith.constant dense<0.000000e+00> : vector<8x256xf32>
    %14 = tpu.matmul %13, %11, %cst_15 {dimension_numbers = #tpu.dot_dimension_numbers<[1], [0], [0], [1], [0, 0, 1, 1], [], []>} : vector<8x4xf32>, vector<4x256xf32>, vector<8x256xf32> -> vector<8x256xf32>
    %15 = arith.addf %10, %14 : vector<8x256xf32>
    %c0_16 = arith.constant 0 : index
    %c143 = arith.constant 143 : index
    %16 = vector.load %arg35[%c0_16, %c143] : memref<32x512xf32, #tpu.memory_space<vmem>>, vector<4x256xf32>
    %c6 = arith.constant 6 : index
    %c0_17 = arith.constant 0 : index
    %c0_18 = arith.constant 0 : index
    %17 = vector.load %arg2[%c6, %c0_17, %c0_18] : memref<9x8x4xf32, #tpu.memory_space<vmem>>, vector<1x8x4xf32>
    %18 = vector.shape_cast %17 : vector<1x8x4xf32> to vector<8x4xf32>
    %cst_19 = arith.constant dense<0.000000e+00> : vector<8x256xf32>
    %19 = tpu.matmul %18, %16, %cst_19 {dimension_numbers = #tpu.dot_dimension_numbers<[1], [0], [0], [1], [0, 0, 1, 1], [], []>} : vector<8x4xf32>, vector<4x256xf32>, vector<8x256xf32> -> vector<8x256xf32>
    %20 = arith.addf %15, %19 : vector<8x256xf32>
    %c0_20 = arith.constant 0 : index
    %c0_21 = arith.constant 0 : index
    %21 = vector.load %arg4[%c0_20, %c0_21] : memref<2x256xf32, #tpu.memory_space<vmem>>, vector<1x256xf32>
    %22 = vector.broadcast %21 : vector<1x256xf32> to vector<8x256xf32>
    %23 = arith.mulf %20, %22 : vector<8x256xf32>
    %c0_22 = arith.constant 0 : index
    %c112 = arith.constant 112 : index
    %24 = vector.load %arg35[%c0_22, %c112] : memref<32x512xf32, #tpu.memory_space<vmem>>, vector<4x256xf32>
    %c1 = arith.constant 1 : index
    %c0_23 = arith.constant 0 : index
    %c0_24 = arith.constant 0 : index
    %25 = vector.load %arg2[%c1, %c0_23, %c0_24] : memref<9x8x4xf32, #tpu.memory_space<vmem>>, vector<1x8x4xf32>
    %26 = vector.shape_cast %25 : vector<1x8x4xf32> to vector<8x4xf32>
    %cst_25 = arith.constant dense<0.000000e+00> : vector<8x256xf32>
    %27 = tpu.matmul %26, %24, %cst_25 {dimension_numbers = #tpu.dot_dimension_numbers<[1], [0], [0], [1], [0, 0, 1, 1], [], []>} : vector<8x4xf32>, vector<4x256xf32>, vector<8x256xf32> -> vector<8x256xf32>
    %c0_26 = arith.constant 0 : index
    %c128_27 = arith.constant 128 : index
    %28 = vector.load %arg35[%c0_26, %c128_27] : memref<32x512xf32, #tpu.memory_space<vmem>>, vector<4x256xf32>
    %c4 = arith.constant 4 : index
    %c0_28 = arith.constant 0 : index
    %c0_29 = arith.constant 0 : index
    %29 = vector.load %arg2[%c4, %c0_28, %c0_29] : memref<9x8x4xf32, #tpu.memory_space<vmem>>, vector<1x8x4xf32>
    %30 = vector.shape_cast %29 : vector<1x8x4xf32> to vector<8x4xf32>
    %cst_30 = arith.constant dense<0.000000e+00> : vector<8x256xf32>
    %31 = tpu.matmul %30, %28, %cst_30 {dimension_numbers = #tpu.dot_dimension_numbers<[1], [0], [0], [1], [0, 0, 1, 1], [], []>} : vector<8x4xf32>, vector<4x256xf32>, vector<8x256xf32> -> vector<8x256xf32>
    %32 = arith.addf %27, %31 : vector<8x256xf32>
    %c0_31 = arith.constant 0 : index
    %c144 = arith.constant 144 : index
    %33 = vector.load %arg35[%c0_31, %c144] : memref<32x512xf32, #tpu.memory_space<vmem>>, vector<4x256xf32>
    %c7 = arith.constant 7 : index
    %c0_32 = arith.constant 0 : index
    %c0_33 = arith.constant 0 : index
    %34 = vector.load %arg2[%c7, %c0_32, %c0_33] : memref<9x8x4xf32, #tpu.memory_space<vmem>>, vector<1x8x4xf32>
    %35 = vector.shape_cast %34 : vector<1x8x4xf32> to vector<8x4xf32>
    %cst_34 = arith.constant dense<0.000000e+00> : vector<8x256xf32>
    %36 = tpu.matmul %35, %33, %cst_34 {dimension_numbers = #tpu.dot_dimension_numbers<[1], [0], [0], [1], [0, 0, 1, 1], [], []>} : vector<8x4xf32>, vector<4x256xf32>, vector<8x256xf32> -> vector<8x256xf32>
    %37 = arith.addf %32, %36 : vector<8x256xf32>
    %38 = arith.addf %23, %37 : vector<8x256xf32>
    %c0_35 = arith.constant 0 : index
    %c113 = arith.constant 113 : index
    %39 = vector.load %arg35[%c0_35, %c113] : memref<32x512xf32, #tpu.memory_space<vmem>>, vector<4x256xf32>
    %c2 = arith.constant 2 : index
    %c0_36 = arith.constant 0 : index
    %c0_37 = arith.constant 0 : index
    %40 = vector.load %arg2[%c2, %c0_36, %c0_37] : memref<9x8x4xf32, #tpu.memory_space<vmem>>, vector<1x8x4xf32>
    %41 = vector.shape_cast %40 : vector<1x8x4xf32> to vector<8x4xf32>
    %cst_38 = arith.constant dense<0.000000e+00> : vector<8x256xf32>
    %42 = tpu.matmul %41, %39, %cst_38 {dimension_numbers = #tpu.dot_dimension_numbers<[1], [0], [0], [1], [0, 0, 1, 1], [], []>} : vector<8x4xf32>, vector<4x256xf32>, vector<8x256xf32> -> vector<8x256xf32>
    %c0_39 = arith.constant 0 : index
    %c129 = arith.constant 129 : index
    %43 = vector.load %arg35[%c0_39, %c129] : memref<32x512xf32, #tpu.memory_space<vmem>>, vector<4x256xf32>
    %c5 = arith.constant 5 : index
    %c0_40 = arith.constant 0 : index
    %c0_41 = arith.constant 0 : index
    %44 = vector.load %arg2[%c5, %c0_40, %c0_41] : memref<9x8x4xf32, #tpu.memory_space<vmem>>, vector<1x8x4xf32>
    %45 = vector.shape_cast %44 : vector<1x8x4xf32> to vector<8x4xf32>
    %cst_42 = arith.constant dense<0.000000e+00> : vector<8x256xf32>
    %46 = tpu.matmul %45, %43, %cst_42 {dimension_numbers = #tpu.dot_dimension_numbers<[1], [0], [0], [1], [0, 0, 1, 1], [], []>} : vector<8x4xf32>, vector<4x256xf32>, vector<8x256xf32> -> vector<8x256xf32>
    %47 = arith.addf %42, %46 : vector<8x256xf32>
    %c0_43 = arith.constant 0 : index
    %c145 = arith.constant 145 : index
    %48 = vector.load %arg35[%c0_43, %c145] : memref<32x512xf32, #tpu.memory_space<vmem>>, vector<4x256xf32>
    %c8 = arith.constant 8 : index
    %c0_44 = arith.constant 0 : index
    %c0_45 = arith.constant 0 : index
    %49 = vector.load %arg2[%c8, %c0_44, %c0_45] : memref<9x8x4xf32, #tpu.memory_space<vmem>>, vector<1x8x4xf32>
    %50 = vector.shape_cast %49 : vector<1x8x4xf32> to vector<8x4xf32>
    %cst_46 = arith.constant dense<0.000000e+00> : vector<8x256xf32>
    %51 = tpu.matmul %50, %48, %cst_46 {dimension_numbers = #tpu.dot_dimension_numbers<[1], [0], [0], [1], [0, 0, 1, 1], [], []>} : vector<8x4xf32>, vector<4x256xf32>, vector<8x256xf32> -> vector<8x256xf32>
    %52 = arith.addf %47, %51 : vector<8x256xf32>
    %c1_47 = arith.constant 1 : index
    %c0_48 = arith.constant 0 : index
    %53 = vector.load %arg4[%c1_47, %c0_48] : memref<2x256xf32, #tpu.memory_space<vmem>>, vector<1x256xf32>
    %54 = vector.broadcast %53 : vector<1x256xf32> to vector<8x256xf32>
    %55 = arith.mulf %52, %54 : vector<8x256xf32>
    %56 = arith.addf %38, %55 : vector<8x256xf32>
    %c0_49 = arith.constant 0 : index
    %c0_50 = arith.constant 0 : index
    %57 = vector.load %arg3[%c0_49, %c0_50] : memref<8x1xf32, #tpu.memory_space<vmem>>, vector<8x1xf32>
    %58 = vector.broadcast %57 : vector<8x1xf32> to vector<8x256xf32>
    %59 = arith.addf %56, %58 : vector<8x256xf32>
    %cst_51 = arith.constant 0.000000e+00 : f32
    %60 = vector.broadcast %cst_51 : f32 to vector<8x128xf32>
    %c0_52 = arith.constant 0 : index
    %c0_53 = arith.constant 0 : index
    %61 = vector.load %arg35[%c0_52, %c0_53] : memref<32x512xf32, #tpu.memory_space<vmem>>, vector<8x128xf32>
    tpu.vector_store %arg35[%c0_52, %c0_53], %60 {strides = array<i32>} : memref<32x512xf32, #tpu.memory_space<vmem>>, vector<8x128xf32>,
    %cst_54 = arith.constant 0.000000e+00 : f32
    %62 = vector.broadcast %cst_54 : f32 to vector<8x128xf32>
    %c0_55 = arith.constant 0 : index
    %c384_56 = arith.constant 384 : index
    %63 = vector.load %arg35[%c0_55, %c384_56] : memref<32x512xf32, #tpu.memory_space<vmem>>, vector<8x128xf32>
    tpu.vector_store %arg35[%c0_55, %c384_56], %62 {strides = array<i32>} : memref<32x512xf32, #tpu.memory_space<vmem>>, vector<8x128xf32>,
    %c0_57 = arith.constant 0 : index
    %c128_58 = arith.constant 128 : index
    %64 = vector.load %arg35[%c0_57, %c128_58] : memref<32x512xf32, #tpu.memory_space<vmem>>, vector<8x256xf32>
    tpu.vector_store %arg35[%c0_57, %c128_58], %59 {strides = array<i32>} : memref<32x512xf32, #tpu.memory_space<vmem>>, vector<8x256xf32>,
    %c0_59 = arith.constant 0 : index
    %c111_60 = arith.constant 111 : index
    %65 = vector.load %arg35[%c0_59, %c111_60] : memref<32x512xf32, #tpu.memory_space<vmem>>, vector<8x256xf32>
    %c0_61 = arith.constant 0 : index
    %c0_62 = arith.constant 0 : index
    %c0_63 = arith.constant 0 : index
    %66 = vector.load %arg5[%c0_61, %c0_62, %c0_63] : memref<9x8x8xf32, #tpu.memory_space<vmem>>, vector<1x8x8xf32>
    %67 = vector.shape_cast %66 : vector<1x8x8xf32> to vector<8x8xf32>
    %cst_64 = arith.constant dense<0.000000e+00> : vector<8x256xf32>
    %68 = tpu.matmul %67, %65, %cst_64 {dimension_numbers = #tpu.dot_dimension_numbers<[1], [0], [0], [1], [0, 0, 1, 1], [], []>} : vector<8x8xf32>, vector<8x256xf32>, vector<8x256xf32> -> vector<8x256xf32>
    %c0_65 = arith.constant 0 : index
    %c127_66 = arith.constant 127 : index
    %69 = vector.load %arg35[%c0_65, %c127_66] : memref<32x512xf32, #tpu.memory_space<vmem>>, vector<8x256xf32>
    %c3_67 = arith.constant 3 : index
    %c0_68 = arith.constant 0 : index
    %c0_69 = arith.constant 0 : index
    %70 = vector.load %arg5[%c3_67, %c0_68, %c0_69] : memref<9x8x8xf32, #tpu.memory_space<vmem>>, vector<1x8x8xf32>
    %71 = vector.shape_cast %70 : vector<1x8x8xf32> to vector<8x8xf32>
    %cst_70 = arith.constant dense<0.000000e+00> : vector<8x256xf32>
    %72 = tpu.matmul %71, %69, %cst_70 {dimension_numbers = #tpu.dot_dimension_numbers<[1], [0], [0], [1], [0, 0, 1, 1], [], []>} : vector<8x8xf32>, vector<8x256xf32>, vector<8x256xf32> -> vector<8x256xf32>
    %73 = arith.addf %68, %72 : vector<8x256xf32>
    %c0_71 = arith.constant 0 : index
    %c143_72 = arith.constant 143 : index
    %74 = vector.load %arg35[%c0_71, %c143_72] : memref<32x512xf32, #tpu.memory_space<vmem>>, vector<8x256xf32>
    %c6_73 = arith.constant 6 : index
    %c0_74 = arith.constant 0 : index
    %c0_75 = arith.constant 0 : index
    %75 = vector.load %arg5[%c6_73, %c0_74, %c0_75] : memref<9x8x8xf32, #tpu.memory_space<vmem>>, vector<1x8x8xf32>
    %76 = vector.shape_cast %75 : vector<1x8x8xf32> to vector<8x8xf32>
    %cst_76 = arith.constant dense<0.000000e+00> : vector<8x256xf32>
    %77 = tpu.matmul %76, %74, %cst_76 {dimension_numbers = #tpu.dot_dimension_numbers<[1], [0], [0], [1], [0, 0, 1, 1], [], []>} : vector<8x8xf32>, vector<8x256xf32>, vector<8x256xf32> -> vector<8x256xf32>
    %78 = arith.addf %73, %77 : vector<8x256xf32>
    %c0_77 = arith.constant 0 : index
    %c0_78 = arith.constant 0 : index
    %79 = vector.load %arg4[%c0_77, %c0_78] : memref<2x256xf32, #tpu.memory_space<vmem>>, vector<1x256xf32>
    %80 = vector.broadcast %79 : vector<1x256xf32> to vector<8x256xf32>
    %81 = arith.mulf %78, %80 : vector<8x256xf32>
    %c0_79 = arith.constant 0 : index
    %c112_80 = arith.constant 112 : index
    %82 = vector.load %arg35[%c0_79, %c112_80] : memref<32x512xf32, #tpu.memory_space<vmem>>, vector<8x256xf32>
    %c1_81 = arith.constant 1 : index
    %c0_82 = arith.constant 0 : index
    %c0_83 = arith.constant 0 : index
    %83 = vector.load %arg5[%c1_81, %c0_82, %c0_83] : memref<9x8x8xf32, #tpu.memory_space<vmem>>, vector<1x8x8xf32>
    %84 = vector.shape_cast %83 : vector<1x8x8xf32> to vector<8x8xf32>
    %cst_84 = arith.constant dense<0.000000e+00> : vector<8x256xf32>
    %85 = tpu.matmul %84, %82, %cst_84 {dimension_numbers = #tpu.dot_dimension_numbers<[1], [0], [0], [1], [0, 0, 1, 1], [], []>} : vector<8x8xf32>, vector<8x256xf32>, vector<8x256xf32> -> vector<8x256xf32>
    %c0_85 = arith.constant 0 : index
    %c128_86 = arith.constant 128 : index
    %86 = vector.load %arg35[%c0_85, %c128_86] : memref<32x512xf32, #tpu.memory_space<vmem>>, vector<8x256xf32>
    %c4_87 = arith.constant 4 : index
    %c0_88 = arith.constant 0 : index
    %c0_89 = arith.constant 0 : index
    %87 = vector.load %arg5[%c4_87, %c0_88, %c0_89] : memref<9x8x8xf32, #tpu.memory_space<vmem>>, vector<1x8x8xf32>
    %88 = vector.shape_cast %87 : vector<1x8x8xf32> to vector<8x8xf32>
    %cst_90 = arith.constant dense<0.000000e+00> : vector<8x256xf32>
    %89 = tpu.matmul %88, %86, %cst_90 {dimension_numbers = #tpu.dot_dimension_numbers<[1], [0], [0], [1], [0, 0, 1, 1], [], []>} : vector<8x8xf32>, vector<8x256xf32>, vector<8x256xf32> -> vector<8x256xf32>
    %90 = arith.addf %85, %89 : vector<8x256xf32>
    %c0_91 = arith.constant 0 : index
    %c144_92 = arith.constant 144 : index
    %91 = vector.load %arg35[%c0_91, %c144_92] : memref<32x512xf32, #tpu.memory_space<vmem>>, vector<8x256xf32>
    %c7_93 = arith.constant 7 : index
    %c0_94 = arith.constant 0 : index
    %c0_95 = arith.constant 0 : index
    %92 = vector.load %arg5[%c7_93, %c0_94, %c0_95] : memref<9x8x8xf32, #tpu.memory_space<vmem>>, vector<1x8x8xf32>
    %93 = vector.shape_cast %92 : vector<1x8x8xf32> to vector<8x8xf32>
    %cst_96 = arith.constant dense<0.000000e+00> : vector<8x256xf32>
    %94 = tpu.matmul %93, %91, %cst_96 {dimension_numbers = #tpu.dot_dimension_numbers<[1], [0], [0], [1], [0, 0, 1, 1], [], []>} : vector<8x8xf32>, vector<8x256xf32>, vector<8x256xf32> -> vector<8x256xf32>
    %95 = arith.addf %90, %94 : vector<8x256xf32>
    %96 = arith.addf %81, %95 : vector<8x256xf32>
    %c0_97 = arith.constant 0 : index
    %c113_98 = arith.constant 113 : index
    %97 = vector.load %arg35[%c0_97, %c113_98] : memref<32x512xf32, #tpu.memory_space<vmem>>, vector<8x256xf32>
    %c2_99 = arith.constant 2 : index
    %c0_100 = arith.constant 0 : index
    %c0_101 = arith.constant 0 : index
    %98 = vector.load %arg5[%c2_99, %c0_100, %c0_101] : memref<9x8x8xf32, #tpu.memory_space<vmem>>, vector<1x8x8xf32>
    %99 = vector.shape_cast %98 : vector<1x8x8xf32> to vector<8x8xf32>
    %cst_102 = arith.constant dense<0.000000e+00> : vector<8x256xf32>
    %100 = tpu.matmul %99, %97, %cst_102 {dimension_numbers = #tpu.dot_dimension_numbers<[1], [0], [0], [1], [0, 0, 1, 1], [], []>} : vector<8x8xf32>, vector<8x256xf32>, vector<8x256xf32> -> vector<8x256xf32>
    %c0_103 = arith.constant 0 : index
    %c129_104 = arith.constant 129 : index
    %101 = vector.load %arg35[%c0_103, %c129_104] : memref<32x512xf32, #tpu.memory_space<vmem>>, vector<8x256xf32>
    %c5_105 = arith.constant 5 : index
    %c0_106 = arith.constant 0 : index
    %c0_107 = arith.constant 0 : index
    %102 = vector.load %arg5[%c5_105, %c0_106, %c0_107] : memref<9x8x8xf32, #tpu.memory_space<vmem>>, vector<1x8x8xf32>
    %103 = vector.shape_cast %102 : vector<1x8x8xf32> to vector<8x8xf32>
    %cst_108 = arith.constant dense<0.000000e+00> : vector<8x256xf32>
    %104 = tpu.matmul %103, %101, %cst_108 {dimension_numbers = #tpu.dot_dimension_numbers<[1], [0], [0], [1], [0, 0, 1, 1], [], []>} : vector<8x8xf32>, vector<8x256xf32>, vector<8x256xf32> -> vector<8x256xf32>
    %105 = arith.addf %100, %104 : vector<8x256xf32>
    %c0_109 = arith.constant 0 : index
    %c145_110 = arith.constant 145 : index
    %106 = vector.load %arg35[%c0_109, %c145_110] : memref<32x512xf32, #tpu.memory_space<vmem>>, vector<8x256xf32>
    %c8_111 = arith.constant 8 : index
    %c0_112 = arith.constant 0 : index
    %c0_113 = arith.constant 0 : index
    %107 = vector.load %arg5[%c8_111, %c0_112, %c0_113] : memref<9x8x8xf32, #tpu.memory_space<vmem>>, vector<1x8x8xf32>
    %108 = vector.shape_cast %107 : vector<1x8x8xf32> to vector<8x8xf32>
    %cst_114 = arith.constant dense<0.000000e+00> : vector<8x256xf32>
    %109 = tpu.matmul %108, %106, %cst_114 {dimension_numbers = #tpu.dot_dimension_numbers<[1], [0], [0], [1], [0, 0, 1, 1], [], []>} : vector<8x8xf32>, vector<8x256xf32>, vector<8x256xf32> -> vector<8x256xf32>
    %110 = arith.addf %105, %109 : vector<8x256xf32>
    %c1_115 = arith.constant 1 : index
    %c0_116 = arith.constant 0 : index
    %111 = vector.load %arg4[%c1_115, %c0_116] : memref<2x256xf32, #tpu.memory_space<vmem>>, vector<1x256xf32>
    %112 = vector.broadcast %111 : vector<1x256xf32> to vector<8x256xf32>
    %113 = arith.mulf %110, %112 : vector<8x256xf32>
    %114 = arith.addf %96, %113 : vector<8x256xf32>
    %c0_117 = arith.constant 0 : index
    %c0_118 = arith.constant 0 : index
    %115 = vector.load %arg6[%c0_117, %c0_118] : memref<8x1xf32, #tpu.memory_space<vmem>>, vector<8x1xf32>
    %116 = vector.broadcast %115 : vector<8x1xf32> to vector<8x256xf32>
    %117 = arith.addf %114, %116 : vector<8x256xf32>
    %118 = arith.negf %117 : vector<8x256xf32>
    %119 = math.exp %118 : vector<8x256xf32>
    %cst_119 = arith.constant 1.000000e+00 : f32
    %120 = vector.broadcast %cst_119 : f32 to vector<8x256xf32>
    %121 = arith.addf %120, %119 : vector<8x256xf32>
    %122 = arith.divf %120, %121 : vector<8x256xf32>
    %123 = arith.mulf %117, %122 : vector<8x256xf32>
    %c0_120 = arith.constant 0 : index
    %c128_121 = arith.constant 128 : index
    %124 = vector.load %arg35[%c0_120, %c128_121] : memref<32x512xf32, #tpu.memory_space<vmem>>, vector<8x256xf32>
    tpu.vector_store %arg35[%c0_120, %c128_121], %123 {strides = array<i32>} : memref<32x512xf32, #tpu.memory_space<vmem>>, vector<8x256xf32>,
    %c0_122 = arith.constant 0 : index
    %c111_123 = arith.constant 111 : index
    %125 = vector.load %arg35[%c0_122, %c111_123] : memref<32x512xf32, #tpu.memory_space<vmem>>, vector<8x256xf32>
    %c0_124 = arith.constant 0 : index
    %c0_125 = arith.constant 0 : index
    %c0_126 = arith.constant 0 : index
    %126 = vector.load %arg7[%c0_124, %c0_125, %c0_126] : memref<9x8x8xf32, #tpu.memory_space<vmem>>, vector<1x8x8xf32>
    %127 = vector.shape_cast %126 : vector<1x8x8xf32> to vector<8x8xf32>
    %cst_127 = arith.constant dense<0.000000e+00> : vector<8x256xf32>
    %128 = tpu.matmul %127, %125, %cst_127 {dimension_numbers = #tpu.dot_dimension_numbers<[1], [0], [0], [1], [0, 0, 1, 1], [], []>} : vector<8x8xf32>, vector<8x256xf32>, vector<8x256xf32> -> vector<8x256xf32>
    %c0_128 = arith.constant 0 : index
    %c127_129 = arith.constant 127 : index
    %129 = vector.load %arg35[%c0_128, %c127_129] : memref<32x512xf32, #tpu.memory_space<vmem>>, vector<8x256xf32>
    %c3_130 = arith.constant 3 : index
    %c0_131 = arith.constant 0 : index
    %c0_132 = arith.constant 0 : index
    %130 = vector.load %arg7[%c3_130, %c0_131, %c0_132] : memref<9x8x8xf32, #tpu.memory_space<vmem>>, vector<1x8x8xf32>
    %131 = vector.shape_cast %130 : vector<1x8x8xf32> to vector<8x8xf32>
    %cst_133 = arith.constant dense<0.000000e+00> : vector<8x256xf32>
    %132 = tpu.matmul %131, %129, %cst_133 {dimension_numbers = #tpu.dot_dimension_numbers<[1], [0], [0], [1], [0, 0, 1, 1], [], []>} : vector<8x8xf32>, vector<8x256xf32>, vector<8x256xf32> -> vector<8x256xf32>
    %133 = arith.addf %128, %132 : vector<8x256xf32>
    %c0_134 = arith.constant 0 : index
    %c143_135 = arith.constant 143 : index
    %134 = vector.load %arg35[%c0_134, %c143_135] : memref<32x512xf32, #tpu.memory_space<vmem>>, vector<8x256xf32>
    %c6_136 = arith.constant 6 : index
    %c0_137 = arith.constant 0 : index
    %c0_138 = arith.constant 0 : index
    %135 = vector.load %arg7[%c6_136, %c0_137, %c0_138] : memref<9x8x8xf32, #tpu.memory_space<vmem>>, vector<1x8x8xf32>
    %136 = vector.shape_cast %135 : vector<1x8x8xf32> to vector<8x8xf32>
    %cst_139 = arith.constant dense<0.000000e+00> : vector<8x256xf32>
    %137 = tpu.matmul %136, %134, %cst_139 {dimension_numbers = #tpu.dot_dimension_numbers<[1], [0], [0], [1], [0, 0, 1, 1], [], []>} : vector<8x8xf32>, vector<8x256xf32>, vector<8x256xf32> -> vector<8x256xf32>
    %138 = arith.addf %133, %137 : vector<8x256xf32>
    %c0_140 = arith.constant 0 : index
    %c0_141 = arith.constant 0 : index
    %139 = vector.load %arg4[%c0_140, %c0_141] : memref<2x256xf32, #tpu.memory_space<vmem>>, vector<1x256xf32>
    %140 = vector.broadcast %139 : vector<1x256xf32> to vector<8x256xf32>
    %141 = arith.mulf %138, %140 : vector<8x256xf32>
    %c0_142 = arith.constant 0 : index
    %c112_143 = arith.constant 112 : index
    %142 = vector.load %arg35[%c0_142, %c112_143] : memref<32x512xf32, #tpu.memory_space<vmem>>, vector<8x256xf32>
    %c1_144 = arith.constant 1 : index
    %c0_145 = arith.constant 0 : index
    %c0_146 = arith.constant 0 : index
    %143 = vector.load %arg7[%c1_144, %c0_145, %c0_146] : memref<9x8x8xf32, #tpu.memory_space<vmem>>, vector<1x8x8xf32>
    %144 = vector.shape_cast %143 : vector<1x8x8xf32> to vector<8x8xf32>
    %cst_147 = arith.constant dense<0.000000e+00> : vector<8x256xf32>
    %145 = tpu.matmul %144, %142, %cst_147 {dimension_numbers = #tpu.dot_dimension_numbers<[1], [0], [0], [1], [0, 0, 1, 1], [], []>} : vector<8x8xf32>, vector<8x256xf32>, vector<8x256xf32> -> vector<8x256xf32>
    %c0_148 = arith.constant 0 : index
    %c128_149 = arith.constant 128 : index
    %146 = vector.load %arg35[%c0_148, %c128_149] : memref<32x512xf32, #tpu.memory_space<vmem>>, vector<8x256xf32>
    %c4_150 = arith.constant 4 : index
    %c0_151 = arith.constant 0 : index
    %c0_152 = arith.constant 0 : index
    %147 = vector.load %arg7[%c4_150, %c0_151, %c0_152] : memref<9x8x8xf32, #tpu.memory_space<vmem>>, vector<1x8x8xf32>
    %148 = vector.shape_cast %147 : vector<1x8x8xf32> to vector<8x8xf32>
    %cst_153 = arith.constant dense<0.000000e+00> : vector<8x256xf32>
    %149 = tpu.matmul %148, %146, %cst_153 {dimension_numbers = #tpu.dot_dimension_numbers<[1], [0], [0], [1], [0, 0, 1, 1], [], []>} : vector<8x8xf32>, vector<8x256xf32>, vector<8x256xf32> -> vector<8x256xf32>
    %150 = arith.addf %145, %149 : vector<8x256xf32>
    %c0_154 = arith.constant 0 : index
    %c144_155 = arith.constant 144 : index
    %151 = vector.load %arg35[%c0_154, %c144_155] : memref<32x512xf32, #tpu.memory_space<vmem>>, vector<8x256xf32>
    %c7_156 = arith.constant 7 : index
    %c0_157 = arith.constant 0 : index
    %c0_158 = arith.constant 0 : index
    %152 = vector.load %arg7[%c7_156, %c0_157, %c0_158] : memref<9x8x8xf32, #tpu.memory_space<vmem>>, vector<1x8x8xf32>
    %153 = vector.shape_cast %152 : vector<1x8x8xf32> to vector<8x8xf32>
    %cst_159 = arith.constant dense<0.000000e+00> : vector<8x256xf32>
    %154 = tpu.matmul %153, %151, %cst_159 {dimension_numbers = #tpu.dot_dimension_numbers<[1], [0], [0], [1], [0, 0, 1, 1], [], []>} : vector<8x8xf32>, vector<8x256xf32>, vector<8x256xf32> -> vector<8x256xf32>
    %155 = arith.addf %150, %154 : vector<8x256xf32>
    %156 = arith.addf %141, %155 : vector<8x256xf32>
    %c0_160 = arith.constant 0 : index
    %c113_161 = arith.constant 113 : index
    %157 = vector.load %arg35[%c0_160, %c113_161] : memref<32x512xf32, #tpu.memory_space<vmem>>, vector<8x256xf32>
    %c2_162 = arith.constant 2 : index
    %c0_163 = arith.constant 0 : index
    %c0_164 = arith.constant 0 : index
    %158 = vector.load %arg7[%c2_162, %c0_163, %c0_164] : memref<9x8x8xf32, #tpu.memory_space<vmem>>, vector<1x8x8xf32>
    %159 = vector.shape_cast %158 : vector<1x8x8xf32> to vector<8x8xf32>
    %cst_165 = arith.constant dense<0.000000e+00> : vector<8x256xf32>
    %160 = tpu.matmul %159, %157, %cst_165 {dimension_numbers = #tpu.dot_dimension_numbers<[1], [0], [0], [1], [0, 0, 1, 1], [], []>} : vector<8x8xf32>, vector<8x256xf32>, vector<8x256xf32> -> vector<8x256xf32>
    %c0_166 = arith.constant 0 : index
    %c129_167 = arith.constant 129 : index
    %161 = vector.load %arg35[%c0_166, %c129_167] : memref<32x512xf32, #tpu.memory_space<vmem>>, vector<8x256xf32>
    %c5_168 = arith.constant 5 : index
    %c0_169 = arith.constant 0 : index
    %c0_170 = arith.constant 0 : index
    %162 = vector.load %arg7[%c5_168, %c0_169, %c0_170] : memref<9x8x8xf32, #tpu.memory_space<vmem>>, vector<1x8x8xf32>
    %163 = vector.shape_cast %162 : vector<1x8x8xf32> to vector<8x8xf32>
    %cst_171 = arith.constant dense<0.000000e+00> : vector<8x256xf32>
    %164 = tpu.matmul %163, %161, %cst_171 {dimension_numbers = #tpu.dot_dimension_numbers<[1], [0], [0], [1], [0, 0, 1, 1], [], []>} : vector<8x8xf32>, vector<8x256xf32>, vector<8x256xf32> -> vector<8x256xf32>
    %165 = arith.addf %160, %164 : vector<8x256xf32>
    %c0_172 = arith.constant 0 : index
    %c145_173 = arith.constant 145 : index
    %166 = vector.load %arg35[%c0_172, %c145_173] : memref<32x512xf32, #tpu.memory_space<vmem>>, vector<8x256xf32>
    %c8_174 = arith.constant 8 : index
    %c0_175 = arith.constant 0 : index
    %c0_176 = arith.constant 0 : index
    %167 = vector.load %arg7[%c8_174, %c0_175, %c0_176] : memref<9x8x8xf32, #tpu.memory_space<vmem>>, vector<1x8x8xf32>
    %168 = vector.shape_cast %167 : vector<1x8x8xf32> to vector<8x8xf32>
    %cst_177 = arith.constant dense<0.000000e+00> : vector<8x256xf32>
    %169 = tpu.matmul %168, %166, %cst_177 {dimension_numbers = #tpu.dot_dimension_numbers<[1], [0], [0], [1], [0, 0, 1, 1], [], []>} : vector<8x8xf32>, vector<8x256xf32>, vector<8x256xf32> -> vector<8x256xf32>
    %170 = arith.addf %165, %169 : vector<8x256xf32>
    %c1_178 = arith.constant 1 : index
    %c0_179 = arith.constant 0 : index
    %171 = vector.load %arg4[%c1_178, %c0_179] : memref<2x256xf32, #tpu.memory_space<vmem>>, vector<1x256xf32>
    %172 = vector.broadcast %171 : vector<1x256xf32> to vector<8x256xf32>
    %173 = arith.mulf %170, %172 : vector<8x256xf32>
    %174 = arith.addf %156, %173 : vector<8x256xf32>
    %175 = arith.mulf %174, %174 : vector<8x256xf32>
    %cst_180 = arith.constant dense<0.000000e+00> : vector<256xf32>
    %176 = vector.multi_reduction <add>, %175, %cst_180 [0] : vector<8x256xf32> to vector<256xf32>
    %177 = vector.shape_cast %176 : vector<256xf32> to vector<1x256xf32>
    %cst_181 = arith.constant 8.000000e+00 : f32
    %178 = vector.broadcast %cst_181 : f32 to vector<1x256xf32>
    %179 = arith.divf %177, %178 : vector<1x256xf32>
    %cst_182 = arith.constant 9.99999974E-6 : f32
    %180 = vector.broadcast %cst_182 : f32 to vector<1x256xf32>
    %181 = arith.addf %179, %180 : vector<1x256xf32>
    %182 = math.rsqrt %181 : vector<1x256xf32>
    %183 = vector.broadcast %182 : vector<1x256xf32> to vector<8x256xf32>
    %184 = arith.mulf %174, %183 : vector<8x256xf32>
    %c0_183 = arith.constant 0 : index
    %c0_184 = arith.constant 0 : index
    %185 = vector.load %arg8[%c0_183, %c0_184] : memref<8x1xf32, #tpu.memory_space<vmem>>, vector<8x1xf32>
    %186 = vector.broadcast %185 : vector<8x1xf32> to vector<8x256xf32>
    %187 = arith.mulf %184, %186 : vector<8x256xf32>
    %c0_185 = arith.constant 0 : index
    %c0_186 = arith.constant 0 : index
    %188 = vector.load %arg9[%c0_185, %c0_186] : memref<8x1xf32, #tpu.memory_space<vmem>>, vector<8x1xf32>
    %189 = vector.broadcast %188 : vector<8x1xf32> to vector<8x256xf32>
    %190 = arith.addf %187, %189 : vector<8x256xf32>
    %191 = arith.addf %190, %59 : vector<8x256xf32>
    %c0_187 = arith.constant 0 : index
    %c128_188 = arith.constant 128 : index
    %192 = vector.load %arg35[%c0_187, %c128_188] : memref<32x512xf32, #tpu.memory_space<vmem>>, vector<8x256xf32>
    tpu.vector_store %arg35[%c0_187, %c128_188], %191 {strides = array<i32>} : memref<32x512xf32, #tpu.memory_space<vmem>>, vector<8x256xf32>,
    %c0_189 = arith.constant 0 : index
    %c111_190 = arith.constant 111 : index
    %193 = vector.load %arg35[%c0_189, %c111_190] : memref<32x512xf32, #tpu.memory_space<vmem>>, vector<8x256xf32>
    %c0_191 = arith.constant 0 : index
    %c0_192 = arith.constant 0 : index
    %c0_193 = arith.constant 0 : index
    %194 = vector.load %arg10[%c0_191, %c0_192, %c0_193] : memref<9x4x8xf32, #tpu.memory_space<vmem>>, vector<1x4x8xf32>
    %195 = vector.shape_cast %194 : vector<1x4x8xf32> to vector<4x8xf32>
    %cst_194 = arith.constant dense<0.000000e+00> : vector<4x256xf32>
    %196 = tpu.matmul %195, %193, %cst_194 {dimension_numbers = #tpu.dot_dimension_numbers<[1], [0], [0], [1], [0, 0, 1, 1], [], []>} : vector<4x8xf32>, vector<8x256xf32>, vector<4x256xf32> -> vector<4x256xf32>
    %c0_195 = arith.constant 0 : index
    %c127_196 = arith.constant 127 : index
    %197 = vector.load %arg35[%c0_195, %c127_196] : memref<32x512xf32, #tpu.memory_space<vmem>>, vector<8x256xf32>
    %c3_197 = arith.constant 3 : index
    %c0_198 = arith.constant 0 : index
    %c0_199 = arith.constant 0 : index
    %198 = vector.load %arg10[%c3_197, %c0_198, %c0_199] : memref<9x4x8xf32, #tpu.memory_space<vmem>>, vector<1x4x8xf32>
    %199 = vector.shape_cast %198 : vector<1x4x8xf32> to vector<4x8xf32>
    %cst_200 = arith.constant dense<0.000000e+00> : vector<4x256xf32>
    %200 = tpu.matmul %199, %197, %cst_200 {dimension_numbers = #tpu.dot_dimension_numbers<[1], [0], [0], [1], [0, 0, 1, 1], [], []>} : vector<4x8xf32>, vector<8x256xf32>, vector<4x256xf32> -> vector<4x256xf32>
    %201 = arith.addf %196, %200 : vector<4x256xf32>
    %c0_201 = arith.constant 0 : index
    %c143_202 = arith.constant 143 : index
    %202 = vector.load %arg35[%c0_201, %c143_202] : memref<32x512xf32, #tpu.memory_space<vmem>>, vector<8x256xf32>
    %c6_203 = arith.constant 6 : index
    %c0_204 = arith.constant 0 : index
    %c0_205 = arith.constant 0 : index
    %203 = vector.load %arg10[%c6_203, %c0_204, %c0_205] : memref<9x4x8xf32, #tpu.memory_space<vmem>>, vector<1x4x8xf32>
    %204 = vector.shape_cast %203 : vector<1x4x8xf32> to vector<4x8xf32>
    %cst_206 = arith.constant dense<0.000000e+00> : vector<4x256xf32>
    %205 = tpu.matmul %204, %202, %cst_206 {dimension_numbers = #tpu.dot_dimension_numbers<[1], [0], [0], [1], [0, 0, 1, 1], [], []>} : vector<4x8xf32>, vector<8x256xf32>, vector<4x256xf32> -> vector<4x256xf32>
    %206 = arith.addf %201, %205 : vector<4x256xf32>
    %c0_207 = arith.constant 0 : index
    %c0_208 = arith.constant 0 : index
    %207 = vector.load %arg4[%c0_207, %c0_208] : memref<2x256xf32, #tpu.memory_space<vmem>>, vector<1x256xf32>
    %208 = vector.broadcast %207 : vector<1x256xf32> to vector<4x256xf32>
    %209 = arith.mulf %206, %208 : vector<4x256xf32>
    %c0_209 = arith.constant 0 : index
    %c112_210 = arith.constant 112 : index
    %210 = vector.load %arg35[%c0_209, %c112_210] : memref<32x512xf32, #tpu.memory_space<vmem>>, vector<8x256xf32>
    %c1_211 = arith.constant 1 : index
    %c0_212 = arith.constant 0 : index
    %c0_213 = arith.constant 0 : index
    %211 = vector.load %arg10[%c1_211, %c0_212, %c0_213] : memref<9x4x8xf32, #tpu.memory_space<vmem>>, vector<1x4x8xf32>
    %212 = vector.shape_cast %211 : vector<1x4x8xf32> to vector<4x8xf32>
    %cst_214 = arith.constant dense<0.000000e+00> : vector<4x256xf32>
    %213 = tpu.matmul %212, %210, %cst_214 {dimension_numbers = #tpu.dot_dimension_numbers<[1], [0], [0], [1], [0, 0, 1, 1], [], []>} : vector<4x8xf32>, vector<8x256xf32>, vector<4x256xf32> -> vector<4x256xf32>
    %c0_215 = arith.constant 0 : index
    %c128_216 = arith.constant 128 : index
    %214 = vector.load %arg35[%c0_215, %c128_216] : memref<32x512xf32, #tpu.memory_space<vmem>>, vector<8x256xf32>
    %c4_217 = arith.constant 4 : index
    %c0_218 = arith.constant 0 : index
    %c0_219 = arith.constant 0 : index
    %215 = vector.load %arg10[%c4_217, %c0_218, %c0_219] : memref<9x4x8xf32, #tpu.memory_space<vmem>>, vector<1x4x8xf32>
    %216 = vector.shape_cast %215 : vector<1x4x8xf32> to vector<4x8xf32>
    %cst_220 = arith.constant dense<0.000000e+00> : vector<4x256xf32>
    %217 = tpu.matmul %216, %214, %cst_220 {dimension_numbers = #tpu.dot_dimension_numbers<[1], [0], [0], [1], [0, 0, 1, 1], [], []>} : vector<4x8xf32>, vector<8x256xf32>, vector<4x256xf32> -> vector<4x256xf32>
    %218 = arith.addf %213, %217 : vector<4x256xf32>
    %c0_221 = arith.constant 0 : index
    %c144_222 = arith.constant 144 : index
    %219 = vector.load %arg35[%c0_221, %c144_222] : memref<32x512xf32, #tpu.memory_space<vmem>>, vector<8x256xf32>
    %c7_223 = arith.constant 7 : index
    %c0_224 = arith.constant 0 : index
    %c0_225 = arith.constant 0 : index
    %220 = vector.load %arg10[%c7_223, %c0_224, %c0_225] : memref<9x4x8xf32, #tpu.memory_space<vmem>>, vector<1x4x8xf32>
    %221 = vector.shape_cast %220 : vector<1x4x8xf32> to vector<4x8xf32>
    %cst_226 = arith.constant dense<0.000000e+00> : vector<4x256xf32>
    %222 = tpu.matmul %221, %219, %cst_226 {dimension_numbers = #tpu.dot_dimension_numbers<[1], [0], [0], [1], [0, 0, 1, 1], [], []>} : vector<4x8xf32>, vector<8x256xf32>, vector<4x256xf32> -> vector<4x256xf32>
    %223 = arith.addf %218, %222 : vector<4x256xf32>
    %224 = arith.addf %209, %223 : vector<4x256xf32>
    %c0_227 = arith.constant 0 : index
    %c113_228 = arith.constant 113 : index
    %225 = vector.load %arg35[%c0_227, %c113_228] : memref<32x512xf32, #tpu.memory_space<vmem>>, vector<8x256xf32>
    %c2_229 = arith.constant 2 : index
    %c0_230 = arith.constant 0 : index
    %c0_231 = arith.constant 0 : index
    %226 = vector.load %arg10[%c2_229, %c0_230, %c0_231] : memref<9x4x8xf32, #tpu.memory_space<vmem>>, vector<1x4x8xf32>
    %227 = vector.shape_cast %226 : vector<1x4x8xf32> to vector<4x8xf32>
    %cst_232 = arith.constant dense<0.000000e+00> : vector<4x256xf32>
    %228 = tpu.matmul %227, %225, %cst_232 {dimension_numbers = #tpu.dot_dimension_numbers<[1], [0], [0], [1], [0, 0, 1, 1], [], []>} : vector<4x8xf32>, vector<8x256xf32>, vector<4x256xf32> -> vector<4x256xf32>
    %c0_233 = arith.constant 0 : index
    %c129_234 = arith.constant 129 : index
    %229 = vector.load %arg35[%c0_233, %c129_234] : memref<32x512xf32, #tpu.memory_space<vmem>>, vector<8x256xf32>
    %c5_235 = arith.constant 5 : index
    %c0_236 = arith.constant 0 : index
    %c0_237 = arith.constant 0 : index
    %230 = vector.load %arg10[%c5_235, %c0_236, %c0_237] : memref<9x4x8xf32, #tpu.memory_space<vmem>>, vector<1x4x8xf32>
    %231 = vector.shape_cast %230 : vector<1x4x8xf32> to vector<4x8xf32>
    %cst_238 = arith.constant dense<0.000000e+00> : vector<4x256xf32>
    %232 = tpu.matmul %231, %229, %cst_238 {dimension_numbers = #tpu.dot_dimension_numbers<[1], [0], [0], [1], [0, 0, 1, 1], [], []>} : vector<4x8xf32>, vector<8x256xf32>, vector<4x256xf32> -> vector<4x256xf32>
    %233 = arith.addf %228, %232 : vector<4x256xf32>
    %c0_239 = arith.constant 0 : index
    %c145_240 = arith.constant 145 : index
    %234 = vector.load %arg35[%c0_239, %c145_240] : memref<32x512xf32, #tpu.memory_space<vmem>>, vector<8x256xf32>
    %c8_241 = arith.constant 8 : index
    %c0_242 = arith.constant 0 : index
    %c0_243 = arith.constant 0 : index
    %235 = vector.load %arg10[%c8_241, %c0_242, %c0_243] : memref<9x4x8xf32, #tpu.memory_space<vmem>>, vector<1x4x8xf32>
    %236 = vector.shape_cast %235 : vector<1x4x8xf32> to vector<4x8xf32>
    %cst_244 = arith.constant dense<0.000000e+00> : vector<4x256xf32>
    %237 = tpu.matmul %236, %234, %cst_244 {dimension_numbers = #tpu.dot_dimension_numbers<[1], [0], [0], [1], [0, 0, 1, 1], [], []>} : vector<4x8xf32>, vector<8x256xf32>, vector<4x256xf32> -> vector<4x256xf32>
    %238 = arith.addf %233, %237 : vector<4x256xf32>
    %c1_245 = arith.constant 1 : index
    %c0_246 = arith.constant 0 : index
    %239 = vector.load %arg4[%c1_245, %c0_246] : memref<2x256xf32, #tpu.memory_space<vmem>>, vector<1x256xf32>
    %240 = vector.broadcast %239 : vector<1x256xf32> to vector<4x256xf32>
    %241 = arith.mulf %238, %240 : vector<4x256xf32>
    %242 = arith.addf %224, %241 : vector<4x256xf32>
    %c0_247 = arith.constant 0 : index
    %c0_248 = arith.constant 0 : index
    %243 = vector.load %arg11[%c0_247, %c0_248] : memref<4x1xf32, #tpu.memory_space<vmem>>, vector<4x1xf32>
    %244 = vector.broadcast %243 : vector<4x1xf32> to vector<4x256xf32>
    %245 = arith.addf %242, %244 : vector<4x256xf32>
    %c0_249 = arith.constant 0 : index
    %c0_250 = arith.constant 0 : index
    %c0_251 = arith.constant 0 : index
    %246 = vector.load %arg12[%c0_249, %c0_250, %c0_251] : memref<4x256x64xf32, #tpu.memory_space<vmem>>, vector<1x256x64xf32>
    %247 = vector.shape_cast %246 : vector<1x256x64xf32> to vector<256x64xf32>
    %cst_252 = arith.constant dense<0.000000e+00> : vector<4x64xf32>
    %248 = tpu.matmul %245, %247, %cst_252 {dimension_numbers = #tpu.dot_dimension_numbers<[1], [0], [0], [1], [0, 0, 1, 1], [], []>} : vector<4x256xf32>, vector<256x64xf32>, vector<4x64xf32> -> vector<4x64xf32>
    %cst_253 = arith.constant dense<0.000000e+00> : vector<8x64xf32>
    %249 = tpu.matmul %191, %247, %cst_253 {dimension_numbers = #tpu.dot_dimension_numbers<[1], [0], [0], [1], [0, 0, 1, 1], [], []>} : vector<8x256xf32>, vector<256x64xf32>, vector<8x64xf32> -> vector<8x64xf32>
    %c0_254 = arith.constant 0 : index
    %c0_255 = arith.constant 0 : index
    %c0_256 = arith.constant 0 : index
    %250 = vector.load %arg13[%c0_254, %c0_255, %c0_256] : memref<4x16x4xf32, #tpu.memory_space<vmem>>, vector<1x16x4xf32>
    %251 = vector.shape_cast %250 : vector<1x16x4xf32> to vector<16x4xf32>
    %cst_257 = arith.constant dense<0.000000e+00> : vector<16x64xf32>
    %252 = tpu.matmul %251, %248, %cst_257 {dimension_numbers = #tpu.dot_dimension_numbers<[1], [0], [0], [1], [0, 0, 1, 1], [], []>} : vector<16x4xf32>, vector<4x64xf32>, vector<16x64xf32> -> vector<16x64xf32>
    %c0_258 = arith.constant 0 : index
    %c0_259 = arith.constant 0 : index
    %c0_260 = arith.constant 0 : index
    %253 = vector.load %arg14[%c0_258, %c0_259, %c0_260] : memref<4x16x8xf32, #tpu.memory_space<vmem>>, vector<1x16x8xf32>
    %254 = vector.shape_cast %253 : vector<1x16x8xf32> to vector<16x8xf32>
    %cst_261 = arith.constant dense<0.000000e+00> : vector<16x64xf32>
    %255 = tpu.matmul %254, %249, %cst_261 {dimension_numbers = #tpu.dot_dimension_numbers<[1], [0], [0], [1], [0, 0, 1, 1], [], []>} : vector<16x8xf32>, vector<8x64xf32>, vector<16x64xf32> -> vector<16x64xf32>
    %256 = arith.addf %252, %255 : vector<16x64xf32>
    %c1_262 = arith.constant 1 : index
    %c0_263 = arith.constant 0 : index
    %c0_264 = arith.constant 0 : index
    %257 = vector.load %arg12[%c1_262, %c0_263, %c0_264] : memref<4x256x64xf32, #tpu.memory_space<vmem>>, vector<1x256x64xf32>
    %258 = vector.shape_cast %257 : vector<1x256x64xf32> to vector<256x64xf32>
    %cst_265 = arith.constant dense<0.000000e+00> : vector<4x64xf32>
    %259 = tpu.matmul %245, %258, %cst_265 {dimension_numbers = #tpu.dot_dimension_numbers<[1], [0], [0], [1], [0, 0, 1, 1], [], []>} : vector<4x256xf32>, vector<256x64xf32>, vector<4x64xf32> -> vector<4x64xf32>
    %cst_266 = arith.constant dense<0.000000e+00> : vector<8x64xf32>
    %260 = tpu.matmul %191, %258, %cst_266 {dimension_numbers = #tpu.dot_dimension_numbers<[1], [0], [0], [1], [0, 0, 1, 1], [], []>} : vector<8x256xf32>, vector<256x64xf32>, vector<8x64xf32> -> vector<8x64xf32>
    %c1_267 = arith.constant 1 : index
    %c0_268 = arith.constant 0 : index
    %c0_269 = arith.constant 0 : index
    %261 = vector.load %arg13[%c1_267, %c0_268, %c0_269] : memref<4x16x4xf32, #tpu.memory_space<vmem>>, vector<1x16x4xf32>
    %262 = vector.shape_cast %261 : vector<1x16x4xf32> to vector<16x4xf32>
    %cst_270 = arith.constant dense<0.000000e+00> : vector<16x64xf32>
    %263 = tpu.matmul %262, %259, %cst_270 {dimension_numbers = #tpu.dot_dimension_numbers<[1], [0], [0], [1], [0, 0, 1, 1], [], []>} : vector<16x4xf32>, vector<4x64xf32>, vector<16x64xf32> -> vector<16x64xf32>
    %c1_271 = arith.constant 1 : index
    %c0_272 = arith.constant 0 : index
    %c0_273 = arith.constant 0 : index
    %264 = vector.load %arg14[%c1_271, %c0_272, %c0_273] : memref<4x16x8xf32, #tpu.memory_space<vmem>>, vector<1x16x8xf32>
    %265 = vector.shape_cast %264 : vector<1x16x8xf32> to vector<16x8xf32>
    %cst_274 = arith.constant dense<0.000000e+00> : vector<16x64xf32>
    %266 = tpu.matmul %265, %260, %cst_274 {dimension_numbers = #tpu.dot_dimension_numbers<[1], [0], [0], [1], [0, 0, 1, 1], [], []>} : vector<16x8xf32>, vector<8x64xf32>, vector<16x64xf32> -> vector<16x64xf32>
    %267 = arith.addf %263, %266 : vector<16x64xf32>
    %268 = arith.addf %256, %267 : vector<16x64xf32>
    %c2_275 = arith.constant 2 : index
    %c0_276 = arith.constant 0 : index
    %c0_277 = arith.constant 0 : index
    %269 = vector.load %arg12[%c2_275, %c0_276, %c0_277] : memref<4x256x64xf32, #tpu.memory_space<vmem>>, vector<1x256x64xf32>
    %270 = vector.shape_cast %269 : vector<1x256x64xf32> to vector<256x64xf32>
    %cst_278 = arith.constant dense<0.000000e+00> : vector<4x64xf32>
    %271 = tpu.matmul %245, %270, %cst_278 {dimension_numbers = #tpu.dot_dimension_numbers<[1], [0], [0], [1], [0, 0, 1, 1], [], []>} : vector<4x256xf32>, vector<256x64xf32>, vector<4x64xf32> -> vector<4x64xf32>
    %cst_279 = arith.constant dense<0.000000e+00> : vector<8x64xf32>
    %272 = tpu.matmul %191, %270, %cst_279 {dimension_numbers = #tpu.dot_dimension_numbers<[1], [0], [0], [1], [0, 0, 1, 1], [], []>} : vector<8x256xf32>, vector<256x64xf32>, vector<8x64xf32> -> vector<8x64xf32>
    %c2_280 = arith.constant 2 : index
    %c0_281 = arith.constant 0 : index
    %c0_282 = arith.constant 0 : index
    %273 = vector.load %arg13[%c2_280, %c0_281, %c0_282] : memref<4x16x4xf32, #tpu.memory_space<vmem>>, vector<1x16x4xf32>
    %274 = vector.shape_cast %273 : vector<1x16x4xf32> to vector<16x4xf32>
    %cst_283 = arith.constant dense<0.000000e+00> : vector<16x64xf32>
    %275 = tpu.matmul %274, %271, %cst_283 {dimension_numbers = #tpu.dot_dimension_numbers<[1], [0], [0], [1], [0, 0, 1, 1], [], []>} : vector<16x4xf32>, vector<4x64xf32>, vector<16x64xf32> -> vector<16x64xf32>
    %c2_284 = arith.constant 2 : index
    %c0_285 = arith.constant 0 : index
    %c0_286 = arith.constant 0 : index
    %276 = vector.load %arg14[%c2_284, %c0_285, %c0_286] : memref<4x16x8xf32, #tpu.memory_space<vmem>>, vector<1x16x8xf32>
    %277 = vector.shape_cast %276 : vector<1x16x8xf32> to vector<16x8xf32>
    %cst_287 = arith.constant dense<0.000000e+00> : vector<16x64xf32>
    %278 = tpu.matmul %277, %272, %cst_287 {dimension_numbers = #tpu.dot_dimension_numbers<[1], [0], [0], [1], [0, 0, 1, 1], [], []>} : vector<16x8xf32>, vector<8x64xf32>, vector<16x64xf32> -> vector<16x64xf32>
    %279 = arith.addf %275, %278 : vector<16x64xf32>
    %280 = arith.addf %268, %279 : vector<16x64xf32>
    %c3_288 = arith.constant 3 : index
    %c0_289 = arith.constant 0 : index
    %c0_290 = arith.constant 0 : index
    %281 = vector.load %arg12[%c3_288, %c0_289, %c0_290] : memref<4x256x64xf32, #tpu.memory_space<vmem>>, vector<1x256x64xf32>
    %282 = vector.shape_cast %281 : vector<1x256x64xf32> to vector<256x64xf32>
    %cst_291 = arith.constant dense<0.000000e+00> : vector<4x64xf32>
    %283 = tpu.matmul %245, %282, %cst_291 {dimension_numbers = #tpu.dot_dimension_numbers<[1], [0], [0], [1], [0, 0, 1, 1], [], []>} : vector<4x256xf32>, vector<256x64xf32>, vector<4x64xf32> -> vector<4x64xf32>
    %cst_292 = arith.constant dense<0.000000e+00> : vector<8x64xf32>
    %284 = tpu.matmul %191, %282, %cst_292 {dimension_numbers = #tpu.dot_dimension_numbers<[1], [0], [0], [1], [0, 0, 1, 1], [], []>} : vector<8x256xf32>, vector<256x64xf32>, vector<8x64xf32> -> vector<8x64xf32>
    %c3_293 = arith.constant 3 : index
    %c0_294 = arith.constant 0 : index
    %c0_295 = arith.constant 0 : index
    %285 = vector.load %arg13[%c3_293, %c0_294, %c0_295] : memref<4x16x4xf32, #tpu.memory_space<vmem>>, vector<1x16x4xf32>
    %286 = vector.shape_cast %285 : vector<1x16x4xf32> to vector<16x4xf32>
    %cst_296 = arith.constant dense<0.000000e+00> : vector<16x64xf32>
    %287 = tpu.matmul %286, %283, %cst_296 {dimension_numbers = #tpu.dot_dimension_numbers<[1], [0], [0], [1], [0, 0, 1, 1], [], []>} : vector<16x4xf32>, vector<4x64xf32>, vector<16x64xf32> -> vector<16x64xf32>
    %c3_297 = arith.constant 3 : index
    %c0_298 = arith.constant 0 : index
    %c0_299 = arith.constant 0 : index
    %288 = vector.load %arg14[%c3_297, %c0_298, %c0_299] : memref<4x16x8xf32, #tpu.memory_space<vmem>>, vector<1x16x8xf32>
    %289 = vector.shape_cast %288 : vector<1x16x8xf32> to vector<16x8xf32>
    %cst_300 = arith.constant dense<0.000000e+00> : vector<16x64xf32>
    %290 = tpu.matmul %289, %284, %cst_300 {dimension_numbers = #tpu.dot_dimension_numbers<[1], [0], [0], [1], [0, 0, 1, 1], [], []>} : vector<16x8xf32>, vector<8x64xf32>, vector<16x64xf32> -> vector<16x64xf32>
    %291 = arith.addf %287, %290 : vector<16x64xf32>
    %292 = arith.addf %280, %291 : vector<16x64xf32>
    %cst_301 = arith.constant 0.000000e+00 : f32
    %293 = vector.broadcast %cst_301 : f32 to vector<16x128xf32>
    %c0_302 = arith.constant 0 : index
    %c0_303 = arith.constant 0 : index
    %294 = vector.load %arg35[%c0_302, %c0_303] : memref<32x512xf32, #tpu.memory_space<vmem>>, vector<16x128xf32>
    tpu.vector_store %arg35[%c0_302, %c0_303], %293 {strides = array<i32>} : memref<32x512xf32, #tpu.memory_space<vmem>>, vector<16x128xf32>,
    %cst_304 = arith.constant 0.000000e+00 : f32
    %295 = vector.broadcast %cst_304 : f32 to vector<16x128xf32>
    %c0_305 = arith.constant 0 : index
    %c192 = arith.constant 192 : index
    %296 = vector.load %arg35[%c0_305, %c192] : memref<32x512xf32, #tpu.memory_space<vmem>>, vector<16x128xf32>
    tpu.vector_store %arg35[%c0_305, %c192], %295 {strides = array<i32>} : memref<32x512xf32, #tpu.memory_space<vmem>>, vector<16x128xf32>,
    %c0_306 = arith.constant 0 : index
    %c128_307 = arith.constant 128 : index
    %297 = vector.load %arg35[%c0_306, %c128_307] : memref<32x512xf32, #tpu.memory_space<vmem>>, vector<16x64xf32>
    tpu.vector_store %arg35[%c0_306, %c128_307], %292 {strides = array<i32>} : memref<32x512xf32, #tpu.memory_space<vmem>>, vector<16x64xf32>,
    %c0_308 = arith.constant 0 : index
    %c119 = arith.constant 119 : index
    %298 = vector.load %arg35[%c0_308, %c119] : memref<32x512xf32, #tpu.memory_space<vmem>>, vector<16x64xf32>
    %c0_309 = arith.constant 0 : index
    %c0_310 = arith.constant 0 : index
    %c0_311 = arith.constant 0 : index
    %299 = vector.load %arg15[%c0_309, %c0_310, %c0_311] : memref<9x16x16xf32, #tpu.memory_space<vmem>>, vector<1x16x16xf32>
    %300 = vector.shape_cast %299 : vector<1x16x16xf32> to vector<16x16xf32>
    %cst_312 = arith.constant dense<0.000000e+00> : vector<16x64xf32>
    %301 = tpu.matmul %300, %298, %cst_312 {dimension_numbers = #tpu.dot_dimension_numbers<[1], [0], [0], [1], [0, 0, 1, 1], [], []>} : vector<16x16xf32>, vector<16x64xf32>, vector<16x64xf32> -> vector<16x64xf32>
    %c0_313 = arith.constant 0 : index
    %c127_314 = arith.constant 127 : index
    %302 = vector.load %arg35[%c0_313, %c127_314] : memref<32x512xf32, #tpu.memory_space<vmem>>, vector<16x64xf32>
    %c3_315 = arith.constant 3 : index
    %c0_316 = arith.constant 0 : index
    %c0_317 = arith.constant 0 : index
    %303 = vector.load %arg15[%c3_315, %c0_316, %c0_317] : memref<9x16x16xf32, #tpu.memory_space<vmem>>, vector<1x16x16xf32>
    %304 = vector.shape_cast %303 : vector<1x16x16xf32> to vector<16x16xf32>
    %cst_318 = arith.constant dense<0.000000e+00> : vector<16x64xf32>
    %305 = tpu.matmul %304, %302, %cst_318 {dimension_numbers = #tpu.dot_dimension_numbers<[1], [0], [0], [1], [0, 0, 1, 1], [], []>} : vector<16x16xf32>, vector<16x64xf32>, vector<16x64xf32> -> vector<16x64xf32>
    %306 = arith.addf %301, %305 : vector<16x64xf32>
    %c0_319 = arith.constant 0 : index
    %c135 = arith.constant 135 : index
    %307 = vector.load %arg35[%c0_319, %c135] : memref<32x512xf32, #tpu.memory_space<vmem>>, vector<16x64xf32>
    %c6_320 = arith.constant 6 : index
    %c0_321 = arith.constant 0 : index
    %c0_322 = arith.constant 0 : index
    %308 = vector.load %arg15[%c6_320, %c0_321, %c0_322] : memref<9x16x16xf32, #tpu.memory_space<vmem>>, vector<1x16x16xf32>
    %309 = vector.shape_cast %308 : vector<1x16x16xf32> to vector<16x16xf32>
    %cst_323 = arith.constant dense<0.000000e+00> : vector<16x64xf32>
    %310 = tpu.matmul %309, %307, %cst_323 {dimension_numbers = #tpu.dot_dimension_numbers<[1], [0], [0], [1], [0, 0, 1, 1], [], []>} : vector<16x16xf32>, vector<16x64xf32>, vector<16x64xf32> -> vector<16x64xf32>
    %311 = arith.addf %306, %310 : vector<16x64xf32>
    %c0_324 = arith.constant 0 : index
    %c0_325 = arith.constant 0 : index
    %312 = vector.load %arg17[%c0_324, %c0_325] : memref<2x64xf32, #tpu.memory_space<vmem>>, vector<1x64xf32>
    %313 = vector.broadcast %312 : vector<1x64xf32> to vector<16x64xf32>
    %314 = arith.mulf %311, %313 : vector<16x64xf32>
    %c0_326 = arith.constant 0 : index
    %c120 = arith.constant 120 : index
    %315 = vector.load %arg35[%c0_326, %c120] : memref<32x512xf32, #tpu.memory_space<vmem>>, vector<16x64xf32>
    %c1_327 = arith.constant 1 : index
    %c0_328 = arith.constant 0 : index
    %c0_329 = arith.constant 0 : index
    %316 = vector.load %arg15[%c1_327, %c0_328, %c0_329] : memref<9x16x16xf32, #tpu.memory_space<vmem>>, vector<1x16x16xf32>
    %317 = vector.shape_cast %316 : vector<1x16x16xf32> to vector<16x16xf32>
    %cst_330 = arith.constant dense<0.000000e+00> : vector<16x64xf32>
    %318 = tpu.matmul %317, %315, %cst_330 {dimension_numbers = #tpu.dot_dimension_numbers<[1], [0], [0], [1], [0, 0, 1, 1], [], []>} : vector<16x16xf32>, vector<16x64xf32>, vector<16x64xf32> -> vector<16x64xf32>
    %c0_331 = arith.constant 0 : index
    %c128_332 = arith.constant 128 : index
    %319 = vector.load %arg35[%c0_331, %c128_332] : memref<32x512xf32, #tpu.memory_space<vmem>>, vector<16x64xf32>
    %c4_333 = arith.constant 4 : index
    %c0_334 = arith.constant 0 : index
    %c0_335 = arith.constant 0 : index
    %320 = vector.load %arg15[%c4_333, %c0_334, %c0_335] : memref<9x16x16xf32, #tpu.memory_space<vmem>>, vector<1x16x16xf32>
    %321 = vector.shape_cast %320 : vector<1x16x16xf32> to vector<16x16xf32>
    %cst_336 = arith.constant dense<0.000000e+00> : vector<16x64xf32>
    %322 = tpu.matmul %321, %319, %cst_336 {dimension_numbers = #tpu.dot_dimension_numbers<[1], [0], [0], [1], [0, 0, 1, 1], [], []>} : vector<16x16xf32>, vector<16x64xf32>, vector<16x64xf32> -> vector<16x64xf32>
    %323 = arith.addf %318, %322 : vector<16x64xf32>
    %c0_337 = arith.constant 0 : index
    %c136 = arith.constant 136 : index
    %324 = vector.load %arg35[%c0_337, %c136] : memref<32x512xf32, #tpu.memory_space<vmem>>, vector<16x64xf32>
    %c7_338 = arith.constant 7 : index
    %c0_339 = arith.constant 0 : index
    %c0_340 = arith.constant 0 : index
    %325 = vector.load %arg15[%c7_338, %c0_339, %c0_340] : memref<9x16x16xf32, #tpu.memory_space<vmem>>, vector<1x16x16xf32>
    %326 = vector.shape_cast %325 : vector<1x16x16xf32> to vector<16x16xf32>
    %cst_341 = arith.constant dense<0.000000e+00> : vector<16x64xf32>
    %327 = tpu.matmul %326, %324, %cst_341 {dimension_numbers = #tpu.dot_dimension_numbers<[1], [0], [0], [1], [0, 0, 1, 1], [], []>} : vector<16x16xf32>, vector<16x64xf32>, vector<16x64xf32> -> vector<16x64xf32>
    %328 = arith.addf %323, %327 : vector<16x64xf32>
    %329 = arith.addf %314, %328 : vector<16x64xf32>
    %c0_342 = arith.constant 0 : index
    %c121 = arith.constant 121 : index
    %330 = vector.load %arg35[%c0_342, %c121] : memref<32x512xf32, #tpu.memory_space<vmem>>, vector<16x64xf32>
    %c2_343 = arith.constant 2 : index
    %c0_344 = arith.constant 0 : index
    %c0_345 = arith.constant 0 : index
    %331 = vector.load %arg15[%c2_343, %c0_344, %c0_345] : memref<9x16x16xf32, #tpu.memory_space<vmem>>, vector<1x16x16xf32>
    %332 = vector.shape_cast %331 : vector<1x16x16xf32> to vector<16x16xf32>
    %cst_346 = arith.constant dense<0.000000e+00> : vector<16x64xf32>
    %333 = tpu.matmul %332, %330, %cst_346 {dimension_numbers = #tpu.dot_dimension_numbers<[1], [0], [0], [1], [0, 0, 1, 1], [], []>} : vector<16x16xf32>, vector<16x64xf32>, vector<16x64xf32> -> vector<16x64xf32>
    %c0_347 = arith.constant 0 : index
    %c129_348 = arith.constant 129 : index
    %334 = vector.load %arg35[%c0_347, %c129_348] : memref<32x512xf32, #tpu.memory_space<vmem>>, vector<16x64xf32>
    %c5_349 = arith.constant 5 : index
    %c0_350 = arith.constant 0 : index
    %c0_351 = arith.constant 0 : index
    %335 = vector.load %arg15[%c5_349, %c0_350, %c0_351] : memref<9x16x16xf32, #tpu.memory_space<vmem>>, vector<1x16x16xf32>
    %336 = vector.shape_cast %335 : vector<1x16x16xf32> to vector<16x16xf32>
    %cst_352 = arith.constant dense<0.000000e+00> : vector<16x64xf32>
    %337 = tpu.matmul %336, %334, %cst_352 {dimension_numbers = #tpu.dot_dimension_numbers<[1], [0], [0], [1], [0, 0, 1, 1], [], []>} : vector<16x16xf32>, vector<16x64xf32>, vector<16x64xf32> -> vector<16x64xf32>
    %338 = arith.addf %333, %337 : vector<16x64xf32>
    %c0_353 = arith.constant 0 : index
    %c137 = arith.constant 137 : index
    %339 = vector.load %arg35[%c0_353, %c137] : memref<32x512xf32, #tpu.memory_space<vmem>>, vector<16x64xf32>
    %c8_354 = arith.constant 8 : index
    %c0_355 = arith.constant 0 : index
    %c0_356 = arith.constant 0 : index
    %340 = vector.load %arg15[%c8_354, %c0_355, %c0_356] : memref<9x16x16xf32, #tpu.memory_space<vmem>>, vector<1x16x16xf32>
    %341 = vector.shape_cast %340 : vector<1x16x16xf32> to vector<16x16xf32>
    %cst_357 = arith.constant dense<0.000000e+00> : vector<16x64xf32>
    %342 = tpu.matmul %341, %339, %cst_357 {dimension_numbers = #tpu.dot_dimension_numbers<[1], [0], [0], [1], [0, 0, 1, 1], [], []>} : vector<16x16xf32>, vector<16x64xf32>, vector<16x64xf32> -> vector<16x64xf32>
    %343 = arith.addf %338, %342 : vector<16x64xf32>
    %c1_358 = arith.constant 1 : index
    %c0_359 = arith.constant 0 : index
    %344 = vector.load %arg17[%c1_358, %c0_359] : memref<2x64xf32, #tpu.memory_space<vmem>>, vector<1x64xf32>
    %345 = vector.broadcast %344 : vector<1x64xf32> to vector<16x64xf32>
    %346 = arith.mulf %343, %345 : vector<16x64xf32>
    %347 = arith.addf %329, %346 : vector<16x64xf32>
    %c0_360 = arith.constant 0 : index
    %c0_361 = arith.constant 0 : index
    %348 = vector.load %arg16[%c0_360, %c0_361] : memref<16x1xf32, #tpu.memory_space<vmem>>, vector<16x1xf32>
    %349 = vector.broadcast %348 : vector<16x1xf32> to vector<16x64xf32>
    %350 = arith.addf %347, %349 : vector<16x64xf32>
    %351 = arith.negf %350 : vector<16x64xf32>
    %352 = math.exp %351 : vector<16x64xf32>
    %cst_362 = arith.constant 1.000000e+00 : f32
    %353 = vector.broadcast %cst_362 : f32 to vector<16x64xf32>
    %354 = arith.addf %353, %352 : vector<16x64xf32>
    %355 = arith.divf %353, %354 : vector<16x64xf32>
    %356 = arith.mulf %350, %355 : vector<16x64xf32>
    %c0_363 = arith.constant 0 : index
    %c128_364 = arith.constant 128 : index
    %357 = vector.load %arg35[%c0_363, %c128_364] : memref<32x512xf32, #tpu.memory_space<vmem>>, vector<16x64xf32>
    tpu.vector_store %arg35[%c0_363, %c128_364], %356 {strides = array<i32>} : memref<32x512xf32, #tpu.memory_space<vmem>>, vector<16x64xf32>,
    %c0_365 = arith.constant 0 : index
    %c119_366 = arith.constant 119 : index
    %358 = vector.load %arg35[%c0_365, %c119_366] : memref<32x512xf32, #tpu.memory_space<vmem>>, vector<16x64xf32>
    %c0_367 = arith.constant 0 : index
    %c0_368 = arith.constant 0 : index
    %c0_369 = arith.constant 0 : index
    %359 = vector.load %arg18[%c0_367, %c0_368, %c0_369] : memref<9x16x16xf32, #tpu.memory_space<vmem>>, vector<1x16x16xf32>
    %360 = vector.shape_cast %359 : vector<1x16x16xf32> to vector<16x16xf32>
    %cst_370 = arith.constant dense<0.000000e+00> : vector<16x64xf32>
    %361 = tpu.matmul %360, %358, %cst_370 {dimension_numbers = #tpu.dot_dimension_numbers<[1], [0], [0], [1], [0, 0, 1, 1], [], []>} : vector<16x16xf32>, vector<16x64xf32>, vector<16x64xf32> -> vector<16x64xf32>
    %c0_371 = arith.constant 0 : index
    %c127_372 = arith.constant 127 : index
    %362 = vector.load %arg35[%c0_371, %c127_372] : memref<32x512xf32, #tpu.memory_space<vmem>>, vector<16x64xf32>
    %c3_373 = arith.constant 3 : index
    %c0_374 = arith.constant 0 : index
    %c0_375 = arith.constant 0 : index
    %363 = vector.load %arg18[%c3_373, %c0_374, %c0_375] : memref<9x16x16xf32, #tpu.memory_space<vmem>>, vector<1x16x16xf32>
    %364 = vector.shape_cast %363 : vector<1x16x16xf32> to vector<16x16xf32>
    %cst_376 = arith.constant dense<0.000000e+00> : vector<16x64xf32>
    %365 = tpu.matmul %364, %362, %cst_376 {dimension_numbers = #tpu.dot_dimension_numbers<[1], [0], [0], [1], [0, 0, 1, 1], [], []>} : vector<16x16xf32>, vector<16x64xf32>, vector<16x64xf32> -> vector<16x64xf32>
    %366 = arith.addf %361, %365 : vector<16x64xf32>
    %c0_377 = arith.constant 0 : index
    %c135_378 = arith.constant 135 : index
    %367 = vector.load %arg35[%c0_377, %c135_378] : memref<32x512xf32, #tpu.memory_space<vmem>>, vector<16x64xf32>
    %c6_379 = arith.constant 6 : index
    %c0_380 = arith.constant 0 : index
    %c0_381 = arith.constant 0 : index
    %368 = vector.load %arg18[%c6_379, %c0_380, %c0_381] : memref<9x16x16xf32, #tpu.memory_space<vmem>>, vector<1x16x16xf32>
    %369 = vector.shape_cast %368 : vector<1x16x16xf32> to vector<16x16xf32>
    %cst_382 = arith.constant dense<0.000000e+00> : vector<16x64xf32>
    %370 = tpu.matmul %369, %367, %cst_382 {dimension_numbers = #tpu.dot_dimension_numbers<[1], [0], [0], [1], [0, 0, 1, 1], [], []>} : vector<16x16xf32>, vector<16x64xf32>, vector<16x64xf32> -> vector<16x64xf32>
    %371 = arith.addf %366, %370 : vector<16x64xf32>
    %c0_383 = arith.constant 0 : index
    %c0_384 = arith.constant 0 : index
    %372 = vector.load %arg17[%c0_383, %c0_384] : memref<2x64xf32, #tpu.memory_space<vmem>>, vector<1x64xf32>
    %373 = vector.broadcast %372 : vector<1x64xf32> to vector<16x64xf32>
    %374 = arith.mulf %371, %373 : vector<16x64xf32>
    %c0_385 = arith.constant 0 : index
    %c120_386 = arith.constant 120 : index
    %375 = vector.load %arg35[%c0_385, %c120_386] : memref<32x512xf32, #tpu.memory_space<vmem>>, vector<16x64xf32>
    %c1_387 = arith.constant 1 : index
    %c0_388 = arith.constant 0 : index
    %c0_389 = arith.constant 0 : index
    %376 = vector.load %arg18[%c1_387, %c0_388, %c0_389] : memref<9x16x16xf32, #tpu.memory_space<vmem>>, vector<1x16x16xf32>
    %377 = vector.shape_cast %376 : vector<1x16x16xf32> to vector<16x16xf32>
    %cst_390 = arith.constant dense<0.000000e+00> : vector<16x64xf32>
    %378 = tpu.matmul %377, %375, %cst_390 {dimension_numbers = #tpu.dot_dimension_numbers<[1], [0], [0], [1], [0, 0, 1, 1], [], []>} : vector<16x16xf32>, vector<16x64xf32>, vector<16x64xf32> -> vector<16x64xf32>
    %c0_391 = arith.constant 0 : index
    %c128_392 = arith.constant 128 : index
    %379 = vector.load %arg35[%c0_391, %c128_392] : memref<32x512xf32, #tpu.memory_space<vmem>>, vector<16x64xf32>
    %c4_393 = arith.constant 4 : index
    %c0_394 = arith.constant 0 : index
    %c0_395 = arith.constant 0 : index
    %380 = vector.load %arg18[%c4_393, %c0_394, %c0_395] : memref<9x16x16xf32, #tpu.memory_space<vmem>>, vector<1x16x16xf32>
    %381 = vector.shape_cast %380 : vector<1x16x16xf32> to vector<16x16xf32>
    %cst_396 = arith.constant dense<0.000000e+00> : vector<16x64xf32>
    %382 = tpu.matmul %381, %379, %cst_396 {dimension_numbers = #tpu.dot_dimension_numbers<[1], [0], [0], [1], [0, 0, 1, 1], [], []>} : vector<16x16xf32>, vector<16x64xf32>, vector<16x64xf32> -> vector<16x64xf32>
    %383 = arith.addf %378, %382 : vector<16x64xf32>
    %c0_397 = arith.constant 0 : index
    %c136_398 = arith.constant 136 : index
    %384 = vector.load %arg35[%c0_397, %c136_398] : memref<32x512xf32, #tpu.memory_space<vmem>>, vector<16x64xf32>
    %c7_399 = arith.constant 7 : index
    %c0_400 = arith.constant 0 : index
    %c0_401 = arith.constant 0 : index
    %385 = vector.load %arg18[%c7_399, %c0_400, %c0_401] : memref<9x16x16xf32, #tpu.memory_space<vmem>>, vector<1x16x16xf32>
    %386 = vector.shape_cast %385 : vector<1x16x16xf32> to vector<16x16xf32>
    %cst_402 = arith.constant dense<0.000000e+00> : vector<16x64xf32>
    %387 = tpu.matmul %386, %384, %cst_402 {dimension_numbers = #tpu.dot_dimension_numbers<[1], [0], [0], [1], [0, 0, 1, 1], [], []>} : vector<16x16xf32>, vector<16x64xf32>, vector<16x64xf32> -> vector<16x64xf32>
    %388 = arith.addf %383, %387 : vector<16x64xf32>
    %389 = arith.addf %374, %388 : vector<16x64xf32>
    %c0_403 = arith.constant 0 : index
    %c121_404 = arith.constant 121 : index
    %390 = vector.load %arg35[%c0_403, %c121_404] : memref<32x512xf32, #tpu.memory_space<vmem>>, vector<16x64xf32>
    %c2_405 = arith.constant 2 : index
    %c0_406 = arith.constant 0 : index
    %c0_407 = arith.constant 0 : index
    %391 = vector.load %arg18[%c2_405, %c0_406, %c0_407] : memref<9x16x16xf32, #tpu.memory_space<vmem>>, vector<1x16x16xf32>
    %392 = vector.shape_cast %391 : vector<1x16x16xf32> to vector<16x16xf32>
    %cst_408 = arith.constant dense<0.000000e+00> : vector<16x64xf32>
    %393 = tpu.matmul %392, %390, %cst_408 {dimension_numbers = #tpu.dot_dimension_numbers<[1], [0], [0], [1], [0, 0, 1, 1], [], []>} : vector<16x16xf32>, vector<16x64xf32>, vector<16x64xf32> -> vector<16x64xf32>
    %c0_409 = arith.constant 0 : index
    %c129_410 = arith.constant 129 : index
    %394 = vector.load %arg35[%c0_409, %c129_410] : memref<32x512xf32, #tpu.memory_space<vmem>>, vector<16x64xf32>
    %c5_411 = arith.constant 5 : index
    %c0_412 = arith.constant 0 : index
    %c0_413 = arith.constant 0 : index
    %395 = vector.load %arg18[%c5_411, %c0_412, %c0_413] : memref<9x16x16xf32, #tpu.memory_space<vmem>>, vector<1x16x16xf32>
    %396 = vector.shape_cast %395 : vector<1x16x16xf32> to vector<16x16xf32>
    %cst_414 = arith.constant dense<0.000000e+00> : vector<16x64xf32>
    %397 = tpu.matmul %396, %394, %cst_414 {dimension_numbers = #tpu.dot_dimension_numbers<[1], [0], [0], [1], [0, 0, 1, 1], [], []>} : vector<16x16xf32>, vector<16x64xf32>, vector<16x64xf32> -> vector<16x64xf32>
    %398 = arith.addf %393, %397 : vector<16x64xf32>
    %c0_415 = arith.constant 0 : index
    %c137_416 = arith.constant 137 : index
    %399 = vector.load %arg35[%c0_415, %c137_416] : memref<32x512xf32, #tpu.memory_space<vmem>>, vector<16x64xf32>
    %c8_417 = arith.constant 8 : index
    %c0_418 = arith.constant 0 : index
    %c0_419 = arith.constant 0 : index
    %400 = vector.load %arg18[%c8_417, %c0_418, %c0_419] : memref<9x16x16xf32, #tpu.memory_space<vmem>>, vector<1x16x16xf32>
    %401 = vector.shape_cast %400 : vector<1x16x16xf32> to vector<16x16xf32>
    %cst_420 = arith.constant dense<0.000000e+00> : vector<16x64xf32>
    %402 = tpu.matmul %401, %399, %cst_420 {dimension_numbers = #tpu.dot_dimension_numbers<[1], [0], [0], [1], [0, 0, 1, 1], [], []>} : vector<16x16xf32>, vector<16x64xf32>, vector<16x64xf32> -> vector<16x64xf32>
    %403 = arith.addf %398, %402 : vector<16x64xf32>
    %c1_421 = arith.constant 1 : index
    %c0_422 = arith.constant 0 : index
    %404 = vector.load %arg17[%c1_421, %c0_422] : memref<2x64xf32, #tpu.memory_space<vmem>>, vector<1x64xf32>
    %405 = vector.broadcast %404 : vector<1x64xf32> to vector<16x64xf32>
    %406 = arith.mulf %403, %405 : vector<16x64xf32>
    %407 = arith.addf %389, %406 : vector<16x64xf32>
    %408 = arith.mulf %407, %407 : vector<16x64xf32>
    %cst_423 = arith.constant dense<0.000000e+00> : vector<64xf32>
    %409 = vector.multi_reduction <add>, %408, %cst_423 [0] : vector<16x64xf32> to vector<64xf32>
    %410 = vector.shape_cast %409 : vector<64xf32> to vector<1x64xf32>
    %cst_424 = arith.constant 1.600000e+01 : f32
    %411 = vector.broadcast %cst_424 : f32 to vector<1x64xf32>
    %412 = arith.divf %410, %411 : vector<1x64xf32>
    %cst_425 = arith.constant 9.99999974E-6 : f32
    %413 = vector.broadcast %cst_425 : f32 to vector<1x64xf32>
    %414 = arith.addf %412, %413 : vector<1x64xf32>
    %415 = math.rsqrt %414 : vector<1x64xf32>
    %416 = vector.broadcast %415 : vector<1x64xf32> to vector<16x64xf32>
    %417 = arith.mulf %407, %416 : vector<16x64xf32>
    %c0_426 = arith.constant 0 : index
    %c0_427 = arith.constant 0 : index
    %418 = vector.load %arg19[%c0_426, %c0_427] : memref<16x1xf32, #tpu.memory_space<vmem>>, vector<16x1xf32>
    %419 = vector.broadcast %418 : vector<16x1xf32> to vector<16x64xf32>
    %420 = arith.mulf %417, %419 : vector<16x64xf32>
    %c0_428 = arith.constant 0 : index
    %c0_429 = arith.constant 0 : index
    %421 = vector.load %arg20[%c0_428, %c0_429] : memref<16x1xf32, #tpu.memory_space<vmem>>, vector<16x1xf32>
    %422 = vector.broadcast %421 : vector<16x1xf32> to vector<16x64xf32>
    %423 = arith.addf %420, %422 : vector<16x64xf32>
    %424 = arith.addf %423, %292 : vector<16x64xf32>
    %c0_430 = arith.constant 0 : index
    %c128_431 = arith.constant 128 : index
    %425 = vector.load %arg35[%c0_430, %c128_431] : memref<32x512xf32, #tpu.memory_space<vmem>>, vector<16x64xf32>
    tpu.vector_store %arg35[%c0_430, %c128_431], %424 {strides = array<i32>} : memref<32x512xf32, #tpu.memory_space<vmem>>, vector<16x64xf32>,
    %c0_432 = arith.constant 0 : index
    %c119_433 = arith.constant 119 : index
    %426 = vector.load %arg35[%c0_432, %c119_433] : memref<32x512xf32, #tpu.memory_space<vmem>>, vector<16x64xf32>
    %c0_434 = arith.constant 0 : index
    %c0_435 = arith.constant 0 : index
    %c0_436 = arith.constant 0 : index
    %427 = vector.load %arg21[%c0_434, %c0_435, %c0_436] : memref<9x8x16xf32, #tpu.memory_space<vmem>>, vector<1x8x16xf32>
    %428 = vector.shape_cast %427 : vector<1x8x16xf32> to vector<8x16xf32>
    %cst_437 = arith.constant dense<0.000000e+00> : vector<8x64xf32>
    %429 = tpu.matmul %428, %426, %cst_437 {dimension_numbers = #tpu.dot_dimension_numbers<[1], [0], [0], [1], [0, 0, 1, 1], [], []>} : vector<8x16xf32>, vector<16x64xf32>, vector<8x64xf32> -> vector<8x64xf32>
    %c0_438 = arith.constant 0 : index
    %c127_439 = arith.constant 127 : index
    %430 = vector.load %arg35[%c0_438, %c127_439] : memref<32x512xf32, #tpu.memory_space<vmem>>, vector<16x64xf32>
    %c3_440 = arith.constant 3 : index
    %c0_441 = arith.constant 0 : index
    %c0_442 = arith.constant 0 : index
    %431 = vector.load %arg21[%c3_440, %c0_441, %c0_442] : memref<9x8x16xf32, #tpu.memory_space<vmem>>, vector<1x8x16xf32>
    %432 = vector.shape_cast %431 : vector<1x8x16xf32> to vector<8x16xf32>
    %cst_443 = arith.constant dense<0.000000e+00> : vector<8x64xf32>
    %433 = tpu.matmul %432, %430, %cst_443 {dimension_numbers = #tpu.dot_dimension_numbers<[1], [0], [0], [1], [0, 0, 1, 1], [], []>} : vector<8x16xf32>, vector<16x64xf32>, vector<8x64xf32> -> vector<8x64xf32>
    %434 = arith.addf %429, %433 : vector<8x64xf32>
    %c0_444 = arith.constant 0 : index
    %c135_445 = arith.constant 135 : index
    %435 = vector.load %arg35[%c0_444, %c135_445] : memref<32x512xf32, #tpu.memory_space<vmem>>, vector<16x64xf32>
    %c6_446 = arith.constant 6 : index
    %c0_447 = arith.constant 0 : index
    %c0_448 = arith.constant 0 : index
    %436 = vector.load %arg21[%c6_446, %c0_447, %c0_448] : memref<9x8x16xf32, #tpu.memory_space<vmem>>, vector<1x8x16xf32>
    %437 = vector.shape_cast %436 : vector<1x8x16xf32> to vector<8x16xf32>
    %cst_449 = arith.constant dense<0.000000e+00> : vector<8x64xf32>
    %438 = tpu.matmul %437, %435, %cst_449 {dimension_numbers = #tpu.dot_dimension_numbers<[1], [0], [0], [1], [0, 0, 1, 1], [], []>} : vector<8x16xf32>, vector<16x64xf32>, vector<8x64xf32> -> vector<8x64xf32>
    %439 = arith.addf %434, %438 : vector<8x64xf32>
    %c0_450 = arith.constant 0 : index
    %c0_451 = arith.constant 0 : index
    %440 = vector.load %arg17[%c0_450, %c0_451] : memref<2x64xf32, #tpu.memory_space<vmem>>, vector<1x64xf32>
    %441 = vector.broadcast %440 : vector<1x64xf32> to vector<8x64xf32>
    %442 = arith.mulf %439, %441 : vector<8x64xf32>
    %c0_452 = arith.constant 0 : index
    %c120_453 = arith.constant 120 : index
    %443 = vector.load %arg35[%c0_452, %c120_453] : memref<32x512xf32, #tpu.memory_space<vmem>>, vector<16x64xf32>
    %c1_454 = arith.constant 1 : index
    %c0_455 = arith.constant 0 : index
    %c0_456 = arith.constant 0 : index
    %444 = vector.load %arg21[%c1_454, %c0_455, %c0_456] : memref<9x8x16xf32, #tpu.memory_space<vmem>>, vector<1x8x16xf32>
    %445 = vector.shape_cast %444 : vector<1x8x16xf32> to vector<8x16xf32>
    %cst_457 = arith.constant dense<0.000000e+00> : vector<8x64xf32>
    %446 = tpu.matmul %445, %443, %cst_457 {dimension_numbers = #tpu.dot_dimension_numbers<[1], [0], [0], [1], [0, 0, 1, 1], [], []>} : vector<8x16xf32>, vector<16x64xf32>, vector<8x64xf32> -> vector<8x64xf32>
    %c0_458 = arith.constant 0 : index
    %c128_459 = arith.constant 128 : index
    %447 = vector.load %arg35[%c0_458, %c128_459] : memref<32x512xf32, #tpu.memory_space<vmem>>, vector<16x64xf32>
    %c4_460 = arith.constant 4 : index
    %c0_461 = arith.constant 0 : index
    %c0_462 = arith.constant 0 : index
    %448 = vector.load %arg21[%c4_460, %c0_461, %c0_462] : memref<9x8x16xf32, #tpu.memory_space<vmem>>, vector<1x8x16xf32>
    %449 = vector.shape_cast %448 : vector<1x8x16xf32> to vector<8x16xf32>
    %cst_463 = arith.constant dense<0.000000e+00> : vector<8x64xf32>
    %450 = tpu.matmul %449, %447, %cst_463 {dimension_numbers = #tpu.dot_dimension_numbers<[1], [0], [0], [1], [0, 0, 1, 1], [], []>} : vector<8x16xf32>, vector<16x64xf32>, vector<8x64xf32> -> vector<8x64xf32>
    %451 = arith.addf %446, %450 : vector<8x64xf32>
    %c0_464 = arith.constant 0 : index
    %c136_465 = arith.constant 136 : index
    %452 = vector.load %arg35[%c0_464, %c136_465] : memref<32x512xf32, #tpu.memory_space<vmem>>, vector<16x64xf32>
    %c7_466 = arith.constant 7 : index
    %c0_467 = arith.constant 0 : index
    %c0_468 = arith.constant 0 : index
    %453 = vector.load %arg21[%c7_466, %c0_467, %c0_468] : memref<9x8x16xf32, #tpu.memory_space<vmem>>, vector<1x8x16xf32>
    %454 = vector.shape_cast %453 : vector<1x8x16xf32> to vector<8x16xf32>
    %cst_469 = arith.constant dense<0.000000e+00> : vector<8x64xf32>
    %455 = tpu.matmul %454, %452, %cst_469 {dimension_numbers = #tpu.dot_dimension_numbers<[1], [0], [0], [1], [0, 0, 1, 1], [], []>} : vector<8x16xf32>, vector<16x64xf32>, vector<8x64xf32> -> vector<8x64xf32>
    %456 = arith.addf %451, %455 : vector<8x64xf32>
    %457 = arith.addf %442, %456 : vector<8x64xf32>
    %c0_470 = arith.constant 0 : index
    %c121_471 = arith.constant 121 : index
    %458 = vector.load %arg35[%c0_470, %c121_471] : memref<32x512xf32, #tpu.memory_space<vmem>>, vector<16x64xf32>
    %c2_472 = arith.constant 2 : index
    %c0_473 = arith.constant 0 : index
    %c0_474 = arith.constant 0 : index
    %459 = vector.load %arg21[%c2_472, %c0_473, %c0_474] : memref<9x8x16xf32, #tpu.memory_space<vmem>>, vector<1x8x16xf32>
    %460 = vector.shape_cast %459 : vector<1x8x16xf32> to vector<8x16xf32>
    %cst_475 = arith.constant dense<0.000000e+00> : vector<8x64xf32>
    %461 = tpu.matmul %460, %458, %cst_475 {dimension_numbers = #tpu.dot_dimension_numbers<[1], [0], [0], [1], [0, 0, 1, 1], [], []>} : vector<8x16xf32>, vector<16x64xf32>, vector<8x64xf32> -> vector<8x64xf32>
    %c0_476 = arith.constant 0 : index
    %c129_477 = arith.constant 129 : index
    %462 = vector.load %arg35[%c0_476, %c129_477] : memref<32x512xf32, #tpu.memory_space<vmem>>, vector<16x64xf32>
    %c5_478 = arith.constant 5 : index
    %c0_479 = arith.constant 0 : index
    %c0_480 = arith.constant 0 : index
    %463 = vector.load %arg21[%c5_478, %c0_479, %c0_480] : memref<9x8x16xf32, #tpu.memory_space<vmem>>, vector<1x8x16xf32>
    %464 = vector.shape_cast %463 : vector<1x8x16xf32> to vector<8x16xf32>
    %cst_481 = arith.constant dense<0.000000e+00> : vector<8x64xf32>
    %465 = tpu.matmul %464, %462, %cst_481 {dimension_numbers = #tpu.dot_dimension_numbers<[1], [0], [0], [1], [0, 0, 1, 1], [], []>} : vector<8x16xf32>, vector<16x64xf32>, vector<8x64xf32> -> vector<8x64xf32>
    %466 = arith.addf %461, %465 : vector<8x64xf32>
    %c0_482 = arith.constant 0 : index
    %c137_483 = arith.constant 137 : index
    %467 = vector.load %arg35[%c0_482, %c137_483] : memref<32x512xf32, #tpu.memory_space<vmem>>, vector<16x64xf32>
    %c8_484 = arith.constant 8 : index
    %c0_485 = arith.constant 0 : index
    %c0_486 = arith.constant 0 : index
    %468 = vector.load %arg21[%c8_484, %c0_485, %c0_486] : memref<9x8x16xf32, #tpu.memory_space<vmem>>, vector<1x8x16xf32>
    %469 = vector.shape_cast %468 : vector<1x8x16xf32> to vector<8x16xf32>
    %cst_487 = arith.constant dense<0.000000e+00> : vector<8x64xf32>
    %470 = tpu.matmul %469, %467, %cst_487 {dimension_numbers = #tpu.dot_dimension_numbers<[1], [0], [0], [1], [0, 0, 1, 1], [], []>} : vector<8x16xf32>, vector<16x64xf32>, vector<8x64xf32> -> vector<8x64xf32>
    %471 = arith.addf %466, %470 : vector<8x64xf32>
    %c1_488 = arith.constant 1 : index
    %c0_489 = arith.constant 0 : index
    %472 = vector.load %arg17[%c1_488, %c0_489] : memref<2x64xf32, #tpu.memory_space<vmem>>, vector<1x64xf32>
    %473 = vector.broadcast %472 : vector<1x64xf32> to vector<8x64xf32>
    %474 = arith.mulf %471, %473 : vector<8x64xf32>
    %475 = arith.addf %457, %474 : vector<8x64xf32>
    %c0_490 = arith.constant 0 : index
    %c0_491 = arith.constant 0 : index
    %476 = vector.load %arg22[%c0_490, %c0_491] : memref<8x1xf32, #tpu.memory_space<vmem>>, vector<8x1xf32>
    %477 = vector.broadcast %476 : vector<8x1xf32> to vector<8x64xf32>
    %478 = arith.addf %475, %477 : vector<8x64xf32>
    %c0_492 = arith.constant 0 : index
    %c0_493 = arith.constant 0 : index
    %c0_494 = arith.constant 0 : index
    %479 = vector.load %arg23[%c0_492, %c0_493, %c0_494] : memref<4x64x16xf32, #tpu.memory_space<vmem>>, vector<1x64x16xf32>
    %480 = vector.shape_cast %479 : vector<1x64x16xf32> to vector<64x16xf32>
    %cst_495 = arith.constant dense<0.000000e+00> : vector<8x16xf32>
    %481 = tpu.matmul %478, %480, %cst_495 {dimension_numbers = #tpu.dot_dimension_numbers<[1], [0], [0], [1], [0, 0, 1, 1], [], []>} : vector<8x64xf32>, vector<64x16xf32>, vector<8x16xf32> -> vector<8x16xf32>
    %cst_496 = arith.constant dense<0.000000e+00> : vector<16x16xf32>
    %482 = tpu.matmul %424, %480, %cst_496 {dimension_numbers = #tpu.dot_dimension_numbers<[1], [0], [0], [1], [0, 0, 1, 1], [], []>} : vector<16x64xf32>, vector<64x16xf32>, vector<16x16xf32> -> vector<16x16xf32>
    %c0_497 = arith.constant 0 : index
    %c0_498 = arith.constant 0 : index
    %c0_499 = arith.constant 0 : index
    %483 = vector.load %arg24[%c0_497, %c0_498, %c0_499] : memref<4x32x8xf32, #tpu.memory_space<vmem>>, vector<1x32x8xf32>
    %484 = vector.shape_cast %483 : vector<1x32x8xf32> to vector<32x8xf32>
    %cst_500 = arith.constant dense<0.000000e+00> : vector<32x16xf32>
    %485 = tpu.matmul %484, %481, %cst_500 {dimension_numbers = #tpu.dot_dimension_numbers<[1], [0], [0], [1], [0, 0, 1, 1], [], []>} : vector<32x8xf32>, vector<8x16xf32>, vector<32x16xf32> -> vector<32x16xf32>
    %c0_501 = arith.constant 0 : index
    %c0_502 = arith.constant 0 : index
    %c0_503 = arith.constant 0 : index
    %486 = vector.load %arg25[%c0_501, %c0_502, %c0_503] : memref<4x32x16xf32, #tpu.memory_space<vmem>>, vector<1x32x16xf32>
    %487 = vector.shape_cast %486 : vector<1x32x16xf32> to vector<32x16xf32>
    %cst_504 = arith.constant dense<0.000000e+00> : vector<32x16xf32>
    %488 = tpu.matmul %487, %482, %cst_504 {dimension_numbers = #tpu.dot_dimension_numbers<[1], [0], [0], [1], [0, 0, 1, 1], [], []>} : vector<32x16xf32>, vector<16x16xf32>, vector<32x16xf32> -> vector<32x16xf32>
    %489 = arith.addf %485, %488 : vector<32x16xf32>
    %c1_505 = arith.constant 1 : index
    %c0_506 = arith.constant 0 : index
    %c0_507 = arith.constant 0 : index
    %490 = vector.load %arg23[%c1_505, %c0_506, %c0_507] : memref<4x64x16xf32, #tpu.memory_space<vmem>>, vector<1x64x16xf32>
    %491 = vector.shape_cast %490 : vector<1x64x16xf32> to vector<64x16xf32>
    %cst_508 = arith.constant dense<0.000000e+00> : vector<8x16xf32>
    %492 = tpu.matmul %478, %491, %cst_508 {dimension_numbers = #tpu.dot_dimension_numbers<[1], [0], [0], [1], [0, 0, 1, 1], [], []>} : vector<8x64xf32>, vector<64x16xf32>, vector<8x16xf32> -> vector<8x16xf32>
    %cst_509 = arith.constant dense<0.000000e+00> : vector<16x16xf32>
    %493 = tpu.matmul %424, %491, %cst_509 {dimension_numbers = #tpu.dot_dimension_numbers<[1], [0], [0], [1], [0, 0, 1, 1], [], []>} : vector<16x64xf32>, vector<64x16xf32>, vector<16x16xf32> -> vector<16x16xf32>
    %c1_510 = arith.constant 1 : index
    %c0_511 = arith.constant 0 : index
    %c0_512 = arith.constant 0 : index
    %494 = vector.load %arg24[%c1_510, %c0_511, %c0_512] : memref<4x32x8xf32, #tpu.memory_space<vmem>>, vector<1x32x8xf32>
    %495 = vector.shape_cast %494 : vector<1x32x8xf32> to vector<32x8xf32>
    %cst_513 = arith.constant dense<0.000000e+00> : vector<32x16xf32>
    %496 = tpu.matmul %495, %492, %cst_513 {dimension_numbers = #tpu.dot_dimension_numbers<[1], [0], [0], [1], [0, 0, 1, 1], [], []>} : vector<32x8xf32>, vector<8x16xf32>, vector<32x16xf32> -> vector<32x16xf32>
    %c1_514 = arith.constant 1 : index
    %c0_515 = arith.constant 0 : index
    %c0_516 = arith.constant 0 : index
    %497 = vector.load %arg25[%c1_514, %c0_515, %c0_516] : memref<4x32x16xf32, #tpu.memory_space<vmem>>, vector<1x32x16xf32>
    %498 = vector.shape_cast %497 : vector<1x32x16xf32> to vector<32x16xf32>
    %cst_517 = arith.constant dense<0.000000e+00> : vector<32x16xf32>
    %499 = tpu.matmul %498, %493, %cst_517 {dimension_numbers = #tpu.dot_dimension_numbers<[1], [0], [0], [1], [0, 0, 1, 1], [], []>} : vector<32x16xf32>, vector<16x16xf32>, vector<32x16xf32> -> vector<32x16xf32>
    %500 = arith.addf %496, %499 : vector<32x16xf32>
    %501 = arith.addf %489, %500 : vector<32x16xf32>
    %c2_518 = arith.constant 2 : index
    %c0_519 = arith.constant 0 : index
    %c0_520 = arith.constant 0 : index
    %502 = vector.load %arg23[%c2_518, %c0_519, %c0_520] : memref<4x64x16xf32, #tpu.memory_space<vmem>>, vector<1x64x16xf32>
    %503 = vector.shape_cast %502 : vector<1x64x16xf32> to vector<64x16xf32>
    %cst_521 = arith.constant dense<0.000000e+00> : vector<8x16xf32>
    %504 = tpu.matmul %478, %503, %cst_521 {dimension_numbers = #tpu.dot_dimension_numbers<[1], [0], [0], [1], [0, 0, 1, 1], [], []>} : vector<8x64xf32>, vector<64x16xf32>, vector<8x16xf32> -> vector<8x16xf32>
    %cst_522 = arith.constant dense<0.000000e+00> : vector<16x16xf32>
    %505 = tpu.matmul %424, %503, %cst_522 {dimension_numbers = #tpu.dot_dimension_numbers<[1], [0], [0], [1], [0, 0, 1, 1], [], []>} : vector<16x64xf32>, vector<64x16xf32>, vector<16x16xf32> -> vector<16x16xf32>
    %c2_523 = arith.constant 2 : index
    %c0_524 = arith.constant 0 : index
    %c0_525 = arith.constant 0 : index
    %506 = vector.load %arg24[%c2_523, %c0_524, %c0_525] : memref<4x32x8xf32, #tpu.memory_space<vmem>>, vector<1x32x8xf32>
    %507 = vector.shape_cast %506 : vector<1x32x8xf32> to vector<32x8xf32>
    %cst_526 = arith.constant dense<0.000000e+00> : vector<32x16xf32>
    %508 = tpu.matmul %507, %504, %cst_526 {dimension_numbers = #tpu.dot_dimension_numbers<[1], [0], [0], [1], [0, 0, 1, 1], [], []>} : vector<32x8xf32>, vector<8x16xf32>, vector<32x16xf32> -> vector<32x16xf32>
    %c2_527 = arith.constant 2 : index
    %c0_528 = arith.constant 0 : index
    %c0_529 = arith.constant 0 : index
    %509 = vector.load %arg25[%c2_527, %c0_528, %c0_529] : memref<4x32x16xf32, #tpu.memory_space<vmem>>, vector<1x32x16xf32>
    %510 = vector.shape_cast %509 : vector<1x32x16xf32> to vector<32x16xf32>
    %cst_530 = arith.constant dense<0.000000e+00> : vector<32x16xf32>
    %511 = tpu.matmul %510, %505, %cst_530 {dimension_numbers = #tpu.dot_dimension_numbers<[1], [0], [0], [1], [0, 0, 1, 1], [], []>} : vector<32x16xf32>, vector<16x16xf32>, vector<32x16xf32> -> vector<32x16xf32>
    %512 = arith.addf %508, %511 : vector<32x16xf32>
    %513 = arith.addf %501, %512 : vector<32x16xf32>
    %c3_531 = arith.constant 3 : index
    %c0_532 = arith.constant 0 : index
    %c0_533 = arith.constant 0 : index
    %514 = vector.load %arg23[%c3_531, %c0_532, %c0_533] : memref<4x64x16xf32, #tpu.memory_space<vmem>>, vector<1x64x16xf32>
    %515 = vector.shape_cast %514 : vector<1x64x16xf32> to vector<64x16xf32>
    %cst_534 = arith.constant dense<0.000000e+00> : vector<8x16xf32>
    %516 = tpu.matmul %478, %515, %cst_534 {dimension_numbers = #tpu.dot_dimension_numbers<[1], [0], [0], [1], [0, 0, 1, 1], [], []>} : vector<8x64xf32>, vector<64x16xf32>, vector<8x16xf32> -> vector<8x16xf32>
    %cst_535 = arith.constant dense<0.000000e+00> : vector<16x16xf32>
    %517 = tpu.matmul %424, %515, %cst_535 {dimension_numbers = #tpu.dot_dimension_numbers<[1], [0], [0], [1], [0, 0, 1, 1], [], []>} : vector<16x64xf32>, vector<64x16xf32>, vector<16x16xf32> -> vector<16x16xf32>
    %c3_536 = arith.constant 3 : index
    %c0_537 = arith.constant 0 : index
    %c0_538 = arith.constant 0 : index
    %518 = vector.load %arg24[%c3_536, %c0_537, %c0_538] : memref<4x32x8xf32, #tpu.memory_space<vmem>>, vector<1x32x8xf32>
    %519 = vector.shape_cast %518 : vector<1x32x8xf32> to vector<32x8xf32>
    %cst_539 = arith.constant dense<0.000000e+00> : vector<32x16xf32>
    %520 = tpu.matmul %519, %516, %cst_539 {dimension_numbers = #tpu.dot_dimension_numbers<[1], [0], [0], [1], [0, 0, 1, 1], [], []>} : vector<32x8xf32>, vector<8x16xf32>, vector<32x16xf32> -> vector<32x16xf32>
    %c3_540 = arith.constant 3 : index
    %c0_541 = arith.constant 0 : index
    %c0_542 = arith.constant 0 : index
    %521 = vector.load %arg25[%c3_540, %c0_541, %c0_542] : memref<4x32x16xf32, #tpu.memory_space<vmem>>, vector<1x32x16xf32>
    %522 = vector.shape_cast %521 : vector<1x32x16xf32> to vector<32x16xf32>
    %cst_543 = arith.constant dense<0.000000e+00> : vector<32x16xf32>
    %523 = tpu.matmul %522, %517, %cst_543 {dimension_numbers = #tpu.dot_dimension_numbers<[1], [0], [0], [1], [0, 0, 1, 1], [], []>} : vector<32x16xf32>, vector<16x16xf32>, vector<32x16xf32> -> vector<32x16xf32>
    %524 = arith.addf %520, %523 : vector<32x16xf32>
    %525 = arith.addf %513, %524 : vector<32x16xf32>
    %cst_544 = arith.constant 0.000000e+00 : f32
    %526 = vector.broadcast %cst_544 : f32 to vector<32x128xf32>
    %c0_545 = arith.constant 0 : index
    %c0_546 = arith.constant 0 : index
    %527 = vector.load %arg35[%c0_545, %c0_546] : memref<32x512xf32, #tpu.memory_space<vmem>>, vector<32x128xf32>
    tpu.vector_store %arg35[%c0_545, %c0_546], %526 {strides = array<i32>} : memref<32x512xf32, #tpu.memory_space<vmem>>, vector<32x128xf32>,
    %cst_547 = arith.constant 0.000000e+00 : f32
    %528 = vector.broadcast %cst_547 : f32 to vector<32x128xf32>
    %c0_548 = arith.constant 0 : index
    %c144_549 = arith.constant 144 : index
    %529 = vector.load %arg35[%c0_548, %c144_549] : memref<32x512xf32, #tpu.memory_space<vmem>>, vector<32x128xf32>
    tpu.vector_store %arg35[%c0_548, %c144_549], %528 {strides = array<i32>} : memref<32x512xf32, #tpu.memory_space<vmem>>, vector<32x128xf32>,
    %c0_550 = arith.constant 0 : index
    %c128_551 = arith.constant 128 : index
    %530 = vector.load %arg35[%c0_550, %c128_551] : memref<32x512xf32, #tpu.memory_space<vmem>>, vector<32x16xf32>
    tpu.vector_store %arg35[%c0_550, %c128_551], %525 {strides = array<i32>} : memref<32x512xf32, #tpu.memory_space<vmem>>, vector<32x16xf32>,
    %c0_552 = arith.constant 0 : index
    %c123 = arith.constant 123 : index
    %531 = vector.load %arg35[%c0_552, %c123] : memref<32x512xf32, #tpu.memory_space<vmem>>, vector<32x16xf32>
    %c0_553 = arith.constant 0 : index
    %c0_554 = arith.constant 0 : index
    %c0_555 = arith.constant 0 : index
    %532 = vector.load %arg26[%c0_553, %c0_554, %c0_555] : memref<9x32x32xf32, #tpu.memory_space<vmem>>, vector<1x32x32xf32>
    %533 = vector.shape_cast %532 : vector<1x32x32xf32> to vector<32x32xf32>
    %cst_556 = arith.constant dense<0.000000e+00> : vector<32x16xf32>
    %534 = tpu.matmul %533, %531, %cst_556 {dimension_numbers = #tpu.dot_dimension_numbers<[1], [0], [0], [1], [0, 0, 1, 1], [], []>} : vector<32x32xf32>, vector<32x16xf32>, vector<32x16xf32> -> vector<32x16xf32>
    %c0_557 = arith.constant 0 : index
    %c127_558 = arith.constant 127 : index
    %535 = vector.load %arg35[%c0_557, %c127_558] : memref<32x512xf32, #tpu.memory_space<vmem>>, vector<32x16xf32>
    %c3_559 = arith.constant 3 : index
    %c0_560 = arith.constant 0 : index
    %c0_561 = arith.constant 0 : index
    %536 = vector.load %arg26[%c3_559, %c0_560, %c0_561] : memref<9x32x32xf32, #tpu.memory_space<vmem>>, vector<1x32x32xf32>
    %537 = vector.shape_cast %536 : vector<1x32x32xf32> to vector<32x32xf32>
    %cst_562 = arith.constant dense<0.000000e+00> : vector<32x16xf32>
    %538 = tpu.matmul %537, %535, %cst_562 {dimension_numbers = #tpu.dot_dimension_numbers<[1], [0], [0], [1], [0, 0, 1, 1], [], []>} : vector<32x32xf32>, vector<32x16xf32>, vector<32x16xf32> -> vector<32x16xf32>
    %539 = arith.addf %534, %538 : vector<32x16xf32>
    %c0_563 = arith.constant 0 : index
    %c131 = arith.constant 131 : index
    %540 = vector.load %arg35[%c0_563, %c131] : memref<32x512xf32, #tpu.memory_space<vmem>>, vector<32x16xf32>
    %c6_564 = arith.constant 6 : index
    %c0_565 = arith.constant 0 : index
    %c0_566 = arith.constant 0 : index
    %541 = vector.load %arg26[%c6_564, %c0_565, %c0_566] : memref<9x32x32xf32, #tpu.memory_space<vmem>>, vector<1x32x32xf32>
    %542 = vector.shape_cast %541 : vector<1x32x32xf32> to vector<32x32xf32>
    %cst_567 = arith.constant dense<0.000000e+00> : vector<32x16xf32>
    %543 = tpu.matmul %542, %540, %cst_567 {dimension_numbers = #tpu.dot_dimension_numbers<[1], [0], [0], [1], [0, 0, 1, 1], [], []>} : vector<32x32xf32>, vector<32x16xf32>, vector<32x16xf32> -> vector<32x16xf32>
    %544 = arith.addf %539, %543 : vector<32x16xf32>
    %c0_568 = arith.constant 0 : index
    %c0_569 = arith.constant 0 : index
    %545 = vector.load %arg28[%c0_568, %c0_569] : memref<2x16xf32, #tpu.memory_space<vmem>>, vector<1x16xf32>
    %546 = vector.broadcast %545 : vector<1x16xf32> to vector<32x16xf32>
    %547 = arith.mulf %544, %546 : vector<32x16xf32>
    %c0_570 = arith.constant 0 : index
    %c124 = arith.constant 124 : index
    %548 = vector.load %arg35[%c0_570, %c124] : memref<32x512xf32, #tpu.memory_space<vmem>>, vector<32x16xf32>
    %c1_571 = arith.constant 1 : index
    %c0_572 = arith.constant 0 : index
    %c0_573 = arith.constant 0 : index
    %549 = vector.load %arg26[%c1_571, %c0_572, %c0_573] : memref<9x32x32xf32, #tpu.memory_space<vmem>>, vector<1x32x32xf32>
    %550 = vector.shape_cast %549 : vector<1x32x32xf32> to vector<32x32xf32>
    %cst_574 = arith.constant dense<0.000000e+00> : vector<32x16xf32>
    %551 = tpu.matmul %550, %548, %cst_574 {dimension_numbers = #tpu.dot_dimension_numbers<[1], [0], [0], [1], [0, 0, 1, 1], [], []>} : vector<32x32xf32>, vector<32x16xf32>, vector<32x16xf32> -> vector<32x16xf32>
    %c0_575 = arith.constant 0 : index
    %c128_576 = arith.constant 128 : index
    %552 = vector.load %arg35[%c0_575, %c128_576] : memref<32x512xf32, #tpu.memory_space<vmem>>, vector<32x16xf32>
    %c4_577 = arith.constant 4 : index
    %c0_578 = arith.constant 0 : index
    %c0_579 = arith.constant 0 : index
    %553 = vector.load %arg26[%c4_577, %c0_578, %c0_579] : memref<9x32x32xf32, #tpu.memory_space<vmem>>, vector<1x32x32xf32>
    %554 = vector.shape_cast %553 : vector<1x32x32xf32> to vector<32x32xf32>
    %cst_580 = arith.constant dense<0.000000e+00> : vector<32x16xf32>
    %555 = tpu.matmul %554, %552, %cst_580 {dimension_numbers = #tpu.dot_dimension_numbers<[1], [0], [0], [1], [0, 0, 1, 1], [], []>} : vector<32x32xf32>, vector<32x16xf32>, vector<32x16xf32> -> vector<32x16xf32>
    %556 = arith.addf %551, %555 : vector<32x16xf32>
    %c0_581 = arith.constant 0 : index
    %c132 = arith.constant 132 : index
    %557 = vector.load %arg35[%c0_581, %c132] : memref<32x512xf32, #tpu.memory_space<vmem>>, vector<32x16xf32>
    %c7_582 = arith.constant 7 : index
    %c0_583 = arith.constant 0 : index
    %c0_584 = arith.constant 0 : index
    %558 = vector.load %arg26[%c7_582, %c0_583, %c0_584] : memref<9x32x32xf32, #tpu.memory_space<vmem>>, vector<1x32x32xf32>
    %559 = vector.shape_cast %558 : vector<1x32x32xf32> to vector<32x32xf32>
    %cst_585 = arith.constant dense<0.000000e+00> : vector<32x16xf32>
    %560 = tpu.matmul %559, %557, %cst_585 {dimension_numbers = #tpu.dot_dimension_numbers<[1], [0], [0], [1], [0, 0, 1, 1], [], []>} : vector<32x32xf32>, vector<32x16xf32>, vector<32x16xf32> -> vector<32x16xf32>
    %561 = arith.addf %556, %560 : vector<32x16xf32>
    %562 = arith.addf %547, %561 : vector<32x16xf32>
    %c0_586 = arith.constant 0 : index
    %c125 = arith.constant 125 : index
    %563 = vector.load %arg35[%c0_586, %c125] : memref<32x512xf32, #tpu.memory_space<vmem>>, vector<32x16xf32>
    %c2_587 = arith.constant 2 : index
    %c0_588 = arith.constant 0 : index
    %c0_589 = arith.constant 0 : index
    %564 = vector.load %arg26[%c2_587, %c0_588, %c0_589] : memref<9x32x32xf32, #tpu.memory_space<vmem>>, vector<1x32x32xf32>
    %565 = vector.shape_cast %564 : vector<1x32x32xf32> to vector<32x32xf32>
    %cst_590 = arith.constant dense<0.000000e+00> : vector<32x16xf32>
    %566 = tpu.matmul %565, %563, %cst_590 {dimension_numbers = #tpu.dot_dimension_numbers<[1], [0], [0], [1], [0, 0, 1, 1], [], []>} : vector<32x32xf32>, vector<32x16xf32>, vector<32x16xf32> -> vector<32x16xf32>
    %c0_591 = arith.constant 0 : index
    %c129_592 = arith.constant 129 : index
    %567 = vector.load %arg35[%c0_591, %c129_592] : memref<32x512xf32, #tpu.memory_space<vmem>>, vector<32x16xf32>
    %c5_593 = arith.constant 5 : index
    %c0_594 = arith.constant 0 : index
    %c0_595 = arith.constant 0 : index
    %568 = vector.load %arg26[%c5_593, %c0_594, %c0_595] : memref<9x32x32xf32, #tpu.memory_space<vmem>>, vector<1x32x32xf32>
    %569 = vector.shape_cast %568 : vector<1x32x32xf32> to vector<32x32xf32>
    %cst_596 = arith.constant dense<0.000000e+00> : vector<32x16xf32>
    %570 = tpu.matmul %569, %567, %cst_596 {dimension_numbers = #tpu.dot_dimension_numbers<[1], [0], [0], [1], [0, 0, 1, 1], [], []>} : vector<32x32xf32>, vector<32x16xf32>, vector<32x16xf32> -> vector<32x16xf32>
    %571 = arith.addf %566, %570 : vector<32x16xf32>
    %c0_597 = arith.constant 0 : index
    %c133 = arith.constant 133 : index
    %572 = vector.load %arg35[%c0_597, %c133] : memref<32x512xf32, #tpu.memory_space<vmem>>, vector<32x16xf32>
    %c8_598 = arith.constant 8 : index
    %c0_599 = arith.constant 0 : index
    %c0_600 = arith.constant 0 : index
    %573 = vector.load %arg26[%c8_598, %c0_599, %c0_600] : memref<9x32x32xf32, #tpu.memory_space<vmem>>, vector<1x32x32xf32>
    %574 = vector.shape_cast %573 : vector<1x32x32xf32> to vector<32x32xf32>
    %cst_601 = arith.constant dense<0.000000e+00> : vector<32x16xf32>
    %575 = tpu.matmul %574, %572, %cst_601 {dimension_numbers = #tpu.dot_dimension_numbers<[1], [0], [0], [1], [0, 0, 1, 1], [], []>} : vector<32x32xf32>, vector<32x16xf32>, vector<32x16xf32> -> vector<32x16xf32>
    %576 = arith.addf %571, %575 : vector<32x16xf32>
    %c1_602 = arith.constant 1 : index
    %c0_603 = arith.constant 0 : index
    %577 = vector.load %arg28[%c1_602, %c0_603] : memref<2x16xf32, #tpu.memory_space<vmem>>, vector<1x16xf32>
    %578 = vector.broadcast %577 : vector<1x16xf32> to vector<32x16xf32>
    %579 = arith.mulf %576, %578 : vector<32x16xf32>
    %580 = arith.addf %562, %579 : vector<32x16xf32>
    %c0_604 = arith.constant 0 : index
    %c0_605 = arith.constant 0 : index
    %581 = vector.load %arg27[%c0_604, %c0_605] : memref<32x1xf32, #tpu.memory_space<vmem>>, vector<32x1xf32>
    %582 = vector.broadcast %581 : vector<32x1xf32> to vector<32x16xf32>
    %583 = arith.addf %580, %582 : vector<32x16xf32>
    %584 = arith.negf %583 : vector<32x16xf32>
    %585 = math.exp %584 : vector<32x16xf32>
    %cst_606 = arith.constant 1.000000e+00 : f32
    %586 = vector.broadcast %cst_606 : f32 to vector<32x16xf32>
    %587 = arith.addf %586, %585 : vector<32x16xf32>
    %588 = arith.divf %586, %587 : vector<32x16xf32>
    %589 = arith.mulf %583, %588 : vector<32x16xf32>
    %c0_607 = arith.constant 0 : index
    %c128_608 = arith.constant 128 : index
    %590 = vector.load %arg35[%c0_607, %c128_608] : memref<32x512xf32, #tpu.memory_space<vmem>>, vector<32x16xf32>
    tpu.vector_store %arg35[%c0_607, %c128_608], %589 {strides = array<i32>} : memref<32x512xf32, #tpu.memory_space<vmem>>, vector<32x16xf32>,
    %c0_609 = arith.constant 0 : index
    %c123_610 = arith.constant 123 : index
    %591 = vector.load %arg35[%c0_609, %c123_610] : memref<32x512xf32, #tpu.memory_space<vmem>>, vector<32x16xf32>
    %c0_611 = arith.constant 0 : index
    %c0_612 = arith.constant 0 : index
    %c0_613 = arith.constant 0 : index
    %592 = vector.load %arg29[%c0_611, %c0_612, %c0_613] : memref<9x32x32xf32, #tpu.memory_space<vmem>>, vector<1x32x32xf32>
    %593 = vector.shape_cast %592 : vector<1x32x32xf32> to vector<32x32xf32>
    %cst_614 = arith.constant dense<0.000000e+00> : vector<32x16xf32>
    %594 = tpu.matmul %593, %591, %cst_614 {dimension_numbers = #tpu.dot_dimension_numbers<[1], [0], [0], [1], [0, 0, 1, 1], [], []>} : vector<32x32xf32>, vector<32x16xf32>, vector<32x16xf32> -> vector<32x16xf32>
    %c0_615 = arith.constant 0 : index
    %c127_616 = arith.constant 127 : index
    %595 = vector.load %arg35[%c0_615, %c127_616] : memref<32x512xf32, #tpu.memory_space<vmem>>, vector<32x16xf32>
    %c3_617 = arith.constant 3 : index
    %c0_618 = arith.constant 0 : index
    %c0_619 = arith.constant 0 : index
    %596 = vector.load %arg29[%c3_617, %c0_618, %c0_619] : memref<9x32x32xf32, #tpu.memory_space<vmem>>, vector<1x32x32xf32>
    %597 = vector.shape_cast %596 : vector<1x32x32xf32> to vector<32x32xf32>
    %cst_620 = arith.constant dense<0.000000e+00> : vector<32x16xf32>
    %598 = tpu.matmul %597, %595, %cst_620 {dimension_numbers = #tpu.dot_dimension_numbers<[1], [0], [0], [1], [0, 0, 1, 1], [], []>} : vector<32x32xf32>, vector<32x16xf32>, vector<32x16xf32> -> vector<32x16xf32>
    %599 = arith.addf %594, %598 : vector<32x16xf32>
    %c0_621 = arith.constant 0 : index
    %c131_622 = arith.constant 131 : index
    %600 = vector.load %arg35[%c0_621, %c131_622] : memref<32x512xf32, #tpu.memory_space<vmem>>, vector<32x16xf32>
    %c6_623 = arith.constant 6 : index
    %c0_624 = arith.constant 0 : index
    %c0_625 = arith.constant 0 : index
    %601 = vector.load %arg29[%c6_623, %c0_624, %c0_625] : memref<9x32x32xf32, #tpu.memory_space<vmem>>, vector<1x32x32xf32>
    %602 = vector.shape_cast %601 : vector<1x32x32xf32> to vector<32x32xf32>
    %cst_626 = arith.constant dense<0.000000e+00> : vector<32x16xf32>
    %603 = tpu.matmul %602, %600, %cst_626 {dimension_numbers = #tpu.dot_dimension_numbers<[1], [0], [0], [1], [0, 0, 1, 1], [], []>} : vector<32x32xf32>, vector<32x16xf32>, vector<32x16xf32> -> vector<32x16xf32>
    %604 = arith.addf %599, %603 : vector<32x16xf32>
    %c0_627 = arith.constant 0 : index
    %c0_628 = arith.constant 0 : index
    %605 = vector.load %arg28[%c0_627, %c0_628] : memref<2x16xf32, #tpu.memory_space<vmem>>, vector<1x16xf32>
    %606 = vector.broadcast %605 : vector<1x16xf32> to vector<32x16xf32>
    %607 = arith.mulf %604, %606 : vector<32x16xf32>
    %c0_629 = arith.constant 0 : index
    %c124_630 = arith.constant 124 : index
    %608 = vector.load %arg35[%c0_629, %c124_630] : memref<32x512xf32, #tpu.memory_space<vmem>>, vector<32x16xf32>
    %c1_631 = arith.constant 1 : index
    %c0_632 = arith.constant 0 : index
    %c0_633 = arith.constant 0 : index
    %609 = vector.load %arg29[%c1_631, %c0_632, %c0_633] : memref<9x32x32xf32, #tpu.memory_space<vmem>>, vector<1x32x32xf32>
    %610 = vector.shape_cast %609 : vector<1x32x32xf32> to vector<32x32xf32>
    %cst_634 = arith.constant dense<0.000000e+00> : vector<32x16xf32>
    %611 = tpu.matmul %610, %608, %cst_634 {dimension_numbers = #tpu.dot_dimension_numbers<[1], [0], [0], [1], [0, 0, 1, 1], [], []>} : vector<32x32xf32>, vector<32x16xf32>, vector<32x16xf32> -> vector<32x16xf32>
    %c0_635 = arith.constant 0 : index
    %c128_636 = arith.constant 128 : index
    %612 = vector.load %arg35[%c0_635, %c128_636] : memref<32x512xf32, #tpu.memory_space<vmem>>, vector<32x16xf32>
    %c4_637 = arith.constant 4 : index
    %c0_638 = arith.constant 0 : index
    %c0_639 = arith.constant 0 : index
    %613 = vector.load %arg29[%c4_637, %c0_638, %c0_639] : memref<9x32x32xf32, #tpu.memory_space<vmem>>, vector<1x32x32xf32>
    %614 = vector.shape_cast %613 : vector<1x32x32xf32> to vector<32x32xf32>
    %cst_640 = arith.constant dense<0.000000e+00> : vector<32x16xf32>
    %615 = tpu.matmul %614, %612, %cst_640 {dimension_numbers = #tpu.dot_dimension_numbers<[1], [0], [0], [1], [0, 0, 1, 1], [], []>} : vector<32x32xf32>, vector<32x16xf32>, vector<32x16xf32> -> vector<32x16xf32>
    %616 = arith.addf %611, %615 : vector<32x16xf32>
    %c0_641 = arith.constant 0 : index
    %c132_642 = arith.constant 132 : index
    %617 = vector.load %arg35[%c0_641, %c132_642] : memref<32x512xf32, #tpu.memory_space<vmem>>, vector<32x16xf32>
    %c7_643 = arith.constant 7 : index
    %c0_644 = arith.constant 0 : index
    %c0_645 = arith.constant 0 : index
    %618 = vector.load %arg29[%c7_643, %c0_644, %c0_645] : memref<9x32x32xf32, #tpu.memory_space<vmem>>, vector<1x32x32xf32>
    %619 = vector.shape_cast %618 : vector<1x32x32xf32> to vector<32x32xf32>
    %cst_646 = arith.constant dense<0.000000e+00> : vector<32x16xf32>
    %620 = tpu.matmul %619, %617, %cst_646 {dimension_numbers = #tpu.dot_dimension_numbers<[1], [0], [0], [1], [0, 0, 1, 1], [], []>} : vector<32x32xf32>, vector<32x16xf32>, vector<32x16xf32> -> vector<32x16xf32>
    %621 = arith.addf %616, %620 : vector<32x16xf32>
    %622 = arith.addf %607, %621 : vector<32x16xf32>
    %c0_647 = arith.constant 0 : index
    %c125_648 = arith.constant 125 : index
    %623 = vector.load %arg35[%c0_647, %c125_648] : memref<32x512xf32, #tpu.memory_space<vmem>>, vector<32x16xf32>
    %c2_649 = arith.constant 2 : index
    %c0_650 = arith.constant 0 : index
    %c0_651 = arith.constant 0 : index
    %624 = vector.load %arg29[%c2_649, %c0_650, %c0_651] : memref<9x32x32xf32, #tpu.memory_space<vmem>>, vector<1x32x32xf32>
    %625 = vector.shape_cast %624 : vector<1x32x32xf32> to vector<32x32xf32>
    %cst_652 = arith.constant dense<0.000000e+00> : vector<32x16xf32>
    %626 = tpu.matmul %625, %623, %cst_652 {dimension_numbers = #tpu.dot_dimension_numbers<[1], [0], [0], [1], [0, 0, 1, 1], [], []>} : vector<32x32xf32>, vector<32x16xf32>, vector<32x16xf32> -> vector<32x16xf32>
    %c0_653 = arith.constant 0 : index
    %c129_654 = arith.constant 129 : index
    %627 = vector.load %arg35[%c0_653, %c129_654] : memref<32x512xf32, #tpu.memory_space<vmem>>, vector<32x16xf32>
    %c5_655 = arith.constant 5 : index
    %c0_656 = arith.constant 0 : index
    %c0_657 = arith.constant 0 : index
    %628 = vector.load %arg29[%c5_655, %c0_656, %c0_657] : memref<9x32x32xf32, #tpu.memory_space<vmem>>, vector<1x32x32xf32>
    %629 = vector.shape_cast %628 : vector<1x32x32xf32> to vector<32x32xf32>
    %cst_658 = arith.constant dense<0.000000e+00> : vector<32x16xf32>
    %630 = tpu.matmul %629, %627, %cst_658 {dimension_numbers = #tpu.dot_dimension_numbers<[1], [0], [0], [1], [0, 0, 1, 1], [], []>} : vector<32x32xf32>, vector<32x16xf32>, vector<32x16xf32> -> vector<32x16xf32>
    %631 = arith.addf %626, %630 : vector<32x16xf32>
    %c0_659 = arith.constant 0 : index
    %c133_660 = arith.constant 133 : index
    %632 = vector.load %arg35[%c0_659, %c133_660] : memref<32x512xf32, #tpu.memory_space<vmem>>, vector<32x16xf32>
    %c8_661 = arith.constant 8 : index
    %c0_662 = arith.constant 0 : index
    %c0_663 = arith.constant 0 : index
    %633 = vector.load %arg29[%c8_661, %c0_662, %c0_663] : memref<9x32x32xf32, #tpu.memory_space<vmem>>, vector<1x32x32xf32>
    %634 = vector.shape_cast %633 : vector<1x32x32xf32> to vector<32x32xf32>
    %cst_664 = arith.constant dense<0.000000e+00> : vector<32x16xf32>
    %635 = tpu.matmul %634, %632, %cst_664 {dimension_numbers = #tpu.dot_dimension_numbers<[1], [0], [0], [1], [0, 0, 1, 1], [], []>} : vector<32x32xf32>, vector<32x16xf32>, vector<32x16xf32> -> vector<32x16xf32>
    %636 = arith.addf %631, %635 : vector<32x16xf32>
    %c1_665 = arith.constant 1 : index
    %c0_666 = arith.constant 0 : index
    %637 = vector.load %arg28[%c1_665, %c0_666] : memref<2x16xf32, #tpu.memory_space<vmem>>, vector<1x16xf32>
    %638 = vector.broadcast %637 : vector<1x16xf32> to vector<32x16xf32>
    %639 = arith.mulf %636, %638 : vector<32x16xf32>
    %640 = arith.addf %622, %639 : vector<32x16xf32>
    %641 = arith.mulf %640, %640 : vector<32x16xf32>
    %cst_667 = arith.constant dense<0.000000e+00> : vector<16xf32>
    %642 = vector.multi_reduction <add>, %641, %cst_667 [0] : vector<32x16xf32> to vector<16xf32>
    %643 = vector.shape_cast %642 : vector<16xf32> to vector<1x16xf32>
    %cst_668 = arith.constant 3.200000e+01 : f32
    %644 = vector.broadcast %cst_668 : f32 to vector<1x16xf32>
    %645 = arith.divf %643, %644 : vector<1x16xf32>
    %cst_669 = arith.constant 9.99999974E-6 : f32
    %646 = vector.broadcast %cst_669 : f32 to vector<1x16xf32>
    %647 = arith.addf %645, %646 : vector<1x16xf32>
    %648 = math.rsqrt %647 : vector<1x16xf32>
    %649 = vector.broadcast %648 : vector<1x16xf32> to vector<32x16xf32>
    %650 = arith.mulf %640, %649 : vector<32x16xf32>
    %c0_670 = arith.constant 0 : index
    %c0_671 = arith.constant 0 : index
    %651 = vector.load %arg30[%c0_670, %c0_671] : memref<32x1xf32, #tpu.memory_space<vmem>>, vector<32x1xf32>
    %652 = vector.broadcast %651 : vector<32x1xf32> to vector<32x16xf32>
    %653 = arith.mulf %650, %652 : vector<32x16xf32>
    %c0_672 = arith.constant 0 : index
    %c0_673 = arith.constant 0 : index
    %654 = vector.load %arg31[%c0_672, %c0_673] : memref<32x1xf32, #tpu.memory_space<vmem>>, vector<32x1xf32>
    %655 = vector.broadcast %654 : vector<32x1xf32> to vector<32x16xf32>
    %656 = arith.addf %653, %655 : vector<32x16xf32>
    %657 = arith.addf %656, %525 : vector<32x16xf32>
    %c0_674 = arith.constant 0 : index
    %c128_675 = arith.constant 128 : index
    %658 = vector.load %arg35[%c0_674, %c128_675] : memref<32x512xf32, #tpu.memory_space<vmem>>, vector<32x16xf32>
    tpu.vector_store %arg35[%c0_674, %c128_675], %657 {strides = array<i32>} : memref<32x512xf32, #tpu.memory_space<vmem>>, vector<32x16xf32>,
    %c0_676 = arith.constant 0 : index
    %c123_677 = arith.constant 123 : index
    %659 = vector.load %arg35[%c0_676, %c123_677] : memref<32x512xf32, #tpu.memory_space<vmem>>, vector<32x16xf32>
    %c0_678 = arith.constant 0 : index
    %c0_679 = arith.constant 0 : index
    %c0_680 = arith.constant 0 : index
    %660 = vector.load %arg32[%c0_678, %c0_679, %c0_680] : memref<9x8x32xf32, #tpu.memory_space<vmem>>, vector<1x8x32xf32>
    %661 = vector.shape_cast %660 : vector<1x8x32xf32> to vector<8x32xf32>
    %cst_681 = arith.constant dense<0.000000e+00> : vector<8x16xf32>
    %662 = tpu.matmul %661, %659, %cst_681 {dimension_numbers = #tpu.dot_dimension_numbers<[1], [0], [0], [1], [0, 0, 1, 1], [], []>} : vector<8x32xf32>, vector<32x16xf32>, vector<8x16xf32> -> vector<8x16xf32>
    %c0_682 = arith.constant 0 : index
    %c127_683 = arith.constant 127 : index
    %663 = vector.load %arg35[%c0_682, %c127_683] : memref<32x512xf32, #tpu.memory_space<vmem>>, vector<32x16xf32>
    %c3_684 = arith.constant 3 : index
    %c0_685 = arith.constant 0 : index
    %c0_686 = arith.constant 0 : index
    %664 = vector.load %arg32[%c3_684, %c0_685, %c0_686] : memref<9x8x32xf32, #tpu.memory_space<vmem>>, vector<1x8x32xf32>
    %665 = vector.shape_cast %664 : vector<1x8x32xf32> to vector<8x32xf32>
    %cst_687 = arith.constant dense<0.000000e+00> : vector<8x16xf32>
    %666 = tpu.matmul %665, %663, %cst_687 {dimension_numbers = #tpu.dot_dimension_numbers<[1], [0], [0], [1], [0, 0, 1, 1], [], []>} : vector<8x32xf32>, vector<32x16xf32>, vector<8x16xf32> -> vector<8x16xf32>
    %667 = arith.addf %662, %666 : vector<8x16xf32>
    %c0_688 = arith.constant 0 : index
    %c131_689 = arith.constant 131 : index
    %668 = vector.load %arg35[%c0_688, %c131_689] : memref<32x512xf32, #tpu.memory_space<vmem>>, vector<32x16xf32>
    %c6_690 = arith.constant 6 : index
    %c0_691 = arith.constant 0 : index
    %c0_692 = arith.constant 0 : index
    %669 = vector.load %arg32[%c6_690, %c0_691, %c0_692] : memref<9x8x32xf32, #tpu.memory_space<vmem>>, vector<1x8x32xf32>
    %670 = vector.shape_cast %669 : vector<1x8x32xf32> to vector<8x32xf32>
    %cst_693 = arith.constant dense<0.000000e+00> : vector<8x16xf32>
    %671 = tpu.matmul %670, %668, %cst_693 {dimension_numbers = #tpu.dot_dimension_numbers<[1], [0], [0], [1], [0, 0, 1, 1], [], []>} : vector<8x32xf32>, vector<32x16xf32>, vector<8x16xf32> -> vector<8x16xf32>
    %672 = arith.addf %667, %671 : vector<8x16xf32>
    %c0_694 = arith.constant 0 : index
    %c0_695 = arith.constant 0 : index
    %673 = vector.load %arg28[%c0_694, %c0_695] : memref<2x16xf32, #tpu.memory_space<vmem>>, vector<1x16xf32>
    %674 = vector.broadcast %673 : vector<1x16xf32> to vector<8x16xf32>
    %675 = arith.mulf %672, %674 : vector<8x16xf32>
    %c0_696 = arith.constant 0 : index
    %c124_697 = arith.constant 124 : index
    %676 = vector.load %arg35[%c0_696, %c124_697] : memref<32x512xf32, #tpu.memory_space<vmem>>, vector<32x16xf32>
    %c1_698 = arith.constant 1 : index
    %c0_699 = arith.constant 0 : index
    %c0_700 = arith.constant 0 : index
    %677 = vector.load %arg32[%c1_698, %c0_699, %c0_700] : memref<9x8x32xf32, #tpu.memory_space<vmem>>, vector<1x8x32xf32>
    %678 = vector.shape_cast %677 : vector<1x8x32xf32> to vector<8x32xf32>
    %cst_701 = arith.constant dense<0.000000e+00> : vector<8x16xf32>
    %679 = tpu.matmul %678, %676, %cst_701 {dimension_numbers = #tpu.dot_dimension_numbers<[1], [0], [0], [1], [0, 0, 1, 1], [], []>} : vector<8x32xf32>, vector<32x16xf32>, vector<8x16xf32> -> vector<8x16xf32>
    %c0_702 = arith.constant 0 : index
    %c128_703 = arith.constant 128 : index
    %680 = vector.load %arg35[%c0_702, %c128_703] : memref<32x512xf32, #tpu.memory_space<vmem>>, vector<32x16xf32>
    %c4_704 = arith.constant 4 : index
    %c0_705 = arith.constant 0 : index
    %c0_706 = arith.constant 0 : index
    %681 = vector.load %arg32[%c4_704, %c0_705, %c0_706] : memref<9x8x32xf32, #tpu.memory_space<vmem>>, vector<1x8x32xf32>
    %682 = vector.shape_cast %681 : vector<1x8x32xf32> to vector<8x32xf32>
    %cst_707 = arith.constant dense<0.000000e+00> : vector<8x16xf32>
    %683 = tpu.matmul %682, %680, %cst_707 {dimension_numbers = #tpu.dot_dimension_numbers<[1], [0], [0], [1], [0, 0, 1, 1], [], []>} : vector<8x32xf32>, vector<32x16xf32>, vector<8x16xf32> -> vector<8x16xf32>
    %684 = arith.addf %679, %683 : vector<8x16xf32>
    %c0_708 = arith.constant 0 : index
    %c132_709 = arith.constant 132 : index
    %685 = vector.load %arg35[%c0_708, %c132_709] : memref<32x512xf32, #tpu.memory_space<vmem>>, vector<32x16xf32>
    %c7_710 = arith.constant 7 : index
    %c0_711 = arith.constant 0 : index
    %c0_712 = arith.constant 0 : index
    %686 = vector.load %arg32[%c7_710, %c0_711, %c0_712] : memref<9x8x32xf32, #tpu.memory_space<vmem>>, vector<1x8x32xf32>
    %687 = vector.shape_cast %686 : vector<1x8x32xf32> to vector<8x32xf32>
    %cst_713 = arith.constant dense<0.000000e+00> : vector<8x16xf32>
    %688 = tpu.matmul %687, %685, %cst_713 {dimension_numbers = #tpu.dot_dimension_numbers<[1], [0], [0], [1], [0, 0, 1, 1], [], []>} : vector<8x32xf32>, vector<32x16xf32>, vector<8x16xf32> -> vector<8x16xf32>
    %689 = arith.addf %684, %688 : vector<8x16xf32>
    %690 = arith.addf %675, %689 : vector<8x16xf32>
    %c0_714 = arith.constant 0 : index
    %c125_715 = arith.constant 125 : index
    %691 = vector.load %arg35[%c0_714, %c125_715] : memref<32x512xf32, #tpu.memory_space<vmem>>, vector<32x16xf32>
    %c2_716 = arith.constant 2 : index
    %c0_717 = arith.constant 0 : index
    %c0_718 = arith.constant 0 : index
    %692 = vector.load %arg32[%c2_716, %c0_717, %c0_718] : memref<9x8x32xf32, #tpu.memory_space<vmem>>, vector<1x8x32xf32>
    %693 = vector.shape_cast %692 : vector<1x8x32xf32> to vector<8x32xf32>
    %cst_719 = arith.constant dense<0.000000e+00> : vector<8x16xf32>
    %694 = tpu.matmul %693, %691, %cst_719 {dimension_numbers = #tpu.dot_dimension_numbers<[1], [0], [0], [1], [0, 0, 1, 1], [], []>} : vector<8x32xf32>, vector<32x16xf32>, vector<8x16xf32> -> vector<8x16xf32>
    %c0_720 = arith.constant 0 : index
    %c129_721 = arith.constant 129 : index
    %695 = vector.load %arg35[%c0_720, %c129_721] : memref<32x512xf32, #tpu.memory_space<vmem>>, vector<32x16xf32>
    %c5_722 = arith.constant 5 : index
    %c0_723 = arith.constant 0 : index
    %c0_724 = arith.constant 0 : index
    %696 = vector.load %arg32[%c5_722, %c0_723, %c0_724] : memref<9x8x32xf32, #tpu.memory_space<vmem>>, vector<1x8x32xf32>
    %697 = vector.shape_cast %696 : vector<1x8x32xf32> to vector<8x32xf32>
    %cst_725 = arith.constant dense<0.000000e+00> : vector<8x16xf32>
    %698 = tpu.matmul %697, %695, %cst_725 {dimension_numbers = #tpu.dot_dimension_numbers<[1], [0], [0], [1], [0, 0, 1, 1], [], []>} : vector<8x32xf32>, vector<32x16xf32>, vector<8x16xf32> -> vector<8x16xf32>
    %699 = arith.addf %694, %698 : vector<8x16xf32>
    %c0_726 = arith.constant 0 : index
    %c133_727 = arith.constant 133 : index
    %700 = vector.load %arg35[%c0_726, %c133_727] : memref<32x512xf32, #tpu.memory_space<vmem>>, vector<32x16xf32>
    %c8_728 = arith.constant 8 : index
    %c0_729 = arith.constant 0 : index
    %c0_730 = arith.constant 0 : index
    %701 = vector.load %arg32[%c8_728, %c0_729, %c0_730] : memref<9x8x32xf32, #tpu.memory_space<vmem>>, vector<1x8x32xf32>
    %702 = vector.shape_cast %701 : vector<1x8x32xf32> to vector<8x32xf32>
    %cst_731 = arith.constant dense<0.000000e+00> : vector<8x16xf32>
    %703 = tpu.matmul %702, %700, %cst_731 {dimension_numbers = #tpu.dot_dimension_numbers<[1], [0], [0], [1], [0, 0, 1, 1], [], []>} : vector<8x32xf32>, vector<32x16xf32>, vector<8x16xf32> -> vector<8x16xf32>
    %704 = arith.addf %699, %703 : vector<8x16xf32>
    %c1_732 = arith.constant 1 : index
    %c0_733 = arith.constant 0 : index
    %705 = vector.load %arg28[%c1_732, %c0_733] : memref<2x16xf32, #tpu.memory_space<vmem>>, vector<1x16xf32>
    %706 = vector.broadcast %705 : vector<1x16xf32> to vector<8x16xf32>
    %707 = arith.mulf %704, %706 : vector<8x16xf32>
    %708 = arith.addf %690, %707 : vector<8x16xf32>
    %c0_734 = arith.constant 0 : index
    %c0_735 = arith.constant 0 : index
    %709 = vector.load %arg33[%c0_734, %c0_735] : memref<8x1xf32, #tpu.memory_space<vmem>>, vector<8x1xf32>
    %710 = vector.broadcast %709 : vector<8x1xf32> to vector<8x16xf32>
    %711 = arith.addf %708, %710 : vector<8x16xf32>
    %c0_736 = arith.constant 0 : index
    %c0_737 = arith.constant 0 : index
    %c0_738 = arith.constant 0 : index
    %712 = vector.load %arg34[%c0_736, %c0_737, %c0_738] : memref<1x8x16xf32, #tpu.memory_space<vmem>>, vector<1x8x16xf32>
    %713 = vector.shape_cast %712 : vector<1x8x16xf32> to vector<8x16xf32>
    %714 = vector.shape_cast %711 : vector<8x16xf32> to vector<1x8x16xf32>
    tpu.vector_store %arg34[%c0_736, %c0_737, %c0_738], %714 {strides = array<i32>} : memref<1x8x16xf32, #tpu.memory_space<vmem>>, vector<1x8x16xf32>,
    return
  }
  func.func @transform_0(%arg0: i32) -> (i32, i32, i32) {
    %c0_i32 = arith.constant 0 : i32
    %c0_i32_0 = arith.constant 0 : i32
    %c0_i32_1 = arith.constant 0 : i32
    return %arg0, %c0_i32, %c0_i32_0 : i32, i32, i32
  }
  func.func @transform_1(%arg0: i32) -> (i32, i32, i32) {
    %c0_i32 = arith.constant 0 : i32
    %c0_i32_0 = arith.constant 0 : i32
    %c0_i32_1 = arith.constant 0 : i32
    %c0_i32_2 = arith.constant 0 : i32
    return %c0_i32, %c0_i32_0, %c0_i32_1 : i32, i32, i32
  }
  func.func @transform_2(%arg0: i32) -> (i32, i32) {
    %c0_i32 = arith.constant 0 : i32
    %c0_i32_0 = arith.constant 0 : i32
    %c0_i32_1 = arith.constant 0 : i32
    return %c0_i32, %c0_i32_0 : i32, i32
  }
  func.func @transform_3(%arg0: i32) -> (i32, i32) {
    %c0_i32 = arith.constant 0 : i32
    %c0_i32_0 = arith.constant 0 : i32
    %c0_i32_1 = arith.constant 0 : i32
    return %c0_i32, %c0_i32_0 : i32, i32
  }
  func.func @transform_4(%arg0: i32) -> (i32, i32, i32) {
    %c0_i32 = arith.constant 0 : i32
    %c0_i32_0 = arith.constant 0 : i32
    %c0_i32_1 = arith.constant 0 : i32
    %c0_i32_2 = arith.constant 0 : i32
    return %c0_i32, %c0_i32_0, %c0_i32_1 : i32, i32, i32
  }
  func.func @transform_5(%arg0: i32) -> (i32, i32) {
    %c0_i32 = arith.constant 0 : i32
    %c0_i32_0 = arith.constant 0 : i32
    %c0_i32_1 = arith.constant 0 : i32
    return %c0_i32, %c0_i32_0 : i32, i32
  }
  func.func @transform_6(%arg0: i32) -> (i32, i32, i32) {
    %c0_i32 = arith.constant 0 : i32
    %c0_i32_0 = arith.constant 0 : i32
    %c0_i32_1 = arith.constant 0 : i32
    %c0_i32_2 = arith.constant 0 : i32
    return %c0_i32, %c0_i32_0, %c0_i32_1 : i32, i32, i32
  }
  func.func @transform_7(%arg0: i32) -> (i32, i32) {
    %c0_i32 = arith.constant 0 : i32
    %c0_i32_0 = arith.constant 0 : i32
    %c0_i32_1 = arith.constant 0 : i32
    return %c0_i32, %c0_i32_0 : i32, i32
  }
  func.func @transform_8(%arg0: i32) -> (i32, i32) {
    %c0_i32 = arith.constant 0 : i32
    %c0_i32_0 = arith.constant 0 : i32
    %c0_i32_1 = arith.constant 0 : i32
    return %c0_i32, %c0_i32_0 : i32, i32
  }
  func.func @transform_9(%arg0: i32) -> (i32, i32, i32) {
    %c0_i32 = arith.constant 0 : i32
    %c0_i32_0 = arith.constant 0 : i32
    %c0_i32_1 = arith.constant 0 : i32
    %c0_i32_2 = arith.constant 0 : i32
    return %c0_i32, %c0_i32_0, %c0_i32_1 : i32, i32, i32
  }
  func.func @transform_10(%arg0: i32) -> (i32, i32) {
    %c0_i32 = arith.constant 0 : i32
    %c0_i32_0 = arith.constant 0 : i32
    %c0_i32_1 = arith.constant 0 : i32
    return %c0_i32, %c0_i32_0 : i32, i32
  }
  func.func @transform_11(%arg0: i32) -> (i32, i32, i32) {
    %c0_i32 = arith.constant 0 : i32
    %c0_i32_0 = arith.constant 0 : i32
    %c0_i32_1 = arith.constant 0 : i32
    %c0_i32_2 = arith.constant 0 : i32
    return %c0_i32, %c0_i32_0, %c0_i32_1 : i32, i32, i32
  }
  func.func @transform_12(%arg0: i32) -> (i32, i32, i32) {
    %c0_i32 = arith.constant 0 : i32
    %c0_i32_0 = arith.constant 0 : i32
    %c0_i32_1 = arith.constant 0 : i32
    %c0_i32_2 = arith.constant 0 : i32
    return %c0_i32, %c0_i32_0, %c0_i32_1 : i32, i32, i32
  }
  func.func @transform_13(%arg0: i32) -> (i32, i32, i32) {
    %c0_i32 = arith.constant 0 : i32
    %c0_i32_0 = arith.constant 0 : i32
    %c0_i32_1 = arith.constant 0 : i32
    %c0_i32_2 = arith.constant 0 : i32
    return %c0_i32, %c0_i32_0, %c0_i32_1 : i32, i32, i32
  }
  func.func @transform_14(%arg0: i32) -> (i32, i32, i32) {
    %c0_i32 = arith.constant 0 : i32
    %c0_i32_0 = arith.constant 0 : i32
    %c0_i32_1 = arith.constant 0 : i32
    %c0_i32_2 = arith.constant 0 : i32
    return %c0_i32, %c0_i32_0, %c0_i32_1 : i32, i32, i32
  }
  func.func @transform_15(%arg0: i32) -> (i32, i32) {
    %c0_i32 = arith.constant 0 : i32
    %c0_i32_0 = arith.constant 0 : i32
    %c0_i32_1 = arith.constant 0 : i32
    return %c0_i32, %c0_i32_0 : i32, i32
  }
  func.func @transform_16(%arg0: i32) -> (i32, i32) {
    %c0_i32 = arith.constant 0 : i32
    %c0_i32_0 = arith.constant 0 : i32
    %c0_i32_1 = arith.constant 0 : i32
    return %c0_i32, %c0_i32_0 : i32, i32
  }
  func.func @transform_17(%arg0: i32) -> (i32, i32, i32) {
    %c0_i32 = arith.constant 0 : i32
    %c0_i32_0 = arith.constant 0 : i32
    %c0_i32_1 = arith.constant 0 : i32
    %c0_i32_2 = arith.constant 0 : i32
    return %c0_i32, %c0_i32_0, %c0_i32_1 : i32, i32, i32
  }
  func.func @transform_18(%arg0: i32) -> (i32, i32) {
    %c0_i32 = arith.constant 0 : i32
    %c0_i32_0 = arith.constant 0 : i32
    %c0_i32_1 = arith.constant 0 : i32
    return %c0_i32, %c0_i32_0 : i32, i32
  }
  func.func @transform_19(%arg0: i32) -> (i32, i32) {
    %c0_i32 = arith.constant 0 : i32
    %c0_i32_0 = arith.constant 0 : i32
    %c0_i32_1 = arith.constant 0 : i32
    return %c0_i32, %c0_i32_0 : i32, i32
  }
  func.func @transform_20(%arg0: i32) -> (i32, i32, i32) {
    %c0_i32 = arith.constant 0 : i32
    %c0_i32_0 = arith.constant 0 : i32
    %c0_i32_1 = arith.constant 0 : i32
    %c0_i32_2 = arith.constant 0 : i32
    return %c0_i32, %c0_i32_0, %c0_i32_1 : i32, i32, i32
  }
  func.func @transform_21(%arg0: i32) -> (i32, i32) {
    %c0_i32 = arith.constant 0 : i32
    %c0_i32_0 = arith.constant 0 : i32
    %c0_i32_1 = arith.constant 0 : i32
    return %c0_i32, %c0_i32_0 : i32, i32
  }
  func.func @transform_22(%arg0: i32) -> (i32, i32, i32) {
    %c0_i32 = arith.constant 0 : i32
    %c0_i32_0 = arith.constant 0 : i32
    %c0_i32_1 = arith.constant 0 : i32
    %c0_i32_2 = arith.constant 0 : i32
    return %c0_i32, %c0_i32_0, %c0_i32_1 : i32, i32, i32
  }
  func.func @transform_23(%arg0: i32) -> (i32, i32, i32) {
    %c0_i32 = arith.constant 0 : i32
    %c0_i32_0 = arith.constant 0 : i32
    %c0_i32_1 = arith.constant 0 : i32
    %c0_i32_2 = arith.constant 0 : i32
    return %c0_i32, %c0_i32_0, %c0_i32_1 : i32, i32, i32
  }
  func.func @transform_24(%arg0: i32) -> (i32, i32, i32) {
    %c0_i32 = arith.constant 0 : i32
    %c0_i32_0 = arith.constant 0 : i32
    %c0_i32_1 = arith.constant 0 : i32
    %c0_i32_2 = arith.constant 0 : i32
    return %c0_i32, %c0_i32_0, %c0_i32_1 : i32, i32, i32
  }
  func.func @transform_25(%arg0: i32) -> (i32, i32, i32) {
    %c0_i32 = arith.constant 0 : i32
    %c0_i32_0 = arith.constant 0 : i32
    %c0_i32_1 = arith.constant 0 : i32
    %c0_i32_2 = arith.constant 0 : i32
    return %c0_i32, %c0_i32_0, %c0_i32_1 : i32, i32, i32
  }
  func.func @transform_26(%arg0: i32) -> (i32, i32) {
    %c0_i32 = arith.constant 0 : i32
    %c0_i32_0 = arith.constant 0 : i32
    %c0_i32_1 = arith.constant 0 : i32
    return %c0_i32, %c0_i32_0 : i32, i32
  }
  func.func @transform_27(%arg0: i32) -> (i32, i32) {
    %c0_i32 = arith.constant 0 : i32
    %c0_i32_0 = arith.constant 0 : i32
    %c0_i32_1 = arith.constant 0 : i32
    return %c0_i32, %c0_i32_0 : i32, i32
  }
  func.func @transform_28(%arg0: i32) -> (i32, i32, i32) {
    %c0_i32 = arith.constant 0 : i32
    %c0_i32_0 = arith.constant 0 : i32
    %c0_i32_1 = arith.constant 0 : i32
    %c0_i32_2 = arith.constant 0 : i32
    return %c0_i32, %c0_i32_0, %c0_i32_1 : i32, i32, i32
  }
  func.func @transform_29(%arg0: i32) -> (i32, i32) {
    %c0_i32 = arith.constant 0 : i32
    %c0_i32_0 = arith.constant 0 : i32
    %c0_i32_1 = arith.constant 0 : i32
    return %c0_i32, %c0_i32_0 : i32, i32
  }
  func.func @transform_30(%arg0: i32) -> (i32, i32) {
    %c0_i32 = arith.constant 0 : i32
    %c0_i32_0 = arith.constant 0 : i32
    %c0_i32_1 = arith.constant 0 : i32
    return %c0_i32, %c0_i32_0 : i32, i32
  }
  func.func @transform_31(%arg0: i32) -> (i32, i32, i32) {
    %c0_i32 = arith.constant 0 : i32
    %c0_i32_0 = arith.constant 0 : i32
    %c0_i32_1 = arith.constant 0 : i32
    %c0_i32_2 = arith.constant 0 : i32
    return %c0_i32, %c0_i32_0, %c0_i32_1 : i32, i32, i32
  }
  func.func @transform_32(%arg0: i32) -> (i32, i32) {
    %c0_i32 = arith.constant 0 : i32
    %c0_i32_0 = arith.constant 0 : i32
    %c0_i32_1 = arith.constant 0 : i32
    return %c0_i32, %c0_i32_0 : i32, i32
  }
  func.func @transform_33(%arg0: i32) -> (i32, i32, i32) {
    %c0_i32 = arith.constant 0 : i32
    %c0_i32_0 = arith.constant 0 : i32
    %c0_i32_1 = arith.constant 0 : i32
    return %arg0, %c0_i32, %c0_i32_0 : i32, i32, i32
  }
}

</mosaic_0001>

<bundles_post_ra>
// kernel: encoder_forward_fused.1
= control target key start
LH: loop header
LB: loop body
LE: loop exit
PB: predicated region body
PF: predicated region fallthrough
CT: control target
= control target key end

     0   :  { %s18331_s6 = smov 1   ;;  %s18332_s10 = smov 2   ;;  %s20311_s0 = inlined_call_operand.smem [shape: u32[34], index: -1, kind: input, shape index: {}] }
   0x1   :  { %s18428_s5 = sld [smem:[%s20311_s0]]   ;;  %s18333_s14 = smov 3  }
   0x2   :  { %s18433_s9 = sld [smem:[%s20311_s0 + %s18331_s6]]   ;;  %s18334_s18 = smov 4  }
   0x3   :  { %s18438_s13 = sld [smem:[%s20311_s0 + %s18332_s10]]   ;;  %s18335_s22 = smov 5  }
   0x4   :  { %s18443_s17 = sld [smem:[%s20311_s0 + %s18333_s14]]   ;;  %s18336_s26 = smov 6  }
   0x5   :  { %s18448_s21 = sld [smem:[%s20311_s0 + %s18334_s18]]   ;;  %s18337_s30 = smov 7  }
   0x6   :  { %s18453_s25 = sld [smem:[%s20311_s0 + %s18335_s22]]   ;;  %s18338_s4 = smov 8  }
   0x7   :  { %20347 = sst [smem:[#allocation61_spill]] %s18428_s5  ;;  %s18339_s10 = smov 9  }
   0x8   :  { %20348 = sst [smem:[#allocation62_spill]] %s18433_s9  ;;  %s18340_s15 = smov 10  }
   0x9   :  { %20349 = sst [smem:[#allocation63_spill]] %s18438_s13  ;;  %s18341_s20 = smov 11  }
   0xa   :  { %20350 = sst [smem:[#allocation64_spill]] %s18443_s17  ;;  %s18343_s1 = smov 13  }
   0xb   :  { %s18458_s29 = sld [smem:[%s20311_s0 + %s18336_s26]]   ;;  %s18342_s26 = smov 12  }
   0xc   :  { %20351 = sst [smem:[#allocation65_spill]] %s18453_s25  ;;  %s18344_s7 = smov 14  }
   0xd   :  { %s18463_s3 = sld [smem:[%s20311_s0 + %s18337_s30]]   ;;  %s18346_s22 = smov 16  }
   0xe   :  { %s18468_s8 = sld [smem:[%s20311_s0 + %s18338_s4]]   ;;  %s18347_s28 = smov 17  }
   0xf   :  { %s18473_s14 = sld [smem:[%s20311_s0 + %s18339_s10]]  }
  0x10   :  { %s18478_s19 = sld [smem:[%s20311_s0 + %s18340_s15]]   ;;  %s18345_s15 = smov 15  }
  0x11   :  { %s18483_s24 = sld [smem:[%s20311_s0 + %s18341_s20]]  }
  0x12   :  { %s18488_s30 = sld [smem:[%s20311_s0 + %s18342_s26]]  }
  0x13   :  { %20352 = sst [smem:[#allocation66_spill]] %s18463_s3 }
  0x14   :  { %20353 = sst [smem:[#allocation67_spill]] %s18468_s8 }
  0x15   :  { %20354 = sst [smem:[#allocation68_spill]] %s18473_s14 }
  0x16   :  { %s18493_s6 = sld [smem:[%s20311_s0 + %s18343_s1]]  }
  0x17   :  { %20355 = sst [smem:[#allocation69_spill]] %s18483_s24 }
  0x18   :  { %s18498_s12 = sld [smem:[%s20311_s0 + %s18344_s7]]   ;;  %s18348_s7 = smov 18  }
  0x19   :  { %s18503_s20 = sld [smem:[%s20311_s0 + %s18345_s15]]   ;;  %s18349_s15 = smov 19  }
  0x1a   :  { %s18508_s27 = sld [smem:[%s20311_s0 + %s18346_s22]]   ;;  %s18350_s22 = smov 20  }
  0x1b   :  { %s18513_s4 = sld [smem:[%s20311_s0 + %s18347_s28]]   ;;  %s18351_s28 = smov 21  }
  0x1c   :  { %20356 = sst [smem:[#allocation70_spill]] %s18493_s6 }
  0x1d   :  { %s18518_s5 = sld [smem:[%s20311_s0 + %s18348_s7]]   ;;  %s18352_s7 = smov 22  }
  0x1e   :  { %20357 = sst [smem:[#allocation71_spill]] %s18498_s12 }
  0x1f   :  { %20358 = sst [smem:[#allocation72_spill]] %s18503_s20 }
  0x20   :  { %s18523_s20 = sld [smem:[%s20311_s0 + %s18349_s15]]   ;;  %s18353_s15 = smov 23  }
  0x21   :  { %20359 = sst [smem:[#allocation73_spill]] %s18513_s4 }
  0x22   :  { %s18528_s6 = sld [smem:[%s20311_s0 + %s18350_s22]]   ;;  %s18354_s22 = smov 24  }
  0x23   :  { %20360 = sst [smem:[#allocation74_spill]] %s18518_s5 }
  0x24   :  { %s18533_s4 = sld [smem:[%s20311_s0 + %s18351_s28]]   ;;  %s18355_s28 = smov 25  }
  0x25   :  { %s18538_s5 = sld [smem:[%s20311_s0 + %s18352_s7]]   ;;  %s18356_s7 = smov 26  }
  0x26   :  { %s18543_s24 = sld [smem:[%s20311_s0 + %s18353_s15]]   ;;  %s18357_s15 = smov 27  }
  0x27   :  { %s18553_s14 = sld [smem:[%s20311_s0 + %s18355_s28]]   ;;  %s18359_s28 = smov 29  }
  0x28   :  { %20361 = sst [smem:[#allocation75_spill]] %s18528_s6 }
  0x29   :  { %s18548_s6 = sld [smem:[%s20311_s0 + %s18354_s22]]   ;;  %s18358_s22 = smov 28  }
  0x2a   :  { %20362 = sst [smem:[#allocation76_spill]] %s18533_s4 }
  0x2b   :  { %20363 = sst [smem:[#allocation77_spill]] %s18538_s5 }
  0x2c   :  { %s18558_s5 = sld [smem:[%s20311_s0 + %s18356_s7]]   ;;  %s18360_s7 = smov 30  }
  0x2d   :  { %s18563_s3 = sld [smem:[%s20311_s0 + %s18357_s15]]   ;;  %s18361_s15 = smov 31  }
  0x2e   :  { %s18573_s25 = sld [smem:[%s20311_s0 + %s18359_s28]]   ;;  %s18363_s28 = smov 33  }
  0x2f   :  { %20364 = sst [smem:[#allocation78_spill]] %s18548_s6 }
  0x30   :  { %s18568_s6 = sld [smem:[%s20311_s0 + %s18358_s22]]   ;;  %s18362_s22 = smov 32  }
  0x31   :  { %s18583_s17 = sld [smem:[%s20311_s0 + %s18361_s15]]  }
  0x32   :  { %20365 = sst [smem:[#allocation79_spill]] %s18558_s5 }
  0x33   :  { %20366 = sst [smem:[#allocation80_spill]] %s18563_s3 }
  0x34   :  { %20368 = sst [smem:[#allocation82_spill]] %s18573_s25 }
  0x35   :  { %s18578_s5 = sld [smem:[%s20311_s0 + %s18360_s7]]  }
  0x36   :  { %20367 = sst [smem:[#allocation81_spill]] %s18568_s6 }
  0x37   :  { %s18588_s6 = sld [smem:[%s20311_s0 + %s18362_s22]]  }
  0x38   :  { %s18593_s25 = sld [smem:[%s20311_s0 + %s18363_s28]]  }
  0x39   :  { %72 = vsyncpa [#allocation4], 0 }
  0x3a   :  { %73 = vsyncpa [#allocation6], 0 }
  0x3b   :  { %74 = vsyncpa [#allocation9], 0 }
  0x3c   :  { %75 = vsyncpa [#allocation12], 0 }
  0x3d   :  { %76 = vsyncpa [#allocation15], 0 }
  0x3e   :  { %77 = vsyncpa [#allocation18], 0 }
  0x3f   :  { %78 = vsyncpa [#allocation21], 0 }
  0x40   :  { %79 = vsyncpa [#allocation24], 0 }
  0x41   :  { %80 = vsyncpa [#allocation27], 0 }
  0x42   :  { %81 = vsyncpa [#allocation30], 0 }
  0x43   :  { %82 = vsyncpa [#allocation33], 0 }
  0x44   :  { %83 = vsyncpa [#allocation36], 0 }
  0x45   :  { %84 = vsyncpa [#allocation39], 0 }
  0x46   :  { %85 = vsyncpa [#allocation42], 0 }
  0x47   :  { %86 = vsyncpa [#allocation45], 0  ;;  %s18595_s7 = smov 0  }
  0x48 LB: > { %s20369_s13 = sld [smem:[#allocation63_spill]]  ;;  %s20371_s9 = sld [smem:[#allocation62_spill]]  ;;  %s18329_s7 = sphi %s18595_s7, %s92_s7  }
  0x49   : > { %s20370_s12 = sld [smem:[#allocation71_spill]]  ;;  %s20372_s4 = sld [smem:[#allocation76_spill]] }
  0x4a   : > { %s20373_s3 = sld [smem:[#allocation80_spill]]  ;;  %s20374_s8 = sld [smem:[#allocation67_spill]] }
  0x4b   : > { %s18364_s0 = smov [#allocation5]   ;;  %s18601_s11 = sadd.s32 4294967295, %s18329_s7  }
  0x4c   : > { %s847_s10 = sshll.u32 %s18364_s0, 4  ;;  %p13812_p0 = scmp.ge.s32.totalorder %s18329_s7, 1  ;;  %s18606_s10 = int_to_ptr.vmem [resolvable:$true] %s847_s10 }
  0x4d   : > { %p821_p1 = scmp.lt.s32.totalorder %s18329_s7, 3  ;;  %p20327_p2 = scmp.eq.s32.totalorder %s18601_s11, 0 }
  0x4e   : > { %s18365_s16 = smov [#allocation8]   ;;  %s18366_s23 = smov [#allocation11]  }
  0x4f   : > { %p18608_p3 = pnand %p13812_p0, %p821_p1  ;;  %s868_s18 = sshll.u32 %s18365_s16, 4  ;;  %s18614_s18 = int_to_ptr.vmem [resolvable:$true] %s868_s18 }
  0x50   : > { %s892_s26 = sshll.u32 %s18366_s23, 4  ;;  %s18367_s28 = smov [#allocation14]   ;;  %s18622_s26 = int_to_ptr.vmem [resolvable:$true] %s892_s26 }
  0x51   : > { %s20375_s15 = scalar_select %p18608_p3, 1, 0 }
  0x52   : > { %p16652_p4 = pneg %p18608_p3  ;;  %s18624_s1 = sshll.u32 %s18367_s28, 4  ;;  %s918_s1 = int_to_ptr.vmem [resolvable:$true] %s18624_s1 }
  0x53   : > { %s17479_s2 = scalar_lea.hbm %s20369_s13, 128 }
  0x54   : > { %p18618_p5 = pnand %p20327_p2, %p16652_p4  ;;  %p17480_p6 = scmp.ne.s32.totalorder %s20369_s13, %s17479_s2 }
  0x55   : > { %p17486_p10 = scmp.lt.u32.totalorder %s17479_s2, %s20369_s13 }
  0x56   : > { %p18630_p7 = pneg %p18618_p5 }
  0x58   : > { %p17482_p8 = pnand %p18630_p7, %p17480_p6 }
  0x5a   : > { %p17483_p9 = pneg %p17482_p8 }
  0x5c   : > { %p17488_p11 = pnand %p17486_p10, %p17483_p9 }
  0x5e   : > { %17491 = shalt.err (!%p17488_p11)
}
  0x5f   : > { %s17492_s16 = scalar_lea.vmem %s18606_s10, 128  ;;  %p17500_p1 = scmp.lt.s32.totalorder %s18606_s10, %s18606_s10 }
  0x60   : > { %p17493_p12 = scmp.ne.s32.totalorder %s18606_s10, %s17492_s16  ;;  %p17501_p4 = scmp.lt.s32.totalorder %s17492_s16, %s17492_s16 }
  0x62   : > { %p17495_p13 = pnand %p17493_p12, %p18630_p7  ;;  %p17502_p2 = por %p17501_p4, %p17500_p1 }
  0x64   : > { %p17496_p0 = pneg %p17495_p13 }
  0x66   : > { %p17503_p3 = pnand %p17502_p2, %p17496_p0 }
  0x68   : > { %17506 = shalt.err (!%p17503_p3)
}
  0x69   : > { %16658 = dma.hbm_to_vmem [thread:$0]  (!%p18618_p5), %s20369_s13, 128, %s18606_s10, [#allocation6]  }
  0x6a   : > { %s17507_s23 = scalar_lea.hbm %s18448_s21, 1152 }
  0x6b   : > { %p17508_p6 = scmp.ne.s32.totalorder %s18448_s21, %s17507_s23  ;;  %p17514_p10 = scmp.lt.u32.totalorder %s17507_s23, %s18448_s21 }
  0x6d   : > { %p17510_p8 = pnand %p17508_p6, %p18630_p7 }
  0x6f   : > { %p17511_p9 = pneg %p17510_p8 }
  0x71   : > { %p17516_p11 = pnand %p17514_p10, %p17511_p9 }
  0x73   : > { %17519 = shalt.err (!%p17516_p11)
}
  0x74   : > { %s17520_s28 = scalar_lea.vmem %s18614_s18, 1152  ;;  %p17528_p13 = scmp.lt.s32.totalorder %s18614_s18, %s18614_s18 }
  0x75   : > { %p17521_p2 = scmp.ne.s32.totalorder %s18614_s18, %s17520_s28  ;;  %p17529_p0 = scmp.lt.s32.totalorder %s17520_s28, %s17520_s28 }
  0x77   : > { %p17523_p3 = pnand %p17521_p2, %p18630_p7  ;;  %p17530_p1 = por %p17529_p0, %p17528_p13 }
  0x79   : > { %p17524_p12 = pneg %p17523_p3 }
  0x7b   : > { %p17531_p4 = pnand %p17530_p1, %p17524_p12 }
  0x7d   : > { %17534 = shalt.err (!%p17531_p4)
}
  0x7e   : > { %s20329_s10 = smov 128   ;;  %s20333_s2 = smov 8  }
  0x7f   : > { %16664 = dma.hbm_to_vmem [thread:$0]  (!%p18618_p5), %s18448_s21, 1152, %s18614_s18, [#allocation9], %s20329_s10, %s20329_s10, %s20333_s2  }
  0x80   : > { %s17535_s16 = scalar_lea.hbm %s18458_s29, 1152 }
  0x81   : > { %p17536_p6 = scmp.ne.s32.totalorder %s18458_s29, %s17535_s16  ;;  %p17542_p10 = scmp.lt.u32.totalorder %s17535_s16, %s18458_s29 }
  0x83   : > { %p17538_p8 = pnand %p17536_p6, %p18630_p7 }
  0x85   : > { %p17539_p9 = pneg %p17538_p8 }
  0x87   : > { %p17544_p11 = pnand %p17542_p10, %p17539_p9 }
  0x89   : > { %17547 = shalt.err (!%p17544_p11)
}
  0x8a   : > { %s17548_s23 = scalar_lea.vmem %s18622_s26, 1152  ;;  %p17556_p13 = scmp.lt.s32.totalorder %s18622_s26, %s18622_s26 }
  0x8b   : > { %p17549_p2 = scmp.ne.s32.totalorder %s18622_s26, %s17548_s23  ;;  %p17557_p0 = scmp.lt.s32.totalorder %s17548_s23, %s17548_s23 }
  0x8d   : > { %p17551_p3 = pnand %p17549_p2, %p18630_p7  ;;  %p17558_p1 = por %p17557_p0, %p17556_p13 }
  0x8f   : > { %p17552_p12 = pneg %p17551_p3 }
  0x91   : > { %p17559_p4 = pnand %p17558_p1, %p17552_p12 }
  0x93   : > { %17562 = shalt.err (!%p17559_p4)
}
  0x94   : > { %16670 = dma.hbm_to_vmem [thread:$0]  (!%p18618_p5), %s18458_s29, 1152, %s18622_s26, [#allocation12], %s20329_s10, %s20329_s10, %s20333_s2  }
  0x95   : > { %s17563_s18 = scalar_lea.hbm %s20374_s8, 128 }
  0x96   : > { %p17564_p6 = scmp.ne.s32.totalorder %s20374_s8, %s17563_s18  ;;  %p17570_p10 = scmp.lt.u32.totalorder %s17563_s18, %s20374_s8 }
  0x98   : > { %p17566_p8 = pnand %p17564_p6, %p18630_p7 }
  0x9a   : > { %p17567_p9 = pneg %p17566_p8 }
  0x9c   : > { %p17572_p11 = pnand %p17570_p10, %p17567_p9 }
  0x9e   : > { %17575 = shalt.err (!%p17572_p11)
}
  0x9f   : > { %s17576_s28 = scalar_lea.vmem %s918_s1, 128  ;;  %p17584_p13 = scmp.lt.s32.totalorder %s918_s1, %s918_s1 }
  0xa0   : > { %p17577_p2 = scmp.ne.s32.totalorder %s918_s1, %s17576_s28  ;;  %p17585_p0 = scmp.lt.s32.totalorder %s17576_s28, %s17576_s28 }
  0xa2   : > { %p17579_p3 = pnand %p17577_p2, %p18630_p7  ;;  %p17586_p1 = por %p17585_p0, %p17584_p13 }
  0xa4   : > { %p17580_p12 = pneg %p17579_p3 }
  0xa6   : > { %p17587_p4 = pnand %p17586_p1, %p17580_p12 }
  0xa8   : > { %17590 = shalt.err (!%p17587_p4)
}
  0xa9   : > { %16676 = dma.hbm_to_vmem [thread:$0]  (!%p18618_p5), %s20374_s8, 128, %s918_s1, [#allocation15]  }
  0xaa   : > { %s18370_s26 = smov [#allocation17]   ;;  %s18371_s23 = smov [#allocation20]  }
  0xab   : > { %s941_s16 = sshll.u32 %s18370_s26, 4  ;;  %s964_s18 = sshll.u32 %s18371_s23, 4  ;;  %s942_s16 = int_to_ptr.vmem [resolvable:$true] %s941_s16  ;;  %s965_s18 = int_to_ptr.vmem [resolvable:$true] %s964_s18 }
  0xac   : > { %s17591_s10 = scalar_lea.hbm %s18478_s19, 64 }
  0xad   : > { %p17592_p6 = scmp.ne.s32.totalorder %s18478_s19, %s17591_s10  ;;  %p17598_p10 = scmp.lt.u32.totalorder %s17591_s10, %s18478_s19 }
  0xaf   : > { %p17594_p8 = pnand %p17592_p6, %p18630_p7 }
  0xb1   : > { %p17595_p9 = pneg %p17594_p8 }
  0xb3   : > { %p17600_p11 = pnand %p17598_p10, %p17595_p9 }
  0xb5   : > { %17603 = shalt.err (!%p17600_p11)
}
  0xb6   : > { %s17604_s28 = scalar_lea.vmem %s942_s16, 64  ;;  %p17612_p13 = scmp.lt.s32.totalorder %s942_s16, %s942_s16 }
  0xb7   : > { %p17605_p2 = scmp.ne.s32.totalorder %s942_s16, %s17604_s28  ;;  %p17613_p0 = scmp.lt.s32.totalorder %s17604_s28, %s17604_s28 }
  0xb9   : > { %p17607_p3 = pnand %p17605_p2, %p18630_p7  ;;  %p17614_p1 = por %p17613_p0, %p17612_p13 }
  0xbb   : > { %p17608_p12 = pneg %p17607_p3 }
  0xbd   : > { %p17615_p4 = pnand %p17614_p1, %p17608_p12 }
  0xbf   : > { %17618 = shalt.err (!%p17615_p4)
}
  0xc0   : > { %16682 = dma.hbm_to_vmem [thread:$0]  (!%p18618_p5), %s18478_s19, 64, %s942_s16, [#allocation18]  }
  0xc1   : > { %s17619_s1 = scalar_lea.hbm %s18488_s30, 1024 }
  0xc2   : > { %p17620_p6 = scmp.ne.s32.totalorder %s18488_s30, %s17619_s1  ;;  %p17626_p10 = scmp.lt.u32.totalorder %s17619_s1, %s18488_s30 }
  0xc4   : > { %p17622_p8 = pnand %p17620_p6, %p18630_p7 }
  0xc6   : > { %p17623_p9 = pneg %p17622_p8 }
  0xc8   : > { %p17628_p11 = pnand %p17626_p10, %p17623_p9 }
  0xca   : > { %17631 = shalt.err (!%p17628_p11)
}
  0xcb   : > { %s17632_s10 = scalar_lea.vmem %s965_s18, 1024  ;;  %p17640_p13 = scmp.lt.s32.totalorder %s965_s18, %s965_s18 }
  0xcc   : > { %p17633_p2 = scmp.ne.s32.totalorder %s965_s18, %s17632_s10  ;;  %p17641_p0 = scmp.lt.s32.totalorder %s17632_s10, %s17632_s10 }
  0xce   : > { %p17635_p3 = pnand %p17633_p2, %p18630_p7  ;;  %p17642_p1 = por %p17641_p0, %p17640_p13 }
  0xd0   : > { %p17636_p12 = pneg %p17635_p3 }
  0xd2   : > { %p17643_p4 = pnand %p17642_p1, %p17636_p12 }
  0xd4   : > { %17646 = shalt.err (!%p17643_p4)
}
  0xd5   : > { %s20378_s26 = smov 128   ;;  %s18372_s16 = smov [#allocation23]  }
  0xd6   : > { %16688 = dma.hbm_to_vmem [thread:$0]  (!%p18618_p5), %s18488_s30, 1024, %s965_s18, [#allocation21], %s20378_s26, %s20378_s26, %s20333_s2  }
  0xd7   : > { %s990_s23 = sshll.u32 %s18372_s16, 4  ;;  %s18373_s28 = smov [#allocation26]   ;;  %s991_s23 = int_to_ptr.vmem [resolvable:$true] %s990_s23 }
  0xd8   : > { %s1017_s1 = sshll.u32 %s18373_s28, 4  ;;  %s17647_s10 = scalar_lea.hbm %s20370_s12, 2304  ;;  %s1018_s1 = int_to_ptr.vmem [resolvable:$true] %s1017_s1 }
  0xd9   : > { %p17648_p6 = scmp.ne.s32.totalorder %s20370_s12, %s17647_s10  ;;  %p17654_p10 = scmp.lt.u32.totalorder %s17647_s10, %s20370_s12 }
  0xdb   : > { %p17650_p8 = pnand %p17648_p6, %p18630_p7 }
  0xdd   : > { %p17651_p9 = pneg %p17650_p8 }
  0xdf   : > { %p17656_p11 = pnand %p17654_p10, %p17651_p9 }
  0xe1   : > { %17659 = shalt.err (!%p17656_p11)
}
  0xe2   : > { %s17660_s8 = scalar_lea.vmem %s991_s23, 2304  ;;  %p17668_p13 = scmp.lt.s32.totalorder %s991_s23, %s991_s23 }
  0xe3   : > { %p17661_p2 = scmp.ne.s32.totalorder %s991_s23, %s17660_s8  ;;  %p17669_p0 = scmp.lt.s32.totalorder %s17660_s8, %s17660_s8 }
  0xe5   : > { %p17663_p3 = pnand %p17661_p2, %p18630_p7  ;;  %p17670_p1 = por %p17669_p0, %p17668_p13 }
  0xe7   : > { %p17664_p12 = pneg %p17663_p3 }
  0xe9   : > { %p17671_p4 = pnand %p17670_p1, %p17664_p12 }
  0xeb   : > { %17674 = shalt.err (!%p17671_p4)
}
  0xec   : > { %16694 = dma.hbm_to_vmem [thread:$0]  (!%p18618_p5), %s20370_s12, 2304, %s991_s23, [#allocation24], %s20378_s26, %s20378_s26, %s20333_s2  }
  0xed   : > { %s17675_s18 = scalar_lea.hbm %s18508_s27, 32 }
  0xee   : > { %p17676_p6 = scmp.ne.s32.totalorder %s18508_s27, %s17675_s18  ;;  %p17682_p10 = scmp.lt.u32.totalorder %s17675_s18, %s18508_s27 }
  0xf0   : > { %p17678_p8 = pnand %p17676_p6, %p18630_p7 }
  0xf2   : > { %p17679_p9 = pneg %p17678_p8 }
  0xf4   : > { %p17684_p11 = pnand %p17682_p10, %p17679_p9 }
  0xf6   : > { %17687 = shalt.err (!%p17684_p11)
}
  0xf7   : > { %s17688_s8 = scalar_lea.vmem %s1018_s1, 32  ;;  %p17696_p13 = scmp.lt.s32.totalorder %s1018_s1, %s1018_s1 }
  0xf8   : > { %p17689_p2 = scmp.ne.s32.totalorder %s1018_s1, %s17688_s8  ;;  %p17697_p0 = scmp.lt.s32.totalorder %s17688_s8, %s17688_s8 }
  0xfa   : > { %p17691_p3 = pnand %p17689_p2, %p18630_p7  ;;  %p17698_p1 = por %p17697_p0, %p17696_p13 }
  0xfc   : > { %p17692_p12 = pneg %p17691_p3 }
  0xfe   : > { %p17699_p4 = pnand %p17698_p1, %p17692_p12 }
 0x100   : > { %17702 = shalt.err (!%p17699_p4)
}
 0x101   : > { %16700 = dma.hbm_to_vmem [thread:$0]  (!%p18618_p5), %s18508_s27, 32, %s1018_s1, [#allocation27]  }
 0x102   : > { %s18374_s16 = smov [#allocation29]   ;;  %s18375_s28 = smov [#allocation32]  }
 0x103   : > { %s1043_s23 = sshll.u32 %s18374_s16, 4  ;;  %s1070_s10 = sshll.u32 %s18375_s28, 4  ;;  %s1044_s23 = int_to_ptr.vmem [resolvable:$true] %s1043_s23  ;;  %s1071_s10 = int_to_ptr.vmem [resolvable:$true] %s1070_s10 }
 0x104   : > { %s17703_s18 = scalar_lea.hbm %s18523_s20, 256 }
 0x105   : > { %p17704_p6 = scmp.ne.s32.totalorder %s18523_s20, %s17703_s18  ;;  %p17710_p10 = scmp.lt.u32.totalorder %s17703_s18, %s18523_s20 }
 0x107   : > { %p17706_p8 = pnand %p17704_p6, %p18630_p7 }
 0x109   : > { %p17707_p9 = pneg %p17706_p8 }
 0x10b   : > { %p17712_p11 = pnand %p17710_p10, %p17707_p9 }
 0x10d   : > { %17715 = shalt.err (!%p17712_p11)
}
 0x10e   : > { %s17716_s8 = scalar_lea.vmem %s1044_s23, 256  ;;  %p17724_p13 = scmp.lt.s32.totalorder %s1044_s23, %s1044_s23 }
 0x10f   : > { %p17717_p2 = scmp.ne.s32.totalorder %s1044_s23, %s17716_s8  ;;  %p17725_p0 = scmp.lt.s32.totalorder %s17716_s8, %s17716_s8 }
 0x111   : > { %p17719_p3 = pnand %p17717_p2, %p18630_p7  ;;  %p17726_p1 = por %p17725_p0, %p17724_p13 }
 0x113   : > { %p17720_p12 = pneg %p17719_p3 }
 0x115   : > { %p17727_p4 = pnand %p17726_p1, %p17720_p12 }
 0x117   : > { %17730 = shalt.err (!%p17727_p4)
}
 0x118   : > { %16706 = dma.hbm_to_vmem [thread:$0]  (!%p18618_p5), %s18523_s20, 256, %s1044_s23, [#allocation30], %s20378_s26, %s20378_s26, %s20333_s2  }
 0x119   : > { %s17731_s1 = scalar_lea.hbm %s20372_s4, 128 }
 0x11a   : > { %p17732_p6 = scmp.ne.s32.totalorder %s20372_s4, %s17731_s1  ;;  %p17738_p10 = scmp.lt.u32.totalorder %s17731_s1, %s20372_s4 }
 0x11c   : > { %p17734_p8 = pnand %p17732_p6, %p18630_p7 }
 0x11e   : > { %p17735_p9 = pneg %p17734_p8 }
 0x120   : > { %p17740_p11 = pnand %p17738_p10, %p17735_p9 }
 0x122   : > { %17743 = shalt.err (!%p17740_p11)
}
 0x123   : > { %s17744_s16 = scalar_lea.vmem %s1071_s10, 128  ;;  %p17752_p13 = scmp.lt.s32.totalorder %s1071_s10, %s1071_s10 }
 0x124   : > { %p17745_p2 = scmp.ne.s32.totalorder %s1071_s10, %s17744_s16  ;;  %p17753_p0 = scmp.lt.s32.totalorder %s17744_s16, %s17744_s16 }
 0x126   : > { %p17747_p3 = pnand %p17745_p2, %p18630_p7  ;;  %p17754_p1 = por %p17753_p0, %p17752_p13 }
 0x128   : > { %p17748_p12 = pneg %p17747_p3 }
 0x12a   : > { %p17755_p4 = pnand %p17754_p1, %p17748_p12 }
 0x12c   : > { %17758 = shalt.err (!%p17755_p4)
}
 0x12d   : > { %16712 = dma.hbm_to_vmem [thread:$0]  (!%p18618_p5), %s20372_s4, 128, %s1071_s10, [#allocation33]  }
 0x12e   : > { %s18376_s23 = smov [#allocation35]   ;;  %s18377_s18 = smov [#allocation38]  }
 0x12f   : > { %s1093_s28 = sshll.u32 %s18376_s23, 4  ;;  %s1119_s8 = sshll.u32 %s18377_s18, 4  ;;  %s1094_s28 = int_to_ptr.vmem [resolvable:$true] %s1093_s28  ;;  %s1120_s8 = int_to_ptr.vmem [resolvable:$true] %s1119_s8 }
 0x130   : > { %s17759_s1 = scalar_lea.hbm %s18543_s24, 2048 }
 0x131   : > { %p17760_p6 = scmp.ne.s32.totalorder %s18543_s24, %s17759_s1  ;;  %p17766_p10 = scmp.lt.u32.totalorder %s17759_s1, %s18543_s24 }
 0x133   : > { %p17762_p8 = pnand %p17760_p6, %p18630_p7 }
 0x135   : > { %p17763_p9 = pneg %p17762_p8 }
 0x137   : > { %p17768_p11 = pnand %p17766_p10, %p17763_p9 }
 0x139   : > { %17771 = shalt.err (!%p17768_p11)
}
 0x13a   : > { %s17772_s16 = scalar_lea.vmem %s1094_s28, 2048  ;;  %p17780_p13 = scmp.lt.s32.totalorder %s1094_s28, %s1094_s28 }
 0x13b   : > { %p17773_p2 = scmp.ne.s32.totalorder %s1094_s28, %s17772_s16  ;;  %p17781_p0 = scmp.lt.s32.totalorder %s17772_s16, %s17772_s16 }
 0x13d   : > { %p17775_p3 = pnand %p17773_p2, %p18630_p7  ;;  %p17782_p1 = por %p17781_p0, %p17780_p13 }
 0x13f   : > { %p17776_p12 = pneg %p17775_p3 }
 0x141   : > { %p17783_p4 = pnand %p17782_p1, %p17776_p12 }
 0x143   : > { %17786 = shalt.err (!%p17783_p4)
}
 0x144   : > { %16718 = dma.hbm_to_vmem [thread:$0]  (!%p18618_p5), %s18543_s24, 2048, %s1094_s28, [#allocation36], %s20378_s26, %s20378_s26, %s20333_s2  }
 0x145   : > { %s17787_s10 = scalar_lea.hbm %s18553_s14, 4608 }
 0x146   : > { %p17788_p6 = scmp.ne.s32.totalorder %s18553_s14, %s17787_s10  ;;  %p17794_p10 = scmp.lt.u32.totalorder %s17787_s10, %s18553_s14 }
 0x148   : > { %p17790_p8 = pnand %p17788_p6, %p18630_p7 }
 0x14a   : > { %p17791_p9 = pneg %p17790_p8 }
 0x14c   : > { %p17796_p11 = pnand %p17794_p10, %p17791_p9 }
 0x14e   : > { %17799 = shalt.err (!%p17796_p11)
}
 0x14f   : > { %s17800_s23 = scalar_lea.vmem %s1120_s8, 4608  ;;  %p17808_p13 = scmp.lt.s32.totalorder %s1120_s8, %s1120_s8 }
 0x150   : > { %p17801_p2 = scmp.ne.s32.totalorder %s1120_s8, %s17800_s23  ;;  %p17809_p0 = scmp.lt.s32.totalorder %s17800_s23, %s17800_s23 }
 0x152   : > { %p17803_p3 = pnand %p17801_p2, %p18630_p7  ;;  %p17810_p1 = por %p17809_p0, %p17808_p13 }
 0x154   : > { %p17804_p12 = pneg %p17803_p3 }
 0x156   : > { %p17811_p4 = pnand %p17810_p1, %p17804_p12 }
 0x158   : > { %17814 = shalt.err (!%p17811_p4)
}
 0x159   : > { %16724 = dma.hbm_to_vmem [thread:$0]  (!%p18618_p5), %s18553_s14, 4608, %s1120_s8, [#allocation39], %s20378_s26, %s20378_s26, %s20333_s2  }
 0x15a   : > { %s18378_s28 = smov [#allocation41]   ;;  %s18379_s1 = smov [#allocation3]  }
 0x15b   : > { %s1146_s18 = sshll.u32 %s18378_s28, 4  ;;  %s833_s16 = sshll.u32 %s18379_s1, 4  ;;  %s1147_s18 = int_to_ptr.vmem [resolvable:$true] %s1146_s18  ;;  %s834_s16 = int_to_ptr.vmem [resolvable:$true] %s833_s16 }
 0x15c   : > { %s17815_s10 = scalar_lea.hbm %s20373_s3, 32 }
 0x15d   : > { %p17816_p6 = scmp.ne.s32.totalorder %s20373_s3, %s17815_s10  ;;  %p17822_p10 = scmp.lt.u32.totalorder %s17815_s10, %s20373_s3 }
 0x15f   : > { %p17818_p8 = pnand %p17816_p6, %p18630_p7 }
 0x161   : > { %p17819_p9 = pneg %p17818_p8 }
 0x163   : > { %p17824_p11 = pnand %p17822_p10, %p17819_p9 }
 0x165   : > { %17827 = shalt.err (!%p17824_p11)
}
 0x166   : > { %s17828_s23 = scalar_lea.vmem %s1147_s18, 32  ;;  %p17836_p13 = scmp.lt.s32.totalorder %s1147_s18, %s1147_s18 }
 0x167   : > { %p17829_p2 = scmp.ne.s32.totalorder %s1147_s18, %s17828_s23  ;;  %p17837_p0 = scmp.lt.s32.totalorder %s17828_s23, %s17828_s23 }
 0x169   : > { %p17831_p3 = pnand %p17829_p2, %p18630_p7  ;;  %p17838_p1 = por %p17837_p0, %p17836_p13 }
 0x16b   : > { %p17832_p12 = pneg %p17831_p3 }
 0x16d   : > { %p17839_p4 = pnand %p17838_p1, %p17832_p12 }
 0x16f   : > { %17842 = shalt.err (!%p17839_p4)
}
 0x170   : > { %16730 = dma.hbm_to_vmem [thread:$0]  (!%p18618_p5), %s20373_s3, 32, %s1147_s18, [#allocation42]  }
 0x171   : > { %s17843_s8 = scalar_lea.hbm %s20371_s9, 1152 }
 0x172   : > { %p17844_p6 = scmp.ne.s32.totalorder %s20371_s9, %s17843_s8  ;;  %p17850_p10 = scmp.lt.u32.totalorder %s17843_s8, %s20371_s9 }
 0x174   : > { %p17846_p8 = pnand %p17844_p6, %p18630_p7 }
 0x176   : > { %p17847_p9 = pneg %p17846_p8 }
 0x178   : > { %p17852_p11 = pnand %p17850_p10, %p17847_p9 }
 0x17a   : > { %17855 = shalt.err (!%p17852_p11)
}
 0x17b   : > { %s17856_s28 = scalar_lea.vmem %s834_s16, 1152  ;;  %p17864_p13 = scmp.lt.s32.totalorder %s834_s16, %s834_s16 }
 0x17c   : > { %p17857_p2 = scmp.ne.s32.totalorder %s834_s16, %s17856_s28  ;;  %p17865_p0 = scmp.lt.s32.totalorder %s17856_s28, %s17856_s28 }
 0x17e   : > { %p17859_p3 = pnand %p17857_p2, %p18630_p7  ;;  %p17866_p1 = por %p17865_p0, %p17864_p13 }
 0x180   : > { %p17860_p12 = pneg %p17859_p3 }
 0x182   : > { %p17867_p4 = pnand %p17866_p1, %p17860_p12 }
 0x184   : > { %17870 = shalt.err (!%p17867_p4)
}
 0x185   : > { %s20379_s18 = sld [smem:[#allocation64_spill]]  ;;  %s18380_s1 = smov [#allocation7]  }
 0x186   : > { %16655 = dma.hbm_to_vmem [thread:$0]  (!%p18618_p5), %s20371_s9, 1152, %s834_s16, [#allocation4], %s20378_s26, %s20378_s26, %s20333_s2  }
 0x187   : > { %s858_s10 = sshll.u32 %s18380_s1, 4  ;;  %s18381_s23 = smov [#allocation10]   ;;  %s859_s10 = int_to_ptr.vmem [resolvable:$true] %s858_s10 }
 0x188   : > { %s882_s8 = sshll.u32 %s18381_s23, 4  ;;  %s883_s8 = int_to_ptr.vmem [resolvable:$true] %s882_s8 }
 0x18b   : > { %s17871_s28 = scalar_lea.hbm %s20379_s18, 64 }
 0x18c   : > { %p17872_p6 = scmp.ne.s32.totalorder %s20379_s18, %s17871_s28  ;;  %p17878_p10 = scmp.lt.u32.totalorder %s17871_s28, %s20379_s18 }
 0x18e   : > { %p17874_p8 = pnand %p17872_p6, %p18630_p7 }
 0x190   : > { %p17875_p9 = pneg %p17874_p8 }
 0x192   : > { %p17880_p11 = pnand %p17878_p10, %p17875_p9 }
 0x194   : > { %17883 = shalt.err (!%p17880_p11)
}
 0x195   : > { %s17884_s3 = scalar_lea.vmem %s859_s10, 64  ;;  %p17892_p13 = scmp.lt.s32.totalorder %s859_s10, %s859_s10 }
 0x196   : > { %p17885_p2 = scmp.ne.s32.totalorder %s859_s10, %s17884_s3  ;;  %p17893_p0 = scmp.lt.s32.totalorder %s17884_s3, %s17884_s3 }
 0x198   : > { %p17887_p3 = pnand %p17885_p2, %p18630_p7  ;;  %p17894_p1 = por %p17893_p0, %p17892_p13 }
 0x19a   : > { %p17888_p12 = pneg %p17887_p3 }
 0x19c   : > { %p17895_p4 = pnand %p17894_p1, %p17888_p12 }
 0x19e   : > { %17898 = shalt.err (!%p17895_p4)
}
 0x19f   : > { %s20380_s16 = sld [smem:[#allocation65_spill]] }
 0x1a0   : > { %16661 = dma.hbm_to_vmem [thread:$0]  (!%p18618_p5), %s20379_s18, 64, %s859_s10, [#allocation6]  }
 0x1a5   : > { %s17899_s1 = scalar_lea.hbm %s20380_s16, 128 }
 0x1a6   : > { %p17900_p6 = scmp.ne.s32.totalorder %s20380_s16, %s17899_s1  ;;  %p17906_p10 = scmp.lt.u32.totalorder %s17899_s1, %s20380_s16 }
 0x1a8   : > { %p17902_p8 = pnand %p17900_p6, %p18630_p7 }
 0x1aa   : > { %p17903_p9 = pneg %p17902_p8 }
 0x1ac   : > { %p17908_p11 = pnand %p17906_p10, %p17903_p9 }
 0x1ae   : > { %17911 = shalt.err (!%p17908_p11)
}
 0x1af   : > { %s17912_s3 = scalar_lea.vmem %s883_s8, 128  ;;  %p17920_p13 = scmp.lt.s32.totalorder %s883_s8, %s883_s8 }
 0x1b0   : > { %p17913_p2 = scmp.ne.s32.totalorder %s883_s8, %s17912_s3  ;;  %p17921_p0 = scmp.lt.s32.totalorder %s17912_s3, %s17912_s3 }
 0x1b2   : > { %p17915_p3 = pnand %p17913_p2, %p18630_p7  ;;  %p17922_p1 = por %p17921_p0, %p17920_p13 }
 0x1b4   : > { %p17916_p12 = pneg %p17915_p3 }
 0x1b6   : > { %p17923_p4 = pnand %p17922_p1, %p17916_p12 }
 0x1b8   : > { %17926 = shalt.err (!%p17923_p4)
}
 0x1b9   : > { %s20381_s10 = sld [smem:[#allocation66_spill]]  ;;  %s18382_s23 = smov [#allocation13]  }
 0x1ba   : > { %16667 = dma.hbm_to_vmem [thread:$0]  (!%p18618_p5), %s20380_s16, 128, %s883_s8, [#allocation9]  }
 0x1bb   : > { %s906_s28 = sshll.u32 %s18382_s23, 4  ;;  %s18383_s1 = smov [#allocation16]   ;;  %s907_s28 = int_to_ptr.vmem [resolvable:$true] %s906_s28 }
 0x1bc   : > { %s927_s2 = sshll.u32 %s18383_s1, 4  ;;  %s928_s2 = int_to_ptr.vmem [resolvable:$true] %s927_s2 }
 0x1bf   : > { %s17927_s4 = scalar_lea.hbm %s20381_s10, 128 }
 0x1c0   : > { %p17928_p6 = scmp.ne.s32.totalorder %s20381_s10, %s17927_s4  ;;  %p17934_p10 = scmp.lt.u32.totalorder %s17927_s4, %s20381_s10 }
 0x1c2   : > { %p17930_p8 = pnand %p17928_p6, %p18630_p7 }
 0x1c4   : > { %p17931_p9 = pneg %p17930_p8 }
 0x1c6   : > { %p17936_p11 = pnand %p17934_p10, %p17931_p9 }
 0x1c8   : > { %17939 = shalt.err (!%p17936_p11)
}
 0x1c9   : > { %s17940_s3 = scalar_lea.vmem %s907_s28, 128  ;;  %p17948_p13 = scmp.lt.s32.totalorder %s907_s28, %s907_s28 }
 0x1ca   : > { %p17941_p2 = scmp.ne.s32.totalorder %s907_s28, %s17940_s3  ;;  %p17949_p0 = scmp.lt.s32.totalorder %s17940_s3, %s17940_s3 }
 0x1cc   : > { %p17943_p3 = pnand %p17941_p2, %p18630_p7  ;;  %p17950_p1 = por %p17949_p0, %p17948_p13 }
 0x1ce   : > { %p17944_p12 = pneg %p17943_p3 }
 0x1d0   : > { %p17951_p4 = pnand %p17950_p1, %p17944_p12 }
 0x1d2   : > { %17954 = shalt.err (!%p17951_p4)
}
 0x1d3   : > { %s20382_s8 = sld [smem:[#allocation68_spill]] }
 0x1d4   : > { %16673 = dma.hbm_to_vmem [thread:$0]  (!%p18618_p5), %s20381_s10, 128, %s907_s28, [#allocation12]  }
 0x1d9   : > { %s17955_s4 = scalar_lea.hbm %s20382_s8, 576 }
 0x1da   : > { %p17956_p6 = scmp.ne.s32.totalorder %s20382_s8, %s17955_s4  ;;  %p17962_p10 = scmp.lt.u32.totalorder %s17955_s4, %s20382_s8 }
 0x1dc   : > { %p17958_p8 = pnand %p17956_p6, %p18630_p7 }
 0x1de   : > { %p17959_p9 = pneg %p17958_p8 }
 0x1e0   : > { %p17964_p11 = pnand %p17962_p10, %p17959_p9 }
 0x1e2   : > { %17967 = shalt.err (!%p17964_p11)
}
 0x1e3   : > { %s17968_s23 = scalar_lea.vmem %s928_s2, 576  ;;  %p17976_p13 = scmp.lt.s32.totalorder %s928_s2, %s928_s2 }
 0x1e4   : > { %p17969_p2 = scmp.ne.s32.totalorder %s928_s2, %s17968_s23  ;;  %p17977_p0 = scmp.lt.s32.totalorder %s17968_s23, %s17968_s23 }
 0x1e6   : > { %p17971_p3 = pnand %p17969_p2, %p18630_p7  ;;  %p17978_p1 = por %p17977_p0, %p17976_p13 }
 0x1e8   : > { %p17972_p12 = pneg %p17971_p3 }
 0x1ea   : > { %p17979_p4 = pnand %p17978_p1, %p17972_p12 }
 0x1ec   : > { %17982 = shalt.err (!%p17979_p4)
}
 0x1ed   : > { %s18384_s28 = smov 64   ;;  %s20383_s1 = sld [smem:[#allocation69_spill]] }
 0x1ee   : > { %s18385_s3 = smov 4   ;;  %s18386_s4 = smov [#allocation19]  }
 0x1ef   : > { %16679 = dma.hbm_to_vmem [thread:$0]  (!%p18618_p5), %s20382_s8, 576, %s928_s2, [#allocation15], %s18384_s28, %s18384_s28, %s18385_s3  }
 0x1f0   : > { %s951_s9 = sshll.u32 %s18386_s4, 4  ;;  %s18387_s10 = smov [#allocation22]   ;;  %s952_s9 = int_to_ptr.vmem [resolvable:$true] %s951_s9 }
 0x1f1   : > { %s977_s12 = sshll.u32 %s18387_s10, 4  ;;  %s978_s12 = int_to_ptr.vmem [resolvable:$true] %s977_s12 }
 0x1f3   : > { %s17983_s13 = scalar_lea.hbm %s20383_s1, 16384 }
 0x1f4   : > { %p17984_p6 = scmp.ne.s32.totalorder %s20383_s1, %s17983_s13  ;;  %p17990_p10 = scmp.lt.u32.totalorder %s17983_s13, %s20383_s1 }
 0x1f6   : > { %p17986_p8 = pnand %p17984_p6, %p18630_p7 }
 0x1f8   : > { %p17987_p9 = pneg %p17986_p8 }
 0x1fa   : > { %p17992_p11 = pnand %p17990_p10, %p17987_p9 }
 0x1fc   : > { %17995 = shalt.err (!%p17992_p11)
}
 0x1fd   : > { %s17996_s23 = scalar_lea.vmem %s952_s9, 16384  ;;  %p18004_p13 = scmp.lt.s32.totalorder %s952_s9, %s952_s9 }
 0x1fe   : > { %p17997_p2 = scmp.ne.s32.totalorder %s952_s9, %s17996_s23  ;;  %p18005_p0 = scmp.lt.s32.totalorder %s17996_s23, %s17996_s23 }
 0x200   : > { %p17999_p3 = pnand %p17997_p2, %p18630_p7  ;;  %p18006_p1 = por %p18005_p0, %p18004_p13 }
 0x202   : > { %p18000_p12 = pneg %p17999_p3 }
 0x204   : > { %p18007_p4 = pnand %p18006_p1, %p18000_p12 }
 0x206   : > { %18010 = shalt.err (!%p18007_p4)
}
 0x207   : > { %s20384_s2 = smov 8   ;;  %s20385_s13 = sld [smem:[#allocation70_spill]] }
 0x208   : > { %16685 = dma.hbm_to_vmem [thread:$0]  (!%p18618_p5), %s20383_s1, 16384, %s952_s9, [#allocation18], %s20378_s26, %s20378_s26, %s20384_s2  }
 0x20d   : > { %s18011_s10 = scalar_lea.hbm %s20385_s13, 1024 }
 0x20e   : > { %p18012_p6 = scmp.ne.s32.totalorder %s20385_s13, %s18011_s10  ;;  %p18018_p10 = scmp.lt.u32.totalorder %s18011_s10, %s20385_s13 }
 0x210   : > { %p18014_p8 = pnand %p18012_p6, %p18630_p7 }
 0x212   : > { %p18015_p9 = pneg %p18014_p8 }
 0x214   : > { %p18020_p11 = pnand %p18018_p10, %p18015_p9 }
 0x216   : > { %18023 = shalt.err (!%p18020_p11)
}
 0x217   : > { %s18024_s28 = scalar_lea.vmem %s978_s12, 1024  ;;  %p18032_p13 = scmp.lt.s32.totalorder %s978_s12, %s978_s12 }
 0x218   : > { %p18025_p2 = scmp.ne.s32.totalorder %s978_s12, %s18024_s28  ;;  %p18033_p0 = scmp.lt.s32.totalorder %s18024_s28, %s18024_s28 }
 0x21a   : > { %p18027_p3 = pnand %p18025_p2, %p18630_p7  ;;  %p18034_p1 = por %p18033_p0, %p18032_p13 }
 0x21c   : > { %p18028_p12 = pneg %p18027_p3 }
 0x21e   : > { %p18035_p4 = pnand %p18034_p1, %p18028_p12 }
 0x220   : > { %18038 = shalt.err (!%p18035_p4)
}
 0x221   : > { %s20386_s9 = sld [smem:[#allocation72_spill]]  ;;  %s18388_s3 = smov [#allocation25]  }
 0x222   : > { %16691 = dma.hbm_to_vmem [thread:$0]  (!%p18618_p5), %s20385_s13, 1024, %s978_s12, [#allocation21], %s20378_s26, %s20378_s26, %s20384_s2  }
 0x223   : > { %s1003_s4 = sshll.u32 %s18388_s3, 4  ;;  %s18389_s23 = smov [#allocation28]   ;;  %s1004_s4 = int_to_ptr.vmem [resolvable:$true] %s1003_s4 }
 0x224   : > { %s1030_s10 = sshll.u32 %s18389_s23, 4  ;;  %s1031_s10 = int_to_ptr.vmem [resolvable:$true] %s1030_s10 }
 0x227   : > { %s18039_s28 = scalar_lea.hbm %s20386_s9, 256 }
 0x228   : > { %p18040_p6 = scmp.ne.s32.totalorder %s20386_s9, %s18039_s28  ;;  %p18046_p10 = scmp.lt.u32.totalorder %s18039_s28, %s20386_s9 }
 0x22a   : > { %p18042_p8 = pnand %p18040_p6, %p18630_p7 }
 0x22c   : > { %p18043_p9 = pneg %p18042_p8 }
 0x22e   : > { %p18048_p11 = pnand %p18046_p10, %p18043_p9 }
 0x230   : > { %18051 = shalt.err (!%p18048_p11)
}
 0x231   : > { %s18052_s1 = scalar_lea.vmem %s1004_s4, 256  ;;  %p18060_p13 = scmp.lt.s32.totalorder %s1004_s4, %s1004_s4 }
 0x232   : > { %p18053_p2 = scmp.ne.s32.totalorder %s1004_s4, %s18052_s1  ;;  %p18061_p0 = scmp.lt.s32.totalorder %s18052_s1, %s18052_s1 }
 0x234   : > { %p18055_p3 = pnand %p18053_p2, %p18630_p7  ;;  %p18062_p1 = por %p18061_p0, %p18060_p13 }
 0x236   : > { %p18056_p12 = pneg %p18055_p3 }
 0x238   : > { %p18063_p4 = pnand %p18062_p1, %p18056_p12 }
 0x23a   : > { %18066 = shalt.err (!%p18063_p4)
}
 0x23b   : > { %s20387_s12 = sld [smem:[#allocation74_spill]] }
 0x23c   : > { %16697 = dma.hbm_to_vmem [thread:$0]  (!%p18618_p5), %s20386_s9, 256, %s1004_s4, [#allocation24], %s20378_s26, %s20378_s26, %s20384_s2  }
 0x241   : > { %s18067_s3 = scalar_lea.hbm %s20387_s12, 256 }
 0x242   : > { %p18068_p6 = scmp.ne.s32.totalorder %s20387_s12, %s18067_s3  ;;  %p18074_p10 = scmp.lt.u32.totalorder %s18067_s3, %s20387_s12 }
 0x244   : > { %p18070_p8 = pnand %p18068_p6, %p18630_p7 }
 0x246   : > { %p18071_p9 = pneg %p18070_p8 }
 0x248   : > { %p18076_p11 = pnand %p18074_p10, %p18071_p9 }
 0x24a   : > { %18079 = shalt.err (!%p18076_p11)
}
 0x24b   : > { %s18080_s1 = scalar_lea.vmem %s1031_s10, 256  ;;  %p18088_p13 = scmp.lt.s32.totalorder %s1031_s10, %s1031_s10 }
 0x24c   : > { %p18081_p2 = scmp.ne.s32.totalorder %s1031_s10, %s18080_s1  ;;  %p18089_p0 = scmp.lt.s32.totalorder %s18080_s1, %s18080_s1 }
 0x24e   : > { %p18083_p3 = pnand %p18081_p2, %p18630_p7  ;;  %p18090_p1 = por %p18089_p0, %p18088_p13 }
 0x250   : > { %p18084_p12 = pneg %p18083_p3 }
 0x252   : > { %p18091_p4 = pnand %p18090_p1, %p18084_p12 }
 0x254   : > { %18094 = shalt.err (!%p18091_p4)
}
 0x255   : > { %s20388_s4 = sld [smem:[#allocation75_spill]]  ;;  %s18390_s23 = smov [#allocation31]  }
 0x256   : > { %16703 = dma.hbm_to_vmem [thread:$0]  (!%p18618_p5), %s20387_s12, 256, %s1031_s10, [#allocation27], %s20378_s26, %s20378_s26, %s20384_s2  }
 0x257   : > { %s1056_s28 = sshll.u32 %s18390_s23, 4  ;;  %s18391_s3 = smov [#allocation34]   ;;  %s1057_s28 = int_to_ptr.vmem [resolvable:$true] %s1056_s28 }
 0x258   : > { %s1080_s8 = sshll.u32 %s18391_s3, 4  ;;  %s1081_s8 = int_to_ptr.vmem [resolvable:$true] %s1080_s8 }
 0x25b   : > { %s18095_s1 = scalar_lea.hbm %s20388_s4, 1152 }
 0x25c   : > { %p18096_p6 = scmp.ne.s32.totalorder %s20388_s4, %s18095_s1  ;;  %p18102_p10 = scmp.lt.u32.totalorder %s18095_s1, %s20388_s4 }
 0x25e   : > { %p18098_p8 = pnand %p18096_p6, %p18630_p7 }
 0x260   : > { %p18099_p9 = pneg %p18098_p8 }
 0x262   : > { %p18104_p11 = pnand %p18102_p10, %p18099_p9 }
 0x264   : > { %18107 = shalt.err (!%p18104_p11)
}
 0x265   : > { %s18108_s9 = scalar_lea.vmem %s1057_s28, 1152  ;;  %p18116_p13 = scmp.lt.s32.totalorder %s1057_s28, %s1057_s28 }
 0x266   : > { %p18109_p2 = scmp.ne.s32.totalorder %s1057_s28, %s18108_s9  ;;  %p18117_p0 = scmp.lt.s32.totalorder %s18108_s9, %s18108_s9 }
 0x268   : > { %p18111_p3 = pnand %p18109_p2, %p18630_p7  ;;  %p18118_p1 = por %p18117_p0, %p18116_p13 }
 0x26a   : > { %p18112_p12 = pneg %p18111_p3 }
 0x26c   : > { %p18119_p4 = pnand %p18118_p1, %p18112_p12 }
 0x26e   : > { %18122 = shalt.err (!%p18119_p4)
}
 0x26f   : > { %s20389_s10 = sld [smem:[#allocation77_spill]] }
 0x270   : > { %16709 = dma.hbm_to_vmem [thread:$0]  (!%p18618_p5), %s20388_s4, 1152, %s1057_s28, [#allocation30], %s20378_s26, %s20378_s26, %s20384_s2  }
 0x275   : > { %s18123_s23 = scalar_lea.hbm %s20389_s10, 4096 }
 0x276   : > { %p18124_p6 = scmp.ne.s32.totalorder %s20389_s10, %s18123_s23  ;;  %p18130_p10 = scmp.lt.u32.totalorder %s18123_s23, %s20389_s10 }
 0x278   : > { %p18126_p8 = pnand %p18124_p6, %p18630_p7 }
 0x27a   : > { %p18127_p9 = pneg %p18126_p8 }
 0x27c   : > { %p18132_p11 = pnand %p18130_p10, %p18127_p9 }
 0x27e   : > { %18135 = shalt.err (!%p18132_p11)
}
 0x27f   : > { %s18136_s9 = scalar_lea.vmem %s1081_s8, 4096  ;;  %p18144_p13 = scmp.lt.s32.totalorder %s1081_s8, %s1081_s8 }
 0x280   : > { %p18137_p2 = scmp.ne.s32.totalorder %s1081_s8, %s18136_s9  ;;  %p18145_p0 = scmp.lt.s32.totalorder %s18136_s9, %s18136_s9 }
 0x282   : > { %p18139_p3 = pnand %p18137_p2, %p18630_p7  ;;  %p18146_p1 = por %p18145_p0, %p18144_p13 }
 0x284   : > { %p18140_p12 = pneg %p18139_p3 }
 0x286   : > { %p18147_p4 = pnand %p18146_p1, %p18140_p12 }
 0x288   : > { %18150 = shalt.err (!%p18147_p4)
}
 0x289   : > { %s20390_s28 = sld [smem:[#allocation78_spill]]  ;;  %s18392_s3 = smov [#allocation37]  }
 0x28a   : > { %16715 = dma.hbm_to_vmem [thread:$0]  (!%p18618_p5), %s20389_s10, 4096, %s1081_s8, [#allocation33], %s20378_s26, %s20378_s26, %s20384_s2  }
 0x28b   : > { %s1106_s1 = sshll.u32 %s18392_s3, 4  ;;  %s18393_s23 = smov [#allocation40]   ;;  %s1107_s1 = int_to_ptr.vmem [resolvable:$true] %s1106_s1 }
 0x28c   : > { %s1132_s4 = sshll.u32 %s18393_s23, 4  ;;  %s1133_s4 = int_to_ptr.vmem [resolvable:$true] %s1132_s4 }
 0x28f   : > { %s18151_s9 = scalar_lea.hbm %s20390_s28, 2048 }
 0x290   : > { %p18152_p6 = scmp.ne.s32.totalorder %s20390_s28, %s18151_s9  ;;  %p18158_p10 = scmp.lt.u32.totalorder %s18151_s9, %s20390_s28 }
 0x292   : > { %p18154_p8 = pnand %p18152_p6, %p18630_p7 }
 0x294   : > { %p18155_p9 = pneg %p18154_p8 }
 0x296   : > { %p18160_p11 = pnand %p18158_p10, %p18155_p9 }
 0x298   : > { %18163 = shalt.err (!%p18160_p11)
}
 0x299   : > { %s18164_s12 = scalar_lea.vmem %s1107_s1, 2048  ;;  %p18172_p13 = scmp.lt.s32.totalorder %s1107_s1, %s1107_s1 }
 0x29a   : > { %p18165_p2 = scmp.ne.s32.totalorder %s1107_s1, %s18164_s12  ;;  %p18173_p0 = scmp.lt.s32.totalorder %s18164_s12, %s18164_s12 }
 0x29c   : > { %p18167_p3 = pnand %p18165_p2, %p18630_p7  ;;  %p18174_p1 = por %p18173_p0, %p18172_p13 }
 0x29e   : > { %p18168_p12 = pneg %p18167_p3 }
 0x2a0   : > { %p18175_p4 = pnand %p18174_p1, %p18168_p12 }
 0x2a2   : > { %18178 = shalt.err (!%p18175_p4)
}
 0x2a3   : > { %s20391_s8 = sld [smem:[#allocation79_spill]] }
 0x2a4   : > { %16721 = dma.hbm_to_vmem [thread:$0]  (!%p18618_p5), %s20390_s28, 2048, %s1107_s1, [#allocation36], %s20378_s26, %s20378_s26, %s20384_s2  }
 0x2a9   : > { %s18179_s3 = scalar_lea.hbm %s20391_s8, 512 }
 0x2aa   : > { %p18180_p6 = scmp.ne.s32.totalorder %s20391_s8, %s18179_s3  ;;  %p18186_p10 = scmp.lt.u32.totalorder %s18179_s3, %s20391_s8 }
 0x2ac   : > { %p18182_p8 = pnand %p18180_p6, %p18630_p7 }
 0x2ae   : > { %p18183_p9 = pneg %p18182_p8 }
 0x2b0   : > { %p18188_p11 = pnand %p18186_p10, %p18183_p9 }
 0x2b2   : > { %18191 = shalt.err (!%p18188_p11)
}
 0x2b3   : > { %s18192_s12 = scalar_lea.vmem %s1133_s4, 512  ;;  %p18200_p13 = scmp.lt.s32.totalorder %s1133_s4, %s1133_s4 }
 0x2b4   : > { %p18193_p2 = scmp.ne.s32.totalorder %s1133_s4, %s18192_s12  ;;  %p18201_p0 = scmp.lt.s32.totalorder %s18192_s12, %s18192_s12 }
 0x2b6   : > { %p18195_p3 = pnand %p18193_p2, %p18630_p7  ;;  %p18202_p1 = por %p18201_p0, %p18200_p13 }
 0x2b8   : > { %p18196_p12 = pneg %p18195_p3 }
 0x2ba   : > { %p18203_p4 = pnand %p18202_p1, %p18196_p12 }
 0x2bc   : > { %18206 = shalt.err (!%p18203_p4)
}
 0x2bd   : > { %s20392_s1 = sld [smem:[#allocation81_spill]]  ;;  %s18394_s23 = smov [#allocation43]  }
 0x2be   : > { %16727 = dma.hbm_to_vmem [thread:$0]  (!%p18618_p5), %s20391_s8, 512, %s1133_s4, [#allocation39], %s20378_s26, %s20378_s26, %s20384_s2  }
 0x2bf   : > { %s1156_s9 = sshll.u32 %s18394_s23, 4  ;;  %s18395_s3 = smov [#allocation44]   ;;  %s1157_s9 = int_to_ptr.vmem [resolvable:$true] %s1156_s9 }
 0x2c0   : > { %s1169_s10 = sshll.u32 %s18395_s3, 4  ;;  %s1170_s10 = int_to_ptr.vmem [resolvable:$true] %s1169_s10 }
 0x2c3   : > { %s18207_s12 = scalar_lea.hbm %s20392_s1, 4608 }
 0x2c4   : > { %p18208_p6 = scmp.ne.s32.totalorder %s20392_s1, %s18207_s12  ;;  %p18214_p10 = scmp.lt.u32.totalorder %s18207_s12, %s20392_s1 }
 0x2c6   : > { %p18210_p8 = pnand %p18208_p6, %p18630_p7 }
 0x2c8   : > { %p18211_p9 = pneg %p18210_p8 }
 0x2ca   : > { %p18216_p11 = pnand %p18214_p10, %p18211_p9 }
 0x2cc   : > { %18219 = shalt.err (!%p18216_p11)
}
 0x2cd   : > { %s18220_s13 = scalar_lea.vmem %s1157_s9, 4608  ;;  %p18228_p13 = scmp.lt.s32.totalorder %s1157_s9, %s1157_s9 }
 0x2ce   : > { %p18221_p2 = scmp.ne.s32.totalorder %s1157_s9, %s18220_s13  ;;  %p18229_p0 = scmp.lt.s32.totalorder %s18220_s13, %s18220_s13 }
 0x2d0   : > { %p18223_p3 = pnand %p18221_p2, %p18630_p7  ;;  %p18230_p1 = por %p18229_p0, %p18228_p13 }
 0x2d2   : > { %p18224_p12 = pneg %p18223_p3 }
 0x2d4   : > { %p18231_p4 = pnand %p18230_p1, %p18224_p12 }
 0x2d6   : > { %18234 = shalt.err (!%p18231_p4)
}
 0x2d7   : > { %s20393_s4 = sld [smem:[#allocation82_spill]] }
 0x2d8   : > { %16733 = dma.hbm_to_vmem [thread:$0]  (!%p18618_p5), %s20392_s1, 4608, %s1157_s9, [#allocation42], %s20378_s26, %s20378_s26, %s20384_s2  }
 0x2dd   : > { %s18235_s23 = scalar_lea.hbm %s20393_s4, 512 }
 0x2de   : > { %p18236_p6 = scmp.ne.s32.totalorder %s20393_s4, %s18235_s23  ;;  %p18242_p10 = scmp.lt.u32.totalorder %s18235_s23, %s20393_s4 }
 0x2e0   : > { %p18238_p8 = pnand %p18236_p6, %p18630_p7 }
 0x2e2   : > { %p18239_p9 = pneg %p18238_p8 }
 0x2e4   : > { %p18244_p11 = pnand %p18242_p10, %p18239_p9 }
 0x2e6   : > { %18247 = shalt.err (!%p18244_p11)
}
 0x2e7   : > { %s18248_s13 = scalar_lea.vmem %s1170_s10, 512  ;;  %p18256_p13 = scmp.lt.s32.totalorder %s1170_s10, %s1170_s10 }
 0x2e8   : > { %p18249_p2 = scmp.ne.s32.totalorder %s1170_s10, %s18248_s13  ;;  %p18257_p0 = scmp.lt.s32.totalorder %s18248_s13, %s18248_s13 }
 0x2ea   : > { %p18251_p3 = pnand %p18249_p2, %p18630_p7  ;;  %p18258_p1 = por %p18257_p0, %p18256_p13 }
 0x2ec   : > { %p18252_p12 = pneg %p18251_p3 }
 0x2ee   : > { %p18259_p4 = pnand %p18258_p1, %p18252_p12 }
 0x2f0   : > { %18262 = shalt.err (!%p18259_p4)
}
 0x2f1   : > { %16736 = dma.hbm_to_vmem [thread:$0]  (!%p18618_p5), %s20393_s4, 512, %s1170_s10, [#allocation45], %s20378_s26, %s20378_s26, %s20384_s2  }
 0x2f2   : > { %p20394_p6 = scmp.ne.s32.totalorder %s20375_s15, 0 }
 0x2f3   : > { %p20395_p8 = scmp.eq.s32.totalorder (!%p20394_p6), %s18601_s11, 0 }
 0x2f4   : > { %1202 = sbr.rel (%p20394_p6) target bundleno = 7045 (0x1b85), region = 152 }
 0x2fb   : > { %18268 = dma.done.wait (%p20395_p8), [#allocation4], 1152   ;;  %p20396_p7 = pmov %p20395_p8 }
 0x2fd   : > { %18270 = vsyncadd (%p20396_p7), [#allocation4], 4294966144  ;;  %p20397_p9 = pmov %p20396_p7 }
 0x2fe   : > { %p20398_p10 = pmov %p20396_p7 }
 0x2ff   : > { %18272 = dma.done.wait (%p20397_p9), [#allocation6], 192  }
 0x300   : > { %18274 = vsyncadd (%p20398_p10), [#allocation6], 4294967104  ;;  %p20399_p11 = pmov %p20396_p7 }
 0x301   : > { %p20400_p5 = pmov %p20396_p7 }
 0x302   : > { %18276 = dma.done.wait (%p20399_p11), [#allocation9], 1280  }
 0x303   : > { %18278 = vsyncadd (%p20400_p5), [#allocation9], 4294966016  ;;  %p20401_p2 = pmov %p20400_p5 }
 0x305   : > { %18280 = dma.done.wait (%p20401_p2), [#allocation12], 1280   ;;  %p20402_p3 = pmov %p20401_p2 }
 0x306   : > { %p20403_p12 = pmov %p20401_p2 }
 0x307   : > { %18282 = vsyncadd (%p20402_p3), [#allocation12], 4294966016 }
 0x308   : > { %18284 = dma.done.wait (%p20403_p12), [#allocation15], 704   ;;  %p20404_p13 = pmov %p20401_p2 }
 0x309   : > { %p20405_p0 = pmov %p20401_p2 }
 0x30a   : > { %18286 = vsyncadd (%p20404_p13), [#allocation15], 4294966592 }
 0x30b   : > { %18288 = dma.done.wait (%p20405_p0), [#allocation18], 16448   ;;  %p20406_p1 = pmov %p20405_p0 }
 0x30c   : > { %p20407_p4 = pmov %p20405_p0 }
 0x30d   : > { %18290 = vsyncadd (%p20406_p1), [#allocation18], 4294950848 }
 0x30e   : > { %18292 = dma.done.wait (%p20407_p4), [#allocation21], 2048   ;;  %p20408_p6 = pmov %p20405_p0 }
 0x30f   : > { %p20409_p8 = pmov %p20405_p0 }
 0x310   : > { %18294 = vsyncadd (%p20408_p6), [#allocation21], 4294965248 }
 0x311   : > { %18296 = dma.done.wait (%p20409_p8), [#allocation24], 2560   ;;  %p20410_p7 = pmov %p20405_p0 }
 0x312   : > { %p20411_p9 = pmov %p20405_p0 }
 0x313   : > { %18298 = vsyncadd (%p20410_p7), [#allocation24], 4294964736 }
 0x314   : > { %18300 = dma.done.wait (%p20411_p9), [#allocation27], 288   ;;  %p20412_p10 = pmov %p20405_p0 }
 0x315   : > { %p20413_p11 = pmov %p20405_p0 }
 0x316   : > { %18302 = vsyncadd (%p20412_p10), [#allocation27], 4294967008 }
 0x317   : > { %18304 = dma.done.wait (%p20413_p11), [#allocation30], 1408   ;;  %p20414_p5 = pmov %p20405_p0 }
 0x318   : > { %p20415_p2 = pmov %p20405_p0 }
 0x319   : > { %18306 = vsyncadd (%p20414_p5), [#allocation30], 4294965888 }
 0x31a   : > { %18308 = dma.done.wait (%p20415_p2), [#allocation33], 4224   ;;  %p20416_p3 = pmov %p20405_p0 }
 0x31b   : > { %p20417_p12 = pmov %p20405_p0 }
 0x31c   : > { %18310 = vsyncadd (%p20416_p3), [#allocation33], 4294963072 }
 0x31d   : > { %18312 = dma.done.wait (%p20417_p12), [#allocation36], 4096   ;;  %p20418_p13 = pmov %p20405_p0 }
 0x31f   : > { %18314 = vsyncadd (%p20418_p13), [#allocation36], 4294963200 }
 0x320   : > { %18316 = dma.done.wait (%p20405_p0), [#allocation39], 5120   ;;  %p20419_p1 = pmov %p20405_p0 }
 0x321   : > { %p20420_p4 = pmov %p20405_p0 }
 0x322   : > { %18318 = vsyncadd (%p20419_p1), [#allocation39], 4294962176 }
 0x323   : > { %18320 = dma.done.wait (%p20420_p4), [#allocation42], 4640   ;;  %p20421_p6 = pmov %p20405_p0 }
 0x324   : > { %p20422_p8 = pmov %p20405_p0 }
 0x325   : > { %18322 = vsyncadd (%p20421_p6), [#allocation42], 4294962656 }
 0x326   : > { %18324 = dma.done.wait (%p20422_p8), [#allocation45], 512   ;;  %p20423_p7 = pmov %p20405_p0 }
 0x327   : > { %s20424_s15 = sld [smem:[#allocation61_spill]]  ;;  %vm1794_vm0 = vcmask 130048   ;;  %vm6164_vm1 = vcmask 523264   ;;  %v18396_v0 = vmov 0.0   ;;  %p1393_p9 = scmp.lt.s32.totalorder %s18601_s11, 1  ;;  %vm1432_vm2 = vcmask 1043456  }
 0x328   : > { %18326 = vsyncadd (%p20423_p7), [#allocation45], 4294966784  ;;  %1403 = vst [vmem:[#allocation2] sm:$0xf] %v18396_v0  ;;  %1501 = vmatprep.mubr.f32.mxu0 %v18396_v0  ;;  %1781 = vmatprep.mubr.f32.mxu1 %v18396_v0  ;;  %s18397_s26 = smov 1   ;;  %s18398_s2 = smov 17   ;;  %v1694_v62 = vlaneseq }
 0x329   : > { %1404 = vst [vmem:[#allocation2 + $0x18] sm:$0xf] %v18396_v0  ;;  %10199 = vst [vmem:[#allocation2 + $0x40] sm:$0xff] %v18396_v0  ;;  %s20427_s11 = smov (!%p1393_p9, %s18601_s11), 1  ;;  %s18399_s10 = smov 113   ;;  %vm1428_vm3 = vcmask 31744  }
 0x32a   : > { %s14164_s22 = sshll.u32 %s20427_s11, 3  ;;  %s18400_s9 = smov 127   ;;  %v1709_v9 = vld [vmem:[#allocation3 + $0x20] sm:$0xff]  ;;  %v18405_v10 = vmov 0   ;;  %v2254_v11 = vld [vmem:[#allocation5] sm:$0xff]  ;;  %vm1425_vm4 = vcmask 7168  }
 0x32b   : > { %s18401_s3 = smov 16   ;;  %s18402_s12 = smov 15   ;;  %16890 = vset.pattern.permute.xlu0 %v18405_v10  ;;  %16891 = vset.pattern.permute.xlu1 %v18405_v10  ;;  %v1415_v19 = vld [vmem:[#allocation3 + $0x18] sm:$0xff]  ;;  %vm1514_vm5 = vcmask 138240   ;;  %v1413_v26 = vld [vmem:[#allocation3] sm:$0xff]  ;;  %vm1609_vm6 = vcmask 924672  }
 0x32c   : > { %s18403_s23 = smov 112   ;;  %s18404_s13 = smov 111   ;;  %vm1978_vm7 = vcmask 1039360   ;;  %v1599_v35 = vld [vmem:[#allocation3 + $0x30] sm:$0xff]  ;;  %v1971_v40 = vld [vmem:[#allocation3 + $0x28] sm:$0xff]  ;;  %vm2065_vm8 = vcmask 121856  }
 0x32d   : > { %s1397_s0 = scalar_lea.vmem %s20424_s15, %s14164_s22  ;;  %v1707_v46 = vld [vmem:[#allocation3 + $0x8] sm:$0xff]  ;;  %v1969_v49 = vld [vmem:[#allocation3 + $0x10] sm:$0xff]  ;;  %vm1883_vm9 = vcmask 916480   ;;  %vm2154_vm10 = vcmask 908288   ;;  %v2147_v56 = vld [vmem:[#allocation3 + $0x40] sm:$0xff]  ;;  %v1695_v63 = vshrl.u32 %v1694_v62, 7 }
 0x32e   : > { %v1402_v1 = vld [vmem:[%s1397_s0] sm:$0xff]  ;;  %v1876_v58 = vld [vmem:[#allocation3 + $0x38] sm:$0xff]  ;;  %vm2285_vm11 = vcmask 64512   ;;  %v2805_v62 = vld [vmem:[#allocation8 + $0x10] sm:$0xff]  ;;  %vm6162_vm12 = vcmask 1048064   ;;  %s18406_s15 = smov 9  }
 0x32f   : > { %v1410_v2 = vld [vmem:[#allocation2] sm:$0xf]  ;;  %1408 = vst [vmem:[#allocation2 + $0x8] sm:$0xf] %v1402_v1  ;;  %v1406_v4 = vcombine.high %v1402_v1, %v1402_v1  ;;  %v19137_v1 = vsub.s32 0, %v1695_v63  ;;  %s18407_s0 = smov 8  }
 0x330   : > { %v1597_v3 = vld [vmem:[#allocation2 + $0x18] sm:$0xf]  ;;  %1419 = vrot.lane.b32.xlu1 %v1410_v2, %s18397_s26  ;;  %10197 = vst [vmem:[#allocation2] sm:$0xff] %v18396_v0  ;;  %vm6284_vm13 = vcmask 72704   ;;  %vm6844_vm14 = vcmask 56320   ;;  %vm18413_vm15 = vmmov 0  }
 0x331   : > { %2263 = vst [vmem:[#allocation2 + $0x18] sm:$0xff] %v18396_v0  ;;  %1409 = vst [vmem:[#allocation2 + $0x10] sm:$0xf] %v1406_v4  ;;  %v2238_v4 = vld [vmem:[#allocation7 + $0x1] ss:$2 sm:$0x3] }
 0x334   : > { %1508 = vrot.lane.b32.xlu1 %v1410_v2, %s18398_s2 }
 0x336   : > { %v1411_v5 = vld [vmem:[#allocation2 + $0x8] sm:$0xf] }
 0x337   : > { %1421 = vrot.lane.b32.xlu0 %v1411_v5, %s18397_s26  ;;  %v1595_v7 = vld [vmem:[#allocation2 + $0x8] sm:$0xf] }
 0x338   : > { %1607 = vrot.lane.b32.xlu1 %v1597_v3, %s18399_s10  ;;  %v1412_v6 = vld [vmem:[#allocation2 + $0x10] sm:$0xf] }
 0x339   : > { %13883 = vmatprep.subr.msk.mxu1 %vm1432_vm2, %v1412_v6  ;;  %v1596_v8 = vld [vmem:[#allocation2 + $0x10] sm:$0xf] }
 0x33a   : > { %13884 = vmatpush1.msk.msra.mxu1 %vm1432_vm2, %v1411_v5 }
 0x33b   : > { %1423 = vrot.lane.b32.xlu0 %v1412_v6, %s18397_s26  ;;  %13885 = vmatmul.mubr.msk.f32.vlgmr.msra.gmra.mrb[0].mxu1 %vm1428_vm3, %v1709_v9 }
 0x33c   : > { %1510 = vrot.lane.b32.xlu1 %v1411_v5, %s18398_s2  ;;  %1868 = vmatprep.mubr.f32.mxu1 %v18396_v0 }
 0x33f   : > { %1603 = vrot.lane.b32.xlu0 %v1595_v7, %s18399_s10 }
 0x340   : > { %1974 = vrot.lane.b32.xlu1 %v1596_v8, %s18400_s9 }
 0x343   : > { %1512 = vrot.lane.b32.xlu0 %v1412_v6, %s18398_s2 }
 0x344   : > { %1972 = vrot.lane.b32.xlu1 %v1595_v7, %s18400_s9 }
 0x347   : > { %1605 = vrot.lane.b32.xlu0 %v1596_v8, %s18399_s10 }
 0x348   : > { %1792 = vrot.lane.b32.xlu1 %v1412_v6, %s18401_s3 }
 0x34b   : > { %1976 = vrot.lane.b32.xlu0 %v1597_v3, %s18400_s9 }
 0x34c   : > { %2063 = vrot.lane.b32.xlu1 %v1412_v6, %s18402_s12 }
 0x34f   : > { %1790 = vrot.lane.b32.xlu0 %v1411_v5, %s18401_s3 }
 0x350   : > { %2059 = vrot.lane.b32.xlu1 %v1410_v2, %s18402_s12 }
 0x353   : > { %2061 = vrot.lane.b32.xlu0 %v1411_v5, %s18402_s12 }
 0x354   : > { %1881 = vrot.lane.b32.xlu1 %v1597_v3, %s18403_s23 }
 0x357   : > { %1788 = vrot.lane.b32.xlu0 %v1410_v2, %s18401_s3  ;;  %v1692_v2 = vld [vmem:[#allocation7] ss:$2 sm:$0x3] }
 0x358   : > { %2152 = vrot.lane.b32.xlu1 %v1597_v3, %s18404_s13  ;;  %v19139_v3 = vsub.s32 1, %v1695_v63  ;;  %v1697_v5 = vrot.slane %v1692_v2, %v19137_v1 }
 0x35a   : > { %v1701_v6 = vrot.slane %v1692_v2, %v19139_v3  ;;  %v2247_v10 = vrot.slane %v2238_v4, %v19139_v3 }
 0x35b   : > { %1879 = vrot.lane.b32.xlu0 %v1596_v8, %s18403_s23 }
 0x35c   : > { %2148 = vrot.lane.b32.xlu1 %v1595_v7, %s18404_s13 }
 0x35f   : > { %2150 = vrot.lane.b32.xlu0 %v1596_v8, %s18404_s13  ;;  %v2243_v8 = vrot.slane %v2238_v4, %v19137_v1 }
 0x363   : > { %1877 = vrot.lane.b32.xlu0 %v1595_v7, %s18403_s23 }
 0x367   : > { %2257 = vperm.xlu0 %16890, %v2254_v11  }
 0x36b   : > { %2275 = vrot.lane.b32.xlu0 %v18396_v0, %s18397_s26 }
 0x3a2   : > { %v1420_v12 = vpop.permute.xlu1 %1419 }
 0x3a6   : > { %v1509_v13 = vpop.permute.xlu1 %1508 }
 0x3a9   : > { %v1422_v14 = vpop.permute.xlu0 %1421 }
 0x3aa   : > { %v1608_v15 = vpop.permute.xlu1 %1607  ;;  %v1426_v20 = vsel %vm1425_vm4, %v1420_v12, %v1422_v14 }
 0x3ad   : > { %v1424_v16 = vpop.permute.xlu0 %1423 }
 0x3ae   : > { %v1511_v17 = vpop.permute.xlu1 %1510  ;;  %v1427_v18 = vsel %vm1425_vm4, %v1422_v14, %v1424_v16 }
 0x3af   : > { %13874 = vmatprep.subr.msk.mxu0 %vm1432_vm2, %v1427_v18  ;;  %v1515_v27 = vsel %vm1514_vm5, %v1509_v13, %v1511_v17 }
 0x3b0   : > { %13875 = vmatpush1.msk.msra.mxu0 %vm1432_vm2, %v1426_v20 }
 0x3b1   : > { %13876 = vmatmul.mubr.msk.f32.vlgmr.msra.gmra.mrb[0].mxu0 %vm1428_vm3, %v1415_v19  ;;  %v1604_v21 = vpop.permute.xlu0 %1603 }
 0x3b2   : > { %v1975_v22 = vpop.permute.xlu1 %1974  ;;  %1588 = vmatprep.mubr.f32.mxu0 %v18396_v0 }
 0x3b5   : > { %v1513_v23 = vpop.permute.xlu0 %1512 }
 0x3b6   : > { %v1516_v24 = vsel %vm1514_vm5, %v1511_v17, %v1513_v23  ;;  %v1973_v25 = vpop.permute.xlu1 %1972 }
 0x3b7   : > { %13877 = vmatprep.subr.msk.mxu0 %vm1432_vm2, %v1516_v24  ;;  %v1979_v36 = vsel %vm1978_vm7, %v1973_v25, %v1975_v22  ;;  %v2555_v24 = vld [vmem:[#allocation8 + $0x20] sm:$0xff]  ;;  %v3080_v25 = vld [vmem:[#allocation10] sm:$0xff] }
 0x3b8   : > { %13878 = vmatpush1.msk.msra.mxu0 %vm1432_vm2, %v1515_v27 }
 0x3b9   : > { %13879 = vmatmul.mubr.msk.f32.vlgmr.msra.gmra.mrb[0].mxu0 %vm1428_vm3, %v1413_v26  ;;  %v1606_v28 = vpop.permute.xlu0 %1605 }
 0x3ba   : > { %v1610_v29 = vsel %vm1609_vm6, %v1604_v21, %v1606_v28  ;;  %v1611_v30 = vsel %vm1609_vm6, %v1606_v28, %v1608_v15  ;;  %v1793_v31 = vpop.permute.xlu1 %1792  ;;  %1683 = vmatprep.mubr.f32.mxu0 %v18396_v0 }
 0x3bb   : > { %13880 = vmatprep.subr.msk.mxu0 %vm1432_vm2, %v1611_v30 }
 0x3bc   : > { %13881 = vmatpush1.msk.msra.mxu0 %vm1432_vm2, %v1610_v29 }
 0x3bd   : > { %v1977_v32 = vpop.permute.xlu0 %1976 }
 0x3be   : > { %v1980_v33 = vsel %vm1978_vm7, %v1975_v22, %v1977_v32  ;;  %v2064_v34 = vpop.permute.xlu1 %2063 }
 0x3bf   : > { %13892 = vmatprep.subr.msk.mxu0 %vm1432_vm2, %v1980_v33 }
 0x3c1   : > { %13882 = vmatmul.mubr.msk.f32.vlgmr.msra.gmra.mrb[0].mxu0 %vm1428_vm3, %v1599_v35  ;;  %v1791_v37 = vpop.permute.xlu0 %1790 }
 0x3c2   : > { %13893 = vmatpush1.msk.msra.mxu0 %vm1432_vm2, %v1979_v36  ;;  %v1796_v38 = vsel %vm1794_vm0, %v1791_v37, %v1793_v31  ;;  %2052 = vmatprep.mubr.f32.mxu0 %v18396_v0  ;;  %v2060_v39 = vpop.permute.xlu1 %2059 }
 0x3c3   : > { %13886 = vmatprep.subr.msk.mxu1 %vm1432_vm2, %v1796_v38 }
 0x3c5   : > { %13894 = vmatmul.mubr.msk.f32.vlgmr.msra.gmra.mrb[2].mxu0 %vm1428_vm3, %v1971_v40  ;;  %v2062_v41 = vpop.permute.xlu0 %2061 }
 0x3c6   : > { %v2066_v42 = vsel %vm2065_vm8, %v2060_v39, %v2062_v41  ;;  %v2067_v43 = vsel %vm2065_vm8, %v2062_v41, %v2064_v34  ;;  %v1882_v44 = vpop.permute.xlu1 %1881  ;;  %2139 = vmatprep.mubr.f32.mxu0 %v18396_v0  ;;  %v2271_v34 = vld [vmem:[#allocation8 + $0x18] sm:$0xff] }
 0x3c7   : > { %13895 = vmatprep.subr.msk.mxu0 %vm1432_vm2, %v2067_v43  ;;  %v2269_v43 = vld [vmem:[#allocation8] sm:$0xff] }
 0x3c8   : > { %13896 = vmatpush1.msk.msra.mxu0 %vm1432_vm2, %v2066_v42 }
 0x3c9   : > { %v1789_v45 = vpop.permute.xlu0 %1788 }
 0x3ca   : > { %v1795_v47 = vsel %vm1794_vm0, %v1789_v45, %v1791_v37  ;;  %v2153_v48 = vpop.permute.xlu1 %2152 }
 0x3cb   : > { %13887 = vmatpush1.msk.msra.mxu1 %vm1432_vm2, %v1795_v47 }
 0x3cc   : > { %13888 = vmatmul.mubr.msk.f32.vlgmr.msra.gmra.mrb[0].mxu1 %vm1428_vm3, %v1707_v46 }
 0x3cd   : > { %13897 = vmatmul.mubr.msk.f32.vlgmr.msra.gmra.mrb[2].mxu0 %vm1428_vm3, %v1969_v49  ;;  %v1880_v50 = vpop.permute.xlu0 %1879  ;;  %1957 = vmatprep.mubr.f32.mxu1 %v18396_v0  ;;  %v2448_v49 = vld [vmem:[#allocation8 + $0x30] sm:$0xff] }
 0x3ce   : > { %v1885_v51 = vsel %vm1883_vm9, %v1880_v50, %v1882_v44  ;;  %2228 = vmatprep.mubr.f32.mxu0 %v18396_v0  ;;  %v2149_v52 = vpop.permute.xlu1 %2148 }
 0x3cf   : > { %13889 = vmatprep.subr.msk.mxu1 %vm1432_vm2, %v1885_v51 }
 0x3d1   : > { %v2151_v53 = vpop.permute.xlu0 %2150 }
 0x3d2   : > { %v2155_v54 = vsel %vm2154_vm10, %v2149_v52, %v2151_v53  ;;  %v2156_v55 = vsel %vm2154_vm10, %v2151_v53, %v2153_v48 }
 0x3d3   : > { %13898 = vmatprep.subr.msk.mxu0 %vm1432_vm2, %v2156_v55 }
 0x3d4   : > { %13899 = vmatpush1.msk.msra.mxu0 %vm1432_vm2, %v2155_v54  ;;  %v2807_v54 = vld [vmem:[#allocation8 + $0x28] sm:$0xff] }
 0x3d5   : > { %13900 = vmatmul.mubr.msk.f32.vlgmr.msra.gmra.mrb[2].mxu0 %vm1428_vm3, %v2147_v56  ;;  %v1878_v57 = vpop.permute.xlu0 %1877 }
 0x3d6   : > { %v1884_v59 = vsel %vm1883_vm9, %v1878_v57, %v1880_v50  ;;  %2623 = vmatprep.mubr.f32.mxu0 %v18396_v0 }
 0x3d7   : > { %13890 = vmatpush1.msk.msra.mxu1 %vm1432_vm2, %v1884_v59 }
 0x3d8   : > { %13891 = vmatmul.mubr.msk.f32.vlgmr.msra.gmra.mrb[0].mxu1 %vm1428_vm3, %v1876_v58  ;;  %v2553_v58 = vld [vmem:[#allocation8 + $0x8] sm:$0xff] }
 0x3d9   : > { %2353 = vmatprep.mubr.f32.mxu1 %v18396_v0 }
 0x3e6   : > { %v2258_v19 = vpop.permute.xlu0 %2257 }
 0x3ea   : > { %v2276_v26 = vpop.permute.xlu0 %2275 }
 0x494   : > { %v1685_v60 = vpop.f32.mrb[0].mxu0 }
 0x495   : > { %v1687_v61 = vpop.f32.mrb[1].mxu0  ;;  %v1704_v11 = vmul.f32 %v1697_v5, %v1685_v60 }
 0x496   : > { %v1705_v12 = vmul.f32 %v1701_v6, %v1687_v61  ;;  %v2715_v6 = vld [vmem:[#allocation8 + $0x38] sm:$0xff] }
 0x4a8   : > { %v2230_v7 = vpop.f32.mrb[2].mxu0 }
 0x4a9   : > { %v2232_v9 = vpop.f32.mrb[3].mxu0  ;;  %v2250_v14 = vmul.f32 %v2243_v8, %v2230_v7 }
 0x4aa   : > { %v2251_v17 = vmul.f32 %v2247_v10, %v2232_v9 }
 0x4ab   : > { %v1959_v13 = vpop.f32.mrb[0].mxu1 }
 0x4ac   : > { %v1966_v15 = vadd.f32 %v1959_v13, %v1704_v11  ;;  %v1961_v16 = vpop.f32.mrb[1].mxu1  ;;  %v2977_v11 = vld [vmem:[#allocation8 + $0x40] sm:$0xff] }
 0x4ad   : > { %v1967_v18 = vadd.f32 %v1961_v16, %v1705_v12 }
 0x4ae   : > { %v2252_v20 = vadd.f32 %v2250_v14, %v1966_v15  ;;  %v2538_v15 = vld [vmem:[#allocation7] ss:$2 sm:$0x3] }
 0x4af   : > { %v2253_v21 = vadd.f32 %v2251_v17, %v1967_v18  ;;  %v2543_v16 = vrot.slane %v2538_v15, %v19137_v1  ;;  %v2547_v17 = vrot.slane %v2538_v15, %v19139_v3 }
 0x4b0   : > { %v19145_v22 = vadd.f32 %v2258_v19, %v2252_v20 }
 0x4b1   : > { %v19147_v23 = vadd.f32 %v2258_v19, %v2253_v21 }
 0x4b2   : > { %2452 = vrot.lane.b32.xlu0 %v19145_v22, %s18399_s10  ;;  %2277 = vrot.lane.b32.xlu1 %v19145_v22, %s18397_s26 }
 0x4b3   : > { %2559 = vmatprep.subr.mxu0 %v19147_v23 }
 0x4b4   : > { %2560 = vmatpush1.msra.mxu0 %v19145_v22 }
 0x4b5   : > { %13904 = vmatmul.mubr.msk.f32.vlgmr.msra.gmra.mrb[4].mxu0 %vm2285_vm11, %v2555_v24 }
 0x4b6   : > { %2362 = vrot.lane.b32.xlu1 %v19145_v22, %s18398_s2  ;;  %2364 = vrot.lane.b32.xlu0 %v19147_v23, %s18398_s2 }
 0x4b7   : > { %2707 = vmatprep.mubr.f32.mxu0 %v18396_v0 }
 0x4ba   : > { %2812 = vrot.lane.b32.xlu0 %v18396_v0, %s18400_s9  ;;  %2279 = vrot.lane.b32.xlu1 %v19147_v23, %s18397_s26 }
 0x4be   : > { %2454 = vrot.lane.b32.xlu0 %v19147_v23, %s18399_s10  ;;  %2360 = vrot.lane.b32.xlu1 %v18396_v0, %s18398_s2 }
 0x4c2   : > { %2632 = vrot.lane.b32.xlu0 %v19145_v22, %s18401_s3  ;;  %2456 = vrot.lane.b32.xlu1 %v18396_v0, %s18399_s10 }
 0x4c6   : > { %2894 = vrot.lane.b32.xlu0 %v19145_v22, %s18402_s12  ;;  %2808 = vrot.lane.b32.xlu1 %v19145_v22, %s18400_s9 }
 0x4ca   : > { %2630 = vrot.lane.b32.xlu0 %v18396_v0, %s18401_s3  ;;  %2892 = vrot.lane.b32.xlu1 %v18396_v0, %s18402_s12 }
 0x4ce   : > { %2718 = vrot.lane.b32.xlu0 %v19147_v23, %s18403_s23  ;;  %2810 = vrot.lane.b32.xlu1 %v19147_v23, %s18400_s9 }
 0x4d2   : > { %2980 = vrot.lane.b32.xlu0 %v19147_v23, %s18404_s13  ;;  %2634 = vrot.lane.b32.xlu1 %v19147_v23, %s18401_s3 }
 0x4d6   : > { %2716 = vrot.lane.b32.xlu0 %v19145_v22, %s18403_s23  ;;  %2896 = vrot.lane.b32.xlu1 %v19147_v23, %s18402_s12 }
 0x4da   : > { %3083 = vperm.xlu0 %16890, %v3080_v25   ;;  %2720 = vrot.lane.b32.xlu1 %v18396_v0, %s18403_s23  ;;  %v3064_v25 = vld [vmem:[#allocation7 + $0x1] ss:$2 sm:$0x3] }
 0x4de   : > { %2982 = vrot.lane.b32.xlu1 %v18396_v0, %s18404_s13 }
 0x4e2   : > { %2978 = vrot.lane.b32.xlu1 %v19145_v22, %s18404_s13 }
 0x4e6   : > { %3113 = vrot.lane.b32.xlu1 %v18396_v0, %s18397_s26 }
 0x524   : > { %v2453_v27 = vpop.permute.xlu0 %2452  ;;  %v2278_v28 = vpop.permute.xlu1 %2277 }
 0x525   : > { %v2281_v35 = vsel %vm1425_vm4, %v2276_v26, %v2278_v28 }
 0x528   : > { %v2363_v29 = vpop.permute.xlu1 %2362  ;;  %v2365_v30 = vpop.permute.xlu0 %2364 }
 0x529   : > { %v2367_v36 = vsel %vm1514_vm5, %v2363_v29, %v2365_v30 }
 0x52c   : > { %v2813_v31 = vpop.permute.xlu0 %2812  ;;  %v2280_v32 = vpop.permute.xlu1 %2279 }
 0x52d   : > { %v2282_v33 = vsel %vm1425_vm4, %v2278_v28, %v2280_v32  ;;  %v3073_v28 = vrot.slane %v3064_v25, %v19139_v3 }
 0x52e   : > { %2289 = vmatprep.subr.mxu1 %v2282_v33 }
 0x52f   : > { %2290 = vmatpush1.msra.mxu1 %v2281_v35 }
 0x530   : > { %v2455_v37 = vpop.permute.xlu0 %2454  ;;  %13901 = vmatmul.mubr.msk.f32.vlgmr.msra.gmra.mrb[2].mxu1 %vm2285_vm11, %v2271_v34  ;;  %2373 = vmatprep.subr.mxu1 %v2367_v36  ;;  %v2361_v38 = vpop.permute.xlu1 %2360 }
 0x531   : > { %v2366_v39 = vsel %vm1514_vm5, %v2361_v38, %v2363_v29  ;;  %2437 = vmatprep.mubr.f32.mxu1 %v18396_v0  ;;  %v2458_v45 = vsel %vm1609_vm6, %v2453_v27, %v2455_v37  ;;  %v3069_v27 = vrot.slane %v3064_v25, %v19137_v1 }
 0x532   : > { %2374 = vmatpush1.msra.mxu1 %v2366_v39 }
 0x534   : > { %v2633_v40 = vpop.permute.xlu0 %2632  ;;  %v2457_v41 = vpop.permute.xlu1 %2456 }
 0x535   : > { %v2459_v42 = vsel %vm1609_vm6, %v2455_v37, %v2457_v41 }
 0x536   : > { %2465 = vmatprep.subr.mxu1 %v2459_v42 }
 0x538   : > { %v2895_v44 = vpop.permute.xlu0 %2894  ;;  %13902 = vmatmul.mubr.msk.f32.vlgmr.msra.gmra.mrb[2].mxu1 %vm2285_vm11, %v2269_v43  ;;  %v2809_v46 = vpop.permute.xlu1 %2808 }
 0x539   : > { %2466 = vmatpush1.msra.mxu1 %v2458_v45  ;;  %2529 = vmatprep.mubr.f32.mxu1 %v18396_v0 }
 0x53c   : > { %v2631_v47 = vpop.permute.xlu0 %2630  ;;  %v2893_v48 = vpop.permute.xlu1 %2892 }
 0x53d   : > { %v2636_v59 = vsel %vm1794_vm0, %v2631_v47, %v2633_v40  ;;  %v2898_v63 = vsel %vm2065_vm8, %v2893_v48, %v2895_v44  ;;  %v3392_v48 = vld [vmem:[#allocation11 + $0x20] sm:$0xff] }
 0x540   : > { %v2719_v50 = vpop.permute.xlu0 %2718  ;;  %13903 = vmatmul.mubr.msk.f32.vlgmr.msra.gmra.mrb[2].mxu1 %vm2285_vm11, %v2448_v49  ;;  %v2811_v51 = vpop.permute.xlu1 %2810  ;;  %v3948_v49 = vld [vmem:[#allocation14] sm:$0xff] }
 0x541   : > { %v2815_v52 = vsel %vm1978_vm7, %v2811_v51, %v2813_v31  ;;  %v2814_v53 = vsel %vm1978_vm7, %v2809_v46, %v2811_v51  ;;  %2885 = vmatprep.mubr.f32.mxu1 %v18396_v0 }
 0x542   : > { %2821 = vmatprep.subr.mxu1 %v2815_v52 }
 0x543   : > { %2822 = vmatpush1.msra.mxu1 %v2814_v53 }
 0x544   : > { %v2635_v55 = vpop.permute.xlu1 %2634  ;;  %13907 = vmatmul.mubr.msk.f32.vlgmr.msra.gmra.mrb[4].mxu1 %vm2285_vm11, %v2807_v54  ;;  %v2981_v56 = vpop.permute.xlu0 %2980 }
 0x545   : > { %v2637_v57 = vsel %vm1794_vm0, %v2633_v40, %v2635_v55  ;;  %2969 = vmatprep.mubr.f32.mxu1 %v18396_v0 }
 0x546   : > { %2643 = vmatprep.subr.mxu0 %v2637_v57  ;;  %v3109_v57 = vld [vmem:[#allocation11 + $0x18] sm:$0xff] }
 0x547   : > { %2644 = vmatpush1.msra.mxu0 %v2636_v59 }
 0x548   : > { %v2897_v60 = vpop.permute.xlu1 %2896  ;;  %13905 = vmatmul.mubr.msk.f32.vlgmr.msra.gmra.mrb[4].mxu0 %vm2285_vm11, %v2553_v58  ;;  %v2717_v2 = vpop.permute.xlu0 %2716 }
 0x549   : > { %v2899_v61 = vsel %vm2065_vm8, %v2895_v44, %v2897_v60  ;;  %2793 = vmatprep.mubr.f32.mxu0 %v18396_v0  ;;  %v2722_v7 = vsel %vm1883_vm9, %v2717_v2, %v2719_v50 }
 0x54a   : > { %2905 = vmatprep.subr.mxu1 %v2899_v61 }
 0x54b   : > { %2906 = vmatpush1.msra.mxu1 %v2898_v63 }
 0x54c   : > { %v2721_v4 = vpop.permute.xlu1 %2720  ;;  %13908 = vmatmul.mubr.msk.f32.vlgmr.msra.gmra.mrb[4].mxu1 %vm2285_vm11, %v2805_v62 }
 0x54d   : > { %v2723_v5 = vsel %vm1883_vm9, %v2719_v50, %v2721_v4  ;;  %3055 = vmatprep.mubr.f32.mxu1 %v18396_v0  ;;  %v3940_v50 = vld [vmem:[#allocation13] sm:$0xff]  ;;  %v3107_v4 = vld [vmem:[#allocation11] sm:$0xff] }
 0x54e   : > { %2729 = vmatprep.subr.mxu0 %v2723_v5 }
 0x54f   : > { %2730 = vmatpush1.msra.mxu0 %v2722_v7 }
 0x550   : > { %v2983_v8 = vpop.permute.xlu1 %2982  ;;  %13906 = vmatmul.mubr.msk.f32.vlgmr.msra.gmra.mrb[4].mxu0 %vm2285_vm11, %v2715_v6 }
 0x551   : > { %v2985_v9 = vsel %vm2154_vm10, %v2981_v56, %v2983_v8  ;;  %3190 = vmatprep.mubr.f32.mxu0 %v18396_v0 }
 0x552   : > { %2991 = vmatprep.subr.mxu1 %v2985_v9 }
 0x554   : > { %v2979_v10 = vpop.permute.xlu1 %2978 }
 0x555   : > { %v2984_v12 = vsel %vm2154_vm10, %v2979_v10, %v2981_v56 }
 0x556   : > { %2992 = vmatpush1.msra.mxu1 %v2984_v12 }
 0x557   : > { %13909 = vmatmul.mubr.msk.f32.vlgmr.msra.gmra.mrb[4].mxu1 %vm2285_vm11, %v2977_v11  ;;  %v3285_v11 = vld [vmem:[#allocation11 + $0x30] sm:$0xff] }
 0x558   : > { %3460 = vmatprep.mubr.f32.mxu1 %v18396_v0  ;;  %v3114_v51 = vpop.permute.xlu1 %3113 }
 0x559   : > { %v3084_v34 = vpop.permute.xlu0 %3083 }
 0x613   : > { %v2531_v13 = vpop.f32.mrb[2].mxu1 }
 0x614   : > { %v2533_v14 = vpop.f32.mrb[3].mxu1  ;;  %v2550_v18 = vmul.f32 %v2543_v16, %v2531_v13  ;;  %v3644_v16 = vld [vmem:[#allocation11 + $0x28] sm:$0xff] }
 0x615   : > { %v2551_v19 = vmul.f32 %v2547_v17, %v2533_v14 }
 0x623   : > { %v2795_v20 = vpop.f32.mrb[4].mxu0 }
 0x624   : > { %v2802_v21 = vadd.f32 %v2795_v20, %v2550_v18  ;;  %v2797_v24 = vpop.f32.mrb[5].mxu0 }
 0x625   : > { %v2803_v26 = vadd.f32 %v2797_v24, %v2551_v19 }
 0x62a   : > { %v3057_v29 = vpop.f32.mrb[4].mxu1 }
 0x62b   : > { %v3076_v30 = vmul.f32 %v3069_v27, %v3057_v29  ;;  %v3059_v31 = vpop.f32.mrb[5].mxu1  ;;  %v3642_v27 = vld [vmem:[#allocation11 + $0x10] sm:$0xff] }
 0x62c   : > { %v3077_v32 = vmul.f32 %v3073_v28, %v3059_v31 }
 0x62d   : > { %v3078_v33 = vadd.f32 %v3076_v30, %v2802_v21  ;;  %v3390_v21 = vld [vmem:[#allocation11 + $0x8] sm:$0xff] }
 0x62e   : > { %v3079_v35 = vadd.f32 %v3077_v32, %v2803_v26 }
 0x62f   : > { %v3086_v36 = vadd.f32 %v3084_v34, %v3078_v33 }
 0x630   : > { %v3087_v37 = vadd.f32 %v3084_v34, %v3079_v35  ;;  %v3552_v34 = vld [vmem:[#allocation11 + $0x38] sm:$0xff] }
 0x631   : > { %v13910_v38 = vmul.f32 -1.442695, %v3086_v36 }
 0x632   : > { %v13911_v39 = vmul.f32 -1.442695, %v3087_v37 }
 0x633   : > { %17433 = vpow2.f32 %v13910_v38  ;;  %v3814_v38 = vld [vmem:[#allocation11 + $0x40] sm:$0xff] }
 0x634   : > { %17435 = vpow2.f32 %v13911_v39 }
 0x63d   : > { %v17434_v40 = vpop.eup %17433 }
 0x63e   : > { %v17436_v41 = vpop.eup %17435  ;;  %v3094_v42 = vadd.f32 1.0, %v17434_v40 }
 0x63f   : > { %v3095_v43 = vadd.f32 1.0, %v17436_v41 }
 0x640   : > { %17437 = vrcp.f32 %v3094_v42  ;;  %v3375_v42 = vld [vmem:[#allocation7] ss:$2 sm:$0x3] }
 0x641   : > { %17439 = vrcp.f32 %v3095_v43  ;;  %v3380_v43 = vrot.slane %v3375_v42, %v19137_v1 }
 0x64a   : > { %v17438_v44 = vpop.eup %17437 }
 0x64b   : > { %v17440_v45 = vpop.eup %17439  ;;  %v3100_v46 = vmul.f32 %v17438_v44, %v3086_v36  ;;  %v3384_v44 = vrot.slane %v3375_v42, %v19139_v3 }
 0x64c   : > { %v3101_v47 = vmul.f32 %v17440_v45, %v3087_v37  ;;  %v3901_v45 = vld [vmem:[#allocation7 + $0x1] ss:$2 sm:$0x3] }
 0x64d   : > { %3199 = vrot.lane.b32.xlu0 %v3100_v46, %s18398_s2  ;;  %3115 = vrot.lane.b32.xlu1 %v3100_v46, %s18397_s26 }
 0x64e   : > { %3396 = vmatprep.subr.mxu1 %v3101_v47 }
 0x64f   : > { %3397 = vmatpush1.msra.mxu1 %v3100_v46 }
 0x650   : > { %13915 = vmatmul.mubr.msk.f32.vlgmr.msra.gmra.mrb[6].mxu1 %vm2285_vm11, %v3392_v48 }
 0x651   : > { %3289 = vrot.lane.b32.xlu1 %v3100_v46, %s18399_s10  ;;  %3117 = vrot.lane.b32.xlu0 %v3101_v47, %s18397_s26 }
 0x652   : > { %3544 = vmatprep.mubr.f32.mxu1 %v18396_v0 }
 0x655   : > { %3201 = vrot.lane.b32.xlu1 %v3101_v47, %s18398_s2  ;;  %3197 = vrot.lane.b32.xlu0 %v18396_v0, %s18398_s2 }
 0x659   : > { %3649 = vrot.lane.b32.xlu1 %v18396_v0, %s18400_s9  ;;  %3293 = vrot.lane.b32.xlu0 %v18396_v0, %s18399_s10 }
 0x65d   : > { %3291 = vrot.lane.b32.xlu1 %v3101_v47, %s18399_s10  ;;  %3645 = vrot.lane.b32.xlu0 %v3100_v46, %s18400_s9 }
 0x661   : > { %3469 = vrot.lane.b32.xlu1 %v3100_v46, %s18401_s3  ;;  %3729 = vrot.lane.b32.xlu0 %v18396_v0, %s18402_s12 }
 0x665   : > { %3731 = vrot.lane.b32.xlu1 %v3100_v46, %s18402_s12  ;;  %3647 = vrot.lane.b32.xlu0 %v3101_v47, %s18400_s9 }
 0x669   : > { %3467 = vrot.lane.b32.xlu1 %v18396_v0, %s18401_s3  ;;  %3471 = vrot.lane.b32.xlu0 %v3101_v47, %s18401_s3 }
 0x66d   : > { %3555 = vrot.lane.b32.xlu1 %v3101_v47, %s18403_s23  ;;  %3733 = vrot.lane.b32.xlu0 %v3101_v47, %s18402_s12 }
 0x671   : > { %3817 = vrot.lane.b32.xlu1 %v3101_v47, %s18404_s13  ;;  %3557 = vrot.lane.b32.xlu0 %v18396_v0, %s18403_s23 }
 0x675   : > { %3553 = vrot.lane.b32.xlu1 %v3100_v46, %s18403_s23  ;;  %3819 = vrot.lane.b32.xlu0 %v18396_v0, %s18404_s13 }
 0x679   : > { %3815 = vrot.lane.b32.xlu0 %v3100_v46, %s18404_s13  ;;  %3943 = vperm.xlu1 %16891, %v3940_v50  }
 0x67d   : > { %3951 = vperm.xlu0 %16890, %v3948_v49   ;;  %3969 = vrot.lane.b32.xlu1 %v18396_v0, %s18397_s26 }
 0x6bf   : > { %v3200_v52 = vpop.permute.xlu0 %3199  ;;  %v3116_v53 = vpop.permute.xlu1 %3115 }
 0x6c0   : > { %v3119_v58 = vsel %vm1425_vm4, %v3114_v51, %v3116_v53  ;;  %v3906_v51 = vrot.slane %v3901_v45, %v19137_v1 }
 0x6c3   : > { %v3290_v54 = vpop.permute.xlu1 %3289  ;;  %v3118_v55 = vpop.permute.xlu0 %3117 }
 0x6c4   : > { %v3120_v56 = vsel %vm1425_vm4, %v3116_v53, %v3118_v55  ;;  %v3910_v53 = vrot.slane %v3901_v45, %v19139_v3  ;;  %v3963_v45 = vld [vmem:[#allocation16] sm:$0xf] }
 0x6c5   : > { %3126 = vmatprep.subr.mxu0 %v3120_v56 }
 0x6c6   : > { %3127 = vmatpush1.msra.mxu0 %v3119_v58 }
 0x6c7   : > { %v3202_v59 = vpop.permute.xlu1 %3201  ;;  %13912 = vmatmul.mubr.msk.f32.vlgmr.msra.gmra.mrb[6].mxu0 %vm2285_vm11, %v3109_v57  ;;  %v3198_v60 = vpop.permute.xlu0 %3197 }
 0x6c8   : > { %v3203_v61 = vsel %vm1514_vm5, %v3198_v60, %v3200_v52  ;;  %v3204_v62 = vsel %vm1514_vm5, %v3200_v52, %v3202_v59  ;;  %3274 = vmatprep.mubr.f32.mxu0 %v18396_v0 }
 0x6c9   : > { %3210 = vmatprep.subr.mxu0 %v3204_v62 }
 0x6ca   : > { %3211 = vmatpush1.msra.mxu0 %v3203_v61 }
 0x6cb   : > { %v3650_v63 = vpop.permute.xlu1 %3649  ;;  %v3294_v2 = vpop.permute.xlu0 %3293 }
 0x6cf   : > { %v3292_v5 = vpop.permute.xlu1 %3291  ;;  %13913 = vmatmul.mubr.msk.f32.vlgmr.msra.gmra.mrb[6].mxu0 %vm2285_vm11, %v3107_v4  ;;  %v3646_v6 = vpop.permute.xlu0 %3645 }
 0x6d0   : > { %v3296_v7 = vsel %vm1609_vm6, %v3292_v5, %v3294_v2  ;;  %v3295_v8 = vsel %vm1609_vm6, %v3290_v54, %v3292_v5  ;;  %3366 = vmatprep.mubr.f32.mxu0 %v18396_v0 }
 0x6d1   : > { %3302 = vmatprep.subr.mxu0 %v3296_v7 }
 0x6d2   : > { %3303 = vmatpush1.msra.mxu0 %v3295_v8 }
 0x6d3   : > { %v3470_v9 = vpop.permute.xlu1 %3469  ;;  %v3730_v10 = vpop.permute.xlu0 %3729 }
 0x6d7   : > { %v3732_v12 = vpop.permute.xlu1 %3731  ;;  %13914 = vmatmul.mubr.msk.f32.vlgmr.msra.gmra.mrb[6].mxu0 %vm2285_vm11, %v3285_v11  ;;  %v3648_v13 = vpop.permute.xlu0 %3647 }
 0x6d8   : > { %v3652_v14 = vsel %vm1978_vm7, %v3648_v13, %v3650_v63  ;;  %v3651_v15 = vsel %vm1978_vm7, %v3646_v6, %v3648_v13  ;;  %3722 = vmatprep.mubr.f32.mxu0 %v18396_v0  ;;  %v3735_v28 = vsel %vm2065_vm8, %v3730_v10, %v3732_v12 }
 0x6d9   : > { %3658 = vmatprep.subr.mxu0 %v3652_v14 }
 0x6da   : > { %3659 = vmatpush1.msra.mxu0 %v3651_v15 }
 0x6db   : > { %v3468_v17 = vpop.permute.xlu1 %3467  ;;  %v3472_v18 = vpop.permute.xlu0 %3471  ;;  %13918 = vmatmul.mubr.msk.f32.vlgmr.msra.gmra.mrb[8].mxu0 %vm2285_vm11, %v3644_v16 }
 0x6dc   : > { %v3473_v19 = vsel %vm1794_vm0, %v3468_v17, %v3470_v9  ;;  %v3474_v20 = vsel %vm1794_vm0, %v3470_v9, %v3472_v18  ;;  %3806 = vmatprep.mubr.f32.mxu0 %v18396_v0 }
 0x6dd   : > { %3480 = vmatprep.subr.mxu1 %v3474_v20 }
 0x6de   : > { %3481 = vmatpush1.msra.mxu1 %v3473_v19 }
 0x6df   : > { %v3556_v24 = vpop.permute.xlu1 %3555  ;;  %v3734_v25 = vpop.permute.xlu0 %3733  ;;  %13916 = vmatmul.mubr.msk.f32.vlgmr.msra.gmra.mrb[6].mxu1 %vm2285_vm11, %v3390_v21 }
 0x6e0   : > { %v3736_v26 = vsel %vm2065_vm8, %v3732_v12, %v3734_v25  ;;  %3630 = vmatprep.mubr.f32.mxu1 %v18396_v0 }
 0x6e1   : > { %3742 = vmatprep.subr.mxu0 %v3736_v26 }
 0x6e2   : > { %3743 = vmatpush1.msra.mxu0 %v3735_v28 }
 0x6e3   : > { %v3818_v29 = vpop.permute.xlu1 %3817  ;;  %v3558_v30 = vpop.permute.xlu0 %3557  ;;  %13919 = vmatmul.mubr.msk.f32.vlgmr.msra.gmra.mrb[8].mxu0 %vm2285_vm11, %v3642_v27 }
 0x6e4   : > { %v3560_v31 = vsel %vm1883_vm9, %v3556_v24, %v3558_v30  ;;  %3892 = vmatprep.mubr.f32.mxu0 %v18396_v0 }
 0x6e5   : > { %3566 = vmatprep.subr.mxu1 %v3560_v31 }
 0x6e7   : > { %v3554_v32 = vpop.permute.xlu1 %3553  ;;  %v3820_v33 = vpop.permute.xlu0 %3819 }
 0x6e8   : > { %v3559_v35 = vsel %vm1883_vm9, %v3554_v32, %v3556_v24  ;;  %v3822_v36 = vsel %vm2154_vm10, %v3818_v29, %v3820_v33 }
 0x6e9   : > { %3567 = vmatpush1.msra.mxu1 %v3559_v35  ;;  %3828 = vmatprep.subr.mxu0 %v3822_v36 }
 0x6ea   : > { %13917 = vmatmul.mubr.msk.f32.vlgmr.msra.gmra.mrb[6].mxu1 %vm2285_vm11, %v3552_v34 }
 0x6eb   : > { %v3816_v37 = vpop.permute.xlu0 %3815  ;;  %4046 = vmatprep.mubr.f32.mxu1 %v18396_v0 }
 0x6ec   : > { %v3821_v39 = vsel %vm2154_vm10, %v3816_v37, %v3818_v29  ;;  %v3965_v37 = vld [vmem:[#allocation16 + $0xc] sm:$0xf] }
 0x6ed   : > { %3829 = vmatpush1.msra.mxu0 %v3821_v39 }
 0x6ee   : > { %13920 = vmatmul.mubr.msk.f32.vlgmr.msra.gmra.mrb[8].mxu0 %vm2285_vm11, %v3814_v38 }
 0x6ef   : > { %4316 = vmatprep.mubr.f32.mxu0 %v18396_v0 }
 0x6f8   : > { %v3944_v18 = vpop.permute.xlu1 %3943 }
 0x6fc   : > { %v3952_v25 = vpop.permute.xlu0 %3951  ;;  %v3970_v31 = vpop.permute.xlu1 %3969 }
 0x7aa   : > { %v3368_v40 = vpop.f32.mrb[6].mxu0 }
 0x7ab   : > { %v3370_v41 = vpop.f32.mrb[7].mxu0  ;;  %v3387_v46 = vmul.f32 %v3380_v43, %v3368_v40 }
 0x7ac   : > { %v3388_v47 = vmul.f32 %v3384_v44, %v3370_v41 }
 0x7bd   : > { %v3632_v48 = vpop.f32.mrb[6].mxu1 }
 0x7be   : > { %v3639_v49 = vadd.f32 %v3632_v48, %v3387_v46  ;;  %v3634_v50 = vpop.f32.mrb[7].mxu1 }
 0x7bf   : > { %v3640_v52 = vadd.f32 %v3634_v50, %v3388_v47 }
 0x7c1   : > { %v3894_v54 = vpop.f32.mrb[8].mxu0 }
 0x7c2   : > { %v3913_v55 = vmul.f32 %v3906_v51, %v3894_v54  ;;  %v3896_v56 = vpop.f32.mrb[9].mxu0 }
 0x7c3   : > { %v3914_v57 = vmul.f32 %v3910_v53, %v3896_v56 }
 0x7c4   : > { %v3915_v58 = vadd.f32 %v3913_v55, %v3639_v49 }
 0x7c5   : > { %v3916_v59 = vadd.f32 %v3914_v57, %v3640_v52  ;;  %v4141_v52 = vld [vmem:[#allocation16 + $0x18] sm:$0xf]  ;;  %v4500_v57 = vld [vmem:[#allocation16 + $0x14] sm:$0xf] }
 0x7c6   : > { %v3917_v60 = vmul.f32 %v3915_v58, %v3915_v58 }
 0x7c7   : > { %v3918_v61 = vmul.f32 %v3916_v59, %v3916_v59 }
 0x7c8   : > { %v3919_v62 = vrot.slane %v3917_v60, 4 }
 0x7c9   : > { %v3925_v63 = vrot.slane %v3918_v61, 4 }
 0x7ca   : > { %v3920_v2 = vadd.f32 %v3919_v62, %v3917_v60  ;;  %v4246_v62 = vld [vmem:[#allocation16 + $0x4] sm:$0xf] }
 0x7cb   : > { %v3926_v4 = vadd.f32 %v3925_v63, %v3918_v61 }
 0x7cc   : > { %v3921_v5 = vrot.slane %v3920_v2, 2 }
 0x7cd   : > { %v3927_v6 = vrot.slane %v3926_v4, 2 }
 0x7ce   : > { %v3922_v7 = vadd.f32 %v3921_v5, %v3920_v2  ;;  %v4498_v5 = vld [vmem:[#allocation16 + $0x8] sm:$0xf] }
 0x7cf   : > { %v3928_v8 = vadd.f32 %v3927_v6, %v3926_v4 }
 0x7d0   : > { %v3923_v9 = vrot.slane %v3922_v7, 1 }
 0x7d1   : > { %v3929_v10 = vrot.slane %v3928_v8, 1 }
 0x7d2   : > { %v3924_v11 = vadd.f32 %v3923_v9, %v3922_v7 }
 0x7d3   : > { %v3930_v12 = vadd.f32 %v3929_v10, %v3928_v8  ;;  %v4797_v10 = vld [vmem:[#allocation19 + $0x80] sm:$0xff] }
 0x7d4   : > { %v3932_v13 = vmul.f32 0.125, %v3924_v11  ;;  %v4798_v11 = vld [vmem:[#allocation19 + $0x88] sm:$0xff] }
 0x7d5   : > { %v3933_v14 = vmul.f32 0.125, %v3930_v12  ;;  %v4781_v12 = vld [vmem:[#allocation19] sm:$0xff] }
 0x7d6   : > { %v3934_v15 = vadd.f32 1e-05, %v3932_v13  ;;  %v4782_v13 = vld [vmem:[#allocation19 + $0x8] sm:$0xff] }
 0x7d7   : > { %v3935_v16 = vadd.f32 1e-05, %v3933_v14 }
 0x7d8   : > { %17441 = vrsqrt.f32 %v3934_v15 }
 0x7d9   : > { %17443 = vrsqrt.f32 %v3935_v16  ;;  %v4408_v16 = vld [vmem:[#allocation16 + $0x1c] sm:$0xf] }
 0x7e2   : > { %v17442_v17 = vpop.eup %17441 }
 0x7e3   : > { %v17444_v19 = vpop.eup %17443  ;;  %v3938_v20 = vmul.f32 %v17442_v17, %v3915_v58  ;;  %v4799_v17 = vld [vmem:[#allocation19 + $0x90] sm:$0xff] }
 0x7e4   : > { %v3939_v21 = vmul.f32 %v17444_v19, %v3916_v59 }
 0x7e5   : > { %v3946_v24 = vmul.f32 %v3944_v18, %v3938_v20 }
 0x7e6   : > { %v3947_v26 = vmul.f32 %v3944_v18, %v3939_v21  ;;  %v4800_v18 = vld [vmem:[#allocation19 + $0x98] sm:$0xff]  ;;  %v15681_v21 = vpack.c.bf16 %v4798_v11, %v4797_v10  ;;  %v5124_v10 = vld [vmem:[#allocation19 + $0x108] sm:$0xff] }
 0x7e7   : > { %v3954_v27 = vadd.f32 %v3952_v25, %v3946_v24  ;;  %v15683_v24 = vpack.c.bf16 %v4782_v13, %v4781_v12  ;;  %v5141_v12 = vld [vmem:[#allocation19 + $0x190] sm:$0xff]  ;;  %v5142_v13 = vld [vmem:[#allocation19 + $0x198] sm:$0xff] }
 0x7e8   : > { %v3955_v28 = vadd.f32 %v3952_v25, %v3947_v26  ;;  %v15685_v25 = vpack.c.bf16 %v4800_v18, %v4799_v17  ;;  %v5143_v17 = vld [vmem:[#allocation19 + $0x1a0] sm:$0xff] }
 0x7e9   : > { %v19308_v29 = vadd.f32 %v3954_v27, %v19145_v22  ;;  %v4248_v22 = vld [vmem:[#allocation16 + $0x10] sm:$0xf]  ;;  %v4670_v27 = vld [vmem:[#allocation16 + $0x20] sm:$0xf] }
 0x7ea   : > { %v19311_v30 = vadd.f32 %v3955_v28, %v19147_v23  ;;  %v19345_v23 = vld [vmem:[#allocation2 + $0x40] sm:$0xff]  ;;  %v4783_v28 = vld [vmem:[#allocation19 + $0x10] sm:$0xff] }
 0x7eb   : > { %3958 = vst [vmem:[#allocation2 + $0x8] sm:$0xff] %v19308_v29  ;;  %4055 = vrot.lane.b32.xlu0 %v19308_v29, %s18398_s2  ;;  %3971 = vrot.lane.b32.xlu1 %v19308_v29, %s18397_s26 }
 0x7ec   : > { %3959 = vst [vmem:[#allocation2 + $0x10] sm:$0xff] %v19311_v30  ;;  %4252 = vmatprep.subr.mxu0 %v19311_v30 }
 0x7ed   : > { %4253 = vmatpush1.msra.mxu0 %v19308_v29  ;;  %6165 = vst.msk [vmem:[#allocation2 + $0x10] sm:$0xff] %vm6164_vm1, %v18396_v0 }
 0x7ee   : > { %10203 = vst.msk [vmem:[#allocation2 + $0x10] sm:$0xff] %vm1794_vm0, %v18396_v0  ;;  %13924 = vmatmul.mubr.msk.f32.vlgmr.msra.gmra.mrb[10].mxu0 %vm2285_vm11, %v4248_v22  ;;  %v4784_v22 = vld [vmem:[#allocation19 + $0x18] sm:$0xff] }
 0x7ef   : > { %4145 = vrot.lane.b32.xlu1 %v19308_v29, %s18399_s10  ;;  %3973 = vrot.lane.b32.xlu0 %v19311_v30, %s18397_s26 }
 0x7f0   : > { %4400 = vmatprep.mubr.f32.mxu0 %v18396_v0 }
 0x7f3   : > { %4057 = vrot.lane.b32.xlu1 %v19311_v30, %s18398_s2  ;;  %4053 = vrot.lane.b32.xlu0 %v18396_v0, %s18398_s2  ;;  %s18408_s2 = smov 121  }
 0x7f7   : > { %4505 = vrot.lane.b32.xlu1 %v18396_v0, %s18400_s9  ;;  %4149 = vrot.lane.b32.xlu0 %v18396_v0, %s18399_s10  ;;  %v4773_v0 = vld [vmem:[#allocation17] sm:$0xf] }
 0x7fb   : > { %4147 = vrot.lane.b32.xlu1 %v19311_v30, %s18399_s10  ;;  %4501 = vrot.lane.b32.xlu0 %v19308_v29, %s18400_s9  ;;  %s18409_s10 = smov 120  }
 0x7ff   : > { %4325 = vrot.lane.b32.xlu1 %v19308_v29, %s18401_s3  ;;  %4585 = vrot.lane.b32.xlu0 %v19345_v23, %s18402_s12 }
 0x803   : > { %4587 = vrot.lane.b32.xlu1 %v19308_v29, %s18402_s12  ;;  %4503 = vrot.lane.b32.xlu0 %v19311_v30, %s18400_s9 }
 0x807   : > { %4323 = vrot.lane.b32.xlu1 %v19345_v23, %s18401_s3  ;;  %4327 = vrot.lane.b32.xlu0 %v19311_v30, %s18401_s3  ;;  %s18410_s3 = smov 7  }
 0x80b   : > { %4411 = vrot.lane.b32.xlu1 %v19311_v30, %s18403_s23  ;;  %4589 = vrot.lane.b32.xlu0 %v19311_v30, %s18402_s12  ;;  %s18411_s12 = smov 119  }
 0x80f   : > { %4673 = vrot.lane.b32.xlu1 %v19311_v30, %s18404_s13  ;;  %4413 = vrot.lane.b32.xlu0 %v19345_v23, %s18403_s23 }
 0x813   : > { %4409 = vrot.lane.b32.xlu1 %v19308_v29, %s18403_s23  ;;  %4675 = vrot.lane.b32.xlu0 %v19345_v23, %s18404_s13  ;;  %s20425_s23 = sld [smem:[#allocation73_spill]] }
 0x817   : > { %4776 = vperm.xlu1 %16891, %v4773_v0   ;;  %4671 = vrot.lane.b32.xlu0 %v19308_v29, %s18404_s13  ;;  %v4801_v0 = vld [vmem:[#allocation19 + $0xa0] sm:$0xff]  ;;  %s18414_s13 = smov 5  }
 0x85d   : > { %v4056_v32 = vpop.permute.xlu0 %4055  ;;  %v3972_v33 = vpop.permute.xlu1 %3971 }
 0x85e   : > { %v3975_v38 = vsel %vm1425_vm4, %v3970_v31, %v3972_v33  ;;  %v4802_v31 = vld [vmem:[#allocation19 + $0xa8] sm:$0xff] }
 0x861   : > { %v4146_v34 = vpop.permute.xlu1 %4145  ;;  %v3974_v35 = vpop.permute.xlu0 %3973 }
 0x862   : > { %v3976_v36 = vsel %vm1425_vm4, %v3972_v33, %v3974_v35  ;;  %v15689_v33 = vpack.c.bf16 %v4802_v31, %v4801_v0  ;;  %v4786_v35 = vld [vmem:[#allocation19 + $0x28] sm:$0xff]  ;;  %v5147_v0 = vld [vmem:[#allocation19 + $0x1c0] sm:$0xff] }
 0x863   : > { %3982 = vmatprep.subr.mxu1 %v3976_v36  ;;  %v4803_v36 = vld [vmem:[#allocation19 + $0xb0] sm:$0xff]  ;;  %v5148_v31 = vld [vmem:[#allocation19 + $0x1c8] sm:$0xff] }
 0x864   : > { %3983 = vmatpush1.msra.mxu1 %v3975_v38 }
 0x865   : > { %v4058_v39 = vpop.permute.xlu1 %4057  ;;  %13921 = vmatmul.mubr.msk.f32.vlgmr.msra.gmra.mrb[8].mxu1 %vm2285_vm11, %v3965_v37  ;;  %v4054_v40 = vpop.permute.xlu0 %4053  ;;  %v4804_v37 = vld [vmem:[#allocation19 + $0xb8] sm:$0xff] }
 0x866   : > { %v4059_v41 = vsel %vm1514_vm5, %v4054_v40, %v4056_v32  ;;  %v4060_v42 = vsel %vm1514_vm5, %v4056_v32, %v4058_v39  ;;  %4130 = vmatprep.mubr.f32.mxu1 %v19345_v23  ;;  %v15687_v32 = vpack.c.bf16 %v4784_v22, %v4783_v28  ;;  %v15693_v39 = vpack.c.bf16 %v4804_v37, %v4803_v36  ;;  %v4787_v40 = vld [vmem:[#allocation19 + $0x30] sm:$0xff] }
 0x867   : > { %4066 = vmatprep.subr.mxu1 %v4060_v42  ;;  %v4805_v42 = vld [vmem:[#allocation19 + $0xc0] sm:$0xff]  ;;  %v5129_v22 = vld [vmem:[#allocation19 + $0x130] sm:$0xff]  ;;  %vm10377_vm5 = vcmask 39936  }
 0x868   : > { %4067 = vmatpush1.msra.mxu1 %v4059_v41  ;;  %v4788_v41 = vld [vmem:[#allocation19 + $0x38] sm:$0xff]  ;;  %v5149_v37 = vld [vmem:[#allocation19 + $0x1d0] sm:$0xff] }
 0x869   : > { %v4506_v43 = vpop.permute.xlu1 %4505  ;;  %v4150_v44 = vpop.permute.xlu0 %4149 }
 0x86d   : > { %v4148_v46 = vpop.permute.xlu1 %4147  ;;  %13922 = vmatmul.mubr.msk.f32.vlgmr.msra.gmra.mrb[8].mxu1 %vm2285_vm11, %v3963_v45  ;;  %v4502_v47 = vpop.permute.xlu0 %4501 }
 0x86e   : > { %v4152_v48 = vsel %vm1609_vm6, %v4148_v46, %v4150_v44  ;;  %v4151_v49 = vsel %vm1609_vm6, %v4146_v34, %v4148_v46  ;;  %4222 = vmatprep.mubr.f32.mxu1 %v19345_v23  ;;  %v4785_v34 = vld [vmem:[#allocation19 + $0x20] sm:$0xff]  ;;  %v15695_v44 = vpack.c.bf16 %v4788_v41, %v4787_v40  ;;  %v5133_v40 = vld [vmem:[#allocation19 + $0x150] sm:$0xff]  ;;  %v5134_v41 = vld [vmem:[#allocation19 + $0x158] sm:$0xff]  ;;  %vm11095_vm6 = vcmask 23552  }
 0x86f   : > { %4158 = vmatprep.subr.mxu1 %v4152_v48  ;;  %v15691_v38 = vpack.c.bf16 %v4786_v35, %v4785_v34  ;;  %v4789_v46 = vld [vmem:[#allocation19 + $0x40] sm:$0xff]  ;;  %v4807_v48 = vld [vmem:[#allocation19 + $0xd0] sm:$0xff]  ;;  %v5132_v35 = vld [vmem:[#allocation19 + $0x148] sm:$0xff] }
 0x870   : > { %4159 = vmatpush1.msra.mxu1 %v4151_v49  ;;  %v4808_v49 = vld [vmem:[#allocation19 + $0xd8] sm:$0xff]  ;;  %v5131_v34 = vld [vmem:[#allocation19 + $0x140] sm:$0xff] }
 0x871   : > { %v4326_v50 = vpop.permute.xlu1 %4325  ;;  %v4586_v51 = vpop.permute.xlu0 %4585  ;;  %v19429_v36 = vpack.c.bf16 %v5132_v35, %v5131_v34  ;;  %v5472_v35 = vld [vmem:[#allocation19 + $0x218] sm:$0xff] }
 0x875   : > { %v4588_v53 = vpop.permute.xlu1 %4587  ;;  %13923 = vmatmul.mubr.msk.f32.vlgmr.msra.gmra.mrb[8].mxu1 %vm2285_vm11, %v4141_v52  ;;  %v4504_v54 = vpop.permute.xlu0 %4503  ;;  %v4791_v52 = vld [vmem:[#allocation19 + $0x50] sm:$0xff] }
 0x876   : > { %v4508_v55 = vsel %vm1978_vm7, %v4504_v54, %v4506_v43  ;;  %v4507_v56 = vsel %vm1978_vm7, %v4502_v47, %v4504_v54  ;;  %4578 = vmatprep.mubr.f32.mxu1 %v19345_v23  ;;  %v4591_v6 = vsel %vm2065_vm8, %v4586_v51, %v4588_v53  ;;  %v4806_v43 = vld [vmem:[#allocation19 + $0xc8] sm:$0xff]  ;;  %v15701_v51 = vpack.c.bf16 %v4808_v49, %v4807_v48  ;;  %v4809_v54 = vld [vmem:[#allocation19 + $0xe0] sm:$0xff]  ;;  %v5153_v49 = vld [vmem:[#allocation19 + $0x1f0] sm:$0xff] }
 0x877   : > { %4514 = vmatprep.subr.mxu1 %v4508_v55  ;;  %v15697_v45 = vpack.c.bf16 %v4806_v43, %v4805_v42  ;;  %v4790_v47 = vld [vmem:[#allocation19 + $0x48] sm:$0xff]  ;;  %v19435_v42 = vpack.c.bf16 %v5134_v41, %v5133_v40  ;;  %v5151_v43 = vld [vmem:[#allocation19 + $0x1e0] sm:$0xff] }
 0x878   : > { %4515 = vmatpush1.msra.mxu1 %v4507_v56  ;;  %v4810_v55 = vld [vmem:[#allocation19 + $0xe8] sm:$0xff]  ;;  %v4955_v40 = vld [vmem:[#allocation22] sm:$0xff] }
 0x879   : > { %v4324_v58 = vpop.permute.xlu1 %4323  ;;  %v4328_v59 = vpop.permute.xlu0 %4327  ;;  %13927 = vmatmul.mubr.msk.f32.vlgmr.msra.gmra.mrb[10].mxu1 %vm2285_vm11, %v4500_v57  ;;  %v15705_v57 = vpack.c.bf16 %v4810_v55, %v4809_v54  ;;  %v5485_v55 = vld [vmem:[#allocation19 + $0x280] sm:$0xff] }
 0x87a   : > { %v4329_v60 = vsel %vm1794_vm0, %v4324_v58, %v4326_v50  ;;  %v4330_v61 = vsel %vm1794_vm0, %v4326_v50, %v4328_v59  ;;  %4662 = vmatprep.mubr.f32.mxu1 %v19345_v23  ;;  %v15699_v50 = vpack.c.bf16 %v4790_v47, %v4789_v46  ;;  %v4793_v58 = vld [vmem:[#allocation19 + $0x60] sm:$0xff]  ;;  %v4794_v59 = vld [vmem:[#allocation19 + $0x68] sm:$0xff] }
 0x87b   : > { %4336 = vmatprep.subr.mxu0 %v4330_v61  ;;  %v4812_v61 = vld [vmem:[#allocation19 + $0xf8] sm:$0xff]  ;;  %v5135_v46 = vld [vmem:[#allocation19 + $0x160] sm:$0xff]  ;;  %v5136_v47 = vld [vmem:[#allocation19 + $0x168] sm:$0xff] }
 0x87c   : > { %4337 = vmatpush1.msra.mxu0 %v4329_v60  ;;  %v4811_v60 = vld [vmem:[#allocation19 + $0xf0] sm:$0xff]  ;;  %v19441_v48 = vpack.c.bf16 %v5136_v47, %v5135_v46  ;;  %v5474_v46 = vld [vmem:[#allocation19 + $0x228] sm:$0xff] }
 0x87d   : > { %v4412_v63 = vpop.permute.xlu1 %4411  ;;  %v4590_v2 = vpop.permute.xlu0 %4589  ;;  %13925 = vmatmul.mubr.msk.f32.vlgmr.msra.gmra.mrb[10].mxu0 %vm2285_vm11, %v4246_v62  ;;  %v15707_v62 = vpack.c.bf16 %v4794_v59, %v4793_v58  ;;  %v5491_v47 = vld [vmem:[#allocation19 + $0x2b0] sm:$0xff] }
 0x87e   : > { %v4592_v4 = vsel %vm2065_vm8, %v4588_v53, %v4590_v2  ;;  %4486 = vmatprep.mubr.f32.mxu0 %v19345_v23  ;;  %v4792_v53 = vld [vmem:[#allocation19 + $0x58] sm:$0xff]  ;;  %v4795_v2 = vld [vmem:[#allocation19 + $0x70] sm:$0xff] }
 0x87f   : > { %4598 = vmatprep.subr.mxu1 %v4592_v4  ;;  %v15703_v56 = vpack.c.bf16 %v4792_v53, %v4791_v52  ;;  %v4796_v4 = vld [vmem:[#allocation19 + $0x78] sm:$0xff]  ;;  %v5137_v52 = vld [vmem:[#allocation19 + $0x170] sm:$0xff] }
 0x880   : > { %4599 = vmatpush1.msra.mxu1 %v4591_v6  ;;  %v5140_v6 = vld [vmem:[#allocation19 + $0x188] sm:$0xff]  ;;  %v5138_v53 = vld [vmem:[#allocation19 + $0x178] sm:$0xff] }
 0x881   : > { %v4674_v7 = vpop.permute.xlu1 %4673  ;;  %v4414_v8 = vpop.permute.xlu0 %4413  ;;  %13928 = vmatmul.mubr.msk.f32.vlgmr.msra.gmra.mrb[10].mxu1 %vm2285_vm11, %v4498_v5  ;;  %v5139_v5 = vld [vmem:[#allocation19 + $0x180] sm:$0xff]  ;;  %v19447_v54 = vpack.c.bf16 %v5138_v53, %v5137_v52  ;;  %v5475_v53 = vld [vmem:[#allocation19 + $0x230] sm:$0xff] }
 0x882   : > { %v4416_v9 = vsel %vm1883_vm9, %v4412_v63, %v4414_v8  ;;  %4748 = vmatprep.mubr.f32.mxu1 %v19345_v23  ;;  %v19402_v8 = vpack.c.bf16 %v5140_v6, %v5139_v5 }
 0x883   : > { %4422 = vmatprep.subr.mxu0 %v4416_v9  ;;  %v5123_v9 = vld [vmem:[#allocation19 + $0x100] sm:$0xff] }
 0x884   : > { %v19406_v11 = vpack.c.bf16 %v5124_v10, %v5123_v9 }
 0x885   : > { %v4410_v14 = vpop.permute.xlu1 %4409  ;;  %v4676_v15 = vpop.permute.xlu0 %4675 }
 0x886   : > { %v4415_v19 = vsel %vm1883_vm9, %v4410_v14, %v4412_v63  ;;  %v4678_v20 = vsel %vm2154_vm10, %v4674_v7, %v4676_v15  ;;  %v15709_v63 = vpack.c.bf16 %v4812_v61, %v4811_v60  ;;  %v19409_v14 = vpack.c.bf16 %v5142_v13, %v5141_v12  ;;  %v5125_v15 = vld [vmem:[#allocation19 + $0x110] sm:$0xff]  ;;  %v4231_v60 = vld [vmem:[#allocation7] ss:$2 sm:$0x3] }
 0x887   : > { %4423 = vmatpush1.msra.mxu0 %v4415_v19  ;;  %4684 = vmatprep.subr.mxu1 %v4678_v20  ;;  %v5144_v19 = vld [vmem:[#allocation19 + $0x1a8] sm:$0xff]  ;;  %v5127_v20 = vld [vmem:[#allocation19 + $0x120] sm:$0xff]  ;;  %v4236_v61 = vrot.slane %v4231_v60, %v19137_v1 }
 0x888   : > { %13926 = vmatmul.mubr.msk.f32.vlgmr.msra.gmra.mrb[10].mxu0 %vm2285_vm11, %v4408_v16  ;;  %15682 = vmatprep.subr.bf16.mxu0 %v15681_v21  ;;  %v5126_v16 = vld [vmem:[#allocation19 + $0x118] sm:$0xff] }
 0x889   : > { %v4672_v26 = vpop.permute.xlu0 %4671  ;;  %15684 = vmatpush3.bf16.msra.mxu0 %v15683_v24  ;;  %v19411_v18 = vpack.c.bf16 %v5126_v16, %v5125_v15 }
 0x88a   : > { %v4677_v23 = vsel %vm2154_vm10, %v4672_v26, %v4674_v7  ;;  %15686 = vmatprep.subr.bf16.mxu0 %v15685_v25  ;;  %v15711_v7 = vpack.c.bf16 %v4796_v4, %v4795_v2  ;;  %v5146_v26 = vld [vmem:[#allocation19 + $0x1b8] sm:$0xff] }
 0x88b   : > { %4685 = vmatpush1.msra.mxu1 %v4677_v23  ;;  %v5130_v23 = vld [vmem:[#allocation19 + $0x138] sm:$0xff] }
 0x88c   : > { %13929 = vmatmul.mubr.msk.f32.vlgmr.msra.gmra.mrb[10].mxu1 %vm2285_vm11, %v4670_v27  ;;  %15714 = vmatprep.subr.bf16.mxu1 %v15681_v21  ;;  %v5128_v21 = vld [vmem:[#allocation19 + $0x128] sm:$0xff] }
 0x88d   : > { %15716 = vmatpush3.bf16.msra.mxu1 %v15683_v24  ;;  %4947 = vmatprep.mubr.f32.mxu1 %v19311_v30  ;;  %v19414_v24 = vpack.c.bf16 %v5144_v19, %v5143_v17  ;;  %v19417_v27 = vpack.c.bf16 %v5128_v21, %v5127_v20  ;;  %v5469_v20 = vld [vmem:[#allocation19 + $0x200] sm:$0xff]  ;;  %v5470_v21 = vld [vmem:[#allocation19 + $0x208] sm:$0xff] }
 0x88e   : > { %15718 = vmatprep.subr.bf16.mxu1 %v15685_v25  ;;  %15688 = vmatpush3.bf16.msra.mxu0 %v15687_v32  ;;  %v5145_v25 = vld [vmem:[#allocation19 + $0x1b0] sm:$0xff] }
 0x88f   : > { %15690 = vmatprep.subr.bf16.mxu0 %v15689_v33  ;;  %v19420_v28 = vpack.c.bf16 %v5146_v26, %v5145_v25  ;;  %v5487_v26 = vld [vmem:[#allocation19 + $0x290] sm:$0xff] }
 0x891   : > { %15720 = vmatpush3.bf16.msra.mxu1 %v15687_v32  ;;  %v19423_v32 = vpack.c.bf16 %v5130_v23, %v5129_v22  ;;  %v5488_v22 = vld [vmem:[#allocation19 + $0x298] sm:$0xff] }
 0x892   : > { %15722 = vmatprep.subr.bf16.mxu1 %v15689_v33  ;;  %15692 = vmatpush3.bf16.msra.mxu0 %v15691_v38  ;;  %v19426_v33 = vpack.c.bf16 %v5148_v31, %v5147_v0  ;;  %v19460_v31 = vpack.c.bf16 %v5470_v21, %v5469_v20 }
 0x893   : > { %15694 = vmatprep.subr.bf16.mxu0 %v15693_v39 }
 0x895   : > { %15724 = vmatpush3.bf16.msra.mxu1 %v15691_v38  ;;  %v5150_v38 = vld [vmem:[#allocation19 + $0x1d8] sm:$0xff] }
 0x896   : > { %15726 = vmatprep.subr.bf16.mxu1 %v15693_v39  ;;  %15696 = vmatpush3.bf16.msra.mxu0 %v15695_v44  ;;  %v19433_v39 = vpack.c.bf16 %v5150_v38, %v5149_v37  ;;  %v4777_v23 = vpop.permute.xlu1 %4776  ;;  %v5489_v37 = vld [vmem:[#allocation19 + $0x2a0] sm:$0xff]  ;;  %v5490_v38 = vld [vmem:[#allocation19 + $0x2a8] sm:$0xff] }
 0x897   : > { %15698 = vmatprep.subr.bf16.mxu0 %v15697_v45 }
 0x899   : > { %15728 = vmatpush3.bf16.msra.mxu1 %v15695_v44  ;;  %v5152_v44 = vld [vmem:[#allocation19 + $0x1e8] sm:$0xff] }
 0x89a   : > { %15730 = vmatprep.subr.bf16.mxu1 %v15697_v45  ;;  %15700 = vmatpush3.bf16.msra.mxu0 %v15699_v50  ;;  %v19439_v45 = vpack.c.bf16 %v5152_v44, %v5151_v43  ;;  %v19475_v43 = vpack.c.bf16 %v5490_v38, %v5489_v37  ;;  %v5473_v44 = vld [vmem:[#allocation19 + $0x220] sm:$0xff] }
 0x89b   : > { %15702 = vmatprep.subr.bf16.mxu0 %v15701_v51 }
 0x89d   : > { %15732 = vmatpush3.bf16.msra.mxu1 %v15699_v50  ;;  %v5154_v50 = vld [vmem:[#allocation19 + $0x1f8] sm:$0xff] }
 0x89e   : > { %15734 = vmatprep.subr.bf16.mxu1 %v15701_v51  ;;  %15704 = vmatpush3.bf16.msra.mxu0 %v15703_v56  ;;  %v19445_v51 = vpack.c.bf16 %v5154_v50, %v5153_v49  ;;  %v5492_v49 = vld [vmem:[#allocation19 + $0x2b8] sm:$0xff]  ;;  %v19479_v50 = vpack.c.bf16 %v5474_v46, %v5473_v44  ;;  %v5815_v44 = vld [vmem:[#allocation19 + $0x300] sm:$0xff]  ;;  %v5816_v46 = vld [vmem:[#allocation19 + $0x308] sm:$0xff] }
 0x89f   : > { %15706 = vmatprep.subr.bf16.mxu0 %v15705_v57  ;;  %v19482_v52 = vpack.c.bf16 %v5492_v49, %v5491_v47  ;;  %v4956_v47 = vld [vmem:[#allocation22 + $0x8] sm:$0xff]  ;;  %v5833_v49 = vld [vmem:[#allocation19 + $0x390] sm:$0xff] }
 0x8a1   : > { %15736 = vmatpush3.bf16.msra.mxu1 %v15703_v56  ;;  %v5486_v56 = vld [vmem:[#allocation19 + $0x288] sm:$0xff] }
 0x8a2   : > { %15738 = vmatprep.subr.bf16.mxu1 %v15705_v57  ;;  %15708 = vmatpush3.bf16.msra.mxu0 %v15707_v62  ;;  %v19451_v57 = vpack.c.bf16 %v5486_v56, %v5485_v55  ;;  %v5476_v55 = vld [vmem:[#allocation19 + $0x238] sm:$0xff]  ;;  %v5493_v56 = vld [vmem:[#allocation19 + $0x2c0] sm:$0xff] }
 0x8a3   : > { %15710 = vmatprep.subr.bf16.mxu0 %v15709_v63 }
 0x8a5   : > { %15740 = vmatpush3.bf16.msra.mxu1 %v15707_v62  ;;  %v4240_v62 = vrot.slane %v4231_v60, %v19139_v3 }
 0x8a6   : > { %15742 = vmatprep.subr.bf16.mxu1 %v15709_v63  ;;  %15712 = vmatpush3.bf16.msra.mxu0 %v15711_v7  ;;  %v4757_v63 = vld [vmem:[#allocation7 + $0x1] ss:$2 sm:$0x3] }
 0x8a7   : > { %v4762_v9 = vrot.slane %v4757_v63, %v19137_v1  ;;  %v4766_v12 = vrot.slane %v4757_v63, %v19139_v3  ;;  %v19464_v1 = vpack.c.bf16 %v5488_v22, %v5487_v26  ;;  %v5471_v3 = vld [vmem:[#allocation19 + $0x210] sm:$0xff]  ;;  %v5484_v26 = vld [vmem:[#allocation19 + $0x278] sm:$0xff] }
 0x8a8   : > { %v19472_v41 = vpack.c.bf16 %v5472_v35, %v5471_v3  ;;  %v5495_v63 = vld [vmem:[#allocation19 + $0x2d0] sm:$0xff]  ;;  %v5832_v3 = vld [vmem:[#allocation19 + $0x388] sm:$0xff] }
 0x8a9   : > { %15744 = vmatpush3.bf16.msra.mxu1 %v15711_v7 }
 0x8aa   : > { %15746 = vmatprep.subr.bf16.mxu1 %v19402_v8 }
 0x8ac   : > { %4948 = vmatmul.mubr.f32.vlgmr.msra.gmra.mrb[12].mxu1 %v19308_v29 }
 0x8ad   : > { %15748 = vmatpush3.bf16.msra.mxu1 %v19406_v11 }
 0x8ae   : > { %15750 = vmatprep.subr.bf16.mxu1 %v19409_v14 }
 0x8b1   : > { %15752 = vmatpush3.bf16.msra.mxu1 %v19411_v18 }
 0x8b2   : > { %15754 = vmatprep.subr.bf16.mxu1 %v19414_v24 }
 0x8b5   : > { %15756 = vmatpush3.bf16.msra.mxu1 %v19417_v27 }
 0x8b6   : > { %15758 = vmatprep.subr.bf16.mxu1 %v19420_v28 }
 0x8b9   : > { %15760 = vmatpush3.bf16.msra.mxu1 %v19423_v32 }
 0x8ba   : > { %15762 = vmatprep.subr.bf16.mxu1 %v19426_v33 }
 0x8bd   : > { %15764 = vmatpush3.bf16.msra.mxu1 %v19429_v36 }
 0x8be   : > { %15766 = vmatprep.subr.bf16.mxu1 %v19433_v39 }
 0x8c1   : > { %15768 = vmatpush3.bf16.msra.mxu1 %v19435_v42 }
 0x8c2   : > { %15770 = vmatprep.subr.bf16.mxu1 %v19439_v45 }
 0x8c5   : > { %15772 = vmatpush3.bf16.msra.mxu1 %v19441_v48 }
 0x8c6   : > { %15774 = vmatprep.subr.bf16.mxu1 %v19445_v51 }
 0x8c9   : > { %15776 = vmatpush3.bf16.msra.mxu1 %v19447_v54 }
 0x8ca   : > { %15810 = vmatprep.subr.bf16.mxu1 %v19451_v57 }
 0x948   : > { %v4224_v58 = vpop.f32.mrb[8].mxu1 }
 0x949   : > { %v4226_v59 = vpop.f32.mrb[9].mxu1  ;;  %v4243_v2 = vmul.f32 %v4236_v61, %v4224_v58  ;;  %v5494_v58 = vld [vmem:[#allocation19 + $0x2c8] sm:$0xff]  ;;  %v5477_v61 = vld [vmem:[#allocation19 + $0x240] sm:$0xff] }
 0x94a   : > { %v4244_v4 = vmul.f32 %v4240_v62, %v4226_v59  ;;  %v19485_v59 = vpack.c.bf16 %v5476_v55, %v5475_v53  ;;  %v19488_v60 = vpack.c.bf16 %v5494_v58, %v5493_v56  ;;  %v5478_v62 = vld [vmem:[#allocation19 + $0x248] sm:$0xff]  ;;  %v5834_v53 = vld [vmem:[#allocation19 + $0x398] sm:$0xff]  ;;  %v19515_v55 = vpack.c.bf16 %v5816_v46, %v5815_v44  ;;  %v5817_v58 = vld [vmem:[#allocation19 + $0x310] sm:$0xff] }
 0x94b   : > { %v19519_v56 = vpack.c.bf16 %v5834_v53, %v5833_v49  ;;  %v5842_v44 = vld [vmem:[#allocation19 + $0x3d8] sm:$0xff]  ;;  %v5825_v49 = vld [vmem:[#allocation19 + $0x350] sm:$0xff] }
 0x94c   : > { %v5826_v53 = vld [vmem:[#allocation19 + $0x358] sm:$0xff] }
 0x95b   : > { %v4488_v5 = vpop.f32.mrb[10].mxu0 }
 0x95c   : > { %v4495_v6 = vadd.f32 %v4488_v5, %v4243_v2  ;;  %v4490_v7 = vpop.f32.mrb[11].mxu0  ;;  %v5496_v2 = vld [vmem:[#allocation19 + $0x2d8] sm:$0xff] }
 0x95d   : > { %v4496_v10 = vadd.f32 %v4490_v7, %v4244_v4  ;;  %v19491_v4 = vpack.c.bf16 %v5478_v62, %v5477_v61  ;;  %v19494_v5 = vpack.c.bf16 %v5496_v2, %v5495_v63  ;;  %v5480_v7 = vld [vmem:[#allocation19 + $0x258] sm:$0xff]  ;;  %v5835_v62 = vld [vmem:[#allocation19 + $0x3a0] sm:$0xff]  ;;  %v5836_v63 = vld [vmem:[#allocation19 + $0x3a8] sm:$0xff] }
 0x95e   : > { %v5818_v61 = vld [vmem:[#allocation19 + $0x318] sm:$0xff] }
 0x95f   : > { %v4750_v13 = vpop.f32.mrb[10].mxu1  ;;  %v19524_v2 = vpack.c.bf16 %v5818_v61, %v5817_v58  ;;  %v5843_v58 = vld [vmem:[#allocation19 + $0x3e0] sm:$0xff]  ;;  %v5844_v61 = vld [vmem:[#allocation19 + $0x3e8] sm:$0xff] }
 0x960   : > { %v4769_v15 = vmul.f32 %v4762_v9, %v4750_v13  ;;  %v4752_v16 = vpop.f32.mrb[11].mxu1  ;;  %v5497_v9 = vld [vmem:[#allocation19 + $0x2e0] sm:$0xff] }
 0x961   : > { %v4770_v17 = vmul.f32 %v4766_v12, %v4752_v16  ;;  %v5482_v16 = vld [vmem:[#allocation19 + $0x268] sm:$0xff] }
 0x962   : > { %v4771_v19 = vadd.f32 %v4769_v15, %v4495_v6  ;;  %v5479_v6 = vld [vmem:[#allocation19 + $0x250] sm:$0xff]  ;;  %v5481_v15 = vld [vmem:[#allocation19 + $0x260] sm:$0xff] }
 0x963   : > { %v4772_v25 = vadd.f32 %v4770_v17, %v4496_v10  ;;  %v5498_v10 = vld [vmem:[#allocation19 + $0x2e8] sm:$0xff]  ;;  %v19497_v12 = vpack.c.bf16 %v5480_v7, %v5479_v6  ;;  %v5499_v17 = vld [vmem:[#allocation19 + $0x2f0] sm:$0xff]  ;;  %v19503_v20 = vpack.c.bf16 %v5482_v16, %v5481_v15  ;;  %v19527_v6 = vpack.c.bf16 %v5836_v63, %v5835_v62  ;;  %v5819_v7 = vld [vmem:[#allocation19 + $0x320] sm:$0xff] }
 0x964   : > { %v19462_v34 = vadd.f32 %v4777_v23, %v4771_v19  ;;  %v19500_v13 = vpack.c.bf16 %v5498_v10, %v5497_v9  ;;  %v5500_v19 = vld [vmem:[#allocation19 + $0x2f8] sm:$0xff]  ;;  %v5820_v9 = vld [vmem:[#allocation19 + $0x328] sm:$0xff]  ;;  %v5837_v10 = vld [vmem:[#allocation19 + $0x3b0] sm:$0xff]  ;;  %v19548_v62 = vpack.c.bf16 %v5826_v53, %v5825_v49  ;;  %v19551_v63 = vpack.c.bf16 %v5844_v61, %v5843_v58 }
 0x965   : > { %v19458_v0 = vadd.f32 %v4777_v23, %v4772_v25  ;;  %v19506_v21 = vpack.c.bf16 %v5500_v19, %v5499_v17  ;;  %v5483_v25 = vld [vmem:[#allocation19 + $0x270] sm:$0xff]  ;;  %v5831_v23 = vld [vmem:[#allocation19 + $0x380] sm:$0xff]  ;;  %v5838_v15 = vld [vmem:[#allocation19 + $0x3b8] sm:$0xff]  ;;  %v19530_v16 = vpack.c.bf16 %v5820_v9, %v5819_v7 }
 0x966   : > { %v19509_v38 = vpack.c.bf16 %v5484_v26, %v5483_v25  ;;  %v19533_v17 = vpack.c.bf16 %v5838_v15, %v5837_v10  ;;  %v5821_v19 = vld [vmem:[#allocation19 + $0x330] sm:$0xff]  ;;  %v5839_v25 = vld [vmem:[#allocation19 + $0x3c0] sm:$0xff]  ;;  %v5840_v26 = vld [vmem:[#allocation19 + $0x3c8] sm:$0xff] }
 0x967   : > { %4877 = vmatprep.mubr.f32.mxu0 %v19458_v0  ;;  %5219 = vmatprep.mubr.f32.mxu1 %v19458_v0  ;;  %v5827_v7 = vld [vmem:[#allocation19 + $0x360] sm:$0xff]  ;;  %v5828_v9 = vld [vmem:[#allocation19 + $0x368] sm:$0xff]  ;;  %v5845_v10 = vld [vmem:[#allocation19 + $0x3f0] sm:$0xff] }
 0x968   : > { %4878 = vmatmul.mubr.f32.vlgmr.msra.gmra.mrb[12].mxu0 %v19462_v34  ;;  %5220 = vmatmul.mubr.f32.vlgmr.msra.gmra.mrb[14].mxu1 %v19462_v34  ;;  %v5846_v15 = vld [vmem:[#allocation19 + $0x3f8] sm:$0xff] }
 0x969   : > { %15812 = vmatpush3.bf16.msra.mxu1 %v19460_v31  ;;  %5565 = vmatprep.mubr.f32.mxu1 %v19458_v0 }
 0x96a   : > { %15814 = vmatprep.subr.bf16.mxu1 %v19464_v1  ;;  %14879 = vmatprep.mubr.msk.f32.mxu0 %vm2285_vm11, %v4955_v40  ;;  %v19512_v40 = vpack.c.bf16 %v5832_v3, %v5831_v23  ;;  %v19539_v23 = vpack.c.bf16 %v5840_v26, %v5839_v25  ;;  %v5823_v3 = vld [vmem:[#allocation19 + $0x340] sm:$0xff]  ;;  %v5829_v25 = vld [vmem:[#allocation19 + $0x370] sm:$0xff]  ;;  %v5830_v26 = vld [vmem:[#allocation19 + $0x378] sm:$0xff] }
 0x96d   : > { %15816 = vmatpush3.bf16.msra.mxu1 %v19472_v41 }
 0x96e   : > { %15818 = vmatprep.subr.bf16.mxu1 %v19475_v43 }
 0x971   : > { %15820 = vmatpush3.bf16.msra.mxu1 %v19479_v50 }
 0x972   : > { %15822 = vmatprep.subr.bf16.mxu1 %v19482_v52 }
 0x975   : > { %15824 = vmatpush3.bf16.msra.mxu1 %v19485_v59 }
 0x976   : > { %15826 = vmatprep.subr.bf16.mxu1 %v19488_v60 }
 0x979   : > { %15828 = vmatpush3.bf16.msra.mxu1 %v19491_v4 }
 0x97a   : > { %15830 = vmatprep.subr.bf16.mxu1 %v19494_v5 }
 0x97d   : > { %15832 = vmatpush3.bf16.msra.mxu1 %v19497_v12 }
 0x97e   : > { %15834 = vmatprep.subr.bf16.mxu1 %v19500_v13 }
 0x97f   : > { %v14232_v22 = vpop.f32.mrb[12].mxu1 }
 0x980   : > { %v14233_v35 = vpop.f32.mrb[13].mxu1 }
 0x981   : > { %v14234_v37 = vadd.f32 %v14233_v35, %v14232_v22  ;;  %15836 = vmatpush3.bf16.msra.mxu1 %v19503_v20  ;;  %v5824_v35 = vld [vmem:[#allocation19 + $0x348] sm:$0xff] }
 0x982   : > { %15838 = vmatprep.subr.bf16.mxu1 %v19506_v21  ;;  %v19542_v46 = vpack.c.bf16 %v5824_v35, %v5823_v3  ;;  %v19560_v3 = vpack.c.bf16 %v5830_v26, %v5829_v25  ;;  %v4953_v35 = vld [vmem:[#allocation20] sm:$0xff] }
 0x983   : > { %14877 = vmatprep.subr.mxu0 %v14234_v37 }
 0x984   : > { %14878 = vmatpush3.msra.mxu0 %v14234_v37  ;;  %v5841_v37 = vld [vmem:[#allocation19 + $0x3d0] sm:$0xff] }
 0x985   : > { %15840 = vmatpush3.bf16.msra.mxu1 %v19509_v38  ;;  %14880 = vmatmul.mubr.msk.f32.vlgmr.msra.gmra.mrb[14].mxu0 %vm2285_vm11, %v4956_v47  ;;  %v19545_v47 = vpack.c.bf16 %v5842_v44, %v5841_v37 }
 0x986   : > { %15874 = vmatprep.subr.bf16.mxu1 %v19512_v40  ;;  %14884 = vmatprep.mubr.msk.f32.mxu0 %vm1428_vm3, %v4953_v35 }
 0x988   : > { %5566 = vmatmul.mubr.f32.vlgmr.msra.gmra.mrb[16].mxu1 %v19462_v34 }
 0x989   : > { %15876 = vmatpush3.bf16.msra.mxu1 %v19515_v55  ;;  %5911 = vmatprep.mubr.f32.mxu1 %v19458_v0  ;;  %v5822_v0 = vld [vmem:[#allocation19 + $0x338] sm:$0xff] }
 0x98a   : > { %15878 = vmatprep.subr.bf16.mxu1 %v19519_v56  ;;  %v19536_v22 = vpack.c.bf16 %v5822_v0, %v5821_v19  ;;  %v19554_v19 = vpack.c.bf16 %v5828_v9, %v5827_v7  ;;  %v19557_v0 = vpack.c.bf16 %v5846_v15, %v5845_v10  ;;  %v4954_v7 = vld [vmem:[#allocation20 + $0x8] sm:$0xff] }
 0x98d   : > { %15880 = vmatpush3.bf16.msra.mxu1 %v19524_v2 }
 0x98e   : > { %15882 = vmatprep.subr.bf16.mxu1 %v19527_v6 }
 0x991   : > { %15884 = vmatpush3.bf16.msra.mxu1 %v19530_v16 }
 0x992   : > { %15886 = vmatprep.subr.bf16.mxu1 %v19533_v17 }
 0x995   : > { %15888 = vmatpush3.bf16.msra.mxu1 %v19536_v22 }
 0x996   : > { %15890 = vmatprep.subr.bf16.mxu1 %v19539_v23 }
 0x999   : > { %15892 = vmatpush3.bf16.msra.mxu1 %v19542_v46 }
 0x99a   : > { %15894 = vmatprep.subr.bf16.mxu1 %v19545_v47 }
 0x99d   : > { %15896 = vmatpush3.bf16.msra.mxu1 %v19548_v62 }
 0x99e   : > { %15898 = vmatprep.subr.bf16.mxu1 %v19551_v63 }
 0x9a1   : > { %15900 = vmatpush3.bf16.msra.mxu1 %v19554_v19 }
 0x9a2   : > { %15902 = vmatprep.subr.bf16.mxu1 %v19557_v0 }
 0x9a5   : > { %15904 = vmatpush3.bf16.msra.mxu1 %v19560_v3 }
 0x9a8   : > { %5912 = vmatmul.mubr.f32.vlgmr.msra.gmra.mrb[18].mxu1 %v19462_v34  ;;  %v5642_v34 = vld [vmem:[#allocation20 + $0x20] sm:$0xff] }
 0xa3b   : > { %v14197_v37 = vpop.f32.mrb[12].mxu0  ;;  %v14273_v44 = vpop.f32.mrb[14].mxu1 }
 0xa3c   : > { %v14198_v49 = vpop.f32.mrb[13].mxu0  ;;  %v14274_v53 = vpop.f32.mrb[15].mxu1 }
 0xa3d   : > { %v14199_v58 = vadd.f32 %v14198_v49, %v14197_v37  ;;  %v14275_v61 = vadd.f32 %v14274_v53, %v14273_v44  ;;  %v6174_v49 = vld [vmem:[#allocation23] sm:$0xff] }
 0xa3f   : > { %14882 = vmatprep.subr.msk.mxu0 %vm1432_vm2, %v14199_v58 }
 0xa40   : > { %14883 = vmatpush3.msk.msra.mxu0 %vm1432_vm2, %v14199_v58 }
 0xa41   : > { %14885 = vmatmul.mubr.msk.f32.vlgmr.msra.gmra.mrb[14].mxu0 %vm1428_vm3, %v4954_v7  ;;  %15778 = vmatprep.subr.bf16.mxu0 %v19402_v8  ;;  %v6175_v7 = vld [vmem:[#allocation23 + $0x8] sm:$0xff] }
 0xa42   : > { %15780 = vmatpush3.bf16.msra.mxu0 %v19406_v11  ;;  %5289 = vmatprep.mubr.f32.mxu0 %v19311_v30 }
 0xa43   : > { %15782 = vmatprep.subr.bf16.mxu0 %v19409_v14 }
 0xa46   : > { %15784 = vmatpush3.bf16.msra.mxu0 %v19411_v18 }
 0xa47   : > { %15786 = vmatprep.subr.bf16.mxu0 %v19414_v24 }
 0xa4a   : > { %15788 = vmatpush3.bf16.msra.mxu0 %v19417_v27 }
 0xa4b   : > { %15790 = vmatprep.subr.bf16.mxu0 %v19420_v28  ;;  %v5299_v28 = vld [vmem:[#allocation22 + $0x10] sm:$0xff] }
 0xa4e   : > { %15792 = vmatpush3.bf16.msra.mxu0 %v19423_v32 }
 0xa4f   : > { %15794 = vmatprep.subr.bf16.mxu0 %v19426_v33 }
 0xa52   : > { %15796 = vmatpush3.bf16.msra.mxu0 %v19429_v36 }
 0xa53   : > { %15798 = vmatprep.subr.bf16.mxu0 %v19433_v39  ;;  %v5300_v39 = vld [vmem:[#allocation22 + $0x18] sm:$0xff] }
 0xa56   : > { %15800 = vmatpush3.bf16.msra.mxu0 %v19435_v42  ;;  %v5296_v42 = vld [vmem:[#allocation20 + $0x10] sm:$0xff] }
 0xa57   : > { %15802 = vmatprep.subr.bf16.mxu0 %v19439_v45  ;;  %v5297_v45 = vld [vmem:[#allocation20 + $0x18] sm:$0xff] }
 0xa5a   : > { %15804 = vmatpush3.bf16.msra.mxu0 %v19441_v48  ;;  %v5645_v48 = vld [vmem:[#allocation22 + $0x20] sm:$0xff] }
 0xa5b   : > { %v14349_v8 = vpop.f32.mrb[16].mxu1  ;;  %15806 = vmatprep.subr.bf16.mxu0 %v19445_v51 }
 0xa5c   : > { %v14350_v11 = vpop.f32.mrb[17].mxu1 }
 0xa5d   : > { %v14351_v14 = vadd.f32 %v14350_v11, %v14349_v8  ;;  %v6371_v11 = vld [vmem:[#allocation23 + $0x60] sm:$0xff] }
 0xa5e   : > { %15808 = vmatpush3.bf16.msra.mxu0 %v19447_v54 }
 0xa61   : > { %5290 = vmatmul.mubr.f32.vlgmr.msra.gmra.mrb[16].mxu0 %v19308_v29 }
 0xa62   : > { %14889 = vmatprep.mubr.msk.f32.mxu0 %vm2285_vm11, %v5299_v28 }
 0xa7b   : > { %v14425_v18 = vpop.f32.mrb[18].mxu1 }
 0xa7c   : > { %v14426_v24 = vpop.f32.mrb[19].mxu1 }
 0xa7d   : > { %v19587_v27 = vadd.f32 %v14426_v24, %v14425_v18 }
 0xb34   : > { %v14308_v32 = vpop.f32.mrb[16].mxu0 }
 0xb35   : > { %v14309_v33 = vpop.f32.mrb[17].mxu0 }
 0xb36   : > { %v14310_v36 = vadd.f32 %v14309_v33, %v14308_v32 }
 0xb38   : > { %14887 = vmatprep.subr.mxu0 %v14310_v36 }
 0xb39   : > { %14888 = vmatpush3.msra.mxu0 %v14310_v36  ;;  %v6372_v36 = vld [vmem:[#allocation23 + $0x68] sm:$0xff] }
 0xb3a   : > { %14890 = vmatmul.mubr.msk.f32.vlgmr.msra.gmra.mrb[14].mxu0 %vm2285_vm11, %v5300_v39  ;;  %14892 = vmatprep.subr.msk.mxu0 %vm1432_vm2, %v14275_v61 }
 0xb3b   : > { %14893 = vmatpush3.msk.msra.mxu0 %vm1432_vm2, %v14275_v61  ;;  %14894 = vmatprep.mubr.msk.f32.mxu0 %vm1428_vm3, %v5296_v42  ;;  %v6473_v42 = vld [vmem:[#allocation23 + $0x40] sm:$0xff] }
 0xb3c   : > { %15842 = vmatprep.subr.bf16.mxu0 %v19451_v57 }
 0xb42   : > { %14895 = vmatmul.mubr.msk.f32.vlgmr.msra.gmra.mrb[14].mxu0 %vm1428_vm3, %v5297_v45 }
 0xb43   : > { %15844 = vmatpush3.bf16.msra.mxu0 %v19460_v31  ;;  %5635 = vmatprep.mubr.f32.mxu0 %v19311_v30  ;;  %v5646_v31 = vld [vmem:[#allocation22 + $0x28] sm:$0xff] }
 0xb44   : > { %15846 = vmatprep.subr.bf16.mxu0 %v19464_v1  ;;  %v5991_v1 = vld [vmem:[#allocation22 + $0x30] sm:$0xff] }
 0xb47   : > { %15848 = vmatpush3.bf16.msra.mxu0 %v19472_v41 }
 0xb48   : > { %15850 = vmatprep.subr.bf16.mxu0 %v19475_v43 }
 0xb4b   : > { %15852 = vmatpush3.bf16.msra.mxu0 %v19479_v50 }
 0xb4c   : > { %15854 = vmatprep.subr.bf16.mxu0 %v19482_v52  ;;  %v5992_v52 = vld [vmem:[#allocation22 + $0x38] sm:$0xff] }
 0xb4f   : > { %15856 = vmatpush3.bf16.msra.mxu0 %v19485_v59  ;;  %v5988_v59 = vld [vmem:[#allocation20 + $0x30] sm:$0xff] }
 0xb50   : > { %15858 = vmatprep.subr.bf16.mxu0 %v19488_v60  ;;  %v5989_v60 = vld [vmem:[#allocation20 + $0x38] sm:$0xff] }
 0xb53   : > { %15860 = vmatpush3.bf16.msra.mxu0 %v19491_v4  ;;  %v19644_v4 = vld [vmem:[#allocation2 + $0x40] sm:$0xff] }
 0xb54   : > { %15862 = vmatprep.subr.bf16.mxu0 %v19494_v5  ;;  %6166 = vst.msk [vmem:[#allocation2 + $0x28] sm:$0xff] %vm6162_vm12, %v19644_v4 }
 0xb57   : > { %15864 = vmatpush3.bf16.msra.mxu0 %v19497_v12 }
 0xb58   : > { %15866 = vmatprep.subr.bf16.mxu0 %v19500_v13  ;;  %v6177_v13 = vld [vmem:[#allocation23 + $0x30] sm:$0xff] }
 0xb59   : > { %14921 = vmatprep.mubr.msk.f32.mxu1 %vm1794_vm0, %v6177_v13 }
 0xb5b   : > { %15868 = vmatpush3.bf16.msra.mxu0 %v19503_v20 }
 0xb5c   : > { %15870 = vmatprep.subr.bf16.mxu0 %v19506_v21 }
 0xb5f   : > { %15872 = vmatpush3.bf16.msra.mxu0 %v19509_v38 }
 0xb62   : > { %5636 = vmatmul.mubr.f32.vlgmr.msra.gmra.mrb[18].mxu0 %v19308_v29  ;;  %v5643_v29 = vld [vmem:[#allocation20 + $0x28] sm:$0xff] }
 0xb63   : > { %14899 = vmatprep.mubr.msk.f32.mxu0 %vm2285_vm11, %v5645_v48 }
 0xc35   : > { %v14384_v51 = vpop.f32.mrb[18].mxu0 }
 0xc36   : > { %v14385_v54 = vpop.f32.mrb[19].mxu0 }
 0xc37   : > { %v14386_v57 = vadd.f32 %v14385_v54, %v14384_v51 }
 0xc39   : > { %14897 = vmatprep.subr.mxu0 %v14386_v57 }
 0xc3a   : > { %14898 = vmatpush3.msra.mxu0 %v14386_v57  ;;  %v6474_v57 = vld [vmem:[#allocation23 + $0x48] sm:$0xff] }
 0xc3b   : > { %14900 = vmatmul.mubr.msk.f32.vlgmr.msra.gmra.mrb[14].mxu0 %vm2285_vm11, %v5646_v31  ;;  %14902 = vmatprep.subr.msk.mxu0 %vm1432_vm2, %v14351_v14  ;;  %v6470_v31 = vld [vmem:[#allocation23 + $0x10] sm:$0xff] }
 0xc3c   : > { %14903 = vmatpush3.msk.msra.mxu0 %vm1432_vm2, %v14351_v14  ;;  %14904 = vmatprep.mubr.msk.f32.mxu0 %vm1428_vm3, %v5642_v34 }
 0xc3d   : > { %15906 = vmatprep.subr.bf16.mxu0 %v19512_v40 }
 0xc43   : > { %14905 = vmatmul.mubr.msk.f32.vlgmr.msra.gmra.mrb[14].mxu0 %vm1428_vm3, %v5643_v29 }
 0xc44   : > { %15908 = vmatpush3.bf16.msra.mxu0 %v19515_v55  ;;  %5981 = vmatprep.mubr.f32.mxu0 %v19311_v30  ;;  %v17474_v30 = vld [vmem:[#allocation2 + $0x8] sm:$0xff] }
 0xc45   : > { %15910 = vmatprep.subr.bf16.mxu0 %v19519_v56  ;;  %6163 = vst.msk [vmem:[#allocation2 + $0x8] sm:$0xff] %vm6162_vm12, %v19644_v4  ;;  %v7032_v56 = vld [vmem:[#allocation25 + $0x8] sm:$0xff] }
 0xc48   : > { %15912 = vmatpush3.bf16.msra.mxu0 %v19524_v2  ;;  %v7031_v2 = vld [vmem:[#allocation25] sm:$0xff] }
 0xc49   : > { %15914 = vmatprep.subr.bf16.mxu0 %v19527_v6 }
 0xc4c   : > { %15916 = vmatpush3.bf16.msra.mxu0 %v19530_v16 }
 0xc4d   : > { %15918 = vmatprep.subr.bf16.mxu0 %v19533_v17 }
 0xc50   : > { %15920 = vmatpush3.bf16.msra.mxu0 %v19536_v22 }
 0xc51   : > { %15922 = vmatprep.subr.bf16.mxu0 %v19539_v23 }
 0xc54   : > { %15924 = vmatpush3.bf16.msra.mxu0 %v19542_v46 }
 0xc55   : > { %15926 = vmatprep.subr.bf16.mxu0 %v19545_v47 }
 0xc58   : > { %15928 = vmatpush3.bf16.msra.mxu0 %v19548_v62 }
 0xc59   : > { %15930 = vmatprep.subr.bf16.mxu0 %v19551_v63 }
 0xc5c   : > { %15932 = vmatpush3.bf16.msra.mxu0 %v19554_v19 }
 0xc5d   : > { %15934 = vmatprep.subr.bf16.mxu0 %v19557_v0 }
 0xc60   : > { %15936 = vmatpush3.bf16.msra.mxu0 %v19560_v3  ;;  %v6178_v3 = vld [vmem:[#allocation23 + $0x38] sm:$0xff] }
 0xc63   : > { %5982 = vmatmul.mubr.f32.vlgmr.msra.gmra.mrb[20].mxu0 %v17474_v30 }
 0xc64   : > { %14909 = vmatprep.mubr.msk.f32.mxu0 %vm2285_vm11, %v5991_v1 }
 0xd36   : > { %v14460_v41 = vpop.f32.mrb[20].mxu0 }
 0xd37   : > { %v14461_v43 = vpop.f32.mrb[21].mxu0 }
 0xd38   : > { %v14462_v50 = vadd.f32 %v14461_v43, %v14460_v41  ;;  %v6471_v41 = vld [vmem:[#allocation23 + $0x18] sm:$0xff] }
 0xd3a   : > { %14907 = vmatprep.subr.mxu0 %v14462_v50 }
 0xd3b   : > { %14908 = vmatpush3.msra.mxu0 %v14462_v50  ;;  %v6650_v50 = vld [vmem:[#allocation23 + $0x70] sm:$0xff] }
 0xd3c   : > { %14910 = vmatmul.mubr.msk.f32.vlgmr.msra.gmra.mrb[14].mxu0 %vm2285_vm11, %v5992_v52  ;;  %14912 = vmatprep.subr.msk.mxu0 %vm1432_vm2, %v19587_v27 }
 0xd3d   : > { %14913 = vmatpush3.msk.msra.mxu0 %vm1432_vm2, %v19587_v27  ;;  %14914 = vmatprep.mubr.msk.f32.mxu0 %vm1428_vm3, %v5988_v59  ;;  %vm10263_vm2 = vcmask 261120  }
 0xd44   : > { %14915 = vmatmul.mubr.msk.f32.vlgmr.msra.gmra.mrb[14].mxu0 %vm1428_vm3, %v5989_v60 }
 0xe17   : > { %v19648_v5 = vpop.f32.mrb[14].mxu0 }
 0xe18   : > { %6169 = vst.msk [vmem:[#allocation2 + $0x28] sm:$0xff] %vm6164_vm1, %v19648_v5  ;;  %v19652_v12 = vpop.f32.mrb[15].mxu0 }
 0xe19   : > { %6168 = vst.msk [vmem:[#allocation2 + $0x8] sm:$0xff] %vm6164_vm1, %v19652_v12 }
 0xe1f   : > { %v19656_v20 = vld [vmem:[#allocation2 + $0x28] sm:$0xff] }
 0xe20   : > { %v16897_v21 = vpack.i.bf16 %v19656_v20, %v19644_v4  ;;  %v6171_v38 = vld [vmem:[#allocation2 + $0x8] sm:$0xff] }
 0xe21   : > { %v16892_v40 = vpack.i.bf16 %v6171_v38, %v19644_v4  ;;  %v16912_v55 = vpack.i.bf16 %v19656_v20, %v6171_v38  ;;  %v15949_v18 = vpack.c.bf16 %v19656_v20, %v6171_v38 }
 0xe22   : > { %16898 = vrot.lane.b32.xlu1 %v16897_v21, %s18397_s26 }
 0xe23   : > { %16893 = vrot.lane.b32.xlu0 %v16892_v40, %s18397_s26 }
 0xe26   : > { %16908 = vrot.lane.b32.xlu1 %v16897_v21, %s18406_s15 }
 0xe27   : > { %16903 = vrot.lane.b32.xlu0 %v16892_v40, %s18406_s15 }
 0xe2a   : > { %16918 = vrot.lane.b32.xlu1 %v16892_v40, %s18407_s0 }
 0xe2b   : > { %16913 = vrot.lane.b32.xlu0 %v16912_v55, %s18408_s2 }
 0xe2e   : > { %16928 = vrot.lane.b32.xlu1 %v16912_v55, %s18409_s10 }
 0xe2f   : > { %16923 = vrot.lane.b32.xlu0 %v16897_v21, %s18407_s0 }
 0xe32   : > { %16938 = vrot.lane.b32.xlu1 %v16892_v40, %s18410_s3  ;;  %v6651_v40 = vld [vmem:[#allocation23 + $0x78] sm:$0xff] }
 0xe33   : > { %16933 = vrot.lane.b32.xlu0 %v16912_v55, %s18400_s9 }
 0xe36   : > { %16948 = vrot.lane.b32.xlu1 %v16912_v55, %s18411_s12 }
 0xe37   : > { %16943 = vrot.lane.b32.xlu0 %v16897_v21, %s18410_s3 }
 0xe3a   : > { %7040 = vperm.xlu1 %16891, %v7032_v56   ;;  %v6747_v56 = vld [vmem:[#allocation23 + $0x50] sm:$0xff] }
 0xe3b   : > { %7035 = vperm.xlu0 %16890, %v7031_v2  }
 0xe94   : > { %v16899_v6 = vpop.permute.xlu1 %16898 }
 0xe95   : > { %v16901_v16 = vunpack.i.h.bf16 %v16899_v6  ;;  %v16900_v17 = vunpack.i.l.bf16 %v16899_v6  ;;  %v16894_v22 = vpop.permute.xlu0 %16893 }
 0xe96   : > { %v16896_v23 = vunpack.i.h.bf16 %v16894_v22  ;;  %v16895_v46 = vunpack.i.l.bf16 %v16894_v22  ;;  %v6748_v22 = vld [vmem:[#allocation23 + $0x58] sm:$0xff] }
 0xe97   : > { %v6192_v47 = vsel %vm1425_vm4, %v16900_v17, %v16901_v16 }
 0xe98   : > { %v16909_v62 = vpop.permute.xlu1 %16908  ;;  %v6191_v63 = vsel %vm1425_vm4, %v16895_v46, %v16896_v23  ;;  %v6744_v23 = vld [vmem:[#allocation23 + $0x20] sm:$0xff] }
 0xe99   : > { %v16911_v9 = vunpack.i.h.bf16 %v16909_v62  ;;  %v16910_v10 = vunpack.i.l.bf16 %v16909_v62  ;;  %v16904_v15 = vpop.permute.xlu0 %16903  ;;  %v15937_v19 = vpack.c.bf16 %v6192_v47, %v6191_v63  ;;  %v6745_v47 = vld [vmem:[#allocation23 + $0x28] sm:$0xff]  ;;  %v6931_v62 = vld [vmem:[#allocation23 + $0x80] sm:$0xff] }
 0xe9a   : > { %v16906_v0 = vunpack.i.h.bf16 %v16904_v15  ;;  %v16905_v25 = vunpack.i.l.bf16 %v16904_v15  ;;  %v6932_v63 = vld [vmem:[#allocation23 + $0x88] sm:$0xff]  ;;  %v19701_v15 = vld [vmem:[#allocation26] ss:$0 sm:$0xff] }
 0xe9b   : > { %15938 = vmatprep.subr.bf16.mxu1 %v15937_v19  ;;  %v6286_v26 = vsel %vm6284_vm13, %v16910_v10, %v16911_v9 }
 0xe9c   : > { %15940 = vmatpush3.bf16.msra.mxu1 %v15937_v19  ;;  %v6285_v35 = vsel %vm6284_vm13, %v16905_v25, %v16906_v0  ;;  %v16919_v14 = vpop.permute.xlu1 %16918 }
 0xe9d   : > { %v16914_v37 = vpop.permute.xlu0 %16913  ;;  %v15941_v44 = vpack.c.bf16 %v6286_v26, %v6285_v35  ;;  %v16921_v28 = vunpack.i.h.bf16 %v16919_v14  ;;  %v16920_v32 = vunpack.i.l.bf16 %v16919_v14 }
 0xe9e   : > { %v16916_v53 = vunpack.i.h.bf16 %v16914_v37  ;;  %v16915_v58 = vunpack.i.l.bf16 %v16914_v37  ;;  %v19705_v37 = vld [vmem:[#allocation26 + $0x1] ss:$0 sm:$0xff] }
 0xe9f   : > { %14922 = vmatmul.mubr.msk.f32.vlgmr.msra.gmra.mrb[20].mxu1 %vm1794_vm0, %v6178_v3  ;;  %15942 = vmatprep.subr.bf16.mxu1 %v15941_v44  ;;  %v6564_v45 = vsel %vm2285_vm11, %v16920_v32, %v16921_v28 }
 0xea0   : > { %15944 = vmatpush3.bf16.msra.mxu1 %v15941_v44  ;;  %v15945_v61 = vpack.c.bf16 %v16916_v53, %v16915_v58  ;;  %14928 = vmatprep.mubr.msk.f32.mxu1 %vm1794_vm0, %v6174_v49  ;;  %v16929_v33 = vpop.permute.xlu1 %16928 }
 0xea1   : > { %v16924_v8 = vpop.permute.xlu0 %16923  ;;  %v16931_v48 = vunpack.i.h.bf16 %v16929_v33  ;;  %v16930_v51 = vunpack.i.l.bf16 %v16929_v33 }
 0xea2   : > { %15946 = vmatprep.subr.bf16.mxu1 %v15945_v61  ;;  %v16926_v24 = vunpack.i.h.bf16 %v16924_v8  ;;  %v16925_v27 = vunpack.i.l.bf16 %v16924_v8 }
 0xea3   : > { %v15957_v29 = vpack.c.bf16 %v16931_v48, %v16930_v51  ;;  %v13972_v51 = vld [vmem:[%s20425_s23 + $0x30] sm:$0xff] }
 0xea4   : > { %v6565_v39 = vsel %vm2285_vm11, %v16925_v27, %v16926_v24  ;;  %v16939_v52 = vpop.permute.xlu1 %16938  ;;  %14984 = vmatprep.mubr.msk.f32.mxu0 %vm1794_vm0, %v13972_v51  ;;  %v13984_v51 = vld [vmem:[%s20425_s23 + $0x18] sm:$0xff] }
 0xea5   : > { %v15953_v54 = vpack.c.bf16 %v6565_v39, %v6564_v45  ;;  %v16934_v34 = vpop.permute.xlu0 %16933  ;;  %v16941_v20 = vunpack.i.h.bf16 %v16939_v52  ;;  %v16940_v21 = vunpack.i.l.bf16 %v16939_v52  ;;  %v7937_v52 = vld [vmem:[#allocation28] sm:$0xff] }
 0xea6   : > { %v16936_v30 = vunpack.i.h.bf16 %v16934_v34  ;;  %v16935_v1 = vunpack.i.l.bf16 %v16934_v34 }
 0xea7   : > { %14929 = vmatmul.mubr.msk.f32.vlgmr.msra.gmra.mrb[20].mxu1 %vm1794_vm0, %v6175_v7  ;;  %v6845_v2 = vsel %vm6844_vm14, %v16940_v21, %v16941_v20 }
 0xea8   : > { %15948 = vmatpush3.bf16.msra.mxu1 %v15945_v61  ;;  %14935 = vmatprep.mubr.msk.f32.mxu1 %vm1794_vm0, %v6371_v11  ;;  %v15961_v59 = vpack.c.bf16 %v16936_v30, %v16935_v1  ;;  %v16949_v38 = vpop.permute.xlu1 %16948  ;;  %v13985_v30 = vld [vmem:[%s20425_s23 + $0x40] sm:$0xff]  ;;  %v13986_v1 = vld [vmem:[%s20425_s23 + $0x48] sm:$0xff] }
 0xea9   : > { %15950 = vmatprep.subr.bf16.mxu1 %v15949_v18  ;;  %v16944_v43 = vpop.permute.xlu0 %16943  ;;  %v16951_v6 = vunpack.i.h.bf16 %v16949_v38  ;;  %v16950_v16 = vunpack.i.l.bf16 %v16949_v38 }
 0xeaa   : > { %v16946_v60 = vunpack.i.h.bf16 %v16944_v43  ;;  %v16945_v13 = vunpack.i.l.bf16 %v16944_v43  ;;  %v13983_v43 = vld [vmem:[%s20425_s23 + $0x10] sm:$0xff] }
 0xeab   : > { %v15969_v46 = vpack.c.bf16 %v16951_v6, %v16950_v16 }
 0xeac   : > { %v6846_v55 = vsel %vm6844_vm14, %v16945_v13, %v16946_v60  ;;  %v7951_v60 = vld [vmem:[#allocation29] sm:$0xff] }
 0xead   : > { %v15965_v17 = vpack.c.bf16 %v6846_v55, %v6845_v2 }
 0xeaf   : > { %14936 = vmatmul.mubr.msk.f32.vlgmr.msra.gmra.mrb[20].mxu1 %vm1794_vm0, %v6372_v36 }
 0xeb0   : > { %15952 = vmatpush3.bf16.msra.mxu1 %v15949_v18  ;;  %14942 = vmatprep.mubr.msk.f32.mxu1 %vm1794_vm0, %v6473_v42 }
 0xeb1   : > { %15954 = vmatprep.subr.bf16.mxu1 %v15953_v54 }
 0xeb3   : > { %14943 = vmatmul.mubr.msk.f32.vlgmr.msra.gmra.mrb[22].mxu1 %vm1794_vm0, %v6474_v57 }
 0xeb4   : > { %15956 = vmatpush3.bf16.msra.mxu1 %v15953_v54  ;;  %14949 = vmatprep.mubr.msk.f32.mxu1 %vm1794_vm0, %v6470_v31 }
 0xeb5   : > { %15958 = vmatprep.subr.bf16.mxu1 %v15957_v29 }
 0xeb9   : > { %v7041_v7 = vpop.permute.xlu1 %7040 }
 0xeba   : > { %v7036_v11 = vpop.permute.xlu0 %7035 }
 0xebb   : > { %14950 = vmatmul.mubr.msk.f32.vlgmr.msra.gmra.mrb[22].mxu1 %vm1794_vm0, %v6471_v41 }
 0xebc   : > { %15960 = vmatpush3.bf16.msra.mxu1 %v15957_v29  ;;  %14956 = vmatprep.mubr.msk.f32.mxu1 %vm1794_vm0, %v6650_v50  ;;  %v7938_v50 = vld [vmem:[#allocation28 + $0x8] sm:$0xff] }
 0xebd   : > { %15962 = vmatprep.subr.bf16.mxu1 %v15961_v59 }
 0xec3   : > { %14957 = vmatmul.mubr.msk.f32.vlgmr.msra.gmra.mrb[22].mxu1 %vm1794_vm0, %v6651_v40 }
 0xec4   : > { %15964 = vmatpush3.bf16.msra.mxu1 %v15961_v59  ;;  %14963 = vmatprep.mubr.msk.f32.mxu1 %vm1794_vm0, %v6747_v56  ;;  %v7952_v59 = vld [vmem:[#allocation29 + $0x8] sm:$0xff] }
 0xec5   : > { %15966 = vmatprep.subr.bf16.mxu1 %v15965_v17 }
 0xec7   : > { %14964 = vmatmul.mubr.msk.f32.vlgmr.msra.gmra.mrb[24].mxu1 %vm1794_vm0, %v6748_v22 }
 0xec8   : > { %15968 = vmatpush3.bf16.msra.mxu1 %v15965_v17  ;;  %14970 = vmatprep.mubr.msk.f32.mxu1 %vm1794_vm0, %v6744_v23 }
 0xec9   : > { %15970 = vmatprep.subr.bf16.mxu1 %v15969_v46 }
 0xecf   : > { %14971 = vmatmul.mubr.msk.f32.vlgmr.msra.gmra.mrb[24].mxu1 %vm1794_vm0, %v6745_v47 }
 0xed0   : > { %15972 = vmatpush3.bf16.msra.mxu1 %v15969_v46  ;;  %14977 = vmatprep.mubr.msk.f32.mxu1 %vm1794_vm0, %v6931_v62 }
 0xed7   : > { %14978 = vmatmul.mubr.msk.f32.vlgmr.msra.gmra.mrb[24].mxu1 %vm1794_vm0, %v6932_v63 }
 0xed8   : > { %15005 = vmatprep.mubr.msk.f32.mxu1 %vm1794_vm0, %v13985_v30 }
 0xf82   : > { %v14937_v9 = vpop.f32.mrb[20].mxu1 }
 0xf83   : > { %v6451_v10 = vpop.f32.mrb[21].mxu1  ;;  %v6468_v19 = vmul.f32 %v14937_v9, %v19701_v15  ;;  %v13973_v9 = vld [vmem:[%s20425_s23 + $0x38] sm:$0xff] }
 0xf84   : > { %v6467_v0 = vmul.f32 %v19701_v15, %v6451_v10 }
 0xf96   : > { %v14958_v25 = vpop.f32.mrb[22].mxu1 }
 0xf97   : > { %v6742_v26 = vadd.f32 %v14958_v25, %v6468_v19  ;;  %v6730_v3 = vpop.f32.mrb[23].mxu1  ;;  %v7065_v25 = vld [vmem:[%s20425_s23] sm:$0xff] }
 0xf98   : > { %v6741_v35 = vadd.f32 %v6730_v3, %v6467_v0 }
 0xfaa   : > { %v14979_v44 = vpop.f32.mrb[24].mxu1 }
 0xfab   : > { %v7028_v49 = vmul.f32 %v14979_v44, %v19705_v37  ;;  %v7011_v53 = vpop.f32.mrb[25].mxu1 }
 0xfac   : > { %v7027_v58 = vmul.f32 %v19705_v37, %v7011_v53 }
 0xfad   : > { %v7030_v61 = vadd.f32 %v7028_v49, %v6742_v26 }
 0xfae   : > { %v7029_v8 = vadd.f32 %v7027_v58, %v6741_v35 }
 0xfaf   : > { %v7044_v14 = vadd.f32 %v7041_v7, %v7030_v61 }
 0xfb0   : > { %v7043_v18 = vadd.f32 %v7036_v11, %v7029_v8 }
 0xfb1   : > { %v13971_v24 = vmul.f32 -1.442695, %v7044_v14 }
 0xfb2   : > { %v13970_v27 = vmul.f32 -1.442695, %v7043_v18 }
 0xfb3   : > { %17445 = vpow2.f32 %v13971_v24 }
 0xfb4   : > { %17447 = vpow2.f32 %v13970_v27 }
 0xfbd   : > { %v17446_v28 = vpop.eup %17445 }
 0xfbe   : > { %v17448_v32 = vpop.eup %17447  ;;  %v7052_v33 = vadd.f32 1.0, %v17446_v28 }
 0xfbf   : > { %v7051_v36 = vadd.f32 1.0, %v17448_v32 }
 0xfc0   : > { %17449 = vrcp.f32 %v7052_v33  ;;  %v13978_v33 = vld [vmem:[%s20425_s23 + $0x60] sm:$0xff] }
 0xfc1   : > { %17451 = vrcp.f32 %v7051_v36 }
 0xfca   : > { %v17450_v39 = vpop.eup %17449 }
 0xfcb   : > { %v17452_v42 = vpop.eup %17451  ;;  %v7058_v45 = vmul.f32 %v17450_v39, %v7044_v14 }
 0xfcc   : > { %v7057_v48 = vmul.f32 %v17452_v42, %v7043_v18  ;;  %v7066_v18 = vld [vmem:[%s20425_s23 + $0x8] sm:$0xff] }
 0xfcd   : > { %7060 = vst.msk [vmem:[#allocation2 + $0x28] sm:$0xff] %vm6164_vm1, %v7058_v45 }
 0xfce   : > { %7059 = vst.msk [vmem:[#allocation2 + $0x8] sm:$0xff] %vm6164_vm1, %v7057_v48 }
 0xfd4   : > { %v7064_v54 = vld [vmem:[#allocation2 + $0x28] sm:$0xff] }
 0xfd5   : > { %v16957_v57 = vpack.i.bf16 %v7064_v54, %v19644_v4  ;;  %v7062_v31 = vld [vmem:[#allocation2 + $0x8] sm:$0xff] }
 0xfd6   : > { %v16952_v34 = vpack.i.bf16 %v7062_v31, %v19644_v4  ;;  %v15985_v29 = vpack.c.bf16 %v7064_v54, %v7062_v31  ;;  %v16977_v41 = vpack.i.bf16 %v7064_v54, %v7062_v31 }
 0xfd7   : > { %16958 = vrot.lane.b32.xlu1 %v16957_v57, %s18397_s26 }
 0xfd8   : > { %16953 = vrot.lane.b32.xlu0 %v16952_v34, %s18397_s26  ;;  %15986 = vmatprep.subr.bf16.mxu1 %v15985_v29 }
 0xfd9   : > { %15988 = vmatpush3.bf16.msra.mxu1 %v15985_v29 }
 0xfdb   : > { %16968 = vrot.lane.b32.xlu1 %v16957_v57, %s18406_s15 }
 0xfdc   : > { %16963 = vrot.lane.b32.xlu0 %v16952_v34, %s18406_s15  ;;  %15006 = vmatmul.mubr.msk.f32.vlgmr.msra.gmra.mrb[26].mxu1 %vm1794_vm0, %v13986_v1  ;;  %v13979_v1 = vld [vmem:[%s20425_s23 + $0x68] sm:$0xff] }
 0xfdd   : > { %15012 = vmatprep.mubr.msk.f32.mxu1 %vm1794_vm0, %v13983_v43 }
 0xfdf   : > { %16978 = vrot.lane.b32.xlu1 %v16977_v41, %s18400_s9 }
 0xfe0   : > { %16973 = vrot.lane.b32.xlu0 %v16977_v41, %s18408_s2 }
 0xfe3   : > { %16983 = vrot.lane.b32.xlu1 %v16957_v57, %s18407_s0 }
 0xfe4   : > { %16988 = vrot.lane.b32.xlu0 %v16952_v34, %s18407_s0 }
 0xfe7   : > { %16998 = vrot.lane.b32.xlu1 %v16957_v57, %s18410_s3  ;;  %v13991_v57 = vld [vmem:[%s20425_s23 + $0x70] sm:$0xff] }
 0xfe8   : > { %16993 = vrot.lane.b32.xlu0 %v16952_v34, %s18410_s3 }
 0xfeb   : > { %17008 = vrot.lane.b32.xlu1 %v16977_v41, %s18411_s12 }
 0xfec   : > { %17003 = vrot.lane.b32.xlu0 %v16977_v41, %s18409_s10 }
 0xfef   : > { %7946 = vperm.xlu1 %16891, %v7938_v50   ;;  %v13997_v50 = vld [vmem:[%s20425_s23 + $0x50] sm:$0xff] }
 0xff0   : > { %7941 = vperm.xlu0 %16890, %v7937_v52  }
 0xff3   : > { %7960 = vperm.xlu1 %16891, %v7952_v59  }
 0xff4   : > { %7955 = vperm.xlu0 %16890, %v7951_v60  }
0x1049   : > { %v16959_v13 = vpop.permute.xlu1 %16958 }
0x104a   : > { %v16961_v20 = vunpack.i.h.bf16 %v16959_v13  ;;  %v16960_v21 = vunpack.i.l.bf16 %v16959_v13  ;;  %v16954_v38 = vpop.permute.xlu0 %16953  ;;  %v13992_v13 = vld [vmem:[%s20425_s23 + $0x78] sm:$0xff] }
0x104b   : > { %v16956_v40 = vunpack.i.h.bf16 %v16954_v38  ;;  %v16955_v55 = vunpack.i.l.bf16 %v16954_v38 }
0x104c   : > { %v7083_v56 = vsel %vm1425_vm4, %v16960_v21, %v16961_v20  ;;  %v13998_v20 = vld [vmem:[%s20425_s23 + $0x58] sm:$0xff]  ;;  %v13995_v21 = vld [vmem:[%s20425_s23 + $0x20] sm:$0xff] }
0x104d   : > { %v16969_v2 = vpop.permute.xlu1 %16968  ;;  %v7082_v6 = vsel %vm1425_vm4, %v16955_v55, %v16956_v40  ;;  %v13996_v40 = vld [vmem:[%s20425_s23 + $0x28] sm:$0xff]  ;;  %v14003_v55 = vld [vmem:[%s20425_s23 + $0x80] sm:$0xff] }
0x104e   : > { %v16971_v16 = vunpack.i.h.bf16 %v16969_v2  ;;  %v16970_v17 = vunpack.i.l.bf16 %v16969_v2  ;;  %v16964_v22 = vpop.permute.xlu0 %16963  ;;  %v15973_v23 = vpack.c.bf16 %v7083_v56, %v7082_v6  ;;  %v14004_v56 = vld [vmem:[%s20425_s23 + $0x88] sm:$0xff]  ;;  %v18412_v2 = vmov 0.0|0.0  }
0x104f   : > { %v16966_v46 = vunpack.i.h.bf16 %v16964_v22  ;;  %v16965_v47 = vunpack.i.l.bf16 %v16964_v22 }
0x1050   : > { %15974 = vmatprep.subr.bf16.mxu0 %v15973_v23  ;;  %v7176_v62 = vsel %vm6284_vm13, %v16970_v17, %v16971_v16 }
0x1051   : > { %v16979_v63 = vpop.permute.xlu1 %16978  ;;  %15976 = vmatpush3.bf16.msra.mxu0 %v15973_v23  ;;  %v7175_v10 = vsel %vm6284_vm13, %v16965_v47, %v16966_v46 }
0x1052   : > { %v16974_v19 = vpop.permute.xlu0 %16973  ;;  %v15977_v0 = vpack.c.bf16 %v7176_v62, %v7175_v10  ;;  %v16981_v8 = vunpack.i.h.bf16 %v16979_v63  ;;  %v16980_v11 = vunpack.i.l.bf16 %v16979_v63 }
0x1053   : > { %v16976_v26 = vunpack.i.h.bf16 %v16974_v19  ;;  %v16975_v3 = vunpack.i.l.bf16 %v16974_v19 }
0x1054   : > { %14985 = vmatmul.mubr.msk.f32.vlgmr.msra.gmra.mrb[22].mxu0 %vm1794_vm0, %v13973_v9  ;;  %15978 = vmatprep.subr.bf16.mxu0 %v15977_v0  ;;  %v15997_v36 = vpack.c.bf16 %v16981_v8, %v16980_v11 }
0x1055   : > { %v16984_v35 = vpop.permute.xlu1 %16983  ;;  %15980 = vmatpush3.bf16.msra.mxu0 %v15977_v0  ;;  %v15981_v44 = vpack.c.bf16 %v16976_v26, %v16975_v3  ;;  %14991 = vmatprep.mubr.msk.f32.mxu0 %vm1794_vm0, %v7065_v25 }
0x1056   : > { %v16986_v49 = vunpack.i.h.bf16 %v16984_v35  ;;  %v16985_v53 = vunpack.i.l.bf16 %v16984_v35  ;;  %v16989_v58 = vpop.permute.xlu0 %16988 }
0x1057   : > { %v16991_v61 = vunpack.i.h.bf16 %v16989_v58  ;;  %v16990_v7 = vunpack.i.l.bf16 %v16989_v58  ;;  %15982 = vmatprep.subr.bf16.mxu0 %v15981_v44 }
0x1058   : > { %v7455_v14 = vsel %vm2285_vm11, %v16985_v53, %v16986_v49 }
0x1059   : > { %v7454_v24 = vsel %vm2285_vm11, %v16990_v7, %v16991_v61  ;;  %v16999_v27 = vpop.permute.xlu1 %16998 }
0x105a   : > { %v16994_v28 = vpop.permute.xlu0 %16993  ;;  %v15989_v32 = vpack.c.bf16 %v7455_v14, %v7454_v24  ;;  %v17001_v39 = vunpack.i.h.bf16 %v16999_v27  ;;  %v17000_v42 = vunpack.i.l.bf16 %v16999_v27 }
0x105b   : > { %v16996_v45 = vunpack.i.h.bf16 %v16994_v28  ;;  %v16995_v48 = vunpack.i.l.bf16 %v16994_v28 }
0x105c   : > { %14992 = vmatmul.mubr.msk.f32.vlgmr.msra.gmra.mrb[22].mxu0 %vm1794_vm0, %v7066_v18  ;;  %15990 = vmatprep.subr.bf16.mxu1 %v15989_v32  ;;  %v7735_v43 = vsel %vm6844_vm14, %v17000_v42, %v17001_v39 }
0x105d   : > { %15984 = vmatpush3.bf16.msra.mxu0 %v15981_v44  ;;  %15992 = vmatpush3.bf16.msra.mxu1 %v15989_v32  ;;  %v17009_v29 = vpop.permute.xlu1 %17008  ;;  %v7734_v41 = vsel %vm6844_vm14, %v16995_v48, %v16996_v45 }
0x105e   : > { %15998 = vmatprep.subr.bf16.mxu0 %v15997_v36  ;;  %v17004_v54 = vpop.permute.xlu0 %17003  ;;  %14998 = vmatprep.mubr.msk.f32.mxu0 %vm1794_vm0, %v13978_v33  ;;  %v17011_v52 = vunpack.i.h.bf16 %v17009_v29  ;;  %v17010_v59 = vunpack.i.l.bf16 %v17009_v29  ;;  %v16001_v60 = vpack.c.bf16 %v7735_v43, %v7734_v41  ;;  %v8740_v41 = vld [vmem:[#allocation32] sm:$0xff] }
0x105f   : > { %v17006_v31 = vunpack.i.h.bf16 %v17004_v54  ;;  %v17005_v34 = vunpack.i.l.bf16 %v17004_v54 }
0x1060   : > { %15013 = vmatmul.mubr.msk.f32.vlgmr.msra.gmra.mrb[26].mxu1 %vm1794_vm0, %v13984_v51  ;;  %v16005_v38 = vpack.c.bf16 %v17011_v52, %v17010_v59 }
0x1061   : > { %v15993_v30 = vpack.c.bf16 %v17006_v31, %v17005_v34  ;;  %15019 = vmatprep.mubr.msk.f32.mxu1 %vm1794_vm0, %v13991_v57 }
0x1063   : > { %15994 = vmatprep.subr.bf16.mxu1 %v15993_v30 }
0x1064   : > { %14999 = vmatmul.mubr.msk.f32.vlgmr.msra.gmra.mrb[22].mxu0 %vm1794_vm0, %v13979_v1  ;;  %15996 = vmatpush3.bf16.msra.mxu1 %v15993_v30  ;;  %v8241_v30 = vld [vmem:[#allocation31 + $0x20] sm:$0xff] }
0x1065   : > { %16000 = vmatpush3.bf16.msra.mxu0 %v15997_v36  ;;  %15026 = vmatprep.mubr.msk.f32.mxu0 %vm1794_vm0, %v13997_v50 }
0x1066   : > { %16002 = vmatprep.subr.bf16.mxu0 %v16001_v60  ;;  %16009 = vmatprep.subr.bf16.mxu1 %v18412_v2 }
0x1068   : > { %15020 = vmatmul.mubr.msk.f32.vlgmr.msra.gmra.mrb[26].mxu1 %vm1794_vm0, %v13992_v13  ;;  %15027 = vmatmul.mubr.msk.f32.vlgmr.msra.gmra.mrb[24].mxu0 %vm1794_vm0, %v13998_v20 }
0x1069   : > { %16004 = vmatpush3.bf16.msra.mxu0 %v16001_v60  ;;  %15033 = vmatprep.mubr.msk.f32.mxu0 %vm1794_vm0, %v13995_v21 }
0x106a   : > { %16006 = vmatprep.subr.bf16.mxu0 %v16005_v38  ;;  %15047 = vmatprep.mubr.msk.f32.mxu1 %vm18413_vm15, %v19644_v4 }
0x106e   : > { %v7947_v24 = vpop.permute.xlu1 %7946 }
0x106f   : > { %v7942_v27 = vpop.permute.xlu0 %7941 }
0x1070   : > { %15034 = vmatmul.mubr.msk.f32.vlgmr.msra.gmra.mrb[24].mxu0 %vm1794_vm0, %v13996_v40 }
0x1071   : > { %16008 = vmatpush3.bf16.msra.mxu0 %v16005_v38  ;;  %15040 = vmatprep.mubr.msk.f32.mxu0 %vm1794_vm0, %v14003_v55 }
0x1072   : > { %16018 = vmatprep.subr.bf16.mxu0 %v18412_v2  ;;  %v7961_v42 = vpop.permute.xlu1 %7960 }
0x1073   : > { %v7956_v45 = vpop.permute.xlu0 %7955 }
0x1078   : > { %15041 = vmatmul.mubr.msk.f32.vlgmr.msra.gmra.mrb[24].mxu0 %vm1794_vm0, %v14004_v56 }
0x1079   : > { %15068 = vmatprep.mubr.msk.f32.mxu0 %vm18413_vm15, %v19644_v4 }
0x1137   : > { %v15000_v6 = vpop.f32.mrb[22].mxu0 }
0x1138   : > { %v7341_v16 = vpop.f32.mrb[23].mxu0  ;;  %v7358_v17 = vmul.f32 %v15000_v6, %v19701_v15 }
0x1139   : > { %v7357_v22 = vmul.f32 %v19701_v15, %v7341_v16 }
0x113b   : > { %v15021_v23 = vpop.f32.mrb[26].mxu1 }
0x113c   : > { %v7632_v46 = vadd.f32 %v15021_v23, %v7358_v17  ;;  %v7620_v47 = vpop.f32.mrb[27].mxu1 }
0x113d   : > { %v7631_v62 = vadd.f32 %v7620_v47, %v7357_v22  ;;  %v7975_v22 = vld [vmem:[#allocation31 + $0x18] sm:$0xff] }
0x114b   : > { %v15042_v63 = vpop.f32.mrb[24].mxu0 }
0x114c   : > { %v7917_v9 = vmul.f32 %v15042_v63, %v19705_v37  ;;  %v7900_v10 = vpop.f32.mrb[25].mxu0 }
0x114d   : > { %v7916_v19 = vmul.f32 %v19705_v37, %v7900_v10 }
0x114e   : > { %v7919_v0 = vadd.f32 %v7917_v9, %v7632_v46 }
0x114f   : > { %v7918_v25 = vadd.f32 %v7916_v19, %v7631_v62  ;;  %v8239_v19 = vld [vmem:[#allocation31 + $0x8] sm:$0xff] }
0x1150   : > { %v7921_v26 = vmul.f32 %v7919_v0, %v7919_v0 }
0x1151   : > { %v7920_v3 = vmul.f32 %v7918_v25, %v7918_v25 }
0x1152   : > { %v7923_v35 = vsel %vm6164_vm1, %v7921_v26, 0.0 }
0x1153   : > { %v7922_v44 = vsel %vm6164_vm1, %v7920_v3, 0.0 }
0x1154   : > { %v7924_v49 = vadd.f32 %v7923_v35, %v7922_v44 }
0x1156   : > { %v7925_v53 = vrot.slane %v7924_v49, 4 }
0x1158   : > { %v7926_v58 = vadd.f32 %v7925_v53, %v7924_v49  ;;  %v8486_v53 = vld [vmem:[#allocation31 + $0x28] sm:$0xff] }
0x115a   : > { %v7927_v61 = vrot.slane %v7926_v58, 2 }
0x115c   : > { %v7928_v7 = vadd.f32 %v7927_v61, %v7926_v58 }
0x115e   : > { %v7929_v8 = vrot.slane %v7928_v7, 1 }
0x1160   : > { %v7930_v11 = vadd.f32 %v7929_v8, %v7928_v7 }
0x1162   : > { %v7932_v14 = vmul.f32 0.0625, %v7930_v11 }
0x1164   : > { %v7933_v18 = vadd.f32 1e-05, %v7932_v14 }
0x1166   : > { %17453 = vrsqrt.f32 %v7933_v18 }
0x1170   : > { %v17454_v28 = vpop.eup %17453 }
0x1171   : > { %v7935_v32 = vmul.f32 %v17454_v28, %v7918_v25  ;;  %v7936_v33 = vmul.f32 %v17454_v28, %v7919_v0 }
0x1173   : > { %v7949_v36 = vmul.f32 %v7942_v27, %v7935_v32  ;;  %v7950_v39 = vmul.f32 %v7947_v24, %v7936_v33  ;;  %v7973_v33 = vld [vmem:[#allocation31] sm:$0xff] }
0x1175   : > { %v7963_v48 = vadd.f32 %v7956_v45, %v7949_v36  ;;  %v7964_v51 = vadd.f32 %v7961_v42, %v7950_v39 }
0x1177   : > { %v19778_v54 = vadd.f32 %v7963_v48, %v19652_v12  ;;  %v19781_v57 = vadd.f32 %v19648_v5, %v7964_v51  ;;  %v8747_v51 = vld [vmem:[#allocation34] sm:$0xff] }
0x1179   : > { %7967 = vst.msk [vmem:[#allocation2 + $0x8] sm:$0xff] %vm6164_vm1, %v19778_v54  ;;  %7968 = vst.msk [vmem:[#allocation2 + $0x28] sm:$0xff] %vm6164_vm1, %v19781_v57 }
0x1180   : > { %v7972_v31 = vld [vmem:[#allocation2 + $0x28] sm:$0xff] }
0x1181   : > { %v7970_v34 = vld [vmem:[#allocation2 + $0x8] sm:$0xff]  ;;  %v17017_v12 = vpack.i.bf16 %v7972_v31, %v19644_v4 }
0x1182   : > { %v17012_v5 = vpack.i.bf16 %v7970_v34, %v19644_v4  ;;  %v16019_v29 = vpack.c.bf16 %v7972_v31, %v7970_v34  ;;  %v17032_v1 = vpack.i.bf16 %v7972_v31, %v7970_v34  ;;  %v8748_v31 = vld [vmem:[#allocation34 + $0x8] sm:$0xff] }
0x1183   : > { %17018 = vrot.lane.b32.xlu1 %v17017_v12, %s18397_s26 }
0x1184   : > { %17013 = vrot.lane.b32.xlu0 %v17012_v5, %s18397_s26  ;;  %16020 = vmatpush3.bf16.msra.mxu0 %v16019_v29  ;;  %v8484_v29 = vld [vmem:[#allocation31 + $0x10] sm:$0xff] }
0x1185   : > { %16021 = vmatprep.subr.bf16.mxu0 %v18412_v2 }
0x1187   : > { %17028 = vrot.lane.b32.xlu1 %v17017_v12, %s18407_s0  ;;  %15069 = vmatmul.mubr.msk.f32.vlgmr.msra.gmra.mrb[26].mxu0 %vm1794_vm0, %v8241_v30 }
0x1188   : > { %17023 = vrot.lane.b32.xlu0 %v17012_v5, %s18407_s0  ;;  %15075 = vmatprep.mubr.msk.f32.mxu0 %vm18413_vm15, %v19644_v4  ;;  %s18416_s0 = smov 125  }
0x118b   : > { %17038 = vrot.lane.b32.xlu1 %v17012_v5, %s18406_s15 }
0x118c   : > { %17033 = vrot.lane.b32.xlu0 %v17032_v1, %s18400_s9 }
0x118f   : > { %17048 = vrot.lane.b32.xlu1 %v17012_v5, %s18410_s3 }
0x1190   : > { %17043 = vrot.lane.b32.xlu0 %v17017_v12, %s18406_s15  ;;  %s18415_s15 = smov 4  }
0x1193   : > { %17058 = vrot.lane.b32.xlu1 %v17032_v1, %s18408_s2  ;;  %s18417_s2 = smov 3  }
0x1194   : > { %17053 = vrot.lane.b32.xlu0 %v17017_v12, %s18410_s3  ;;  %s18419_s3 = smov 124  }
0x1197   : > { %17068 = vrot.lane.b32.xlu1 %v17032_v1, %s18411_s12 }
0x1198   : > { %17063 = vrot.lane.b32.xlu0 %v17032_v1, %s18409_s10  ;;  %v16037_v1 = vpack.c.bf16 %v8748_v31, %v8747_v51  ;;  %v9474_v51 = vld [vmem:[#allocation34 + $0x80] sm:$0xff]  ;;  %v9475_v31 = vld [vmem:[#allocation34 + $0x88] sm:$0xff]  ;;  %s18418_s10 = smov 123  }
0x119c   : > { %8743 = vperm.xlu0 %16890, %v8740_v41  }
0x11f5   : > { %v17019_v43 = vpop.permute.xlu1 %17018 }
0x11f6   : > { %v17014_v50 = vpop.permute.xlu0 %17013  ;;  %v17021_v52 = vunpack.i.h.bf16 %v17019_v43  ;;  %v17020_v59 = vunpack.i.l.bf16 %v17019_v43 }
0x11f7   : > { %v17016_v60 = vunpack.i.h.bf16 %v17014_v50  ;;  %v17015_v13 = vunpack.i.l.bf16 %v17014_v50  ;;  %v8151_v50 = vld [vmem:[#allocation31 + $0x30] sm:$0xff] }
0x11f8   : > { %v7989_v20 = vsel %vm1425_vm4, %v17020_v59, %v17021_v52  ;;  %v8749_v59 = vld [vmem:[#allocation34 + $0x10] sm:$0xff] }
0x11f9   : > { %v7988_v21 = vsel %vm1425_vm4, %v17015_v13, %v17016_v60  ;;  %v17029_v40 = vpop.permute.xlu1 %17028  ;;  %v8750_v60 = vld [vmem:[#allocation34 + $0x18] sm:$0xff]  ;;  %v8401_v13 = vld [vmem:[#allocation31 + $0x38] sm:$0xff] }
0x11fa   : > { %v16010_v38 = vpack.c.bf16 %v7989_v20, %v7988_v21  ;;  %v17024_v55 = vpop.permute.xlu0 %17023  ;;  %v17031_v56 = vunpack.i.h.bf16 %v17029_v40  ;;  %v17030_v6 = vunpack.i.l.bf16 %v17029_v40  ;;  %v8652_v20 = vld [vmem:[#allocation31 + $0x40] sm:$0xff]  ;;  %v16040_v21 = vpack.c.bf16 %v8750_v60, %v8749_v59  ;;  %v8752_v40 = vld [vmem:[#allocation34 + $0x28] sm:$0xff]  ;;  %v9836_v59 = vld [vmem:[#allocation34 + $0xc0] sm:$0xff] }
0x11fb   : > { %v17026_v16 = vunpack.i.h.bf16 %v17024_v55  ;;  %v17025_v17 = vunpack.i.l.bf16 %v17024_v55  ;;  %v9837_v60 = vld [vmem:[#allocation34 + $0xc8] sm:$0xff] }
0x11fc   : > { %16011 = vmatpush3.bf16.msra.mxu1 %v16010_v38  ;;  %v8324_v23 = vsel %vm2285_vm11, %v17030_v6, %v17031_v56  ;;  %v8751_v38 = vld [vmem:[#allocation34 + $0x20] sm:$0xff]  ;;  %v8753_v56 = vld [vmem:[#allocation34 + $0x30] sm:$0xff]  ;;  %v8754_v6 = vld [vmem:[#allocation34 + $0x38] sm:$0xff] }
0x11fd   : > { %v8323_v46 = vsel %vm2285_vm11, %v17025_v17, %v17026_v16  ;;  %16012 = vmatprep.subr.bf16.mxu1 %v18412_v2  ;;  %v17039_v62 = vpop.permute.xlu1 %17038  ;;  %v16043_v55 = vpack.c.bf16 %v8752_v40, %v8751_v38  ;;  %v16046_v16 = vpack.c.bf16 %v8754_v6, %v8753_v56  ;;  %v9840_v40 = vld [vmem:[#allocation34 + $0xe0] sm:$0xff]  ;;  %v9842_v6 = vld [vmem:[#allocation34 + $0xf0] sm:$0xff] }
0x11fe   : > { %v16022_v47 = vpack.c.bf16 %v8324_v23, %v8323_v46  ;;  %v17034_v63 = vpop.permute.xlu0 %17033  ;;  %v17041_v0 = vunpack.i.h.bf16 %v17039_v62  ;;  %v17040_v25 = vunpack.i.l.bf16 %v17039_v62  ;;  %v8913_v23 = vld [vmem:[#allocation37] sm:$0xff] }
0x11ff   : > { %v17036_v9 = vunpack.i.h.bf16 %v17034_v63  ;;  %v17035_v10 = vunpack.i.l.bf16 %v17034_v63  ;;  %15048 = vmatmul.mubr.msk.f32.vlgmr.msra.gmra.mrb[28].mxu1 %vm1794_vm0, %v7975_v22 }
0x1200   : > { %16023 = vmatpush3.bf16.msra.mxu0 %v16022_v47  ;;  %15054 = vmatprep.mubr.msk.f32.mxu1 %vm18413_vm15, %v19644_v4  ;;  %v8073_v58 = vsel %vm6284_vm13, %v17040_v25, %v17041_v0 }
0x1201   : > { %v16028_v26 = vpack.c.bf16 %v17036_v9, %v17035_v10  ;;  %16027 = vmatprep.subr.bf16.mxu0 %v18412_v2  ;;  %v17049_v3 = vpop.permute.xlu1 %17048 }
0x1202   : > { %v17044_v35 = vpop.permute.xlu0 %17043  ;;  %v17051_v61 = vunpack.i.h.bf16 %v17049_v3  ;;  %v17050_v7 = vunpack.i.l.bf16 %v17049_v3 }
0x1203   : > { %v17046_v44 = vunpack.i.h.bf16 %v17044_v35  ;;  %v17045_v49 = vunpack.i.l.bf16 %v17044_v35  ;;  %15076 = vmatmul.mubr.msk.f32.vlgmr.msra.gmra.mrb[28].mxu0 %vm1794_vm0, %v8239_v19 }
0x1204   : > { %16029 = vmatpush3.bf16.msra.mxu0 %v16028_v26  ;;  %15089 = vmatprep.mubr.msk.f32.mxu0 %vm18413_vm15, %v19644_v4  ;;  %v8574_v36 = vsel %vm6844_vm14, %v17050_v7, %v17051_v61 }
0x1205   : > { %v8074_v8 = vsel %vm6284_vm13, %v17045_v49, %v17046_v44  ;;  %16030 = vmatprep.subr.bf16.mxu0 %v18412_v2  ;;  %v17059_v14 = vpop.permute.xlu1 %17058 }
0x1206   : > { %v16013_v11 = vpack.c.bf16 %v8074_v8, %v8073_v58  ;;  %v17054_v18 = vpop.permute.xlu0 %17053  ;;  %v17061_v24 = vunpack.i.h.bf16 %v17059_v14  ;;  %v17060_v27 = vunpack.i.l.bf16 %v17059_v14  ;;  %v9112_v8 = vld [vmem:[#allocation34 + $0x40] sm:$0xff] }
0x1207   : > { %v17056_v28 = vunpack.i.h.bf16 %v17054_v18  ;;  %v17055_v32 = vunpack.i.l.bf16 %v17054_v18  ;;  %15090 = vmatmul.mubr.msk.f32.vlgmr.msra.gmra.mrb[30].mxu0 %vm1794_vm0, %v8486_v53  ;;  %v9115_v18 = vld [vmem:[#allocation34 + $0x58] sm:$0xff] }
0x1208   : > { %16014 = vmatpush3.bf16.msra.mxu1 %v16013_v11  ;;  %15096 = vmatprep.mubr.msk.f32.mxu0 %vm18413_vm15, %v19644_v4  ;;  %v16016_v39 = vpack.c.bf16 %v17061_v24, %v17060_v27  ;;  %v9113_v11 = vld [vmem:[#allocation34 + $0x48] sm:$0xff]  ;;  %v8915_v24 = vld [vmem:[#allocation37 + $0x10] sm:$0xff] }
0x1209   : > { %v8575_v42 = vsel %vm6844_vm14, %v17055_v32, %v17056_v28  ;;  %16015 = vmatprep.subr.bf16.mxu1 %v18412_v2  ;;  %v17069_v48 = vpop.permute.xlu1 %17068  ;;  %v19860_v14 = vpack.c.bf16 %v9113_v11, %v9112_v8  ;;  %v8916_v28 = vld [vmem:[#allocation37 + $0x18] sm:$0xff]  ;;  %v9116_v32 = vld [vmem:[#allocation34 + $0x60] sm:$0xff] }
0x120a   : > { %v16031_v45 = vpack.c.bf16 %v8575_v42, %v8574_v36  ;;  %v17071_v34 = vunpack.i.h.bf16 %v17069_v48  ;;  %v17070_v12 = vunpack.i.l.bf16 %v17069_v48  ;;  %v17064_v5 = vpop.permute.xlu0 %17063  ;;  %v9118_v42 = vld [vmem:[#allocation34 + $0x70] sm:$0xff] }
0x120b   : > { %15055 = vmatmul.mubr.msk.f32.vlgmr.msra.gmra.mrb[28].mxu1 %vm1794_vm0, %v7973_v33  ;;  %v17066_v41 = vunpack.i.h.bf16 %v17064_v5  ;;  %v17065_v43 = vunpack.i.l.bf16 %v17064_v5  ;;  %v9117_v33 = vld [vmem:[#allocation34 + $0x68] sm:$0xff]  ;;  %v9477_v5 = vld [vmem:[#allocation34 + $0x98] sm:$0xff] }
0x120c   : > { %16017 = vmatpush3.bf16.msra.mxu1 %v16016_v39  ;;  %16032 = vmatpush3.bf16.msra.mxu0 %v16031_v45  ;;  %v16034_v30 = vpack.c.bf16 %v17071_v34, %v17070_v12  ;;  %v19871_v36 = vpack.c.bf16 %v9117_v33, %v9116_v32  ;;  %v19873_v39 = vld [vmem:[#allocation2 + $0x40] sm:$0xff]  ;;  %v9119_v45 = vld [vmem:[#allocation34 + $0x78] sm:$0xff]  ;;  %v19883_v34 = vpack.c.bf16 %v9475_v31, %v9474_v51  ;;  %v9633_v32 = vld [vmem:[#allocation37 + $0x40] sm:$0xff] }
0x120d   : > { %16033 = vmatprep.subr.bf16.mxu0 %v18412_v2  ;;  %15061 = vmatprep.mubr.msk.f32.mxu1 %vm18413_vm15, %v19644_v4  ;;  %v16025_v52 = vpack.c.bf16 %v17066_v41, %v17065_v43  ;;  %v19879_v48 = vpack.c.bf16 %v9119_v45, %v9118_v42  ;;  %v9476_v12 = vld [vmem:[#allocation34 + $0x90] sm:$0xff]  ;;  %v9628_v51 = vld [vmem:[#allocation35 + $0x40] sm:$0xff] }
0x120e   : > { %16024 = vmatprep.subr.bf16.mxu1 %v18412_v2  ;;  %v9480_v43 = vld [vmem:[#allocation34 + $0xb0] sm:$0xff] }
0x120f   : > { %15097 = vmatmul.mubr.msk.f32.vlgmr.msra.gmra.mrb[30].mxu0 %vm1794_vm0, %v8484_v29  ;;  %v19889_v29 = vpack.c.bf16 %v9477_v5, %v9476_v12  ;;  %v9635_v45 = vld [vmem:[#allocation37 + $0x50] sm:$0xff]  ;;  %v9995_v12 = vld [vmem:[#allocation37 + $0x60] sm:$0xff]  ;;  %v9996_v5 = vld [vmem:[#allocation37 + $0x68] sm:$0xff] }
0x1210   : > { %16035 = vmatpush3.bf16.msra.mxu0 %v16034_v30  ;;  %15103 = vmatprep.mubr.msk.f32.mxu0 %vm18413_vm15, %v19644_v4  ;;  %v9478_v30 = vld [vmem:[#allocation34 + $0xa0] sm:$0xff]  ;;  %v9630_v31 = vld [vmem:[#allocation35 + $0x50] sm:$0xff] }
0x1211   : > { %16049 = vmatprep.subr.bf16.mxu0 %v16037_v1 }
0x1213   : > { %15062 = vmatmul.mubr.msk.f32.vlgmr.msra.gmra.mrb[28].mxu1 %vm1794_vm0, %v8151_v50  ;;  %v9481_v50 = vld [vmem:[#allocation34 + $0xb8] sm:$0xff] }
0x1214   : > { %16026 = vmatpush3.bf16.msra.mxu1 %v16025_v52  ;;  %15082 = vmatprep.mubr.msk.f32.mxu1 %vm18413_vm15, %v19644_v4  ;;  %v19899_v52 = vpack.c.bf16 %v9481_v50, %v9480_v43  ;;  %v9992_v43 = vld [vmem:[#allocation35 + $0x70] sm:$0xff]  ;;  %v9993_v50 = vld [vmem:[#allocation35 + $0x78] sm:$0xff] }
0x1215   : > { %16036 = vmatprep.subr.bf16.mxu1 %v18412_v2 }
0x1217   : > { %15083 = vmatmul.mubr.msk.f32.vlgmr.msra.gmra.mrb[30].mxu1 %vm1794_vm0, %v8401_v13  ;;  %15104 = vmatmul.mubr.msk.f32.vlgmr.msra.gmra.mrb[30].mxu0 %vm1794_vm0, %v8652_v20  ;;  %v16133_v13 = vpack.c.bf16 %v9837_v60, %v9836_v59  ;;  %v9838_v20 = vld [vmem:[#allocation34 + $0xd0] sm:$0xff] }
0x1218   : > { %16051 = vmatpush3.bf16.msra.mxu0 %v16037_v1  ;;  %15141 = vmatprep.mubr.msk.f32.mxu0 %vm6164_vm1, %v19778_v54 }
0x1219   : > { %16053 = vmatprep.subr.bf16.mxu0 %v16040_v21  ;;  %16038 = vmatpush3.bf16.msra.mxu1 %v16037_v1  ;;  %v9479_v1 = vld [vmem:[#allocation34 + $0xa8] sm:$0xff] }
0x121a   : > { %16039 = vmatprep.subr.bf16.mxu1 %v18412_v2  ;;  %15122 = vmatprep.mubr.msk.f32.mxu1 %vm18413_vm15, %v19644_v4  ;;  %v19895_v41 = vpack.c.bf16 %v9479_v1, %v9478_v30  ;;  %v9998_v30 = vld [vmem:[#allocation37 + $0x78] sm:$0xff]  ;;  %v9990_v1 = vld [vmem:[#allocation35 + $0x60] sm:$0xff] }
0x121b   : > { %v8744_v49 = vpop.permute.xlu0 %8743 }
0x121c   : > { %16055 = vmatpush3.bf16.msra.mxu0 %v16040_v21 }
0x121d   : > { %16057 = vmatprep.subr.bf16.mxu0 %v16043_v55  ;;  %16041 = vmatpush3.bf16.msra.mxu1 %v16040_v21  ;;  %v9839_v21 = vld [vmem:[#allocation34 + $0xd8] sm:$0xff] }
0x121e   : > { %16042 = vmatprep.subr.bf16.mxu1 %v18412_v2  ;;  %v16136_v38 = vpack.c.bf16 %v9839_v21, %v9838_v20 }
0x1220   : > { %16059 = vmatpush3.bf16.msra.mxu0 %v16043_v55 }
0x1221   : > { %16061 = vmatprep.subr.bf16.mxu0 %v16046_v16  ;;  %16044 = vmatpush3.bf16.msra.mxu1 %v16043_v55  ;;  %v9841_v55 = vld [vmem:[#allocation34 + $0xe8] sm:$0xff] }
0x1222   : > { %16045 = vmatprep.subr.bf16.mxu1 %v18412_v2  ;;  %v16139_v56 = vpack.c.bf16 %v9841_v55, %v9840_v40 }
0x1224   : > { %16063 = vmatpush3.bf16.msra.mxu0 %v16046_v16 }
0x1225   : > { %16047 = vmatpush3.bf16.msra.mxu1 %v16046_v16  ;;  %v9843_v16 = vld [vmem:[#allocation34 + $0xf8] sm:$0xff] }
0x1227   : > { %15142 = vmatmul.mubr.msk.f32.vlgmr.msra.gmra.mrb[32].mxu0 %vm6164_vm1, %v19781_v57 }
0x1228   : > { %15148 = vmatprep.mubr.msk.f32.mxu0 %vm1794_vm0, %v8913_v23 }
0x125a   : > { %v8311_v17 = vpop.f32.mrb[26].mxu0 }
0x125b   : > { %v15070_v22 = vpop.f32.mrb[27].mxu0 }
0x125c   : > { %v8909_v22 = vld [vmem:[#allocation35] sm:$0xff] }
0x12d6   : > { %v8396_v4 = vpop.f32.mrb[28].mxu0 }
0x12d7   : > { %v8397_v46 = vadd.f32 %v8396_v4, %v8311_v17  ;;  %v15077_v47 = vpop.f32.mrb[29].mxu0  ;;  %v16142_v17 = vpack.c.bf16 %v9843_v16, %v9842_v6  ;;  %v8910_v4 = vld [vmem:[#allocation35 + $0x8] sm:$0xff] }
0x12d8   : > { %v8911_v47 = vld [vmem:[#allocation35 + $0x10] sm:$0xff] }
0x12e6   : > { %v8227_v62 = vpop.f32.mrb[28].mxu1 }
0x12e7   : > { %v15063_v63 = vpop.f32.mrb[29].mxu1  ;;  %v8237_v19 = vmul.f32 %v19701_v15, %v8227_v62  ;;  %v8914_v15 = vld [vmem:[#allocation37 + $0x8] sm:$0xff]  ;;  %v8912_v62 = vld [vmem:[#allocation35 + $0x18] sm:$0xff] }
0x12ea   : > { %v8477_v9 = vpop.f32.mrb[30].mxu1  ;;  %v8728_v10 = vpop.f32.mrb[30].mxu0 }
0x12eb   : > { %v8481_v0 = vadd.f32 %v8477_v9, %v8397_v46  ;;  %v15105_v25 = vpop.f32.mrb[31].mxu0  ;;  %v15084_v26 = vpop.f32.mrb[31].mxu1  ;;  %v8738_v35 = vmul.f32 %v19705_v37, %v8728_v10  ;;  %v9114_v37 = vld [vmem:[#allocation34 + $0x50] sm:$0xff] }
0x12ec   : > { %v19865_v27 = vpack.c.bf16 %v9115_v18, %v9114_v37  ;;  %v9274_v37 = vld [vmem:[#allocation37 + $0x38] sm:$0xff]  ;;  %v9266_v18 = vld [vmem:[#allocation35 + $0x20] sm:$0xff] }
0x12ed   : > { %v8482_v3 = vadd.f32 %v8481_v0, %v8237_v19 }
0x12ef   : > { %v8739_v44 = vadd.f32 %v8738_v35, %v8482_v3 }
0x12f1   : > { %v19856_v53 = vadd.f32 %v8744_v49, %v8739_v44 }
0x12f3   : > { %15123 = vmatmul.mubr.msk.f32.vlgmr.msra.gmra.mrb[32].mxu1 %vm6164_vm1, %v19856_v53 }
0x12f4   : > { %15156 = vmatprep.mubr.msk.f32.mxu1 %vm2285_vm11, %v8909_v22  ;;  %v10227_v22 = vld [vmem:[#allocation38 + $0x60] sm:$0xff] }
0x12fa   : > { %v15143_v58 = vpop.f32.mrb[32].mxu0 }
0x12fb   : > { %v8900_v61 = vpop.f32.mrb[33].mxu0 }
0x12fc   : > { %v16064_v7 = vpack.c.bf16 %v15143_v58, %v8900_v61  ;;  %v9271_v61 = vld [vmem:[#allocation37 + $0x20] sm:$0xff] }
0x12fe   : > { %16065 = vmatprep.subr.bf16.mxu0 %v16064_v7 }
0x12ff   : > { %16067 = vmatpush3.bf16.msra.mxu0 %v16064_v7 }
0x1300   : > { %16068 = vmatprep.subr.bf16.mxu0 %v18412_v2 }
0x1302   : > { %15149 = vmatmul.mubr.msk.f32.vlgmr.msra.gmra.mrb[34].mxu0 %vm1794_vm0, %v8914_v15  ;;  %v9272_v15 = vld [vmem:[#allocation37 + $0x28] sm:$0xff] }
0x1303   : > { %16070 = vmatpush3.bf16.msra.mxu0 %v19860_v14  ;;  %15151 = vmatprep.mubr.msk.f32.mxu0 %vm1794_vm0, %v8915_v24  ;;  %v9267_v24 = vld [vmem:[#allocation35 + $0x28] sm:$0xff] }
0x1304   : > { %16071 = vmatprep.subr.bf16.mxu0 %v18412_v2 }
0x1306   : > { %15152 = vmatmul.mubr.msk.f32.gmra.mrb[36].mxu0 %vm1794_vm0, %v8916_v28  ;;  %v9269_v28 = vld [vmem:[#allocation35 + $0x38] sm:$0xff] }
0x1307   : > { %16073 = vmatpush3.bf16.msra.mxu0 %v19865_v27  ;;  %15178 = vmatprep.mubr.msk.f32.mxu0 %vm18413_vm15, %v19873_v39 }
0x1308   : > { %16074 = vmatprep.subr.bf16.mxu0 %v18412_v2 }
0x130b   : > { %16076 = vmatpush3.bf16.msra.mxu0 %v19871_v36 }
0x130c   : > { %16077 = vmatprep.subr.bf16.mxu0 %v18412_v2 }
0x130f   : > { %16079 = vmatpush3.bf16.msra.mxu0 %v19879_v48 }
0x1310   : > { %16100 = vmatprep.subr.bf16.mxu0 %v18412_v2 }
0x1312   : > { %15179 = vmatmul.mubr.msk.f32.vlgmr.msra.gmra.mrb[38].mxu0 %vm6164_vm1, %v19856_v53 }
0x1313   : > { %16102 = vmatpush3.bf16.msra.mxu0 %v19883_v34  ;;  %15234 = vmatprep.mubr.msk.f32.mxu0 %vm18413_vm15, %v19873_v39 }
0x1314   : > { %16103 = vmatprep.subr.bf16.mxu0 %v18412_v2 }
0x1317   : > { %16105 = vmatpush3.bf16.msra.mxu0 %v19889_v29 }
0x1318   : > { %16106 = vmatprep.subr.bf16.mxu0 %v18412_v2 }
0x131b   : > { %16108 = vmatpush3.bf16.msra.mxu0 %v19895_v41 }
0x131c   : > { %16109 = vmatprep.subr.bf16.mxu0 %v18412_v2 }
0x131f   : > { %16111 = vmatpush3.bf16.msra.mxu0 %v19899_v52 }
0x1320   : > { %16132 = vmatprep.subr.bf16.mxu0 %v18412_v2 }
0x1322   : > { %15235 = vmatmul.mubr.msk.f32.vlgmr.msra.gmra.mrb[40].mxu0 %vm6164_vm1, %v19856_v53 }
0x1323   : > { %16134 = vmatpush3.bf16.msra.mxu0 %v16133_v13  ;;  %15290 = vmatprep.mubr.msk.f32.mxu0 %vm18413_vm15, %v19873_v39 }
0x1324   : > { %16135 = vmatprep.subr.bf16.mxu0 %v18412_v2 }
0x1327   : > { %16137 = vmatpush3.bf16.msra.mxu0 %v16136_v38 }
0x1328   : > { %16138 = vmatprep.subr.bf16.mxu0 %v18412_v2 }
0x132b   : > { %16140 = vmatpush3.bf16.msra.mxu0 %v16139_v56 }
0x132c   : > { %16141 = vmatprep.subr.bf16.mxu0 %v18412_v2 }
0x132f   : > { %16143 = vmatpush3.bf16.msra.mxu0 %v16142_v17 }
0x1330   : > { %16145 = vmatprep.subr.bf16.mxu0 %v16133_v13 }
0x1332   : > { %15291 = vmatmul.mubr.msk.f32.vlgmr.msra.gmra.mrb[42].mxu0 %vm6164_vm1, %v19856_v53 }
0x1333   : > { %16147 = vmatpush3.bf16.msra.mxu0 %v16133_v13  ;;  %15309 = vmatprep.mubr.msk.f32.mxu0 %vm6164_vm1, %v19778_v54 }
0x1334   : > { %16149 = vmatprep.subr.bf16.mxu0 %v16136_v38 }
0x1337   : > { %16151 = vmatpush3.bf16.msra.mxu0 %v16136_v38 }
0x1338   : > { %16153 = vmatprep.subr.bf16.mxu0 %v16139_v56 }
0x133b   : > { %16155 = vmatpush3.bf16.msra.mxu0 %v16139_v56 }
0x133c   : > { %16157 = vmatprep.subr.bf16.mxu0 %v16142_v17 }
0x133f   : > { %16159 = vmatpush3.bf16.msra.mxu0 %v16142_v17 }
0x1342   : > { %15310 = vmatmul.mubr.msk.f32.vlgmr.msra.gmra.mrb[44].mxu0 %vm6164_vm1, %v19781_v57 }
0x1343   : > { %15338 = vmatprep.mubr.msk.f32.mxu0 %vm10263_vm2, %v10227_v22 }
0x13c6   : > { %v8824_v23 = vpop.f32.mrb[32].mxu1 }
0x13c7   : > { %v15124_v46 = vpop.f32.mrb[33].mxu1  ;;  %15154 = vmatprep.subr.mxu1 %v8824_v23 }
0x13c8   : > { %15155 = vmatpush3.msra.mxu1 %v8824_v23 }
0x13c9   : > { %15157 = vmatmul.mubr.msk.f32.vlgmr.msra.gmra.mrb[34].mxu1 %vm2285_vm11, %v8910_v4  ;;  %16081 = vmatprep.subr.bf16.mxu1 %v19860_v14 }
0x13ca   : > { %16083 = vmatpush3.bf16.msra.mxu1 %v19860_v14  ;;  %15159 = vmatprep.mubr.msk.f32.mxu1 %vm2285_vm11, %v8911_v47  ;;  %v9273_v14 = vld [vmem:[#allocation37 + $0x30] sm:$0xff] }
0x13cb   : > { %16085 = vmatprep.subr.bf16.mxu1 %v19865_v27 }
0x13cd   : > { %15160 = vmatmul.mubr.msk.f32.gmra.mrb[36].mxu1 %vm2285_vm11, %v8912_v62 }
0x13ce   : > { %16087 = vmatpush3.bf16.msra.mxu1 %v19865_v27  ;;  %15197 = vmatprep.mubr.msk.f32.mxu1 %vm6164_vm1, %v19778_v54  ;;  %v9268_v27 = vld [vmem:[#allocation35 + $0x30] sm:$0xff] }
0x13cf   : > { %16089 = vmatprep.subr.bf16.mxu1 %v19871_v36 }
0x13d2   : > { %16091 = vmatpush3.bf16.msra.mxu1 %v19871_v36 }
0x13d3   : > { %16093 = vmatprep.subr.bf16.mxu1 %v19879_v48 }
0x13d5   : > { %v19930_v63 = vpop.f32.mrb[34].mxu0 }
0x13d6   : > { %16095 = vmatpush3.bf16.msra.mxu1 %v19879_v48  ;;  %v19933_v9 = vpop.f32.mrb[35].mxu0  ;;  %v9636_v48 = vld [vmem:[#allocation37 + $0x58] sm:$0xff] }
0x13d9   : > { %15198 = vmatmul.mubr.msk.f32.vlgmr.msra.gmra.mrb[38].mxu1 %vm6164_vm1, %v19781_v57  ;;  %v19937_v10 = vpop.f32.mrb[36].mxu0 }
0x13da   : > { %v19939_v19 = vpop.f32.mrb[37].mxu0  ;;  %15204 = vmatprep.mubr.msk.f32.mxu1 %vm1794_vm0, %v9271_v61 }
0x13e5   : > { %v9186_v0 = vpop.f32.mrb[38].mxu0 }
0x13e6   : > { %v15180_v25 = vpop.f32.mrb[39].mxu0 }
0x13e7   : > { %v10611_v25 = vld [vmem:[#allocation38 + $0x20] sm:$0xff] }
0x13f5   : > { %v9548_v26 = vpop.f32.mrb[40].mxu0 }
0x13f6   : > { %v15236_v3 = vpop.f32.mrb[41].mxu0 }
0x13f7   : > { %v11332_v3 = vld [vmem:[#allocation40] sm:$0xff] }
0x1405   : > { %v19941_v35 = vpop.f32.mrb[42].mxu0 }
0x1406   : > { %v15292_v44 = vpop.f32.mrb[43].mxu0 }
0x1407   : > { %v11334_v44 = vld [vmem:[#allocation40 + $0x10] sm:$0xff] }
0x1415   : > { %v15311_v49 = vpop.f32.mrb[44].mxu0 }
0x1416   : > { %v9980_v53 = vpop.f32.mrb[45].mxu0 }
0x1417   : > { %v16160_v58 = vpack.c.bf16 %v15311_v49, %v9980_v53 }
0x14ac   : > { %v15199_v7 = vpop.f32.mrb[38].mxu1 }
0x14ad   : > { %v9256_v8 = vpop.f32.mrb[39].mxu1 }
0x14ae   : > { %v16096_v11 = vpack.c.bf16 %v15199_v7, %v9256_v8 }
0x14b0   : > { %16097 = vmatprep.subr.bf16.mxu1 %v16096_v11 }
0x14b1   : > { %16099 = vmatpush3.bf16.msra.mxu1 %v16096_v11 }
0x14b2   : > { %15210 = vmatprep.subr.mxu1 %v9186_v0 }
0x14b4   : > { %15205 = vmatmul.mubr.msk.f32.vlgmr.msra.gmra.mrb[34].mxu1 %vm1794_vm0, %v9272_v15 }
0x14b5   : > { %15211 = vmatpush3.msra.mxu1 %v9186_v0  ;;  %15207 = vmatprep.mubr.msk.f32.mxu1 %vm1794_vm0, %v9273_v14  ;;  %v10619_v0 = vld [vmem:[#allocation38 + $0x98] sm:$0xff] }
0x14b6   : > { %16113 = vmatprep.subr.bf16.mxu1 %v19883_v34 }
0x14b8   : > { %15208 = vmatmul.mubr.msk.f32.gmra.mrb[36].mxu1 %vm1794_vm0, %v9274_v37 }
0x14b9   : > { %15212 = vmatprep.mubr.msk.f32.mxu1 %vm2285_vm11, %v9266_v18 }
0x14bc   : > { %15213 = vmatmul.mubr.msk.f32.vlgmr.msra.gmra.mrb[34].mxu1 %vm2285_vm11, %v9267_v24 }
0x14bd   : > { %16115 = vmatpush3.bf16.msra.mxu1 %v19883_v34  ;;  %15215 = vmatprep.mubr.msk.f32.mxu1 %vm2285_vm11, %v9268_v27  ;;  %v9631_v34 = vld [vmem:[#allocation35 + $0x58] sm:$0xff] }
0x14be   : > { %16117 = vmatprep.subr.bf16.mxu1 %v19889_v29 }
0x14c0   : > { %15216 = vmatmul.mubr.msk.f32.gmra.mrb[36].mxu1 %vm2285_vm11, %v9269_v28 }
0x14c1   : > { %16119 = vmatpush3.bf16.msra.mxu1 %v19889_v29  ;;  %15253 = vmatprep.mubr.msk.f32.mxu1 %vm6164_vm1, %v19778_v54  ;;  %v9634_v54 = vld [vmem:[#allocation37 + $0x48] sm:$0xff]  ;;  %v9997_v29 = vld [vmem:[#allocation37 + $0x70] sm:$0xff] }
0x14c2   : > { %16121 = vmatprep.subr.bf16.mxu1 %v19895_v41 }
0x14c5   : > { %16123 = vmatpush3.bf16.msra.mxu1 %v19895_v41  ;;  %v9991_v41 = vld [vmem:[#allocation35 + $0x68] sm:$0xff] }
0x14c6   : > { %16125 = vmatprep.subr.bf16.mxu1 %v19899_v52 }
0x14c9   : > { %16127 = vmatpush3.bf16.msra.mxu1 %v19899_v52 }
0x14cc   : > { %15254 = vmatmul.mubr.msk.f32.vlgmr.msra.gmra.mrb[40].mxu1 %vm6164_vm1, %v19781_v57  ;;  %v9629_v57 = vld [vmem:[#allocation35 + $0x48] sm:$0xff]  ;;  %vm10201_vm1 = vcmask 1047680  }
0x14cd   : > { %15260 = vmatprep.mubr.msk.f32.mxu1 %vm1794_vm0, %v9633_v32  ;;  %10204 = vst.msk [vmem:[#allocation2 + $0x28] sm:$0xff] %vm10201_vm1, %v19873_v39  ;;  %10202 = vst.msk [vmem:[#allocation2 + $0x8] sm:$0xff] %vm10201_vm1, %v19873_v39 }
0x14ce   : > { %10206 = vst.msk [vmem:[#allocation2 + $0x48] sm:$0xff] %vm10201_vm1, %v19873_v39  ;;  %10208 = vst.msk [vmem:[#allocation2 + $0x68] sm:$0xff] %vm10201_vm1, %v19873_v39 }
0x159f   : > { %v15255_v33 = vpop.f32.mrb[40].mxu1 }
0x15a0   : > { %v9618_v36 = vpop.f32.mrb[41].mxu1 }
0x15a1   : > { %v16128_v42 = vpack.c.bf16 %v15255_v33, %v9618_v36 }
0x15a3   : > { %16129 = vmatprep.subr.bf16.mxu1 %v16128_v42 }
0x15a4   : > { %16131 = vmatpush3.bf16.msra.mxu1 %v16128_v42 }
0x15a5   : > { %15266 = vmatprep.subr.mxu1 %v9548_v26 }
0x15a7   : > { %15261 = vmatmul.mubr.msk.f32.vlgmr.msra.gmra.mrb[34].mxu1 %vm1794_vm0, %v9634_v54 }
0x15a8   : > { %15267 = vmatpush3.msra.mxu1 %v9548_v26  ;;  %15263 = vmatprep.mubr.msk.f32.mxu1 %vm1794_vm0, %v9635_v45  ;;  %v11333_v26 = vld [vmem:[#allocation40 + $0x8] sm:$0xff] }
0x15a9   : > { %16161 = vmatprep.subr.bf16.mxu1 %v16160_v58 }
0x15ab   : > { %15264 = vmatmul.mubr.msk.f32.gmra.mrb[36].mxu1 %vm1794_vm0, %v9636_v48 }
0x15ac   : > { %15268 = vmatprep.mubr.msk.f32.mxu1 %vm2285_vm11, %v9628_v51 }
0x15af   : > { %15269 = vmatmul.mubr.msk.f32.vlgmr.msra.gmra.mrb[34].mxu1 %vm2285_vm11, %v9629_v57 }
0x15b0   : > { %16163 = vmatpush3.bf16.msra.mxu1 %v16160_v58  ;;  %15271 = vmatprep.mubr.msk.f32.mxu1 %vm2285_vm11, %v9630_v31 }
0x15b1   : > { %15322 = vmatprep.subr.mxu1 %v19941_v35 }
0x15b3   : > { %15272 = vmatmul.mubr.msk.f32.gmra.mrb[36].mxu1 %vm2285_vm11, %v9631_v34 }
0x15b4   : > { %15316 = vmatprep.mubr.msk.f32.mxu1 %vm1794_vm0, %v9995_v12 }
0x15b7   : > { %15317 = vmatmul.mubr.msk.f32.vlgmr.msra.gmra.mrb[34].mxu1 %vm1794_vm0, %v9996_v5  ;;  %v10228_v5 = vld [vmem:[#allocation38 + $0x68] sm:$0xff] }
0x15b8   : > { %15323 = vmatpush3.msra.mxu1 %v19941_v35  ;;  %15319 = vmatprep.mubr.msk.f32.mxu1 %vm1794_vm0, %v9997_v29  ;;  %v11335_v35 = vld [vmem:[#allocation40 + $0x18] sm:$0xff] }
0x15bb   : > { %15320 = vmatmul.mubr.msk.f32.gmra.mrb[36].mxu1 %vm1794_vm0, %v9998_v30 }
0x15bc   : > { %15324 = vmatprep.mubr.msk.f32.mxu1 %vm2285_vm11, %v9990_v1 }
0x15bf   : > { %15325 = vmatmul.mubr.msk.f32.vlgmr.msra.gmra.mrb[34].mxu1 %vm2285_vm11, %v9991_v41 }
0x15c0   : > { %15327 = vmatprep.mubr.msk.f32.mxu1 %vm2285_vm11, %v9992_v43 }
0x15c3   : > { %15328 = vmatmul.mubr.msk.f32.gmra.mrb[36].mxu1 %vm2285_vm11, %v9993_v50  ;;  %v10229_v50 = vld [vmem:[#allocation38 + $0x70] sm:$0xff] }
0x1692   : > { %v15326_v52 = vpop.f32.mrb[34].mxu1 }
0x1693   : > { %v19986_v59 = vadd.f32 %v15326_v52, %v19930_v63  ;;  %v10174_v60 = vpop.f32.mrb[35].mxu1 }
0x1694   : > { %v19989_v13 = vadd.f32 %v10174_v60, %v19933_v9 }
0x1695   : > { %10211 = vst.msk [vmem:[#allocation2 + $0x28] sm:$0xff] %vm1794_vm0, %v19986_v59 }
0x1696   : > { %10210 = vst.msk [vmem:[#allocation2 + $0x8] sm:$0xff] %vm1794_vm0, %v19989_v13  ;;  %v15329_v20 = vpop.f32.mrb[36].mxu1 }
0x1697   : > { %v19996_v21 = vadd.f32 %v15329_v20, %v19937_v10  ;;  %v10184_v38 = vpop.f32.mrb[37].mxu1  ;;  %v10617_v10 = vld [vmem:[#allocation38 + $0x88] sm:$0xff] }
0x1698   : > { %v19999_v40 = vadd.f32 %v10184_v38, %v19939_v19  ;;  %v10618_v19 = vld [vmem:[#allocation38 + $0x90] sm:$0xff] }
0x1699   : > { %10213 = vst.msk [vmem:[#allocation2 + $0x68] sm:$0xff] %vm1794_vm0, %v19996_v21 }
0x169a   : > { %10212 = vst.msk [vmem:[#allocation2 + $0x48] sm:$0xff] %vm1794_vm0, %v19999_v40 }
0x169c   : > { %v10217_v55 = vld [vmem:[#allocation2 + $0x28] sm:$0xff] }
0x169d   : > { %v17072_v56 = vpack.i.bf16 %v10217_v55, %v19873_v39  ;;  %v10215_v6 = vld [vmem:[#allocation2 + $0x8] sm:$0xff] }
0x169e   : > { %v17077_v16 = vpack.i.bf16 %v10215_v6, %v19873_v39  ;;  %v16188_v17 = vpack.c.bf16 %v10217_v55, %v10215_v6  ;;  %v17112_v63 = vpack.i.bf16 %v10217_v55, %v10215_v6  ;;  %v10230_v55 = vld [vmem:[#allocation38 + $0x78] sm:$0xff] }
0x169f   : > { %17073 = vrot.lane.b32.xlu0 %v17072_v56, %s18397_s26 }
0x16a0   : > { %17078 = vrot.lane.b32.xlu1 %v17077_v16, %s18397_s26  ;;  %16189 = vmatprep.subr.bf16.mxu1 %v16188_v17  ;;  %v10221_v23 = vld [vmem:[#allocation2 + $0x68] sm:$0xff] }
0x16a1   : > { %16191 = vmatpush3.bf16.msra.mxu1 %v16188_v17  ;;  %v17082_v4 = vpack.i.bf16 %v10221_v23, %v19873_v39  ;;  %v10219_v46 = vld [vmem:[#allocation2 + $0x48] sm:$0xff]  ;;  %v10222_v17 = vld [vmem:[#allocation38] sm:$0xff] }
0x16a2   : > { %v17087_v47 = vpack.i.bf16 %v10219_v46, %v19873_v39  ;;  %v16192_v62 = vpack.c.bf16 %v10221_v23, %v10219_v46  ;;  %v10616_v39 = vld [vmem:[#allocation38 + $0x80] sm:$0xff]  ;;  %v17137_v9 = vpack.i.bf16 %v10221_v23, %v10219_v46 }
0x16a3   : > { %17083 = vrot.lane.b32.xlu0 %v17082_v4, %s18397_s26  ;;  %15380 = vmatprep.mubr.msk.f32.mxu1 %vm10263_vm2, %v10616_v39 }
0x16a4   : > { %17088 = vrot.lane.b32.xlu1 %v17087_v47, %s18397_s26  ;;  %16193 = vmatprep.subr.bf16.mxu1 %v16192_v62 }
0x16a5   : > { %16195 = vmatpush3.bf16.msra.mxu1 %v16192_v62 }
0x16a7   : > { %17098 = vrot.lane.b32.xlu0 %v17072_v56, %s18414_s13 }
0x16a8   : > { %17093 = vrot.lane.b32.xlu1 %v17077_v16, %s18414_s13  ;;  %15381 = vmatmul.mubr.msk.f32.vlgmr.msra.gmra.mrb[42].mxu1 %vm10263_vm2, %v10617_v10 }
0x16a9   : > { %15383 = vmatprep.mubr.msk.f32.mxu1 %vm10263_vm2, %v10618_v19 }
0x16ab   : > { %17103 = vrot.lane.b32.xlu0 %v17082_v4, %s18414_s13 }
0x16ac   : > { %17108 = vrot.lane.b32.xlu1 %v17087_v47, %s18414_s13  ;;  %15384 = vmatmul.mubr.msk.f32.gmra.mrb[44].mxu1 %vm10263_vm2, %v10619_v0 }
0x16ad   : > { %15394 = vmatprep.mubr.msk.f32.mxu1 %vm10263_vm2, %v10611_v25 }
0x16af   : > { %17128 = vrot.lane.b32.xlu0 %v17072_v56, %s18415_s15 }
0x16b0   : > { %17113 = vrot.lane.b32.xlu1 %v17112_v63, %s18416_s0 }
0x16b3   : > { %17138 = vrot.lane.b32.xlu0 %v17137_v9, %s18416_s0 }
0x16b4   : > { %17118 = vrot.lane.b32.xlu1 %v17112_v63, %s18400_s9 }
0x16b7   : > { %17143 = vrot.lane.b32.xlu0 %v17072_v56, %s18417_s2 }
0x16b8   : > { %17123 = vrot.lane.b32.xlu1 %v17077_v16, %s18415_s15 }
0x16bb   : > { %17148 = vrot.lane.b32.xlu0 %v17137_v9, %s18400_s9 }
0x16bc   : > { %17133 = vrot.lane.b32.xlu1 %v17077_v16, %s18417_s2 }
0x16bf   : > { %17153 = vrot.lane.b32.xlu0 %v17082_v4, %s18415_s15 }
0x16c0   : > { %17158 = vrot.lane.b32.xlu1 %v17087_v47, %s18415_s15 }
0x16c3   : > { %17168 = vrot.lane.b32.xlu0 %v17082_v4, %s18417_s2 }
0x16c4   : > { %17163 = vrot.lane.b32.xlu1 %v17087_v47, %s18417_s2  ;;  %v10223_v47 = vld [vmem:[#allocation38 + $0x8] sm:$0xff] }
0x16c7   : > { %17178 = vrot.lane.b32.xlu0 %v17112_v63, %s18418_s10 }
0x16c8   : > { %17173 = vrot.lane.b32.xlu1 %v17112_v63, %s18419_s3 }
0x16cb   : > { %17188 = vrot.lane.b32.xlu0 %v17137_v9, %s18418_s10 }
0x16cc   : > { %17183 = vrot.lane.b32.xlu1 %v17137_v9, %s18419_s3  ;;  %v10224_v9 = vld [vmem:[#allocation38 + $0x10] sm:$0xff] }
0x16cf   : > { %11343 = vperm.xlu0 %16890, %v11333_v26  }
0x16d0   : > { %11338 = vperm.xlu1 %16891, %v11332_v3  }
0x16d3   : > { %11353 = vperm.xlu0 %16890, %v11335_v35   ;;  %v10225_v35 = vld [vmem:[#allocation38 + $0x18] sm:$0xff] }
0x16d4   : > { %11348 = vperm.xlu1 %16891, %v11334_v44  }
0x1711   : > { %v17074_v49 = vpop.permute.xlu0 %17073 }
0x1712   : > { %v17076_v53 = vunpack.i.h.bf16 %v17074_v49  ;;  %v17075_v58 = vunpack.i.l.bf16 %v17074_v49  ;;  %v17079_v61 = vpop.permute.xlu1 %17078  ;;  %v10484_v49 = vld [vmem:[#allocation38 + $0xc0] sm:$0xff] }
0x1713   : > { %v17081_v7 = vunpack.i.h.bf16 %v17079_v61  ;;  %v17080_v8 = vunpack.i.l.bf16 %v17079_v61 }
0x1714   : > { %v10256_v11 = vsel %vm1425_vm4, %v17075_v58, %v17076_v53 }
0x1715   : > { %v17084_v15 = vpop.permute.xlu0 %17083  ;;  %v10255_v14 = vsel %vm1425_vm4, %v17080_v8, %v17081_v7  ;;  %v10485_v8 = vld [vmem:[#allocation38 + $0xc8] sm:$0xff] }
0x1716   : > { %v17086_v37 = vunpack.i.h.bf16 %v17084_v15  ;;  %v17085_v18 = vunpack.i.l.bf16 %v17084_v15  ;;  %v17089_v24 = vpop.permute.xlu1 %17088  ;;  %v16164_v27 = vpack.c.bf16 %v10256_v11, %v10255_v14 }
0x1717   : > { %v17091_v28 = vunpack.i.h.bf16 %v17089_v24  ;;  %v17090_v32 = vunpack.i.l.bf16 %v17089_v24 }
0x1718   : > { %16165 = vmatprep.subr.bf16.mxu0 %v16164_v27  ;;  %v10258_v33 = vsel %vm1425_vm4, %v17085_v18, %v17086_v37 }
0x1719   : > { %16167 = vmatpush3.bf16.msra.mxu0 %v16164_v27  ;;  %v17099_v36 = vpop.permute.xlu0 %17098  ;;  %v10257_v42 = vsel %vm1425_vm4, %v17090_v32, %v17091_v28 }
0x171a   : > { %v17101_v54 = vunpack.i.h.bf16 %v17099_v36  ;;  %v17100_v45 = vunpack.i.l.bf16 %v17099_v36  ;;  %v17094_v48 = vpop.permute.xlu1 %17093  ;;  %v16168_v51 = vpack.c.bf16 %v10258_v33, %v10257_v42  ;;  %v10486_v36 = vld [vmem:[#allocation38 + $0xd0] sm:$0xff] }
0x171b   : > { %v17096_v57 = vunpack.i.h.bf16 %v17094_v48  ;;  %v17095_v31 = vunpack.i.l.bf16 %v17094_v48 }
0x171c   : > { %16169 = vmatprep.subr.bf16.mxu0 %v16168_v51  ;;  %v10379_v34 = vsel %vm10377_vm5, %v17100_v45, %v17101_v54  ;;  %v10487_v45 = vld [vmem:[#allocation38 + $0xd8] sm:$0xff] }
0x171d   : > { %v17104_v12 = vpop.permute.xlu0 %17103  ;;  %16171 = vmatpush3.bf16.msra.mxu0 %v16168_v51  ;;  %v10378_v29 = vsel %vm10377_vm5, %v17095_v31, %v17096_v57 }
0x171e   : > { %v17106_v30 = vunpack.i.h.bf16 %v17104_v12  ;;  %v17105_v1 = vunpack.i.l.bf16 %v17104_v12  ;;  %v17109_v41 = vpop.permute.xlu1 %17108  ;;  %v16172_v43 = vpack.c.bf16 %v10379_v34, %v10378_v29  ;;  %v10966_v34 = vld [vmem:[#allocation38 + $0xa0] sm:$0xff] }
0x171f   : > { %v17111_v52 = vunpack.i.h.bf16 %v17109_v41  ;;  %v17110_v60 = vunpack.i.l.bf16 %v17109_v41 }
0x1720   : > { %15339 = vmatmul.mubr.msk.f32.vlgmr.msra.gmra.mrb[46].mxu0 %vm10263_vm2, %v10228_v5  ;;  %16173 = vmatprep.subr.bf16.mxu0 %v16172_v43  ;;  %v10381_v20 = vsel %vm10377_vm5, %v17105_v1, %v17106_v30 }
0x1721   : > { %v17129_v38 = vpop.permute.xlu0 %17128  ;;  %16175 = vmatpush3.bf16.msra.mxu0 %v16172_v43  ;;  %15341 = vmatprep.mubr.msk.f32.mxu0 %vm10263_vm2, %v10229_v50  ;;  %v10380_v56 = vsel %vm10377_vm5, %v17110_v60, %v17111_v52  ;;  %v10967_v50 = vld [vmem:[#allocation38 + $0xa8] sm:$0xff] }
0x1722   : > { %v17114_v6 = vpop.permute.xlu1 %17113  ;;  %v16176_v16 = vpack.c.bf16 %v10381_v20, %v10380_v56  ;;  %v17131_v25 = vunpack.i.h.bf16 %v17129_v38  ;;  %v17130_v26 = vunpack.i.l.bf16 %v17129_v38 }
0x1723   : > { %v17116_v22 = vunpack.i.h.bf16 %v17114_v6  ;;  %v17115_v23 = vunpack.i.l.bf16 %v17114_v6  ;;  %v10968_v6 = vld [vmem:[#allocation38 + $0xb0] sm:$0xff] }
0x1724   : > { %15342 = vmatmul.mubr.msk.f32.gmra.mrb[48].mxu0 %vm10263_vm2, %v10230_v55  ;;  %16177 = vmatprep.subr.bf16.mxu0 %v16176_v16  ;;  %v10734_v15 = vsel %vm1428_vm3, %v17130_v26, %v17131_v25 }
0x1725   : > { %v16180_v4 = vpack.c.bf16 %v17116_v22, %v17115_v23  ;;  %v17139_v46 = vpop.permute.xlu0 %17138  ;;  %16179 = vmatpush3.bf16.msra.mxu0 %v16176_v16  ;;  %15352 = vmatprep.mubr.msk.f32.mxu0 %vm10263_vm2, %v10222_v17  ;;  %v10969_v22 = vld [vmem:[#allocation38 + $0xb8] sm:$0xff] }
0x1726   : > { %v17141_v62 = vunpack.i.h.bf16 %v17139_v46  ;;  %v17140_v63 = vunpack.i.l.bf16 %v17139_v46  ;;  %v17119_v39 = vpop.permute.xlu1 %17118 }
0x1727   : > { %16181 = vmatprep.subr.bf16.mxu0 %v16180_v4  ;;  %v17121_v19 = vunpack.i.h.bf16 %v17119_v39  ;;  %v17120_v0 = vunpack.i.l.bf16 %v17119_v39 }
0x1728   : > { %v16184_v10 = vpack.c.bf16 %v17141_v62, %v17140_v63  ;;  %15353 = vmatmul.mubr.msk.f32.vlgmr.msra.gmra.mrb[46].mxu0 %vm10263_vm2, %v10223_v47  ;;  %v10612_v63 = vld [vmem:[#allocation38 + $0x28] sm:$0xff] }
0x1729   : > { %v17144_v3 = vpop.permute.xlu0 %17143  ;;  %16183 = vmatpush3.bf16.msra.mxu0 %v16180_v4  ;;  %15355 = vmatprep.mubr.msk.f32.mxu0 %vm10263_vm2, %v10224_v9  ;;  %v16212_v61 = vpack.c.bf16 %v17121_v19, %v17120_v0  ;;  %v10613_v0 = vld [vmem:[#allocation38 + $0x30] sm:$0xff] }
0x172a   : > { %v17124_v44 = vpop.permute.xlu1 %17123  ;;  %16185 = vmatprep.subr.bf16.mxu0 %v16184_v10  ;;  %v17146_v27 = vunpack.i.h.bf16 %v17144_v3  ;;  %v17145_v28 = vunpack.i.l.bf16 %v17144_v3  ;;  %v10962_v3 = vld [vmem:[#allocation38 + $0x48] sm:$0xff] }
0x172b   : > { %v17126_v53 = vunpack.i.h.bf16 %v17124_v44  ;;  %v17125_v58 = vunpack.i.l.bf16 %v17124_v44 }
0x172c   : > { %15356 = vmatmul.mubr.msk.f32.gmra.mrb[48].mxu0 %vm10263_vm2, %v10225_v35  ;;  %v11097_v29 = vsel %vm11095_vm6, %v17145_v28, %v17146_v27  ;;  %v10841_v27 = vld [vmem:[#allocation38 + $0xf0] sm:$0xff] }
0x172d   : > { %v17149_v7 = vpop.permute.xlu0 %17148  ;;  %16187 = vmatpush3.bf16.msra.mxu0 %v16184_v10  ;;  %15366 = vmatprep.mubr.msk.f32.mxu0 %vm10263_vm2, %v10484_v49  ;;  %v10733_v11 = vsel %vm1428_vm3, %v17125_v58, %v17126_v53  ;;  %v10961_v10 = vld [vmem:[#allocation38 + $0x40] sm:$0xff]  ;;  %v10614_v53 = vld [vmem:[#allocation38 + $0x38] sm:$0xff]  ;;  %v11204_v28 = vld [vmem:[#allocation38 + $0x110] sm:$0xff] }
0x172e   : > { %v17151_v14 = vunpack.i.h.bf16 %v17149_v7  ;;  %v17150_v37 = vunpack.i.l.bf16 %v17149_v7  ;;  %v17134_v18 = vpop.permute.xlu1 %17133  ;;  %16213 = vmatprep.subr.bf16.mxu0 %v16212_v61  ;;  %v16196_v24 = vpack.c.bf16 %v10734_v15, %v10733_v11  ;;  %v10963_v7 = vld [vmem:[#allocation38 + $0x50] sm:$0xff]  ;;  %v10839_v11 = vld [vmem:[#allocation38 + $0xe0] sm:$0xff] }
0x172f   : > { %v17136_v32 = vunpack.i.h.bf16 %v17134_v18  ;;  %v17135_v33 = vunpack.i.l.bf16 %v17134_v18  ;;  %v10840_v18 = vld [vmem:[#allocation38 + $0xe8] sm:$0xff] }
0x1730   : > { %v16216_v42 = vpack.c.bf16 %v17151_v14, %v17150_v37  ;;  %15367 = vmatmul.mubr.msk.f32.vlgmr.msra.gmra.mrb[46].mxu0 %vm10263_vm2, %v10485_v8  ;;  %16197 = vmatprep.subr.bf16.mxu1 %v16196_v24  ;;  %v10964_v14 = vld [vmem:[#allocation38 + $0x58] sm:$0xff]  ;;  %v11202_v37 = vld [vmem:[#allocation38 + $0x100] sm:$0xff] }
0x1731   : > { %v17154_v54 = vpop.permute.xlu0 %17153  ;;  %16199 = vmatpush3.bf16.msra.mxu1 %v16196_v24  ;;  %16215 = vmatpush3.bf16.msra.mxu0 %v16212_v61  ;;  %v11096_v48 = vsel %vm11095_vm6, %v17135_v33, %v17136_v32  ;;  %v11203_v24 = vld [vmem:[#allocation38 + $0x108] sm:$0xff]  ;;  %v10842_v32 = vld [vmem:[#allocation38 + $0xf8] sm:$0xff] }
0x1732   : > { %v17156_v51 = vunpack.i.h.bf16 %v17154_v54  ;;  %v17155_v57 = vunpack.i.l.bf16 %v17154_v54  ;;  %v17159_v31 = vpop.permute.xlu1 %17158  ;;  %16217 = vmatprep.subr.bf16.mxu0 %v16216_v42  ;;  %15369 = vmatprep.mubr.msk.f32.mxu0 %vm10263_vm2, %v10486_v36  ;;  %v16220_v30 = vpack.c.bf16 %v11097_v29, %v11096_v48  ;;  %v11205_v33 = vld [vmem:[#allocation38 + $0x118] sm:$0xff]  ;;  %v20085_v48 = vld [vmem:[#allocation41] ss:$0 sm:$0xff] }
0x1733   : > { %v17161_v12 = vunpack.i.h.bf16 %v17159_v31  ;;  %v17160_v5 = vunpack.i.l.bf16 %v17159_v31 }
0x1734   : > { %15370 = vmatmul.mubr.msk.f32.gmra.mrb[48].mxu0 %vm10263_vm2, %v10487_v45  ;;  %v10736_v1 = vsel %vm1428_vm3, %v17155_v57, %v17156_v51  ;;  %v20088_v57 = vld [vmem:[#allocation41 + $0x1] ss:$0 sm:$0xff] }
0x1735   : > { %v17169_v41 = vpop.permute.xlu0 %17168  ;;  %16219 = vmatpush3.bf16.msra.mxu0 %v16216_v42  ;;  %15422 = vmatprep.mubr.msk.f32.mxu0 %vm10263_vm2, %v10966_v34  ;;  %v10735_v43 = vsel %vm1428_vm3, %v17160_v5, %v17161_v12 }
0x1736   : > { %v17171_v52 = vunpack.i.h.bf16 %v17169_v41  ;;  %v17170_v60 = vunpack.i.l.bf16 %v17169_v41  ;;  %v17164_v20 = vpop.permute.xlu1 %17163  ;;  %16221 = vmatprep.subr.bf16.mxu0 %v16220_v30  ;;  %v16200_v38 = vpack.c.bf16 %v10736_v1, %v10735_v43 }
0x1737   : > { %v17166_v55 = vunpack.i.h.bf16 %v17164_v20  ;;  %v17165_v56 = vunpack.i.l.bf16 %v17164_v20 }
0x1738   : > { %16201 = vmatprep.subr.bf16.mxu1 %v16200_v38  ;;  %15423 = vmatmul.mubr.msk.f32.vlgmr.msra.gmra.mrb[50].mxu0 %vm10263_vm2, %v10967_v50  ;;  %v11099_v16 = vsel %vm11095_vm6, %v17170_v60, %v17171_v52 }
0x1739   : > { %v17179_v17 = vpop.permute.xlu0 %17178  ;;  %16203 = vmatpush3.bf16.msra.mxu1 %v16200_v38  ;;  %16223 = vmatpush3.bf16.msra.mxu0 %v16220_v30  ;;  %v11098_v23 = vsel %vm11095_vm6, %v17165_v56, %v17166_v55 }
0x173a   : > { %v17181_v4 = vunpack.i.h.bf16 %v17179_v17  ;;  %v17180_v46 = vunpack.i.l.bf16 %v17179_v17  ;;  %v17174_v47 = vpop.permute.xlu1 %17173  ;;  %15425 = vmatprep.mubr.msk.f32.mxu0 %vm10263_vm2, %v10968_v6  ;;  %v16224_v62 = vpack.c.bf16 %v11099_v16, %v11098_v23 }
0x173b   : > { %v17176_v39 = vunpack.i.h.bf16 %v17174_v47  ;;  %v17175_v9 = vunpack.i.l.bf16 %v17174_v47 }
0x173c   : > { %v16228_v19 = vpack.c.bf16 %v17181_v4, %v17180_v46  ;;  %15426 = vmatmul.mubr.msk.f32.gmra.mrb[52].mxu0 %vm10263_vm2, %v10969_v22  ;;  %16225 = vmatprep.subr.bf16.mxu0 %v16224_v62 }
0x173d   : > { %v16204_v25 = vpack.c.bf16 %v17176_v39, %v17175_v9  ;;  %v17189_v26 = vpop.permute.xlu0 %17188  ;;  %16227 = vmatpush3.bf16.msra.mxu0 %v16224_v62  ;;  %15395 = vmatmul.mubr.msk.f32.vlgmr.msra.gmra.mrb[42].mxu1 %vm10263_vm2, %v10612_v63 }
0x173e   : > { %v17191_v35 = vunpack.i.h.bf16 %v17189_v26  ;;  %v17190_v44 = vunpack.i.l.bf16 %v17189_v26  ;;  %v17184_v49 = vpop.permute.xlu1 %17183  ;;  %16229 = vmatprep.subr.bf16.mxu0 %v16228_v19  ;;  %15436 = vmatprep.mubr.msk.f32.mxu0 %vm10263_vm2, %v10961_v10 }
0x173f   : > { %v17186_v58 = vunpack.i.h.bf16 %v17184_v49  ;;  %v17185_v61 = vunpack.i.l.bf16 %v17184_v49  ;;  %16205 = vmatprep.subr.bf16.mxu1 %v16204_v25  ;;  %15397 = vmatprep.mubr.msk.f32.mxu1 %vm10263_vm2, %v10613_v0 }
0x1740   : > { %v16232_v8 = vpack.c.bf16 %v17191_v35, %v17190_v44  ;;  %16207 = vmatpush3.bf16.msra.mxu1 %v16204_v25  ;;  %15437 = vmatmul.mubr.msk.f32.vlgmr.msra.gmra.mrb[50].mxu0 %vm10263_vm2, %v10962_v3 }
0x1741   : > { %v16208_v15 = vpack.c.bf16 %v17186_v58, %v17185_v61  ;;  %16231 = vmatpush3.bf16.msra.mxu0 %v16228_v19  ;;  %15398 = vmatmul.mubr.msk.f32.gmra.mrb[44].mxu1 %vm10263_vm2, %v10614_v53 }
0x1742   : > { %16233 = vmatprep.subr.bf16.mxu0 %v16232_v8  ;;  %15439 = vmatprep.mubr.msk.f32.mxu0 %vm10263_vm2, %v10963_v7 }
0x1743   : > { %16209 = vmatprep.subr.bf16.mxu1 %v16208_v15  ;;  %15408 = vmatprep.mubr.msk.f32.mxu1 %vm10263_vm2, %v10839_v11 }
0x1744   : > { %16211 = vmatpush3.bf16.msra.mxu1 %v16208_v15  ;;  %15440 = vmatmul.mubr.msk.f32.gmra.mrb[52].mxu0 %vm10263_vm2, %v10964_v14 }
0x1745   : > { %16235 = vmatpush3.bf16.msra.mxu0 %v16232_v8  ;;  %15450 = vmatprep.mubr.msk.f32.mxu0 %vm10263_vm2, %v11202_v37 }
0x1747   : > { %15409 = vmatmul.mubr.msk.f32.vlgmr.msra.gmra.mrb[42].mxu1 %vm10263_vm2, %v10840_v18 }
0x1748   : > { %15451 = vmatmul.mubr.msk.f32.vlgmr.msra.gmra.mrb[50].mxu0 %vm10263_vm2, %v11203_v24  ;;  %15411 = vmatprep.mubr.msk.f32.mxu1 %vm10263_vm2, %v10841_v27 }
0x1749   : > { %15453 = vmatprep.mubr.msk.f32.mxu0 %vm10263_vm2, %v11204_v28 }
0x174b   : > { %15412 = vmatmul.mubr.msk.f32.gmra.mrb[44].mxu1 %vm10263_vm2, %v10842_v32 }
0x174c   : > { %15454 = vmatmul.mubr.msk.f32.gmra.mrb[52].mxu0 %vm10263_vm2, %v11205_v33 }
0x174e   : > { %v11344_v43 = vpop.permute.xlu0 %11343 }
0x174f   : > { %v11339_v60 = vpop.permute.xlu1 %11338 }
0x1752   : > { %v11354_v9 = vpop.permute.xlu0 %11353 }
0x1753   : > { %v11349_v0 = vpop.permute.xlu1 %11348 }
0x1803   : > { %v15368_v36 = vpop.f32.mrb[46].mxu0 }
0x1804   : > { %v10578_v42 = vpop.f32.mrb[47].mxu0  ;;  %v10607_v51 = vmul.f32 %v15368_v36, %v20085_v48  ;;  %v20101_v36 = vld [vmem:[#allocation2 + $0x40] sm:$0xff] }
0x1805   : > { %v10606_v31 = vmul.f32 %v20085_v48, %v10578_v42 }
0x1807   : > { %v15371_v54 = vpop.f32.mrb[48].mxu0 }
0x1808   : > { %v10588_v45 = vpop.f32.mrb[49].mxu0  ;;  %v10609_v50 = vmul.f32 %v15371_v54, %v20085_v48 }
0x1809   : > { %v10608_v20 = vmul.f32 %v20085_v48, %v10588_v45 }
0x181a   : > { %v15410_v34 = vpop.f32.mrb[42].mxu1 }
0x181b   : > { %v10957_v12 = vadd.f32 %v15410_v34, %v10607_v51  ;;  %v10933_v5 = vpop.f32.mrb[43].mxu1  ;;  %v15452_v29 = vpop.f32.mrb[50].mxu0 }
0x181c   : > { %v10956_v30 = vadd.f32 %v10933_v5, %v10606_v31  ;;  %v11325_v1 = vmul.f32 %v15452_v29, %v20088_v57  ;;  %v11296_v41 = vpop.f32.mrb[51].mxu0  ;;  %v11405_v31 = vld [vmem:[#allocation43 + $0x60] sm:$0xff] }
0x181d   : > { %v11324_v52 = vmul.f32 %v20088_v57, %v11296_v41  ;;  %15464 = vmatprep.mubr.msk.f32.mxu1 %vm10263_vm2, %v11405_v31  ;;  %v11792_v41 = vld [vmem:[#allocation43 + $0x80] sm:$0xff] }
0x181e   : > { %v11329_v38 = vadd.f32 %v11325_v1, %v10957_v12  ;;  %v15413_v55 = vpop.f32.mrb[44].mxu1  ;;  %15506 = vmatprep.mubr.msk.f32.mxu0 %vm10263_vm2, %v11792_v41 }
0x181f   : > { %v11328_v56 = vadd.f32 %v11324_v52, %v10956_v30  ;;  %v10959_v6 = vadd.f32 %v15413_v55, %v10609_v50  ;;  %v10943_v16 = vpop.f32.mrb[45].mxu1  ;;  %v15455_v17 = vpop.f32.mrb[52].mxu0  ;;  %v11793_v50 = vld [vmem:[#allocation43 + $0x88] sm:$0xff]  ;;  %v11794_v52 = vld [vmem:[#allocation43 + $0x90] sm:$0xff]  ;;  %v12532_v55 = vld [vmem:[#allocation44] sm:$0xff] }
0x1820   : > { %v11357_v22 = vadd.f32 %v11344_v43, %v11329_v38  ;;  %v10958_v23 = vadd.f32 %v10943_v16, %v10608_v20  ;;  %v11327_v4 = vmul.f32 %v15455_v17, %v20088_v57  ;;  %v11306_v46 = vpop.f32.mrb[53].mxu0  ;;  %v11787_v20 = vld [vmem:[#allocation43 + $0x20] sm:$0xff]  ;;  %v12533_v38 = vld [vmem:[#allocation44 + $0x8] sm:$0xff]  ;;  %v12535_v16 = vld [vmem:[#allocation44 + $0x18] sm:$0xff] }
0x1821   : > { %v11356_v47 = vadd.f32 %v11339_v60, %v11328_v56  ;;  %v11326_v62 = vmul.f32 %v20088_v57, %v11306_v46  ;;  %v11795_v60 = vld [vmem:[#allocation43 + $0x98] sm:$0xff]  ;;  %v12561_v56 = vld [vmem:[%s18578_s5 + $0x8] sm:$0xff]  ;;  %v12534_v17 = vld [vmem:[#allocation44 + $0x10] sm:$0xff] }
0x1822   : > { %v14102_v63 = vmul.f32 -1.442695, %v11357_v22  ;;  %v11331_v39 = vadd.f32 %v11327_v4, %v10959_v6  ;;  %v12560_v6 = vld [vmem:[%s18578_s5] sm:$0xff] }
0x1823   : > { %v14101_v10 = vmul.f32 -1.442695, %v11356_v47  ;;  %v11330_v19 = vadd.f32 %v11326_v62, %v10958_v23  ;;  %v12562_v23 = vld [vmem:[%s18578_s5 + $0x10] sm:$0xff] }
0x1824   : > { %17455 = vpow2.f32 %v14102_v63  ;;  %v11359_v25 = vadd.f32 %v11354_v9, %v11331_v39 }
0x1825   : > { %17457 = vpow2.f32 %v14101_v10  ;;  %v11358_v26 = vadd.f32 %v11349_v0, %v11330_v19 }
0x1826   : > { %v14104_v3 = vmul.f32 -1.442695, %v11359_v25 }
0x1827   : > { %v14103_v35 = vmul.f32 -1.442695, %v11358_v26 }
0x1828   : > { %17459 = vpow2.f32 %v14104_v3 }
0x1829   : > { %17461 = vpow2.f32 %v14103_v35 }
0x182e   : > { %v17456_v44 = vpop.eup %17455 }
0x182f   : > { %v17458_v49 = vpop.eup %17457  ;;  %v11373_v53 = vadd.f32 1.0, %v17456_v44 }
0x1830   : > { %v11372_v58 = vadd.f32 1.0, %v17458_v49 }
0x1831   : > { %17463 = vrcp.f32 %v11373_v53 }
0x1832   : > { %v17460_v61 = vpop.eup %17459  ;;  %17465 = vrcp.f32 %v11372_v58 }
0x1833   : > { %v17462_v7 = vpop.eup %17461  ;;  %v11375_v8 = vadd.f32 1.0, %v17460_v61 }
0x1834   : > { %v11374_v11 = vadd.f32 1.0, %v17462_v7 }
0x1835   : > { %17467 = vrcp.f32 %v11375_v8 }
0x1836   : > { %17469 = vrcp.f32 %v11374_v11 }
0x183b   : > { %v17464_v15 = vpop.eup %17463 }
0x183c   : > { %v17466_v14 = vpop.eup %17465  ;;  %v11385_v37 = vmul.f32 %v17464_v15, %v11357_v22  ;;  %v12563_v22 = vld [vmem:[%s18578_s5 + $0x18] sm:$0xff] }
0x183d   : > { %v11384_v18 = vmul.f32 %v17466_v14, %v11356_v47 }
0x183e   : > { %11389 = vst.msk [vmem:[#allocation2 + $0x28] sm:$0xff] %vm1794_vm0, %v11385_v37 }
0x183f   : > { %v17468_v24 = vpop.eup %17467  ;;  %11388 = vst.msk [vmem:[#allocation2 + $0x8] sm:$0xff] %vm1794_vm0, %v11384_v18 }
0x1840   : > { %v17470_v27 = vpop.eup %17469  ;;  %v11387_v28 = vmul.f32 %v17468_v24, %v11359_v25  ;;  %v11406_v24 = vld [vmem:[#allocation43 + $0x68] sm:$0xff] }
0x1841   : > { %v11386_v32 = vmul.f32 %v17470_v27, %v11358_v26 }
0x1842   : > { %11391 = vst.msk [vmem:[#allocation2 + $0x68] sm:$0xff] %vm1794_vm0, %v11387_v28 }
0x1843   : > { %11390 = vst.msk [vmem:[#allocation2 + $0x48] sm:$0xff] %vm1794_vm0, %v11386_v32 }
0x1845   : > { %v11395_v33 = vld [vmem:[#allocation2 + $0x28] sm:$0xff] }
0x1846   : > { %v17192_v42 = vpack.i.bf16 %v11395_v33, %v20101_v36  ;;  %v11393_v54 = vld [vmem:[#allocation2 + $0x8] sm:$0xff] }
0x1847   : > { %v17197_v45 = vpack.i.bf16 %v11393_v54, %v20101_v36  ;;  %v16260_v51 = vpack.c.bf16 %v11395_v33, %v11393_v54  ;;  %v17232_v1 = vpack.i.bf16 %v11395_v33, %v11393_v54  ;;  %v11407_v54 = vld [vmem:[#allocation43 + $0x70] sm:$0xff] }
0x1848   : > { %17193 = vrot.lane.b32.xlu0 %v17192_v42, %s18397_s26 }
0x1849   : > { %17198 = vrot.lane.b32.xlu1 %v17197_v45, %s18397_s26  ;;  %16261 = vmatprep.subr.bf16.mxu0 %v16260_v51  ;;  %v11399_v34 = vld [vmem:[#allocation2 + $0x68] sm:$0xff] }
0x184a   : > { %16263 = vmatpush3.bf16.msra.mxu0 %v16260_v51  ;;  %v17202_v12 = vpack.i.bf16 %v11399_v34, %v20101_v36  ;;  %v11397_v5 = vld [vmem:[#allocation2 + $0x48] sm:$0xff] }
0x184b   : > { %v17207_v29 = vpack.i.bf16 %v11397_v5, %v20101_v36  ;;  %v16264_v30 = vpack.c.bf16 %v11399_v34, %v11397_v5  ;;  %v17257_v43 = vpack.i.bf16 %v11399_v34, %v11397_v5 }
0x184c   : > { %17203 = vrot.lane.b32.xlu0 %v17202_v12, %s18397_s26 }
0x184d   : > { %17208 = vrot.lane.b32.xlu1 %v17207_v29, %s18397_s26  ;;  %16265 = vmatprep.subr.bf16.mxu0 %v16264_v30 }
0x184e   : > { %16267 = vmatpush3.bf16.msra.mxu0 %v16264_v30 }
0x1850   : > { %17218 = vrot.lane.b32.xlu0 %v17192_v42, %s18414_s13 }
0x1851   : > { %17213 = vrot.lane.b32.xlu1 %v17197_v45, %s18414_s13  ;;  %15507 = vmatmul.mubr.msk.f32.vlgmr.msra.gmra.mrb[54].mxu0 %vm10263_vm2, %v11793_v50 }
0x1852   : > { %15509 = vmatprep.mubr.msk.f32.mxu0 %vm10263_vm2, %v11794_v52 }
0x1854   : > { %17223 = vrot.lane.b32.xlu0 %v17202_v12, %s18414_s13 }
0x1855   : > { %17228 = vrot.lane.b32.xlu1 %v17207_v29, %s18414_s13  ;;  %15510 = vmatmul.mubr.msk.f32.gmra.mrb[56].mxu0 %vm10263_vm2, %v11795_v60  ;;  %v11401_v60 = vld [vmem:[#allocation43 + $0x8] sm:$0xff] }
0x1856   : > { %15520 = vmatprep.mubr.msk.f32.mxu0 %vm10263_vm2, %v11787_v20 }
0x1858   : > { %17248 = vrot.lane.b32.xlu0 %v17192_v42, %s18415_s15 }
0x1859   : > { %17233 = vrot.lane.b32.xlu1 %v17232_v1, %s18416_s0 }
0x185c   : > { %17258 = vrot.lane.b32.xlu0 %v17257_v43, %s18416_s0 }
0x185d   : > { %17238 = vrot.lane.b32.xlu1 %v17232_v1, %s18400_s9 }
0x1860   : > { %17263 = vrot.lane.b32.xlu0 %v17192_v42, %s18417_s2 }
0x1861   : > { %17243 = vrot.lane.b32.xlu1 %v17197_v45, %s18415_s15 }
0x1864   : > { %17268 = vrot.lane.b32.xlu0 %v17257_v43, %s18400_s9 }
0x1865   : > { %17253 = vrot.lane.b32.xlu1 %v17197_v45, %s18417_s2 }
0x1868   : > { %17273 = vrot.lane.b32.xlu0 %v17202_v12, %s18415_s15 }
0x1869   : > { %17278 = vrot.lane.b32.xlu1 %v17207_v29, %s18415_s15 }
0x186c   : > { %17288 = vrot.lane.b32.xlu0 %v17202_v12, %s18417_s2  ;;  %v11408_v12 = vld [vmem:[#allocation43 + $0x78] sm:$0xff] }
0x186d   : > { %17283 = vrot.lane.b32.xlu1 %v17207_v29, %s18417_s2 }
0x1870   : > { %17298 = vrot.lane.b32.xlu0 %v17232_v1, %s18418_s10 }
0x1871   : > { %17293 = vrot.lane.b32.xlu1 %v17232_v1, %s18419_s3  ;;  %v11400_v1 = vld [vmem:[#allocation43] sm:$0xff] }
0x1874   : > { %17308 = vrot.lane.b32.xlu0 %v17257_v43, %s18418_s10 }
0x1875   : > { %17303 = vrot.lane.b32.xlu1 %v17257_v43, %s18419_s3 }
0x1878   : > { %12543 = vperm.xlu0 %16890, %v12533_v38  }
0x1879   : > { %12538 = vperm.xlu1 %16891, %v12532_v55  }
0x187c   : > { %12571 = vperm.xlu0 %16890, %v12561_v56   ;;  %v11402_v56 = vld [vmem:[#allocation43 + $0x10] sm:$0xff] }
0x187d   : > { %12566 = vperm.xlu1 %16891, %v12560_v6  }
0x1880   : > { %12553 = vperm.xlu0 %16890, %v12535_v16  }
0x1881   : > { %12548 = vperm.xlu1 %16891, %v12534_v17  }
0x1884   : > { %12581 = vperm.xlu0 %16890, %v12563_v22  }
0x1885   : > { %12576 = vperm.xlu1 %16891, %v12562_v23  }
0x18ba   : > { %v17194_v4 = vpop.permute.xlu0 %17193 }
0x18bb   : > { %v17196_v46 = vunpack.i.h.bf16 %v17194_v4  ;;  %v17195_v47 = vunpack.i.l.bf16 %v17194_v4  ;;  %v17199_v62 = vpop.permute.xlu1 %17198 }
0x18bc   : > { %v17201_v63 = vunpack.i.h.bf16 %v17199_v62  ;;  %v17200_v39 = vunpack.i.l.bf16 %v17199_v62  ;;  %v11660_v62 = vld [vmem:[#allocation43 + $0xc0] sm:$0xff] }
0x18bd   : > { %v11434_v9 = vsel %vm1425_vm4, %v17195_v47, %v17196_v46  ;;  %v11403_v46 = vld [vmem:[#allocation43 + $0x18] sm:$0xff] }
0x18be   : > { %v17204_v10 = vpop.permute.xlu0 %17203  ;;  %v11433_v19 = vsel %vm1425_vm4, %v17200_v39, %v17201_v63 }
0x18bf   : > { %v17206_v0 = vunpack.i.h.bf16 %v17204_v10  ;;  %v17205_v25 = vunpack.i.l.bf16 %v17204_v10  ;;  %v17209_v26 = vpop.permute.xlu1 %17208  ;;  %v16236_v3 = vpack.c.bf16 %v11434_v9, %v11433_v19  ;;  %v11661_v19 = vld [vmem:[#allocation43 + $0xc8] sm:$0xff] }
0x18c0   : > { %v17211_v35 = vunpack.i.h.bf16 %v17209_v26  ;;  %v17210_v44 = vunpack.i.l.bf16 %v17209_v26 }
0x18c1   : > { %16237 = vmatprep.subr.bf16.mxu1 %v16236_v3  ;;  %v11436_v49 = vsel %vm1425_vm4, %v17205_v25, %v17206_v0 }
0x18c2   : > { %16239 = vmatpush3.bf16.msra.mxu1 %v16236_v3  ;;  %v17219_v53 = vpop.permute.xlu0 %17218  ;;  %v11435_v58 = vsel %vm1425_vm4, %v17210_v44, %v17211_v35 }
0x18c3   : > { %v17221_v61 = vunpack.i.h.bf16 %v17219_v53  ;;  %v17220_v7 = vunpack.i.l.bf16 %v17219_v53  ;;  %v17214_v8 = vpop.permute.xlu1 %17213  ;;  %v16240_v11 = vpack.c.bf16 %v11436_v49, %v11435_v58 }
0x18c4   : > { %v17216_v15 = vunpack.i.h.bf16 %v17214_v8  ;;  %v17215_v14 = vunpack.i.l.bf16 %v17214_v8 }
0x18c5   : > { %16241 = vmatprep.subr.bf16.mxu1 %v16240_v11  ;;  %v11555_v37 = vsel %vm10377_vm5, %v17220_v7, %v17221_v61  ;;  %v11662_v7 = vld [vmem:[#allocation43 + $0xd0] sm:$0xff] }
0x18c6   : > { %v17224_v18 = vpop.permute.xlu0 %17223  ;;  %16243 = vmatpush3.bf16.msra.mxu1 %v16240_v11  ;;  %v11554_v27 = vsel %vm10377_vm5, %v17215_v14, %v17216_v15  ;;  %v11663_v15 = vld [vmem:[#allocation43 + $0xd8] sm:$0xff] }
0x18c7   : > { %v17226_v28 = vunpack.i.h.bf16 %v17224_v18  ;;  %v17225_v32 = vunpack.i.l.bf16 %v17224_v18  ;;  %v17229_v33 = vpop.permute.xlu1 %17228  ;;  %v16244_v42 = vpack.c.bf16 %v11555_v37, %v11554_v27  ;;  %v12142_v27 = vld [vmem:[#allocation43 + $0xa0] sm:$0xff] }
0x18c8   : > { %v17231_v45 = vunpack.i.h.bf16 %v17229_v33  ;;  %v17230_v51 = vunpack.i.l.bf16 %v17229_v33 }
0x18c9   : > { %15465 = vmatmul.mubr.msk.f32.vlgmr.msra.gmra.mrb[46].mxu1 %vm10263_vm2, %v11406_v24  ;;  %16245 = vmatprep.subr.bf16.mxu1 %v16244_v42  ;;  %v11557_v31 = vsel %vm10377_vm5, %v17225_v32, %v17226_v28 }
0x18ca   : > { %v17249_v34 = vpop.permute.xlu0 %17248  ;;  %16247 = vmatpush3.bf16.msra.mxu1 %v16244_v42  ;;  %15467 = vmatprep.mubr.msk.f32.mxu1 %vm10263_vm2, %v11407_v54  ;;  %v11556_v5 = vsel %vm10377_vm5, %v17230_v51, %v17231_v45 }
0x18cb   : > { %v17234_v29 = vpop.permute.xlu1 %17233  ;;  %v16248_v30 = vpack.c.bf16 %v11557_v31, %v11556_v5  ;;  %v17251_v22 = vunpack.i.h.bf16 %v17249_v34  ;;  %v17250_v23 = vunpack.i.l.bf16 %v17249_v34  ;;  %v12143_v31 = vld [vmem:[#allocation43 + $0xa8] sm:$0xff] }
0x18cc   : > { %v17236_v41 = vunpack.i.h.bf16 %v17234_v29  ;;  %v17235_v43 = vunpack.i.l.bf16 %v17234_v29 }
0x18cd   : > { %15468 = vmatmul.mubr.msk.f32.gmra.mrb[48].mxu1 %vm10263_vm2, %v11408_v12  ;;  %16249 = vmatprep.subr.bf16.mxu1 %v16248_v30  ;;  %v11910_v25 = vsel %vm1428_vm3, %v17250_v23, %v17251_v22  ;;  %v12137_v22 = vld [vmem:[#allocation43 + $0x40] sm:$0xff] }
0x18ce   : > { %v16252_v50 = vpack.c.bf16 %v17236_v41, %v17235_v43  ;;  %v17259_v52 = vpop.permute.xlu0 %17258  ;;  %16251 = vmatpush3.bf16.msra.mxu1 %v16248_v30  ;;  %15478 = vmatprep.mubr.msk.f32.mxu1 %vm10263_vm2, %v11400_v1  ;;  %v12144_v41 = vld [vmem:[#allocation43 + $0xb0] sm:$0xff] }
0x18cf   : > { %v17261_v20 = vunpack.i.h.bf16 %v17259_v52  ;;  %v17260_v38 = vunpack.i.l.bf16 %v17259_v52  ;;  %v17239_v55 = vpop.permute.xlu1 %17238  ;;  %v12145_v52 = vld [vmem:[#allocation43 + $0xb8] sm:$0xff] }
0x18d0   : > { %16253 = vmatprep.subr.bf16.mxu1 %v16252_v50  ;;  %v17241_v16 = vunpack.i.h.bf16 %v17239_v55  ;;  %v17240_v17 = vunpack.i.l.bf16 %v17239_v55 }
0x18d1   : > { %v16256_v6 = vpack.c.bf16 %v17261_v20, %v17260_v38  ;;  %15479 = vmatmul.mubr.msk.f32.vlgmr.msra.gmra.mrb[46].mxu1 %vm10263_vm2, %v11401_v60 }
0x18d2   : > { %v17264_v4 = vpop.permute.xlu0 %17263  ;;  %16255 = vmatpush3.bf16.msra.mxu1 %v16252_v50  ;;  %15481 = vmatprep.mubr.msk.f32.mxu1 %vm10263_vm2, %v11402_v56  ;;  %v16284_v9 = vpack.c.bf16 %v17241_v16, %v17240_v17 }
0x18d3   : > { %v17244_v47 = vpop.permute.xlu1 %17243  ;;  %16257 = vmatprep.subr.bf16.mxu1 %v16256_v6  ;;  %v17266_v49 = vunpack.i.h.bf16 %v17264_v4  ;;  %v17265_v53 = vunpack.i.l.bf16 %v17264_v4  ;;  %v11789_v4 = vld [vmem:[#allocation43 + $0x30] sm:$0xff] }
0x18d4   : > { %v17246_v63 = vunpack.i.h.bf16 %v17244_v47  ;;  %v17245_v39 = vunpack.i.l.bf16 %v17244_v47 }
0x18d5   : > { %15482 = vmatmul.mubr.msk.f32.gmra.mrb[48].mxu1 %vm10263_vm2, %v11403_v46  ;;  %v12272_v33 = vsel %vm11095_vm6, %v17265_v53, %v17266_v49  ;;  %v12377_v49 = vld [vmem:[#allocation43 + $0x100] sm:$0xff]  ;;  %v12016_v53 = vld [vmem:[#allocation43 + $0xe8] sm:$0xff] }
0x18d6   : > { %v17269_v10 = vpop.permute.xlu0 %17268  ;;  %16259 = vmatpush3.bf16.msra.mxu1 %v16256_v6  ;;  %15492 = vmatprep.mubr.msk.f32.mxu1 %vm10263_vm2, %v11660_v62  ;;  %v11909_v0 = vsel %vm1428_vm3, %v17245_v39, %v17246_v63  ;;  %v11788_v6 = vld [vmem:[#allocation43 + $0x28] sm:$0xff] }
0x18d7   : > { %v17271_v26 = vunpack.i.h.bf16 %v17269_v10  ;;  %v17270_v3 = vunpack.i.l.bf16 %v17269_v10  ;;  %v17254_v35 = vpop.permute.xlu1 %17253  ;;  %16285 = vmatprep.subr.bf16.mxu1 %v16284_v9  ;;  %v16268_v44 = vpack.c.bf16 %v11910_v25, %v11909_v0  ;;  %v12138_v62 = vld [vmem:[#allocation43 + $0x48] sm:$0xff]  ;;  %v11790_v10 = vld [vmem:[#allocation43 + $0x38] sm:$0xff]  ;;  %v12139_v25 = vld [vmem:[#allocation43 + $0x50] sm:$0xff] }
0x18d8   : > { %v17256_v58 = vunpack.i.h.bf16 %v17254_v35  ;;  %v17255_v61 = vunpack.i.l.bf16 %v17254_v35 }
0x18d9   : > { %v16288_v8 = vpack.c.bf16 %v17271_v26, %v17270_v3  ;;  %15493 = vmatmul.mubr.msk.f32.vlgmr.msra.gmra.mrb[46].mxu1 %vm10263_vm2, %v11661_v19  ;;  %16269 = vmatprep.subr.bf16.mxu0 %v16268_v44  ;;  %v12015_v3 = vld [vmem:[#allocation43 + $0xe0] sm:$0xff] }
0x18da   : > { %v17274_v11 = vpop.permute.xlu0 %17273  ;;  %16271 = vmatpush3.bf16.msra.mxu0 %v16268_v44  ;;  %16287 = vmatpush3.bf16.msra.mxu1 %v16284_v9  ;;  %v12271_v14 = vsel %vm11095_vm6, %v17255_v61, %v17256_v58  ;;  %v12140_v44 = vld [vmem:[#allocation43 + $0x58] sm:$0xff]  ;;  %v12378_v58 = vld [vmem:[#allocation43 + $0x108] sm:$0xff]  ;;  %v12017_v61 = vld [vmem:[#allocation43 + $0xf0] sm:$0xff] }
0x18db   : > { %v17276_v37 = vunpack.i.h.bf16 %v17274_v11  ;;  %v17275_v18 = vunpack.i.l.bf16 %v17274_v11  ;;  %v17279_v24 = vpop.permute.xlu1 %17278  ;;  %16289 = vmatprep.subr.bf16.mxu1 %v16288_v8  ;;  %15495 = vmatprep.mubr.msk.f32.mxu1 %vm10263_vm2, %v11662_v7  ;;  %v16292_v42 = vpack.c.bf16 %v12272_v33, %v12271_v14  ;;  %v12379_v7 = vld [vmem:[#allocation43 + $0x110] sm:$0xff]  ;;  %v12380_v11 = vld [vmem:[#allocation43 + $0x118] sm:$0xff] }
0x18dc   : > { %v17281_v28 = vunpack.i.h.bf16 %v17279_v24  ;;  %v17280_v32 = vunpack.i.l.bf16 %v17279_v24 }
0x18dd   : > { %15496 = vmatmul.mubr.msk.f32.gmra.mrb[48].mxu1 %vm10263_vm2, %v11663_v15  ;;  %v11912_v54 = vsel %vm1428_vm3, %v17275_v18, %v17276_v37 }
0x18de   : > { %v17289_v45 = vpop.permute.xlu0 %17288  ;;  %16291 = vmatpush3.bf16.msra.mxu1 %v16288_v8  ;;  %15548 = vmatprep.mubr.msk.f32.mxu1 %vm10263_vm2, %v12142_v27  ;;  %v11911_v51 = vsel %vm1428_vm3, %v17280_v32, %v17281_v28  ;;  %v12018_v8 = vld [vmem:[#allocation43 + $0xf8] sm:$0xff] }
0x18df   : > { %v17291_v34 = vunpack.i.h.bf16 %v17289_v45  ;;  %v17290_v12 = vunpack.i.l.bf16 %v17289_v45  ;;  %v17284_v5 = vpop.permute.xlu1 %17283  ;;  %16293 = vmatprep.subr.bf16.mxu1 %v16292_v42  ;;  %v16272_v29 = vpack.c.bf16 %v11912_v54, %v11911_v51 }
0x18e0   : > { %v17286_v30 = vunpack.i.h.bf16 %v17284_v5  ;;  %v17285_v1 = vunpack.i.l.bf16 %v17284_v5 }
0x18e1   : > { %16273 = vmatprep.subr.bf16.mxu0 %v16272_v29  ;;  %15549 = vmatmul.mubr.msk.f32.vlgmr.msra.gmra.mrb[50].mxu1 %vm10263_vm2, %v12143_v31  ;;  %v12274_v43 = vsel %vm11095_vm6, %v17290_v12, %v17291_v34 }
0x18e2   : > { %v17299_v50 = vpop.permute.xlu0 %17298  ;;  %16275 = vmatpush3.bf16.msra.mxu0 %v16272_v29  ;;  %16295 = vmatpush3.bf16.msra.mxu1 %v16292_v42  ;;  %v12273_v60 = vsel %vm11095_vm6, %v17285_v1, %v17286_v30 }
0x18e3   : > { %v17301_v20 = vunpack.i.h.bf16 %v17299_v50  ;;  %v17300_v38 = vunpack.i.l.bf16 %v17299_v50  ;;  %v17294_v55 = vpop.permute.xlu1 %17293  ;;  %15551 = vmatprep.mubr.msk.f32.mxu1 %vm10263_vm2, %v12144_v41  ;;  %v16296_v56 = vpack.c.bf16 %v12274_v43, %v12273_v60 }
0x18e4   : > { %v17296_v16 = vunpack.i.h.bf16 %v17294_v55  ;;  %v17295_v17 = vunpack.i.l.bf16 %v17294_v55 }
0x18e5   : > { %v16300_v23 = vpack.c.bf16 %v17301_v20, %v17300_v38  ;;  %15552 = vmatmul.mubr.msk.f32.gmra.mrb[52].mxu1 %vm10263_vm2, %v12145_v52  ;;  %16297 = vmatprep.subr.bf16.mxu1 %v16296_v56 }
0x18e6   : > { %v16276_v46 = vpack.c.bf16 %v17296_v16, %v17295_v17  ;;  %v17309_v47 = vpop.permute.xlu0 %17308  ;;  %16299 = vmatpush3.bf16.msra.mxu1 %v16296_v56  ;;  %15521 = vmatmul.mubr.msk.f32.vlgmr.msra.gmra.mrb[54].mxu0 %vm10263_vm2, %v11788_v6 }
0x18e7   : > { %v17311_v63 = vunpack.i.h.bf16 %v17309_v47  ;;  %v17310_v39 = vunpack.i.l.bf16 %v17309_v47  ;;  %v17304_v9 = vpop.permute.xlu1 %17303  ;;  %16301 = vmatprep.subr.bf16.mxu1 %v16300_v23  ;;  %15562 = vmatprep.mubr.msk.f32.mxu1 %vm10263_vm2, %v12137_v22 }
0x18e8   : > { %v17306_v19 = vunpack.i.h.bf16 %v17304_v9  ;;  %v17305_v0 = vunpack.i.l.bf16 %v17304_v9  ;;  %16277 = vmatprep.subr.bf16.mxu0 %v16276_v46  ;;  %15523 = vmatprep.mubr.msk.f32.mxu0 %vm10263_vm2, %v11789_v4 }
0x18e9   : > { %v16304_v26 = vpack.c.bf16 %v17311_v63, %v17310_v39  ;;  %16279 = vmatpush3.bf16.msra.mxu0 %v16276_v46  ;;  %15563 = vmatmul.mubr.msk.f32.vlgmr.msra.gmra.mrb[50].mxu1 %vm10263_vm2, %v12138_v62 }
0x18ea   : > { %v16280_v35 = vpack.c.bf16 %v17306_v19, %v17305_v0  ;;  %16303 = vmatpush3.bf16.msra.mxu1 %v16300_v23  ;;  %15524 = vmatmul.mubr.msk.f32.gmra.mrb[56].mxu0 %vm10263_vm2, %v11790_v10 }
0x18eb   : > { %16305 = vmatprep.subr.bf16.mxu1 %v16304_v26  ;;  %15565 = vmatprep.mubr.msk.f32.mxu1 %vm10263_vm2, %v12139_v25 }
0x18ec   : > { %16281 = vmatprep.subr.bf16.mxu0 %v16280_v35  ;;  %15534 = vmatprep.mubr.msk.f32.mxu0 %vm10263_vm2, %v12015_v3 }
0x18ed   : > { %16283 = vmatpush3.bf16.msra.mxu0 %v16280_v35  ;;  %15566 = vmatmul.mubr.msk.f32.gmra.mrb[52].mxu1 %vm10263_vm2, %v12140_v44 }
0x18ee   : > { %16307 = vmatpush3.bf16.msra.mxu1 %v16304_v26  ;;  %15576 = vmatprep.mubr.msk.f32.mxu1 %vm10263_vm2, %v12377_v49 }
0x18ef   : > { %16326 = vmatprep.subr.bf16.mxu1 %v18412_v2  ;;  %16308 = vmatprep.subr.bf16.mxu0 %v18412_v2 }
0x18f0   : > { %15535 = vmatmul.mubr.msk.f32.vlgmr.msra.gmra.mrb[54].mxu0 %vm10263_vm2, %v12016_v53 }
0x18f1   : > { %15577 = vmatmul.mubr.msk.f32.vlgmr.msra.gmra.mrb[50].mxu1 %vm10263_vm2, %v12378_v58  ;;  %15537 = vmatprep.mubr.msk.f32.mxu0 %vm10263_vm2, %v12017_v61 }
0x18f2   : > { %15579 = vmatprep.mubr.msk.f32.mxu1 %vm10263_vm2, %v12379_v7 }
0x18f4   : > { %15538 = vmatmul.mubr.msk.f32.gmra.mrb[56].mxu0 %vm10263_vm2, %v12018_v8 }
0x18f5   : > { %15580 = vmatmul.mubr.msk.f32.gmra.mrb[52].mxu1 %vm10263_vm2, %v12380_v11  ;;  %15590 = vmatprep.mubr.msk.f32.mxu0 %vm18413_vm15, %v20101_v36 }
0x18f6   : > { %15623 = vmatprep.mubr.msk.f32.mxu1 %vm18413_vm15, %v20101_v36 }
0x18f7   : > { %v12544_v0 = vpop.permute.xlu0 %12543 }
0x18f8   : > { %v12539_v25 = vpop.permute.xlu1 %12538 }
0x18fb   : > { %v12572_v35 = vpop.permute.xlu0 %12571 }
0x18fc   : > { %v12567_v44 = vpop.permute.xlu1 %12566 }
0x18ff   : > { %v12554_v49 = vpop.permute.xlu0 %12553 }
0x1900   : > { %v12549_v53 = vpop.permute.xlu1 %12548 }
0x19ac   : > { %v15494_v15 = vpop.f32.mrb[46].mxu1 }
0x19ad   : > { %v11754_v14 = vpop.f32.mrb[47].mxu1  ;;  %v11783_v24 = vmul.f32 %v15494_v15, %v20085_v48 }
0x19ae   : > { %v11782_v27 = vmul.f32 %v20085_v48, %v11754_v14 }
0x19b0   : > { %v15497_v37 = vpop.f32.mrb[48].mxu1 }
0x19b1   : > { %v11764_v18 = vpop.f32.mrb[49].mxu1  ;;  %v11785_v31 = vmul.f32 %v15497_v37, %v20085_v48 }
0x19b2   : > { %v11784_v12 = vmul.f32 %v20085_v48, %v11764_v18 }
0x19c3   : > { %v15536_v28 = vpop.f32.mrb[54].mxu0 }
0x19c4   : > { %v12133_v32 = vadd.f32 %v15536_v28, %v11783_v24  ;;  %v12109_v33 = vpop.f32.mrb[55].mxu0  ;;  %v15578_v42 = vpop.f32.mrb[50].mxu1 }
0x19c5   : > { %v12132_v54 = vadd.f32 %v12109_v33, %v11782_v27  ;;  %v12500_v45 = vmul.f32 %v15578_v42, %v20088_v57  ;;  %v12471_v51 = vpop.f32.mrb[51].mxu1  ;;  %v12582_v24 = vpop.permute.xlu0 %12581 }
0x19c6   : > { %v12499_v34 = vmul.f32 %v20088_v57, %v12471_v51  ;;  %v12577_v27 = vpop.permute.xlu1 %12576 }
0x19c7   : > { %v12504_v5 = vadd.f32 %v12500_v45, %v12133_v32  ;;  %v15539_v29 = vpop.f32.mrb[56].mxu0 }
0x19c8   : > { %v12503_v30 = vadd.f32 %v12499_v34, %v12132_v54  ;;  %v12135_v1 = vadd.f32 %v15539_v29, %v11785_v31  ;;  %v12119_v41 = vpop.f32.mrb[57].mxu0  ;;  %v15581_v43 = vpop.f32.mrb[52].mxu1 }
0x19c9   : > { %v12508_v50 = vmul.f32 %v12504_v5, %v12504_v5  ;;  %v12134_v52 = vadd.f32 %v12119_v41, %v11784_v12  ;;  %v12502_v60 = vmul.f32 %v15581_v43, %v20088_v57  ;;  %v12481_v20 = vpop.f32.mrb[53].mxu1  ;;  %v14150_v41 = vld [vmem:[%s18583_s17 + $0x20] sm:$0xff] }
0x19ca   : > { %v12507_v38 = vmul.f32 %v12503_v30, %v12503_v30  ;;  %v12501_v55 = vmul.f32 %v20088_v57, %v12481_v20 }
0x19cb   : > { %v12512_v56 = vsel %vm1794_vm0, %v12508_v50, 0.0  ;;  %v12506_v6 = vadd.f32 %v12502_v60, %v12135_v1 }
0x19cc   : > { %v12511_v16 = vsel %vm1794_vm0, %v12507_v38, 0.0  ;;  %v12505_v48 = vadd.f32 %v12501_v55, %v12134_v52  ;;  %v13447_v52 = vld [vmem:[%s18588_s6] sm:$0xff] }
0x19cd   : > { %v12513_v17 = vadd.f32 %v12512_v56, %v12511_v16  ;;  %v12510_v22 = vmul.f32 %v12506_v6, %v12506_v6 }
0x19ce   : > { %v12509_v23 = vmul.f32 %v12505_v48, %v12505_v48 }
0x19cf   : > { %v12516_v47 = vsel %vm1794_vm0, %v12510_v22, 0.0 }
0x19d0   : > { %v12514_v4 = vsel %vm1794_vm0, %v12509_v23, 0.0 }
0x19d1   : > { %v12515_v46 = vadd.f32 %v12514_v4, %v12513_v17 }
0x19d3   : > { %v12517_v62 = vadd.f32 %v12516_v47, %v12515_v46 }
0x19d5   : > { %v12518_v63 = vrot.slane %v12517_v62, 4 }
0x19d7   : > { %v12519_v39 = vadd.f32 %v12518_v63, %v12517_v62 }
0x19d9   : > { %v12520_v9 = vrot.slane %v12519_v39, 2 }
0x19db   : > { %v12521_v10 = vadd.f32 %v12520_v9, %v12519_v39 }
0x19dd   : > { %v12522_v57 = vrot.slane %v12521_v10, 1 }
0x19df   : > { %v12523_v19 = vadd.f32 %v12522_v57, %v12521_v10 }
0x19e1   : > { %v12525_v26 = vmul.f32 0.03125, %v12523_v19 }
0x19e3   : > { %v12526_v3 = vadd.f32 1e-05, %v12525_v26 }
0x19e5   : > { %17471 = vrsqrt.f32 %v12526_v3 }
0x19ef   : > { %v17472_v58 = vpop.eup %17471 }
0x19f0   : > { %v12528_v61 = vmul.f32 %v17472_v58, %v12503_v30  ;;  %v12529_v7 = vmul.f32 %v17472_v58, %v12504_v5  ;;  %v12530_v8 = vmul.f32 %v17472_v58, %v12505_v48  ;;  %v12531_v11 = vmul.f32 %v17472_v58, %v12506_v6 }
0x19f2   : > { %v12556_v15 = vmul.f32 %v12539_v25, %v12528_v61  ;;  %v12557_v14 = vmul.f32 %v12544_v0, %v12529_v7  ;;  %v12558_v37 = vmul.f32 %v12549_v53, %v12530_v8  ;;  %v12559_v18 = vmul.f32 %v12554_v49, %v12531_v11  ;;  %v14143_v11 = vld [vmem:[%s18583_s17 + $0x18] sm:$0xff] }
0x19f4   : > { %v12584_v28 = vadd.f32 %v12567_v44, %v12556_v15  ;;  %v12585_v32 = vadd.f32 %v12572_v35, %v12557_v14  ;;  %v12586_v33 = vadd.f32 %v12577_v27, %v12558_v37  ;;  %v12587_v42 = vadd.f32 %v12582_v24, %v12559_v18 }
0x19f6   : > { %v12588_v54 = vadd.f32 %v19989_v13, %v12584_v28  ;;  %v12589_v45 = vadd.f32 %v19986_v59, %v12585_v32  ;;  %v12590_v51 = vadd.f32 %v19999_v40, %v12586_v33  ;;  %v12591_v31 = vadd.f32 %v19996_v21, %v12587_v42  ;;  %v14149_v42 = vld [vmem:[%s18583_s17 + $0x8] sm:$0xff] }
0x19f8   : > { %12594 = vst.msk [vmem:[#allocation2 + $0x48] sm:$0xff] %vm1794_vm0, %v12590_v51  ;;  %12592 = vst.msk [vmem:[#allocation2 + $0x8] sm:$0xff] %vm1794_vm0, %v12588_v54 }
0x19f9   : > { %12593 = vst.msk [vmem:[#allocation2 + $0x28] sm:$0xff] %vm1794_vm0, %v12589_v45  ;;  %12595 = vst.msk [vmem:[#allocation2 + $0x68] sm:$0xff] %vm1794_vm0, %v12591_v31 }
0x19ff   : > { %v12597_v12 = vld [vmem:[#allocation2 + $0x8] sm:$0xff] }
0x1a00   : > { %v12599_v34 = vld [vmem:[#allocation2 + $0x28] sm:$0xff]  ;;  %v17312_v13 = vpack.i.bf16 %v12597_v12, %v20101_v36 }
0x1a01   : > { %v17317_v5 = vpack.i.bf16 %v12599_v34, %v20101_v36  ;;  %v16327_v59 = vpack.c.bf16 %v12599_v34, %v12597_v12  ;;  %v12601_v21 = vld [vmem:[#allocation2 + $0x48] sm:$0xff]  ;;  %v17362_v43 = vpack.i.bf16 %v12599_v34, %v12597_v12 }
0x1a02   : > { %17313 = vrot.lane.b32.xlu1 %v17312_v13, %s18397_s26  ;;  %v12603_v40 = vld [vmem:[#allocation2 + $0x68] sm:$0xff]  ;;  %v17332_v1 = vpack.i.bf16 %v12601_v21, %v20101_v36 }
0x1a03   : > { %17318 = vrot.lane.b32.xlu0 %v17317_v5, %s18397_s26  ;;  %16328 = vmatpush3.bf16.msra.mxu1 %v16327_v59  ;;  %v16330_v29 = vpack.c.bf16 %v12603_v40, %v12601_v21  ;;  %v17337_v30 = vpack.i.bf16 %v12603_v40, %v20101_v36  ;;  %v17377_v50 = vpack.i.bf16 %v12603_v40, %v12601_v21 }
0x1a04   : > { %16329 = vmatprep.subr.bf16.mxu1 %v18412_v2 }
0x1a06   : > { %17323 = vrot.lane.b32.xlu1 %v17312_v13, %s18415_s15 }
0x1a07   : > { %17328 = vrot.lane.b32.xlu0 %v17317_v5, %s18415_s15  ;;  %16331 = vmatpush3.bf16.msra.mxu1 %v16330_v29 }
0x1a08   : > { %16332 = vmatprep.subr.bf16.mxu1 %v18412_v2 }
0x1a0a   : > { %17333 = vrot.lane.b32.xlu1 %v17332_v1, %s18397_s26  ;;  %15624 = vmatmul.mubr.msk.f32.vlgmr.msra.gmra.mrb[54].mxu1 %vm10263_vm2, %v14150_v41 }
0x1a0b   : > { %17338 = vrot.lane.b32.xlu0 %v17337_v30, %s18397_s26  ;;  %15634 = vmatprep.mubr.msk.f32.mxu1 %vm18413_vm15, %v20101_v36  ;;  %s1401_s26 = scalar_lea.vmem %s18593_s25, %s14164_s22 }
0x1a0e   : > { %17343 = vrot.lane.b32.xlu1 %v17332_v1, %s18415_s15 }
0x1a0f   : > { %17348 = vrot.lane.b32.xlu0 %v17337_v30, %s18415_s15 }
0x1a12   : > { %17353 = vrot.lane.b32.xlu1 %v17312_v13, %s18414_s13 }
0x1a13   : > { %17358 = vrot.lane.b32.xlu0 %v17317_v5, %s18414_s13 }
0x1a16   : > { %17363 = vrot.lane.b32.xlu1 %v17362_v43, %s18400_s9 }
0x1a17   : > { %17368 = vrot.lane.b32.xlu0 %v17332_v1, %s18414_s13 }
0x1a1a   : > { %17373 = vrot.lane.b32.xlu1 %v17337_v30, %s18414_s13 }
0x1a1b   : > { %17378 = vrot.lane.b32.xlu0 %v17377_v50, %s18400_s9 }
0x1a1e   : > { %17383 = vrot.lane.b32.xlu1 %v17362_v43, %s18416_s0 }
0x1a1f   : > { %17388 = vrot.lane.b32.xlu0 %v17312_v13, %s18417_s2 }
0x1a22   : > { %17393 = vrot.lane.b32.xlu1 %v17317_v5, %s18417_s2 }
0x1a23   : > { %17398 = vrot.lane.b32.xlu0 %v17377_v50, %s18416_s0 }
0x1a26   : > { %17403 = vrot.lane.b32.xlu1 %v17332_v1, %s18417_s2 }
0x1a27   : > { %17408 = vrot.lane.b32.xlu0 %v17337_v30, %s18417_s2 }
0x1a2a   : > { %17413 = vrot.lane.b32.xlu1 %v17362_v43, %s18419_s3 }
0x1a2b   : > { %17418 = vrot.lane.b32.xlu0 %v17362_v43, %s18418_s10 }
0x1a2e   : > { %17423 = vrot.lane.b32.xlu1 %v17377_v50, %s18419_s3 }
0x1a2f   : > { %17428 = vrot.lane.b32.xlu0 %v17377_v50, %s18418_s10 }
0x1a32   : > { %13450 = vperm.xlu1 %16891, %v13447_v52  }
0x1a74   : > { %v17314_v20 = vpop.permute.xlu1 %17313 }
0x1a75   : > { %v17319_v60 = vpop.permute.xlu0 %17318  ;;  %v17316_v56 = vunpack.i.h.bf16 %v17314_v20  ;;  %v17315_v6 = vunpack.i.l.bf16 %v17314_v20 }
0x1a76   : > { %v17321_v38 = vunpack.i.h.bf16 %v17319_v60  ;;  %v17320_v55 = vunpack.i.l.bf16 %v17319_v60 }
0x1a77   : > { %v12631_v48 = vsel %vm1425_vm4, %v17315_v6, %v17316_v56 }
0x1a78   : > { %v12632_v16 = vsel %vm1425_vm4, %v17320_v55, %v17321_v38  ;;  %v17324_v23 = vpop.permute.xlu1 %17323 }
0x1a79   : > { %v16309_v17 = vpack.c.bf16 %v12632_v16, %v12631_v48  ;;  %v17329_v22 = vpop.permute.xlu0 %17328  ;;  %v17326_v47 = vunpack.i.h.bf16 %v17324_v23  ;;  %v17325_v62 = vunpack.i.l.bf16 %v17324_v23  ;;  %v14156_v16 = vld [vmem:[%s18583_s17 + $0x28] sm:$0xff]  ;;  %v12604_v48 = vld [vmem:[%s18583_s17] sm:$0xff] }
0x1a7a   : > { %v17331_v4 = vunpack.i.h.bf16 %v17329_v22  ;;  %v17330_v46 = vunpack.i.l.bf16 %v17329_v22 }
0x1a7b   : > { %16310 = vmatpush3.bf16.msra.mxu0 %v16309_v17  ;;  %v12996_v39 = vsel %vm1428_vm3, %v17325_v62, %v17326_v47 }
0x1a7c   : > { %v12997_v63 = vsel %vm1428_vm3, %v17330_v46, %v17331_v4  ;;  %16311 = vmatprep.subr.bf16.mxu0 %v18412_v2  ;;  %v17334_v57 = vpop.permute.xlu1 %17333 }
0x1a7d   : > { %v16333_v9 = vpack.c.bf16 %v12997_v63, %v12996_v39  ;;  %v17339_v10 = vpop.permute.xlu0 %17338  ;;  %v17336_v25 = vunpack.i.h.bf16 %v17334_v57  ;;  %v17335_v26 = vunpack.i.l.bf16 %v17334_v57 }
0x1a7e   : > { %v17341_v19 = vunpack.i.h.bf16 %v17339_v10  ;;  %v17340_v0 = vunpack.i.l.bf16 %v17339_v10 }
0x1a7f   : > { %16334 = vmatpush3.bf16.msra.mxu1 %v16333_v9  ;;  %v12633_v35 = vsel %vm1425_vm4, %v17335_v26, %v17336_v25 }
0x1a80   : > { %v12634_v3 = vsel %vm1425_vm4, %v17340_v0, %v17341_v19  ;;  %16335 = vmatprep.subr.bf16.mxu1 %v18412_v2  ;;  %v17344_v53 = vpop.permute.xlu1 %17343 }
0x1a81   : > { %v16312_v44 = vpack.c.bf16 %v12634_v3, %v12633_v35  ;;  %v17349_v49 = vpop.permute.xlu0 %17348  ;;  %v17346_v7 = vunpack.i.h.bf16 %v17344_v53  ;;  %v17345_v8 = vunpack.i.l.bf16 %v17344_v53 }
0x1a82   : > { %v17351_v58 = vunpack.i.h.bf16 %v17349_v49  ;;  %v17350_v61 = vunpack.i.l.bf16 %v17349_v49  ;;  %v14146_v49 = vld [vmem:[%s18583_s17 + $0x30] sm:$0xff] }
0x1a83   : > { %16313 = vmatpush3.bf16.msra.mxu0 %v16312_v44  ;;  %v12998_v14 = vsel %vm1428_vm3, %v17345_v8, %v17346_v7 }
0x1a84   : > { %v12999_v15 = vsel %vm1428_vm3, %v17350_v61, %v17351_v58  ;;  %16314 = vmatprep.subr.bf16.mxu0 %v18412_v2  ;;  %v17354_v24 = vpop.permute.xlu1 %17353 }
0x1a85   : > { %v16336_v37 = vpack.c.bf16 %v12999_v15, %v12998_v14  ;;  %v17359_v18 = vpop.permute.xlu0 %17358  ;;  %v17356_v32 = vunpack.i.h.bf16 %v17354_v24  ;;  %v17355_v33 = vunpack.i.l.bf16 %v17354_v24 }
0x1a86   : > { %v17361_v27 = vunpack.i.h.bf16 %v17359_v18  ;;  %v17360_v28 = vunpack.i.l.bf16 %v17359_v18  ;;  %15591 = vmatmul.mubr.msk.f32.vlgmr.msra.gmra.mrb[58].mxu0 %vm10263_vm2, %v14143_v11  ;;  %v17478_v18 = vld [vmem:[#allocation2 + $0x40] sm:$0xff] }
0x1a87   : > { %16337 = vmatpush3.bf16.msra.mxu1 %v16336_v37  ;;  %15601 = vmatprep.mubr.msk.f32.mxu0 %vm18413_vm15, %v20101_v36  ;;  %v12728_v45 = vsel %vm10377_vm5, %v17355_v33, %v17356_v32  ;;  %v14155_v37 = vld [vmem:[%s18583_s17 + $0x10] sm:$0xff] }
0x1a88   : > { %v12729_v54 = vsel %vm10377_vm5, %v17360_v28, %v17361_v27  ;;  %16344 = vmatprep.subr.bf16.mxu1 %v18412_v2  ;;  %v17364_v34 = vpop.permute.xlu1 %17363 }
0x1a89   : > { %v16315_v51 = vpack.c.bf16 %v12729_v54, %v12728_v45  ;;  %v17369_v31 = vpop.permute.xlu0 %17368  ;;  %v17366_v12 = vunpack.i.h.bf16 %v17364_v34  ;;  %v17365_v5 = vunpack.i.l.bf16 %v17364_v34  ;;  %v14153_v34 = vld [vmem:[%s18583_s17 + $0x38] sm:$0xff] }
0x1a8a   : > { %15635 = vmatmul.mubr.msk.f32.vlgmr.msra.gmra.mrb[56].mxu1 %vm10263_vm2, %v14149_v42  ;;  %v17371_v13 = vunpack.i.h.bf16 %v17369_v31  ;;  %v17370_v59 = vunpack.i.l.bf16 %v17369_v31 }
0x1a8b   : > { %16316 = vmatpush3.bf16.msra.mxu0 %v16315_v51  ;;  %15656 = vmatprep.mubr.msk.f32.mxu1 %vm18413_vm15, %v20101_v36  ;;  %v16345_v21 = vpack.c.bf16 %v17366_v12, %v17365_v5  ;;  %v14159_v12 = vld [vmem:[%s18583_s17 + $0x40] sm:$0xff] }
0x1a8c   : > { %16317 = vmatprep.subr.bf16.mxu0 %v18412_v2  ;;  %v17374_v29 = vpop.permute.xlu1 %17373  ;;  %v12730_v50 = vsel %vm10377_vm5, %v17370_v59, %v17371_v13 }
0x1a8d   : > { %v17379_v40 = vpop.permute.xlu0 %17378  ;;  %v17376_v41 = vunpack.i.h.bf16 %v17374_v29  ;;  %v17375_v43 = vunpack.i.l.bf16 %v17374_v29  ;;  %16346 = vmatpush3.bf16.msra.mxu1 %v16345_v21 }
0x1a8e   : > { %v17381_v30 = vunpack.i.h.bf16 %v17379_v40  ;;  %v17380_v1 = vunpack.i.l.bf16 %v17379_v40  ;;  %16347 = vmatprep.subr.bf16.mxu1 %v18412_v2 }
0x1a8f   : > { %v12731_v60 = vsel %vm10377_vm5, %v17375_v43, %v17376_v41 }
0x1a90   : > { %v16348_v52 = vpack.c.bf16 %v17381_v30, %v17380_v1  ;;  %v16318_v20 = vpack.c.bf16 %v12731_v60, %v12730_v50  ;;  %v17384_v55 = vpop.permute.xlu1 %17383  ;;  %v14161_v1 = vld [vmem:[#allocation41 + $0x1] ss:$0 sm:$0xff] }
0x1a91   : > { %v17389_v38 = vpop.permute.xlu0 %17388  ;;  %v17386_v56 = vunpack.i.h.bf16 %v17384_v55  ;;  %v17385_v6 = vunpack.i.l.bf16 %v17384_v55 }
0x1a92   : > { %16349 = vmatpush3.bf16.msra.mxu1 %v16348_v52  ;;  %16319 = vmatpush3.bf16.msra.mxu0 %v16318_v20  ;;  %v17391_v17 = vunpack.i.h.bf16 %v17389_v38  ;;  %v17390_v22 = vunpack.i.l.bf16 %v17389_v38 }
0x1a93   : > { %16350 = vmatprep.subr.bf16.mxu1 %v18412_v2  ;;  %v16321_v23 = vpack.c.bf16 %v17386_v56, %v17385_v6  ;;  %16320 = vmatprep.subr.bf16.mxu0 %v18412_v2 }
0x1a94   : > { %v17394_v46 = vpop.permute.xlu1 %17393  ;;  %v13271_v9 = vsel %vm11095_vm6, %v17390_v22, %v17391_v17 }
0x1a95   : > { %v17399_v4 = vpop.permute.xlu0 %17398  ;;  %15657 = vmatmul.mubr.msk.f32.vlgmr.msra.gmra.mrb[58].mxu1 %vm10263_vm2, %v14156_v16  ;;  %v17396_v63 = vunpack.i.h.bf16 %v17394_v46  ;;  %v17395_v39 = vunpack.i.l.bf16 %v17394_v46  ;;  %15602 = vmatmul.mubr.msk.f32.vlgmr.msra.gmra.mrb[58].mxu0 %vm10263_vm2, %v12604_v48 }
0x1a96   : > { %v17401_v47 = vunpack.i.h.bf16 %v17399_v4  ;;  %v17400_v62 = vunpack.i.l.bf16 %v17399_v4  ;;  %15667 = vmatprep.mubr.msk.f32.mxu1 %vm18413_vm15, %v20101_v36  ;;  %16322 = vmatpush3.bf16.msra.mxu0 %v16321_v23 }
0x1a97   : > { %15612 = vmatprep.mubr.msk.f32.mxu0 %vm18413_vm15, %v20101_v36  ;;  %v13272_v57 = vsel %vm11095_vm6, %v17395_v39, %v17396_v63  ;;  %16323 = vmatprep.subr.bf16.mxu0 %v18412_v2 }
0x1a98   : > { %v16324_v10 = vpack.c.bf16 %v17401_v47, %v17400_v62  ;;  %v16351_v19 = vpack.c.bf16 %v13272_v57, %v13271_v9  ;;  %v17404_v25 = vpop.permute.xlu1 %17403 }
0x1a99   : > { %v17409_v0 = vpop.permute.xlu0 %17408  ;;  %v17406_v35 = vunpack.i.h.bf16 %v17404_v25  ;;  %v17405_v44 = vunpack.i.l.bf16 %v17404_v25 }
0x1a9a   : > { %v17411_v26 = vunpack.i.h.bf16 %v17409_v0  ;;  %v17410_v3 = vunpack.i.l.bf16 %v17409_v0  ;;  %16325 = vmatpush3.bf16.msra.mxu0 %v16324_v10  ;;  %16352 = vmatpush3.bf16.msra.mxu1 %v16351_v19 }
0x1a9b   : > { %v13273_v53 = vsel %vm11095_vm6, %v17405_v44, %v17406_v35  ;;  %16353 = vmatprep.subr.bf16.mxu1 %v18412_v2  ;;  %16338 = vmatprep.subr.bf16.mxu0 %v18412_v2 }
0x1a9c   : > { %v13274_v36 = vsel %vm11095_vm6, %v17410_v3, %v17411_v26  ;;  %v17414_v7 = vpop.permute.xlu1 %17413 }
0x1a9d   : > { %v16354_v58 = vpack.c.bf16 %v13274_v36, %v13273_v53  ;;  %v17419_v61 = vpop.permute.xlu0 %17418  ;;  %v17416_v15 = vunpack.i.h.bf16 %v17414_v7  ;;  %v17415_v14 = vunpack.i.l.bf16 %v17414_v7  ;;  %15613 = vmatmul.mubr.msk.f32.vlgmr.msra.gmra.mrb[58].mxu0 %vm10263_vm2, %v14146_v49 }
0x1a9e   : > { %v17421_v8 = vunpack.i.h.bf16 %v17419_v61  ;;  %v17420_v11 = vunpack.i.l.bf16 %v17419_v61  ;;  %15645 = vmatprep.mubr.msk.f32.mxu0 %vm18413_vm15, %v17478_v18 }
0x1a9f   : > { %16355 = vmatpush3.bf16.msra.mxu1 %v16354_v58  ;;  %v16339_v27 = vpack.c.bf16 %v17416_v15, %v17415_v14 }
0x1aa0   : > { %v16357_v24 = vpack.c.bf16 %v17421_v8, %v17420_v11  ;;  %16356 = vmatprep.subr.bf16.mxu1 %v18412_v2  ;;  %v17424_v32 = vpop.permute.xlu1 %17423 }
0x1aa1   : > { %v17429_v28 = vpop.permute.xlu0 %17428  ;;  %v17426_v54 = vunpack.i.h.bf16 %v17424_v32  ;;  %v17425_v45 = vunpack.i.l.bf16 %v17424_v32  ;;  %16340 = vmatpush3.bf16.msra.mxu0 %v16339_v27 }
0x1aa2   : > { %v17431_v33 = vunpack.i.h.bf16 %v17429_v28  ;;  %v17430_v42 = vunpack.i.l.bf16 %v17429_v28  ;;  %15668 = vmatmul.mubr.msk.f32.vlgmr.msra.gmra.mrb[58].mxu1 %vm10263_vm2, %v14155_v37  ;;  %16341 = vmatprep.subr.bf16.mxu0 %v18412_v2 }
0x1aa3   : > { %16358 = vmatpush3.bf16.msra.mxu1 %v16357_v24  ;;  %v16342_v31 = vpack.c.bf16 %v17426_v54, %v17425_v45  ;;  %15678 = vmatprep.mubr.msk.f32.mxu1 %vm18413_vm15, %v17478_v18 }
0x1aa4   : > { %v16360_v51 = vpack.c.bf16 %v17431_v33, %v17430_v42  ;;  %16359 = vmatprep.subr.bf16.mxu1 %v18412_v2  ;;  %v14148_v2 = vld [vmem:[#allocation41] ss:$0 sm:$0xff] }
0x1aa5   : > { %16343 = vmatpush3.bf16.msra.mxu0 %v16342_v31 }
0x1aa7   : > { %16361 = vmatpush3.bf16.msra.mxu1 %v16360_v51 }
0x1aa8   : > { %15646 = vmatmul.mubr.msk.f32.vlgmr.msra.gmra.mrb[60].mxu0 %vm10263_vm2, %v14153_v34 }
0x1aaa   : > { %15679 = vmatmul.mubr.msk.f32.vlgmr.msra.gmra.mrb[58].mxu1 %vm10263_vm2, %v14159_v12 }
0x1ab1   : > { %v13451_v6 = vpop.permute.xlu1 %13450 }
0x1add   : > { %v12976_v5 = vpop.f32.mrb[54].mxu1 }
0x1ade   : > { %v15625_v13 = vpop.f32.mrb[55].mxu1 }
0x1b5d   : > { %v13073_v59 = vpop.f32.mrb[56].mxu1 }
0x1b5e   : > { %v13074_v21 = vadd.f32 %v13073_v59, %v12976_v5  ;;  %v15636_v40 = vpop.f32.mrb[57].mxu1 }
0x1b70   : > { %v12892_v29 = vpop.f32.mrb[58].mxu0 }
0x1b71   : > { %v15614_v30 = vpop.f32.mrb[59].mxu0  ;;  %v12902_v43 = vmul.f32 %v14148_v2, %v12892_v29 }
0x1b7b   : > { %v13160_v41 = vpop.f32.mrb[60].mxu0 }
0x1b7c   : > { %v13164_v50 = vadd.f32 %v13160_v41, %v13074_v21  ;;  %v15647_v60 = vpop.f32.mrb[61].mxu0 }
0x1b7d   : > { %v13435_v52 = vpop.f32.mrb[58].mxu1 }
0x1b7e   : > { %v13445_v20 = vmul.f32 %v14161_v1, %v13435_v52  ;;  %v15680_v38 = vpop.f32.mrb[59].mxu1  ;;  %v13165_v55 = vadd.f32 %v13164_v50, %v12902_v43 }
0x1b80   : > { %v13446_v56 = vadd.f32 %v13445_v20, %v13165_v55 }
0x1b82   : > { %v13453_v16 = vadd.f32 %v13451_v6, %v13446_v56 }
0x1b84   : > { %13454 = vst.msk [vmem:[%s1401_s26] sm:$0xff] %vm1794_vm0, %v13453_v16 }
0x1b85 PF: > { %s92_s7 = sadd.s32 1, %s18329_s7  }
0x1b86   : > { %p89_p10 = scmp.ge.s32.totalorder %s92_s7, 4  }
0x1b88   :  { %91 = sbr.rel (!%p89_p10) target bundleno = 72 (0x48), region = 427 }
0x1b8f   :  { %13474 = vsyncpa [#allocation4], 1 }
0x1b90   :  { %13476 = vsyncpa [#allocation4 + $0x1], 1 }
0x1b91   :  { %13477 = vsyncpa [#allocation6], 1 }
0x1b92   :  { %13478 = vsyncpa [#allocation9], 1 }
0x1b93   :  { %13479 = vsyncpa [#allocation12], 1 }
0x1b94   :  { %13480 = vsyncpa [#allocation15], 1 }
0x1b95   :  { %13481 = vsyncpa [#allocation18], 1 }
0x1b96   :  { %13482 = vsyncpa [#allocation21], 1 }
0x1b97   :  { %13483 = vsyncpa [#allocation24], 1 }
0x1b98   :  { %13484 = vsyncpa [#allocation27], 1 }
0x1b99   :  { %13485 = vsyncpa [#allocation30], 1 }
0x1b9a   :  { %13486 = vsyncpa [#allocation33], 1 }
0x1b9b   :  { %13487 = vsyncpa [#allocation36], 1 }
0x1b9c   :  { %13488 = vsyncpa [#allocation39], 1 }
0x1b9d   :  { %13489 = vsyncpa [#allocation42], 1 }
0x1b9e   :  { %13490 = vsyncpa [#allocation45], 1 }

</bundles_post_ra>
